<compile_context>
chip_gen: v7x
topology: tpu7x:2x2x1
jax: 0.10.0
libtpu: 0.0.40
codegen_flags: <defaults>
</compile_context>

<pallas_src>
import functools

import numpy as np
import jax
import jax.numpy as jnp
from jax.experimental import pallas as pl
from jax.experimental.pallas import tpu as pltpu


# ----------------------------------------------------------------------------
# Pallas kernels
# ----------------------------------------------------------------------------
def _elu(y):
    # F.elu with alpha=1:  y if y > 0 else exp(y) - 1   (clamp exp arg for safety)
    return jnp.where(y > 0.0, y, jnp.exp(jnp.minimum(y, 0.0)) - 1.0)


def _conv_pool_bn_kernel(cols_ref, w_ref, b_ref, s_ref, t_ref, o_ref):
    """One image: conv as 4 corner matmuls + bias + ELU, 2x2 max-pool via the
    corner max, then the folded BatchNorm affine.  Lane-dense (padded) output."""
    w = w_ref[...]
    b = b_ref[...]
    m = None
    for g in range(4):
        y = jnp.dot(cols_ref[0, g], w, preferred_element_type=jnp.float32) + b
        y = _elu(y)
        m = y if m is None else jnp.maximum(m, y)
    o_ref[0] = (m * s_ref[...] + t_ref[...]).astype(o_ref.dtype)


def _tail_kernel(cols_ref, w2_ref, b2_ref, s2_ref, t2_ref,
                 w3_ref, b3_ref, s3_ref, t3_ref,
                 wf1_ref, bf1_ref, sf1_ref, tf1_ref,
                 wf2_ref, bf2_ref, o_ref):
    """One image: conv2 block + conv3 block + fc1(+ELU+BN1d) + fc2, all in VMEM."""
    # ---- conv2 + bias + ELU + 2x2 max-pool + BN2 (corner matmuls) -----------
    w2 = w2_ref[...]
    b2 = b2_ref[...]
    m2 = None
    for g in range(4):
        y = jnp.dot(cols_ref[0, g], w2, preferred_element_type=jnp.float32) + b2
        y = _elu(y)
        m2 = y if m2 is None else jnp.maximum(m2, y)
    # Rows are ordered (h%2, w%2, h//2, w//2), so each conv3 pooling corner
    # below is a contiguous block of 9 rows.
    act2 = m2 * s2_ref[...] + t2_ref[...]                       # (36, 256) f32

    # ---- conv3 (1x1) + bias + ELU + 2x2 max-pool + BN3 ----------------------
    w3 = w3_ref[...]
    b3 = b3_ref[...]
    m3 = None
    for g in range(4):
        x = act2[g * 9:(g + 1) * 9, :].astype(jnp.bfloat16)     # (9, 256)
        y = jnp.dot(x, w3, preferred_element_type=jnp.float32) + b3
        y = _elu(y)
        m3 = y if m3 is None else jnp.maximum(m3, y)
    act3 = m3 * s3_ref[...] + t3_ref[...]                       # (9, 256) f32

    # ---- fc1 + ELU + BatchNorm1d: contract the 9 spatial positions ----------
    # (fc1 weight is pre-permuted, so no NCHW-order flatten/transpose needed.)
    acc = None
    for r in range(9):
        x = act3[r:r + 1, :].astype(jnp.bfloat16)               # (1, 256)
        y = jnp.dot(x, wf1_ref[r], preferred_element_type=jnp.float32)
        acc = y if acc is None else acc + y
    y1 = _elu(acc + bf1_ref[...])
    y1 = (y1 * sf1_ref[...] + tf1_ref[...]).astype(jnp.bfloat16)  # (1, 384)

    # ---- fc2 ----------------------------------------------------------------
    o_ref[0] = jnp.dot(y1, wf2_ref[...],
                       preferred_element_type=jnp.float32) + bf2_ref[...]


# ----------------------------------------------------------------------------
# pallas_call wrappers
# ----------------------------------------------------------------------------
_COMPILER_PARAMS = pltpu.CompilerParams(
    dimension_semantics=("parallel",),
    vmem_limit_bytes=32 * 1024 * 1024,
)


def _resident(shape):
    """Full-array block with a constant index_map (stays VMEM-resident)."""
    return pl.BlockSpec(shape, lambda *_: (0,) * len(shape))


def _conv1_block(cols, w, b, s, t):
    B, _, np_, kp = cols.shape
    n = w.shape[1]
    return pl.pallas_call(
        _conv_pool_bn_kernel,
        grid=(B,),
        in_specs=[
            pl.BlockSpec((1, 4, np_, kp), lambda i: (i, 0, 0, 0)),
            _resident(w.shape), _resident(b.shape),
            _resident(s.shape), _resident(t.shape),
        ],
        out_specs=pl.BlockSpec((1, np_, n), lambda i: (i, 0, 0)),
        out_shape=jax.ShapeDtypeStruct((B, np_, n), jnp.bfloat16),
        compiler_params=_COMPILER_PARAMS,
    )(cols, w, b, s, t)


def _tail_block(cols, p):
    B, _, np_, kp = cols.shape
    resident_keys = ("w2", "b2", "bn2_scale", "bn2_shift",
                     "w3", "b3", "bn3_scale", "bn3_shift",
                     "wf1", "bf1", "bnf1_scale", "bnf1_shift",
                     "wf2", "bf2")
    return pl.pallas_call(
        _tail_kernel,
        grid=(B,),
        in_specs=[pl.BlockSpec((1, 4, np_, kp), lambda i: (i, 0, 0, 0))]
                 + [_resident(p[k].shape) for k in resident_keys],
        out_specs=pl.BlockSpec((1, 1, 128), lambda i: (i, 0, 0)),
        out_shape=jax.ShapeDtypeStruct((B, 1, 128), jnp.float32),
        compiler_params=_COMPILER_PARAMS,
    )(cols, *[p[k] for k in resident_keys])


# ----------------------------------------------------------------------------
# Parameters (PyTorch layouts converted to padded, kernel-ready layouts)
# ----------------------------------------------------------------------------
def init_params(key, num_classes, num_channels=1):
    assert num_channels == 1
    assert num_classes <= 128
    keys = jax.random.split(key, 16)

    def _normal(k, shape, fan_in):
        return (jax.random.normal(k, shape, jnp.float32) /
                np.sqrt(fan_in)).astype(jnp.float32)

    def _pad2(x, rows, cols):
        r, c = x.shape
        return jnp.pad(x, ((0, rows - r), (0, cols - c)))

    p = {}

    # conv1: torch (100, 1, 5, 5) -> im2col weight (25, 100) -> padded (32, 128)
    w = _normal(keys[0], (100, num_channels, 5, 5), num_channels * 25)
    w = jnp.transpose(w, (2, 3, 1, 0)).reshape(25 * num_channels, 100)
    p["w1"] = _pad2(w, 32, 128).astype(jnp.bfloat16)
    p["b1"] = jnp.pad(_normal(keys[1], (100,), 25), (0, 28)).reshape(1, 128)

    # conv2: torch (150, 100, 3, 3) -> (3,3,cin,cout), pad cin->128 cout->256
    w = _normal(keys[2], (150, 100, 3, 3), 100 * 9)
    w = jnp.transpose(w, (2, 3, 1, 0))                        # (3, 3, 100, 150)
    w = jnp.pad(w, ((0, 0), (0, 0), (0, 28), (0, 106)))       # (3, 3, 128, 256)
    p["w2"] = w.reshape(9 * 128, 256).astype(jnp.bfloat16)
    p["b2"] = jnp.pad(_normal(keys[3], (150,), 900), (0, 106)).reshape(1, 256)

    # conv3 (1x1): torch (250, 150, 1, 1) -> (150, 250) -> padded (256, 256)
    w = _normal(keys[4], (250, 150, 1, 1), 150)
    w = jnp.transpose(w, (2, 3, 1, 0)).reshape(150, 250)
    p["w3"] = _pad2(w, 256, 256).astype(jnp.bfloat16)
    p["b3"] = jnp.pad(_normal(keys[5], (250,), 150), (0, 6)).reshape(1, 256)

    # fc1: torch (350, 2250) with flat index c*9 + r  (PyTorch NCHW flatten).
    # Re-layout to (9, 256, 384): wf1[r, c, n] = W_torch[n, c*9 + r].
    w = _normal(keys[6], (350, 250 * 9), 250 * 9)
    w = jnp.transpose(w.reshape(350, 250, 9), (2, 1, 0))      # (9, 250, 350)
    p["wf1"] = jnp.pad(w, ((0, 0), (0, 6), (0, 34))).astype(jnp.bfloat16)
    p["bf1"] = jnp.pad(_normal(keys[7], (350,), 2250), (0, 34)).reshape(1, 384)

    # fc2: torch (num_classes, 350) -> (350, num_classes) -> padded (384, 128)
    w = _normal(keys[8], (num_classes, 350), 350)
    p["wf2"] = _pad2(w.T, 384, 128).astype(jnp.bfloat16)
    p["bf2"] = jnp.pad(_normal(keys[9], (num_classes,), 350),
                       (0, 128 - num_classes)).reshape(1, 128)

    # BatchNorm (inference): fold gamma/beta/running stats into scale & shift,
    # padded lanes get scale=1 / shift=0 so they stay exactly zero.
    def bn(k, c, cpad):
        k1, k2, k3, k4 = jax.random.split(k, 4)
        gamma = 1.0 + 0.1 * jax.random.normal(k1, (c,), jnp.float32)
        beta = 0.1 * jax.random.normal(k2, (c,), jnp.float32)
        mean = 0.1 * jax.random.normal(k3, (c,), jnp.float32)
        var = 1.0 + 0.1 * jax.random.uniform(k4, (c,), jnp.float32)
        scale = gamma / jnp.sqrt(var + 1e-5)
        shift = beta - mean * scale
        scale = jnp.pad(scale, (0, cpad - c), constant_values=1.0)
        shift = jnp.pad(shift, (0, cpad - c))
        return scale.reshape(1, cpad), shift.reshape(1, cpad)

    p["bn1_scale"], p["bn1_shift"] = bn(keys[10], 100, 128)
    p["bn2_scale"], p["bn2_shift"] = bn(keys[11], 150, 256)
    p["bn3_scale"], p["bn3_shift"] = bn(keys[12], 250, 256)
    p["bnf1_scale"], p["bnf1_shift"] = bn(keys[13], 350, 384)
    return p


# ----------------------------------------------------------------------------
# Forward
# ----------------------------------------------------------------------------
def _corner_cols_conv1(x_bhw):
    """(B, 32, 32) -> corner-separated im2col (B, 4, 196, 25) for conv1+pool."""
    B = x_bhw.shape[0]
    corners = []
    for a in range(2):
        for b in range(2):
            taps = []
            for di in range(5):
                for dj in range(5):
                    taps.append(x_bhw[:, a + di:a + di + 28:2,
                                      b + dj:b + dj + 28:2])      # (B, 14, 14)
            corners.append(jnp.stack(taps, axis=-1))              # (B, 14, 14, 25)
    return jnp.stack(corners, axis=1).reshape(B, 4, 196, 25)


def _corner_cols_conv2(act1):
    """(B, 196, 128) -> corner-separated im2col (B, 4, 36, 1152) for conv2+pool.
    Rows are permuted to (h%2, w%2, h//2, w//2) so each of conv3's pooling
    corners later becomes a contiguous 9-row block."""
    B = act1.shape[0]
    a1 = act1.reshape(B, 14, 14, 128)
    corners = []
    for a in range(2):
        for b in range(2):
            taps = []
            for di in range(3):
                for dj in range(3):
                    taps.append(a1[:, a + di:a + di + 11:2,
                                   b + dj:b + dj + 11:2, :])      # (B, 6, 6, 128)
            c = jnp.concatenate(taps, axis=-1)                    # (B, 6, 6, 1152)
            c = c.reshape(B, 3, 2, 3, 2, 1152)                    # (B,h3,ph,w3,pw,K)
            c = jnp.transpose(c, (0, 2, 4, 1, 3, 5))              # (B,ph,pw,h3,w3,K)
            corners.append(c.reshape(B, 36, 1152))
    return jnp.stack(corners, axis=1)                             # (B, 4, 36, 1152)


def hindi_char_net_forward(params, x_nchw, *, num_classes):
    """Input (B, 1, 32, 32) NCHW -> logits (B, num_classes). Eval-mode semantics."""
    B, C, H, W = x_nchw.shape
    assert (C, H, W) == (1, 32, 32)

    # --- block 1: conv1 + ELU + pool + BN1 (one fused kernel) ----------------
    x = x_nchw.reshape(B, H, W).astype(jnp.bfloat16)
    cols1 = _corner_cols_conv1(x)                                  # (B, 4, 196, 25)
    cols1 = jnp.pad(cols1, ((0, 0), (0, 0), (0, 0), (0, 7)))       # K: 25 -> 32
    act1 = _conv1_block(cols1, params["w1"], params["b1"],
                        params["bn1_scale"], params["bn1_shift"])  # (B,196,128) bf16
    # Dropout(p=0.5) is identity in eval mode.

    # --- blocks 2+3 and fc head: one fused kernel ----------------------------
    # TODO(synk): the conv2 corner-im2col gather still runs as XLA glue between
    # the two kernels; fusing it in-kernel would need strided (stride-2) VMEM
    # loads, which is not worth the lowering risk at these tiny sizes.
    cols2 = _corner_cols_conv2(act1)                               # (B, 4, 36, 1152)
    out = _tail_block(cols2, params)                               # (B, 1, 128) f32
    return out[:, 0, :num_classes]


if __name__ == "__main__":
    NUM_CLASSES = 46  # Devanagari handwritten character classes

    key = jax.random.PRNGKey(0)
    pkey, xkey = jax.random.split(key)
    params = init_params(pkey, NUM_CLASSES, num_channels=1)
    x = jax.random.normal(xkey, (2, 1, 32, 32), jnp.float32)  # (Batch, Channels, X, Y)

    fwd = jax.jit(functools.partial(hindi_char_net_forward, num_classes=NUM_CLASSES))
    logits = fwd(params, x)
    jax.block_until_ready(logits)

    assert logits.shape == (2, NUM_CLASSES), logits.shape
    assert bool(jnp.all(jnp.isfinite(logits)))
    print("KERNEL_OK")
</pallas_src>

<mosaic_0001>
module attributes {stable_mosaic.version = 11 : i64} {
  func.func @_conv_pool_bn_kernel(%arg0: i32, %arg1: memref<1x4x196x32xbf16, #tpu.memory_space<vmem>>, %arg2: memref<32x128xbf16, #tpu.memory_space<vmem>>, %arg3: memref<1x128xf32, #tpu.memory_space<vmem>>, %arg4: memref<1x128xf32, #tpu.memory_space<vmem>>, %arg5: memref<1x128xf32, #tpu.memory_space<vmem>>, %arg6: memref<1x196x128xbf16, #tpu.memory_space<vmem>>) attributes {dimension_semantics = [#tpu.dimension_semantics<parallel>], iteration_bounds = array<i64: 2>, scalar_prefetch = 0 : i64, scratch_operands = 0 : i64, tpu.core_type = #tpu.core_type<tc>, window_params = [{transform_indices = @transform_0, window_bounds = array<i64: 1, 4, 196, 32>}, {pipeline_mode = #tpu.pipeline_mode<synchronous>, transform_indices = @transform_1, window_bounds = array<i64: 32, 128>}, {pipeline_mode = #tpu.pipeline_mode<synchronous>, transform_indices = @transform_2, window_bounds = array<i64: 1, 128>}, {pipeline_mode = #tpu.pipeline_mode<synchronous>, transform_indices = @transform_3, window_bounds = array<i64: 1, 128>}, {pipeline_mode = #tpu.pipeline_mode<synchronous>, transform_indices = @transform_4, window_bounds = array<i64: 1, 128>}, {transform_indices = @transform_5, window_bounds = array<i64: 1, 196, 128>}]} {
    %c0 = arith.constant 0 : index
    %c0_0 = arith.constant 0 : index
    %0 = vector.load %arg2[%c0, %c0_0] : memref<32x128xbf16, #tpu.memory_space<vmem>>, vector<32x128xbf16>
    %c0_1 = arith.constant 0 : index
    %c0_2 = arith.constant 0 : index
    %1 = vector.load %arg3[%c0_1, %c0_2] : memref<1x128xf32, #tpu.memory_space<vmem>>, vector<1x128xf32>
    %c0_3 = arith.constant 0 : index
    %c0_4 = arith.constant 0 : index
    %c0_5 = arith.constant 0 : index
    %c0_6 = arith.constant 0 : index
    %2 = vector.load %arg1[%c0_3, %c0_4, %c0_5, %c0_6] : memref<1x4x196x32xbf16, #tpu.memory_space<vmem>>, vector<1x1x196x32xbf16>
    %3 = vector.shape_cast %2 : vector<1x1x196x32xbf16> to vector<196x32xbf16>
    %cst = arith.constant dense<0.000000e+00> : vector<196x128xf32>
    %4 = tpu.matmul %3, %0, %cst {dimension_numbers = #tpu.dot_dimension_numbers<[1], [0], [0], [1], [0, 0, 1, 1], [], []>} : vector<196x32xbf16>, vector<32x128xbf16>, vector<196x128xf32> -> vector<196x128xf32>
    %5 = vector.broadcast %1 : vector<1x128xf32> to vector<196x128xf32>
    %6 = arith.addf %4, %5 : vector<196x128xf32>
    %cst_7 = arith.constant 0.000000e+00 : f32
    %7 = vector.broadcast %cst_7 : f32 to vector<196x128xf32>
    %8 = arith.cmpf ogt, %6, %7 : vector<196x128xf32>
    %cst_8 = arith.constant 0.000000e+00 : f32
    %9 = vector.broadcast %cst_8 : f32 to vector<196x128xf32>
    %10 = arith.minimumf %6, %9 : vector<196x128xf32>
    %11 = math.exp %10 : vector<196x128xf32>
    %cst_9 = arith.constant 1.000000e+00 : f32
    %12 = vector.broadcast %cst_9 : f32 to vector<196x128xf32>
    %13 = arith.subf %11, %12 : vector<196x128xf32>
    %14 = arith.select %8, %6, %13 : vector<196x128xi1>, vector<196x128xf32>
    %c0_10 = arith.constant 0 : index
    %c1 = arith.constant 1 : index
    %c0_11 = arith.constant 0 : index
    %c0_12 = arith.constant 0 : index
    %15 = vector.load %arg1[%c0_10, %c1, %c0_11, %c0_12] : memref<1x4x196x32xbf16, #tpu.memory_space<vmem>>, vector<1x1x196x32xbf16>
    %16 = vector.shape_cast %15 : vector<1x1x196x32xbf16> to vector<196x32xbf16>
    %cst_13 = arith.constant dense<0.000000e+00> : vector<196x128xf32>
    %17 = tpu.matmul %16, %0, %cst_13 {dimension_numbers = #tpu.dot_dimension_numbers<[1], [0], [0], [1], [0, 0, 1, 1], [], []>} : vector<196x32xbf16>, vector<32x128xbf16>, vector<196x128xf32> -> vector<196x128xf32>
    %18 = vector.broadcast %1 : vector<1x128xf32> to vector<196x128xf32>
    %19 = arith.addf %17, %18 : vector<196x128xf32>
    %cst_14 = arith.constant 0.000000e+00 : f32
    %20 = vector.broadcast %cst_14 : f32 to vector<196x128xf32>
    %21 = arith.cmpf ogt, %19, %20 : vector<196x128xf32>
    %cst_15 = arith.constant 0.000000e+00 : f32
    %22 = vector.broadcast %cst_15 : f32 to vector<196x128xf32>
    %23 = arith.minimumf %19, %22 : vector<196x128xf32>
    %24 = math.exp %23 : vector<196x128xf32>
    %cst_16 = arith.constant 1.000000e+00 : f32
    %25 = vector.broadcast %cst_16 : f32 to vector<196x128xf32>
    %26 = arith.subf %24, %25 : vector<196x128xf32>
    %27 = arith.select %21, %19, %26 : vector<196x128xi1>, vector<196x128xf32>
    %28 = arith.maximumf %14, %27 : vector<196x128xf32>
    %c0_17 = arith.constant 0 : index
    %c2 = arith.constant 2 : index
    %c0_18 = arith.constant 0 : index
    %c0_19 = arith.constant 0 : index
    %29 = vector.load %arg1[%c0_17, %c2, %c0_18, %c0_19] : memref<1x4x196x32xbf16, #tpu.memory_space<vmem>>, vector<1x1x196x32xbf16>
    %30 = vector.shape_cast %29 : vector<1x1x196x32xbf16> to vector<196x32xbf16>
    %cst_20 = arith.constant dense<0.000000e+00> : vector<196x128xf32>
    %31 = tpu.matmul %30, %0, %cst_20 {dimension_numbers = #tpu.dot_dimension_numbers<[1], [0], [0], [1], [0, 0, 1, 1], [], []>} : vector<196x32xbf16>, vector<32x128xbf16>, vector<196x128xf32> -> vector<196x128xf32>
    %32 = vector.broadcast %1 : vector<1x128xf32> to vector<196x128xf32>
    %33 = arith.addf %31, %32 : vector<196x128xf32>
    %cst_21 = arith.constant 0.000000e+00 : f32
    %34 = vector.broadcast %cst_21 : f32 to vector<196x128xf32>
    %35 = arith.cmpf ogt, %33, %34 : vector<196x128xf32>
    %cst_22 = arith.constant 0.000000e+00 : f32
    %36 = vector.broadcast %cst_22 : f32 to vector<196x128xf32>
    %37 = arith.minimumf %33, %36 : vector<196x128xf32>
    %38 = math.exp %37 : vector<196x128xf32>
    %cst_23 = arith.constant 1.000000e+00 : f32
    %39 = vector.broadcast %cst_23 : f32 to vector<196x128xf32>
    %40 = arith.subf %38, %39 : vector<196x128xf32>
    %41 = arith.select %35, %33, %40 : vector<196x128xi1>, vector<196x128xf32>
    %42 = arith.maximumf %28, %41 : vector<196x128xf32>
    %c0_24 = arith.constant 0 : index
    %c3 = arith.constant 3 : index
    %c0_25 = arith.constant 0 : index
    %c0_26 = arith.constant 0 : index
    %43 = vector.load %arg1[%c0_24, %c3, %c0_25, %c0_26] : memref<1x4x196x32xbf16, #tpu.memory_space<vmem>>, vector<1x1x196x32xbf16>
    %44 = vector.shape_cast %43 : vector<1x1x196x32xbf16> to vector<196x32xbf16>
    %cst_27 = arith.constant dense<0.000000e+00> : vector<196x128xf32>
    %45 = tpu.matmul %44, %0, %cst_27 {dimension_numbers = #tpu.dot_dimension_numbers<[1], [0], [0], [1], [0, 0, 1, 1], [], []>} : vector<196x32xbf16>, vector<32x128xbf16>, vector<196x128xf32> -> vector<196x128xf32>
    %46 = vector.broadcast %1 : vector<1x128xf32> to vector<196x128xf32>
    %47 = arith.addf %45, %46 : vector<196x128xf32>
    %cst_28 = arith.constant 0.000000e+00 : f32
    %48 = vector.broadcast %cst_28 : f32 to vector<196x128xf32>
    %49 = arith.cmpf ogt, %47, %48 : vector<196x128xf32>
    %cst_29 = arith.constant 0.000000e+00 : f32
    %50 = vector.broadcast %cst_29 : f32 to vector<196x128xf32>
    %51 = arith.minimumf %47, %50 : vector<196x128xf32>
    %52 = math.exp %51 : vector<196x128xf32>
    %cst_30 = arith.constant 1.000000e+00 : f32
    %53 = vector.broadcast %cst_30 : f32 to vector<196x128xf32>
    %54 = arith.subf %52, %53 : vector<196x128xf32>
    %55 = arith.select %49, %47, %54 : vector<196x128xi1>, vector<196x128xf32>
    %56 = arith.maximumf %42, %55 : vector<196x128xf32>
    %c0_31 = arith.constant 0 : index
    %c0_32 = arith.constant 0 : index
    %57 = vector.load %arg4[%c0_31, %c0_32] : memref<1x128xf32, #tpu.memory_space<vmem>>, vector<1x128xf32>
    %58 = vector.broadcast %57 : vector<1x128xf32> to vector<196x128xf32>
    %59 = arith.mulf %56, %58 : vector<196x128xf32>
    %c0_33 = arith.constant 0 : index
    %c0_34 = arith.constant 0 : index
    %60 = vector.load %arg5[%c0_33, %c0_34] : memref<1x128xf32, #tpu.memory_space<vmem>>, vector<1x128xf32>
    %61 = vector.broadcast %60 : vector<1x128xf32> to vector<196x128xf32>
    %62 = arith.addf %59, %61 : vector<196x128xf32>
    %63 = arith.truncf %62 : vector<196x128xf32> to vector<196x128xbf16>
    %c0_35 = arith.constant 0 : index
    %c0_36 = arith.constant 0 : index
    %c0_37 = arith.constant 0 : index
    %64 = vector.load %arg6[%c0_35, %c0_36, %c0_37] : memref<1x196x128xbf16, #tpu.memory_space<vmem>>, vector<1x196x128xbf16>
    %65 = vector.shape_cast %64 : vector<1x196x128xbf16> to vector<196x128xbf16>
    %66 = vector.shape_cast %63 : vector<196x128xbf16> to vector<1x196x128xbf16>
    tpu.vector_store %arg6[%c0_35, %c0_36, %c0_37], %66 {strides = array<i32>} : memref<1x196x128xbf16, #tpu.memory_space<vmem>>, vector<1x196x128xbf16>,
    return
  }
  func.func @transform_0(%arg0: i32) -> (i32, i32, i32, i32) {
    %c0_i32 = arith.constant 0 : i32
    %c0_i32_0 = arith.constant 0 : i32
    %c0_i32_1 = arith.constant 0 : i32
    %c0_i32_2 = arith.constant 0 : i32
    return %arg0, %c0_i32, %c0_i32_0, %c0_i32_1 : i32, i32, i32, i32
  }
  func.func @transform_1(%arg0: i32) -> (i32, i32) {
    %c0_i32 = arith.constant 0 : i32
    %c0_i32_0 = arith.constant 0 : i32
    %c0_i32_1 = arith.constant 0 : i32
    return %c0_i32, %c0_i32_0 : i32, i32
  }
  func.func @transform_2(%arg0: i32) -> (i32, i32) {
    %c0_i32 = arith.constant 0 : i32
    %c0_i32_0 = arith.constant 0 : i32
    %c0_i32_1 = arith.constant 0 : i32
    return %c0_i32, %c0_i32_0 : i32, i32
  }
  func.func @transform_3(%arg0: i32) -> (i32, i32) {
    %c0_i32 = arith.constant 0 : i32
    %c0_i32_0 = arith.constant 0 : i32
    %c0_i32_1 = arith.constant 0 : i32
    return %c0_i32, %c0_i32_0 : i32, i32
  }
  func.func @transform_4(%arg0: i32) -> (i32, i32) {
    %c0_i32 = arith.constant 0 : i32
    %c0_i32_0 = arith.constant 0 : i32
    %c0_i32_1 = arith.constant 0 : i32
    return %c0_i32, %c0_i32_0 : i32, i32
  }
  func.func @transform_5(%arg0: i32) -> (i32, i32, i32) {
    %c0_i32 = arith.constant 0 : i32
    %c0_i32_0 = arith.constant 0 : i32
    %c0_i32_1 = arith.constant 0 : i32
    return %arg0, %c0_i32, %c0_i32_0 : i32, i32, i32
  }
}

module attributes {stable_mosaic.version = 11 : i64} {
  func.func @_tail_kernel(%arg0: i32, %arg1: memref<1x4x36x1152xbf16, #tpu.memory_space<vmem>>, %arg2: memref<1152x256xbf16, #tpu.memory_space<vmem>>, %arg3: memref<1x256xf32, #tpu.memory_space<vmem>>, %arg4: memref<1x256xf32, #tpu.memory_space<vmem>>, %arg5: memref<1x256xf32, #tpu.memory_space<vmem>>, %arg6: memref<256x256xbf16, #tpu.memory_space<vmem>>, %arg7: memref<1x256xf32, #tpu.memory_space<vmem>>, %arg8: memref<1x256xf32, #tpu.memory_space<vmem>>, %arg9: memref<1x256xf32, #tpu.memory_space<vmem>>, %arg10: memref<9x256x384xbf16, #tpu.memory_space<vmem>>, %arg11: memref<1x384xf32, #tpu.memory_space<vmem>>, %arg12: memref<1x384xf32, #tpu.memory_space<vmem>>, %arg13: memref<1x384xf32, #tpu.memory_space<vmem>>, %arg14: memref<384x128xbf16, #tpu.memory_space<vmem>>, %arg15: memref<1x128xf32, #tpu.memory_space<vmem>>, %arg16: memref<1x1x128xf32, #tpu.memory_space<vmem>>) attributes {dimension_semantics = [#tpu.dimension_semantics<parallel>], iteration_bounds = array<i64: 2>, scalar_prefetch = 0 : i64, scratch_operands = 0 : i64, tpu.core_type = #tpu.core_type<tc>, window_params = [{transform_indices = @transform_0, window_bounds = array<i64: 1, 4, 36, 1152>}, {pipeline_mode = #tpu.pipeline_mode<synchronous>, transform_indices = @transform_1, window_bounds = array<i64: 1152, 256>}, {pipeline_mode = #tpu.pipeline_mode<synchronous>, transform_indices = @transform_2, window_bounds = array<i64: 1, 256>}, {pipeline_mode = #tpu.pipeline_mode<synchronous>, transform_indices = @transform_3, window_bounds = array<i64: 1, 256>}, {pipeline_mode = #tpu.pipeline_mode<synchronous>, transform_indices = @transform_4, window_bounds = array<i64: 1, 256>}, {pipeline_mode = #tpu.pipeline_mode<synchronous>, transform_indices = @transform_5, window_bounds = array<i64: 256, 256>}, {pipeline_mode = #tpu.pipeline_mode<synchronous>, transform_indices = @transform_6, window_bounds = array<i64: 1, 256>}, {pipeline_mode = #tpu.pipeline_mode<synchronous>, transform_indices = @transform_7, window_bounds = array<i64: 1, 256>}, {pipeline_mode = #tpu.pipeline_mode<synchronous>, transform_indices = @transform_8, window_bounds = array<i64: 1, 256>}, {pipeline_mode = #tpu.pipeline_mode<synchronous>, transform_indices = @transform_9, window_bounds = array<i64: 9, 256, 384>}, {pipeline_mode = #tpu.pipeline_mode<synchronous>, transform_indices = @transform_10, window_bounds = array<i64: 1, 384>}, {pipeline_mode = #tpu.pipeline_mode<synchronous>, transform_indices = @transform_11, window_bounds = array<i64: 1, 384>}, {pipeline_mode = #tpu.pipeline_mode<synchronous>, transform_indices = @transform_12, window_bounds = array<i64: 1, 384>}, {pipeline_mode = #tpu.pipeline_mode<synchronous>, transform_indices = @transform_13, window_bounds = array<i64: 384, 128>}, {pipeline_mode = #tpu.pipeline_mode<synchronous>, transform_indices = @transform_14, window_bounds = array<i64: 1, 128>}, {transform_indices = @transform_15, window_bounds = array<i64: 1, 1, 128>}]} {
    %c0 = arith.constant 0 : index
    %c0_0 = arith.constant 0 : index
    %0 = vector.load %arg2[%c0, %c0_0] : memref<1152x256xbf16, #tpu.memory_space<vmem>>, vector<1152x256xbf16>
    %c0_1 = arith.constant 0 : index
    %c0_2 = arith.constant 0 : index
    %1 = vector.load %arg3[%c0_1, %c0_2] : memref<1x256xf32, #tpu.memory_space<vmem>>, vector<1x256xf32>
    %c0_3 = arith.constant 0 : index
    %c0_4 = arith.constant 0 : index
    %c0_5 = arith.constant 0 : index
    %c0_6 = arith.constant 0 : index
    %2 = vector.load %arg1[%c0_3, %c0_4, %c0_5, %c0_6] : memref<1x4x36x1152xbf16, #tpu.memory_space<vmem>>, vector<1x1x36x1152xbf16>
    %3 = vector.shape_cast %2 : vector<1x1x36x1152xbf16> to vector<36x1152xbf16>
    %cst = arith.constant dense<0.000000e+00> : vector<36x256xf32>
    %4 = tpu.matmul %3, %0, %cst {dimension_numbers = #tpu.dot_dimension_numbers<[1], [0], [0], [1], [0, 0, 1, 1], [], []>} : vector<36x1152xbf16>, vector<1152x256xbf16>, vector<36x256xf32> -> vector<36x256xf32>
    %5 = vector.broadcast %1 : vector<1x256xf32> to vector<36x256xf32>
    %6 = arith.addf %4, %5 : vector<36x256xf32>
    %cst_7 = arith.constant 0.000000e+00 : f32
    %7 = vector.broadcast %cst_7 : f32 to vector<36x256xf32>
    %8 = arith.cmpf ogt, %6, %7 : vector<36x256xf32>
    %cst_8 = arith.constant 0.000000e+00 : f32
    %9 = vector.broadcast %cst_8 : f32 to vector<36x256xf32>
    %10 = arith.minimumf %6, %9 : vector<36x256xf32>
    %11 = math.exp %10 : vector<36x256xf32>
    %cst_9 = arith.constant 1.000000e+00 : f32
    %12 = vector.broadcast %cst_9 : f32 to vector<36x256xf32>
    %13 = arith.subf %11, %12 : vector<36x256xf32>
    %14 = arith.select %8, %6, %13 : vector<36x256xi1>, vector<36x256xf32>
    %c0_10 = arith.constant 0 : index
    %c1 = arith.constant 1 : index
    %c0_11 = arith.constant 0 : index
    %c0_12 = arith.constant 0 : index
    %15 = vector.load %arg1[%c0_10, %c1, %c0_11, %c0_12] : memref<1x4x36x1152xbf16, #tpu.memory_space<vmem>>, vector<1x1x36x1152xbf16>
    %16 = vector.shape_cast %15 : vector<1x1x36x1152xbf16> to vector<36x1152xbf16>
    %cst_13 = arith.constant dense<0.000000e+00> : vector<36x256xf32>
    %17 = tpu.matmul %16, %0, %cst_13 {dimension_numbers = #tpu.dot_dimension_numbers<[1], [0], [0], [1], [0, 0, 1, 1], [], []>} : vector<36x1152xbf16>, vector<1152x256xbf16>, vector<36x256xf32> -> vector<36x256xf32>
    %18 = vector.broadcast %1 : vector<1x256xf32> to vector<36x256xf32>
    %19 = arith.addf %17, %18 : vector<36x256xf32>
    %cst_14 = arith.constant 0.000000e+00 : f32
    %20 = vector.broadcast %cst_14 : f32 to vector<36x256xf32>
    %21 = arith.cmpf ogt, %19, %20 : vector<36x256xf32>
    %cst_15 = arith.constant 0.000000e+00 : f32
    %22 = vector.broadcast %cst_15 : f32 to vector<36x256xf32>
    %23 = arith.minimumf %19, %22 : vector<36x256xf32>
    %24 = math.exp %23 : vector<36x256xf32>
    %cst_16 = arith.constant 1.000000e+00 : f32
    %25 = vector.broadcast %cst_16 : f32 to vector<36x256xf32>
    %26 = arith.subf %24, %25 : vector<36x256xf32>
    %27 = arith.select %21, %19, %26 : vector<36x256xi1>, vector<36x256xf32>
    %28 = arith.maximumf %14, %27 : vector<36x256xf32>
    %c0_17 = arith.constant 0 : index
    %c2 = arith.constant 2 : index
    %c0_18 = arith.constant 0 : index
    %c0_19 = arith.constant 0 : index
    %29 = vector.load %arg1[%c0_17, %c2, %c0_18, %c0_19] : memref<1x4x36x1152xbf16, #tpu.memory_space<vmem>>, vector<1x1x36x1152xbf16>
    %30 = vector.shape_cast %29 : vector<1x1x36x1152xbf16> to vector<36x1152xbf16>
    %cst_20 = arith.constant dense<0.000000e+00> : vector<36x256xf32>
    %31 = tpu.matmul %30, %0, %cst_20 {dimension_numbers = #tpu.dot_dimension_numbers<[1], [0], [0], [1], [0, 0, 1, 1], [], []>} : vector<36x1152xbf16>, vector<1152x256xbf16>, vector<36x256xf32> -> vector<36x256xf32>
    %32 = vector.broadcast %1 : vector<1x256xf32> to vector<36x256xf32>
    %33 = arith.addf %31, %32 : vector<36x256xf32>
    %cst_21 = arith.constant 0.000000e+00 : f32
    %34 = vector.broadcast %cst_21 : f32 to vector<36x256xf32>
    %35 = arith.cmpf ogt, %33, %34 : vector<36x256xf32>
    %cst_22 = arith.constant 0.000000e+00 : f32
    %36 = vector.broadcast %cst_22 : f32 to vector<36x256xf32>
    %37 = arith.minimumf %33, %36 : vector<36x256xf32>
    %38 = math.exp %37 : vector<36x256xf32>
    %cst_23 = arith.constant 1.000000e+00 : f32
    %39 = vector.broadcast %cst_23 : f32 to vector<36x256xf32>
    %40 = arith.subf %38, %39 : vector<36x256xf32>
    %41 = arith.select %35, %33, %40 : vector<36x256xi1>, vector<36x256xf32>
    %42 = arith.maximumf %28, %41 : vector<36x256xf32>
    %c0_24 = arith.constant 0 : index
    %c3 = arith.constant 3 : index
    %c0_25 = arith.constant 0 : index
    %c0_26 = arith.constant 0 : index
    %43 = vector.load %arg1[%c0_24, %c3, %c0_25, %c0_26] : memref<1x4x36x1152xbf16, #tpu.memory_space<vmem>>, vector<1x1x36x1152xbf16>
    %44 = vector.shape_cast %43 : vector<1x1x36x1152xbf16> to vector<36x1152xbf16>
    %cst_27 = arith.constant dense<0.000000e+00> : vector<36x256xf32>
    %45 = tpu.matmul %44, %0, %cst_27 {dimension_numbers = #tpu.dot_dimension_numbers<[1], [0], [0], [1], [0, 0, 1, 1], [], []>} : vector<36x1152xbf16>, vector<1152x256xbf16>, vector<36x256xf32> -> vector<36x256xf32>
    %46 = vector.broadcast %1 : vector<1x256xf32> to vector<36x256xf32>
    %47 = arith.addf %45, %46 : vector<36x256xf32>
    %cst_28 = arith.constant 0.000000e+00 : f32
    %48 = vector.broadcast %cst_28 : f32 to vector<36x256xf32>
    %49 = arith.cmpf ogt, %47, %48 : vector<36x256xf32>
    %cst_29 = arith.constant 0.000000e+00 : f32
    %50 = vector.broadcast %cst_29 : f32 to vector<36x256xf32>
    %51 = arith.minimumf %47, %50 : vector<36x256xf32>
    %52 = math.exp %51 : vector<36x256xf32>
    %cst_30 = arith.constant 1.000000e+00 : f32
    %53 = vector.broadcast %cst_30 : f32 to vector<36x256xf32>
    %54 = arith.subf %52, %53 : vector<36x256xf32>
    %55 = arith.select %49, %47, %54 : vector<36x256xi1>, vector<36x256xf32>
    %56 = arith.maximumf %42, %55 : vector<36x256xf32>
    %c0_31 = arith.constant 0 : index
    %c0_32 = arith.constant 0 : index
    %57 = vector.load %arg4[%c0_31, %c0_32] : memref<1x256xf32, #tpu.memory_space<vmem>>, vector<1x256xf32>
    %58 = vector.broadcast %57 : vector<1x256xf32> to vector<36x256xf32>
    %59 = arith.mulf %56, %58 : vector<36x256xf32>
    %c0_33 = arith.constant 0 : index
    %c0_34 = arith.constant 0 : index
    %60 = vector.load %arg5[%c0_33, %c0_34] : memref<1x256xf32, #tpu.memory_space<vmem>>, vector<1x256xf32>
    %61 = vector.broadcast %60 : vector<1x256xf32> to vector<36x256xf32>
    %62 = arith.addf %59, %61 : vector<36x256xf32>
    %c0_35 = arith.constant 0 : index
    %c0_36 = arith.constant 0 : index
    %63 = vector.load %arg6[%c0_35, %c0_36] : memref<256x256xbf16, #tpu.memory_space<vmem>>, vector<256x256xbf16>
    %c0_37 = arith.constant 0 : index
    %c0_38 = arith.constant 0 : index
    %64 = vector.load %arg7[%c0_37, %c0_38] : memref<1x256xf32, #tpu.memory_space<vmem>>, vector<1x256xf32>
    %65 = vector.extract_strided_slice %62 {offsets = [0, 0], sizes = [9, 256], strides = [1, 1]} : vector<36x256xf32> to vector<9x256xf32>
    %66 = arith.truncf %65 : vector<9x256xf32> to vector<9x256xbf16>
    %cst_39 = arith.constant dense<0.000000e+00> : vector<9x256xf32>
    %67 = tpu.matmul %66, %63, %cst_39 {dimension_numbers = #tpu.dot_dimension_numbers<[1], [0], [0], [1], [0, 0, 1, 1], [], []>} : vector<9x256xbf16>, vector<256x256xbf16>, vector<9x256xf32> -> vector<9x256xf32>
    %68 = vector.broadcast %64 : vector<1x256xf32> to vector<9x256xf32>
    %69 = arith.addf %67, %68 : vector<9x256xf32>
    %cst_40 = arith.constant 0.000000e+00 : f32
    %70 = vector.broadcast %cst_40 : f32 to vector<9x256xf32>
    %71 = arith.cmpf ogt, %69, %70 : vector<9x256xf32>
    %cst_41 = arith.constant 0.000000e+00 : f32
    %72 = vector.broadcast %cst_41 : f32 to vector<9x256xf32>
    %73 = arith.minimumf %69, %72 : vector<9x256xf32>
    %74 = math.exp %73 : vector<9x256xf32>
    %cst_42 = arith.constant 1.000000e+00 : f32
    %75 = vector.broadcast %cst_42 : f32 to vector<9x256xf32>
    %76 = arith.subf %74, %75 : vector<9x256xf32>
    %77 = arith.select %71, %69, %76 : vector<9x256xi1>, vector<9x256xf32>
    %78 = vector.extract_strided_slice %62 {offsets = [9, 0], sizes = [9, 256], strides = [1, 1]} : vector<36x256xf32> to vector<9x256xf32>
    %79 = arith.truncf %78 : vector<9x256xf32> to vector<9x256xbf16>
    %cst_43 = arith.constant dense<0.000000e+00> : vector<9x256xf32>
    %80 = tpu.matmul %79, %63, %cst_43 {dimension_numbers = #tpu.dot_dimension_numbers<[1], [0], [0], [1], [0, 0, 1, 1], [], []>} : vector<9x256xbf16>, vector<256x256xbf16>, vector<9x256xf32> -> vector<9x256xf32>
    %81 = vector.broadcast %64 : vector<1x256xf32> to vector<9x256xf32>
    %82 = arith.addf %80, %81 : vector<9x256xf32>
    %cst_44 = arith.constant 0.000000e+00 : f32
    %83 = vector.broadcast %cst_44 : f32 to vector<9x256xf32>
    %84 = arith.cmpf ogt, %82, %83 : vector<9x256xf32>
    %cst_45 = arith.constant 0.000000e+00 : f32
    %85 = vector.broadcast %cst_45 : f32 to vector<9x256xf32>
    %86 = arith.minimumf %82, %85 : vector<9x256xf32>
    %87 = math.exp %86 : vector<9x256xf32>
    %cst_46 = arith.constant 1.000000e+00 : f32
    %88 = vector.broadcast %cst_46 : f32 to vector<9x256xf32>
    %89 = arith.subf %87, %88 : vector<9x256xf32>
    %90 = arith.select %84, %82, %89 : vector<9x256xi1>, vector<9x256xf32>
    %91 = arith.maximumf %77, %90 : vector<9x256xf32>
    %92 = vector.extract_strided_slice %62 {offsets = [18, 0], sizes = [9, 256], strides = [1, 1]} : vector<36x256xf32> to vector<9x256xf32>
    %93 = arith.truncf %92 : vector<9x256xf32> to vector<9x256xbf16>
    %cst_47 = arith.constant dense<0.000000e+00> : vector<9x256xf32>
    %94 = tpu.matmul %93, %63, %cst_47 {dimension_numbers = #tpu.dot_dimension_numbers<[1], [0], [0], [1], [0, 0, 1, 1], [], []>} : vector<9x256xbf16>, vector<256x256xbf16>, vector<9x256xf32> -> vector<9x256xf32>
    %95 = vector.broadcast %64 : vector<1x256xf32> to vector<9x256xf32>
    %96 = arith.addf %94, %95 : vector<9x256xf32>
    %cst_48 = arith.constant 0.000000e+00 : f32
    %97 = vector.broadcast %cst_48 : f32 to vector<9x256xf32>
    %98 = arith.cmpf ogt, %96, %97 : vector<9x256xf32>
    %cst_49 = arith.constant 0.000000e+00 : f32
    %99 = vector.broadcast %cst_49 : f32 to vector<9x256xf32>
    %100 = arith.minimumf %96, %99 : vector<9x256xf32>
    %101 = math.exp %100 : vector<9x256xf32>
    %cst_50 = arith.constant 1.000000e+00 : f32
    %102 = vector.broadcast %cst_50 : f32 to vector<9x256xf32>
    %103 = arith.subf %101, %102 : vector<9x256xf32>
    %104 = arith.select %98, %96, %103 : vector<9x256xi1>, vector<9x256xf32>
    %105 = arith.maximumf %91, %104 : vector<9x256xf32>
    %106 = vector.extract_strided_slice %62 {offsets = [27, 0], sizes = [9, 256], strides = [1, 1]} : vector<36x256xf32> to vector<9x256xf32>
    %107 = arith.truncf %106 : vector<9x256xf32> to vector<9x256xbf16>
    %cst_51 = arith.constant dense<0.000000e+00> : vector<9x256xf32>
    %108 = tpu.matmul %107, %63, %cst_51 {dimension_numbers = #tpu.dot_dimension_numbers<[1], [0], [0], [1], [0, 0, 1, 1], [], []>} : vector<9x256xbf16>, vector<256x256xbf16>, vector<9x256xf32> -> vector<9x256xf32>
    %109 = vector.broadcast %64 : vector<1x256xf32> to vector<9x256xf32>
    %110 = arith.addf %108, %109 : vector<9x256xf32>
    %cst_52 = arith.constant 0.000000e+00 : f32
    %111 = vector.broadcast %cst_52 : f32 to vector<9x256xf32>
    %112 = arith.cmpf ogt, %110, %111 : vector<9x256xf32>
    %cst_53 = arith.constant 0.000000e+00 : f32
    %113 = vector.broadcast %cst_53 : f32 to vector<9x256xf32>
    %114 = arith.minimumf %110, %113 : vector<9x256xf32>
    %115 = math.exp %114 : vector<9x256xf32>
    %cst_54 = arith.constant 1.000000e+00 : f32
    %116 = vector.broadcast %cst_54 : f32 to vector<9x256xf32>
    %117 = arith.subf %115, %116 : vector<9x256xf32>
    %118 = arith.select %112, %110, %117 : vector<9x256xi1>, vector<9x256xf32>
    %119 = arith.maximumf %105, %118 : vector<9x256xf32>
    %c0_55 = arith.constant 0 : index
    %c0_56 = arith.constant 0 : index
    %120 = vector.load %arg8[%c0_55, %c0_56] : memref<1x256xf32, #tpu.memory_space<vmem>>, vector<1x256xf32>
    %121 = vector.broadcast %120 : vector<1x256xf32> to vector<9x256xf32>
    %122 = arith.mulf %119, %121 : vector<9x256xf32>
    %c0_57 = arith.constant 0 : index
    %c0_58 = arith.constant 0 : index
    %123 = vector.load %arg9[%c0_57, %c0_58] : memref<1x256xf32, #tpu.memory_space<vmem>>, vector<1x256xf32>
    %124 = vector.broadcast %123 : vector<1x256xf32> to vector<9x256xf32>
    %125 = arith.addf %122, %124 : vector<9x256xf32>
    %126 = vector.extract_strided_slice %125 {offsets = [0, 0], sizes = [1, 256], strides = [1, 1]} : vector<9x256xf32> to vector<1x256xf32>
    %127 = arith.truncf %126 : vector<1x256xf32> to vector<1x256xbf16>
    %c0_59 = arith.constant 0 : index
    %c0_60 = arith.constant 0 : index
    %c0_61 = arith.constant 0 : index
    %128 = vector.load %arg10[%c0_59, %c0_60, %c0_61] : memref<9x256x384xbf16, #tpu.memory_space<vmem>>, vector<1x256x384xbf16>
    %129 = vector.shape_cast %128 : vector<1x256x384xbf16> to vector<256x384xbf16>
    %cst_62 = arith.constant dense<0.000000e+00> : vector<1x384xf32>
    %130 = tpu.matmul %127, %129, %cst_62 {dimension_numbers = #tpu.dot_dimension_numbers<[1], [0], [0], [1], [0, 0, 1, 1], [], []>} : vector<1x256xbf16>, vector<256x384xbf16>, vector<1x384xf32> -> vector<1x384xf32>
    %131 = vector.extract_strided_slice %125 {offsets = [1, 0], sizes = [1, 256], strides = [1, 1]} : vector<9x256xf32> to vector<1x256xf32>
    %132 = arith.truncf %131 : vector<1x256xf32> to vector<1x256xbf16>
    %c1_63 = arith.constant 1 : index
    %c0_64 = arith.constant 0 : index
    %c0_65 = arith.constant 0 : index
    %133 = vector.load %arg10[%c1_63, %c0_64, %c0_65] : memref<9x256x384xbf16, #tpu.memory_space<vmem>>, vector<1x256x384xbf16>
    %134 = vector.shape_cast %133 : vector<1x256x384xbf16> to vector<256x384xbf16>
    %cst_66 = arith.constant dense<0.000000e+00> : vector<1x384xf32>
    %135 = tpu.matmul %132, %134, %cst_66 {dimension_numbers = #tpu.dot_dimension_numbers<[1], [0], [0], [1], [0, 0, 1, 1], [], []>} : vector<1x256xbf16>, vector<256x384xbf16>, vector<1x384xf32> -> vector<1x384xf32>
    %136 = arith.addf %130, %135 : vector<1x384xf32>
    %137 = vector.extract_strided_slice %125 {offsets = [2, 0], sizes = [1, 256], strides = [1, 1]} : vector<9x256xf32> to vector<1x256xf32>
    %138 = arith.truncf %137 : vector<1x256xf32> to vector<1x256xbf16>
    %c2_67 = arith.constant 2 : index
    %c0_68 = arith.constant 0 : index
    %c0_69 = arith.constant 0 : index
    %139 = vector.load %arg10[%c2_67, %c0_68, %c0_69] : memref<9x256x384xbf16, #tpu.memory_space<vmem>>, vector<1x256x384xbf16>
    %140 = vector.shape_cast %139 : vector<1x256x384xbf16> to vector<256x384xbf16>
    %cst_70 = arith.constant dense<0.000000e+00> : vector<1x384xf32>
    %141 = tpu.matmul %138, %140, %cst_70 {dimension_numbers = #tpu.dot_dimension_numbers<[1], [0], [0], [1], [0, 0, 1, 1], [], []>} : vector<1x256xbf16>, vector<256x384xbf16>, vector<1x384xf32> -> vector<1x384xf32>
    %142 = arith.addf %136, %141 : vector<1x384xf32>
    %143 = vector.extract_strided_slice %125 {offsets = [3, 0], sizes = [1, 256], strides = [1, 1]} : vector<9x256xf32> to vector<1x256xf32>
    %144 = arith.truncf %143 : vector<1x256xf32> to vector<1x256xbf16>
    %c3_71 = arith.constant 3 : index
    %c0_72 = arith.constant 0 : index
    %c0_73 = arith.constant 0 : index
    %145 = vector.load %arg10[%c3_71, %c0_72, %c0_73] : memref<9x256x384xbf16, #tpu.memory_space<vmem>>, vector<1x256x384xbf16>
    %146 = vector.shape_cast %145 : vector<1x256x384xbf16> to vector<256x384xbf16>
    %cst_74 = arith.constant dense<0.000000e+00> : vector<1x384xf32>
    %147 = tpu.matmul %144, %146, %cst_74 {dimension_numbers = #tpu.dot_dimension_numbers<[1], [0], [0], [1], [0, 0, 1, 1], [], []>} : vector<1x256xbf16>, vector<256x384xbf16>, vector<1x384xf32> -> vector<1x384xf32>
    %148 = arith.addf %142, %147 : vector<1x384xf32>
    %149 = vector.extract_strided_slice %125 {offsets = [4, 0], sizes = [1, 256], strides = [1, 1]} : vector<9x256xf32> to vector<1x256xf32>
    %150 = arith.truncf %149 : vector<1x256xf32> to vector<1x256xbf16>
    %c4 = arith.constant 4 : index
    %c0_75 = arith.constant 0 : index
    %c0_76 = arith.constant 0 : index
    %151 = vector.load %arg10[%c4, %c0_75, %c0_76] : memref<9x256x384xbf16, #tpu.memory_space<vmem>>, vector<1x256x384xbf16>
    %152 = vector.shape_cast %151 : vector<1x256x384xbf16> to vector<256x384xbf16>
    %cst_77 = arith.constant dense<0.000000e+00> : vector<1x384xf32>
    %153 = tpu.matmul %150, %152, %cst_77 {dimension_numbers = #tpu.dot_dimension_numbers<[1], [0], [0], [1], [0, 0, 1, 1], [], []>} : vector<1x256xbf16>, vector<256x384xbf16>, vector<1x384xf32> -> vector<1x384xf32>
    %154 = arith.addf %148, %153 : vector<1x384xf32>
    %155 = vector.extract_strided_slice %125 {offsets = [5, 0], sizes = [1, 256], strides = [1, 1]} : vector<9x256xf32> to vector<1x256xf32>
    %156 = arith.truncf %155 : vector<1x256xf32> to vector<1x256xbf16>
    %c5 = arith.constant 5 : index
    %c0_78 = arith.constant 0 : index
    %c0_79 = arith.constant 0 : index
    %157 = vector.load %arg10[%c5, %c0_78, %c0_79] : memref<9x256x384xbf16, #tpu.memory_space<vmem>>, vector<1x256x384xbf16>
    %158 = vector.shape_cast %157 : vector<1x256x384xbf16> to vector<256x384xbf16>
    %cst_80 = arith.constant dense<0.000000e+00> : vector<1x384xf32>
    %159 = tpu.matmul %156, %158, %cst_80 {dimension_numbers = #tpu.dot_dimension_numbers<[1], [0], [0], [1], [0, 0, 1, 1], [], []>} : vector<1x256xbf16>, vector<256x384xbf16>, vector<1x384xf32> -> vector<1x384xf32>
    %160 = arith.addf %154, %159 : vector<1x384xf32>
    %161 = vector.extract_strided_slice %125 {offsets = [6, 0], sizes = [1, 256], strides = [1, 1]} : vector<9x256xf32> to vector<1x256xf32>
    %162 = arith.truncf %161 : vector<1x256xf32> to vector<1x256xbf16>
    %c6 = arith.constant 6 : index
    %c0_81 = arith.constant 0 : index
    %c0_82 = arith.constant 0 : index
    %163 = vector.load %arg10[%c6, %c0_81, %c0_82] : memref<9x256x384xbf16, #tpu.memory_space<vmem>>, vector<1x256x384xbf16>
    %164 = vector.shape_cast %163 : vector<1x256x384xbf16> to vector<256x384xbf16>
    %cst_83 = arith.constant dense<0.000000e+00> : vector<1x384xf32>
    %165 = tpu.matmul %162, %164, %cst_83 {dimension_numbers = #tpu.dot_dimension_numbers<[1], [0], [0], [1], [0, 0, 1, 1], [], []>} : vector<1x256xbf16>, vector<256x384xbf16>, vector<1x384xf32> -> vector<1x384xf32>
    %166 = arith.addf %160, %165 : vector<1x384xf32>
    %167 = vector.extract_strided_slice %125 {offsets = [7, 0], sizes = [1, 256], strides = [1, 1]} : vector<9x256xf32> to vector<1x256xf32>
    %168 = arith.truncf %167 : vector<1x256xf32> to vector<1x256xbf16>
    %c7 = arith.constant 7 : index
    %c0_84 = arith.constant 0 : index
    %c0_85 = arith.constant 0 : index
    %169 = vector.load %arg10[%c7, %c0_84, %c0_85] : memref<9x256x384xbf16, #tpu.memory_space<vmem>>, vector<1x256x384xbf16>
    %170 = vector.shape_cast %169 : vector<1x256x384xbf16> to vector<256x384xbf16>
    %cst_86 = arith.constant dense<0.000000e+00> : vector<1x384xf32>
    %171 = tpu.matmul %168, %170, %cst_86 {dimension_numbers = #tpu.dot_dimension_numbers<[1], [0], [0], [1], [0, 0, 1, 1], [], []>} : vector<1x256xbf16>, vector<256x384xbf16>, vector<1x384xf32> -> vector<1x384xf32>
    %172 = arith.addf %166, %171 : vector<1x384xf32>
    %173 = vector.extract_strided_slice %125 {offsets = [8, 0], sizes = [1, 256], strides = [1, 1]} : vector<9x256xf32> to vector<1x256xf32>
    %174 = arith.truncf %173 : vector<1x256xf32> to vector<1x256xbf16>
    %c8 = arith.constant 8 : index
    %c0_87 = arith.constant 0 : index
    %c0_88 = arith.constant 0 : index
    %175 = vector.load %arg10[%c8, %c0_87, %c0_88] : memref<9x256x384xbf16, #tpu.memory_space<vmem>>, vector<1x256x384xbf16>
    %176 = vector.shape_cast %175 : vector<1x256x384xbf16> to vector<256x384xbf16>
    %cst_89 = arith.constant dense<0.000000e+00> : vector<1x384xf32>
    %177 = tpu.matmul %174, %176, %cst_89 {dimension_numbers = #tpu.dot_dimension_numbers<[1], [0], [0], [1], [0, 0, 1, 1], [], []>} : vector<1x256xbf16>, vector<256x384xbf16>, vector<1x384xf32> -> vector<1x384xf32>
    %178 = arith.addf %172, %177 : vector<1x384xf32>
    %c0_90 = arith.constant 0 : index
    %c0_91 = arith.constant 0 : index
    %179 = vector.load %arg11[%c0_90, %c0_91] : memref<1x384xf32, #tpu.memory_space<vmem>>, vector<1x384xf32>
    %180 = arith.addf %178, %179 : vector<1x384xf32>
    %cst_92 = arith.constant 0.000000e+00 : f32
    %181 = vector.broadcast %cst_92 : f32 to vector<1x384xf32>
    %182 = arith.cmpf ogt, %180, %181 : vector<1x384xf32>
    %cst_93 = arith.constant 0.000000e+00 : f32
    %183 = vector.broadcast %cst_93 : f32 to vector<1x384xf32>
    %184 = arith.minimumf %180, %183 : vector<1x384xf32>
    %185 = math.exp %184 : vector<1x384xf32>
    %cst_94 = arith.constant 1.000000e+00 : f32
    %186 = vector.broadcast %cst_94 : f32 to vector<1x384xf32>
    %187 = arith.subf %185, %186 : vector<1x384xf32>
    %188 = arith.select %182, %180, %187 : vector<1x384xi1>, vector<1x384xf32>
    %c0_95 = arith.constant 0 : index
    %c0_96 = arith.constant 0 : index
    %189 = vector.load %arg12[%c0_95, %c0_96] : memref<1x384xf32, #tpu.memory_space<vmem>>, vector<1x384xf32>
    %190 = arith.mulf %188, %189 : vector<1x384xf32>
    %c0_97 = arith.constant 0 : index
    %c0_98 = arith.constant 0 : index
    %191 = vector.load %arg13[%c0_97, %c0_98] : memref<1x384xf32, #tpu.memory_space<vmem>>, vector<1x384xf32>
    %192 = arith.addf %190, %191 : vector<1x384xf32>
    %193 = arith.truncf %192 : vector<1x384xf32> to vector<1x384xbf16>
    %c0_99 = arith.constant 0 : index
    %c0_100 = arith.constant 0 : index
    %194 = vector.load %arg14[%c0_99, %c0_100] : memref<384x128xbf16, #tpu.memory_space<vmem>>, vector<384x128xbf16>
    %cst_101 = arith.constant dense<0.000000e+00> : vector<1x128xf32>
    %195 = tpu.matmul %193, %194, %cst_101 {dimension_numbers = #tpu.dot_dimension_numbers<[1], [0], [0], [1], [0, 0, 1, 1], [], []>} : vector<1x384xbf16>, vector<384x128xbf16>, vector<1x128xf32> -> vector<1x128xf32>
    %c0_102 = arith.constant 0 : index
    %c0_103 = arith.constant 0 : index
    %196 = vector.load %arg15[%c0_102, %c0_103] : memref<1x128xf32, #tpu.memory_space<vmem>>, vector<1x128xf32>
    %197 = arith.addf %195, %196 : vector<1x128xf32>
    %c0_104 = arith.constant 0 : index
    %c0_105 = arith.constant 0 : index
    %c0_106 = arith.constant 0 : index
    %198 = vector.load %arg16[%c0_104, %c0_105, %c0_106] : memref<1x1x128xf32, #tpu.memory_space<vmem>>, vector<1x1x128xf32>
    %199 = vector.shape_cast %198 : vector<1x1x128xf32> to vector<1x128xf32>
    %200 = vector.shape_cast %197 : vector<1x128xf32> to vector<1x1x128xf32>
    tpu.vector_store %arg16[%c0_104, %c0_105, %c0_106], %200 {strides = array<i32>} : memref<1x1x128xf32, #tpu.memory_space<vmem>>, vector<1x1x128xf32>,
    return
  }
  func.func @transform_0(%arg0: i32) -> (i32, i32, i32, i32) {
    %c0_i32 = arith.constant 0 : i32
    %c0_i32_0 = arith.constant 0 : i32
    %c0_i32_1 = arith.constant 0 : i32
    %c0_i32_2 = arith.constant 0 : i32
    return %arg0, %c0_i32, %c0_i32_0, %c0_i32_1 : i32, i32, i32, i32
  }
  func.func @transform_1(%arg0: i32) -> (i32, i32) {
    %c0_i32 = arith.constant 0 : i32
    %c0_i32_0 = arith.constant 0 : i32
    %c0_i32_1 = arith.constant 0 : i32
    return %c0_i32, %c0_i32_0 : i32, i32
  }
  func.func @transform_2(%arg0: i32) -> (i32, i32) {
    %c0_i32 = arith.constant 0 : i32
    %c0_i32_0 = arith.constant 0 : i32
    %c0_i32_1 = arith.constant 0 : i32
    return %c0_i32, %c0_i32_0 : i32, i32
  }
  func.func @transform_3(%arg0: i32) -> (i32, i32) {
    %c0_i32 = arith.constant 0 : i32
    %c0_i32_0 = arith.constant 0 : i32
    %c0_i32_1 = arith.constant 0 : i32
    return %c0_i32, %c0_i32_0 : i32, i32
  }
  func.func @transform_4(%arg0: i32) -> (i32, i32) {
    %c0_i32 = arith.constant 0 : i32
    %c0_i32_0 = arith.constant 0 : i32
    %c0_i32_1 = arith.constant 0 : i32
    return %c0_i32, %c0_i32_0 : i32, i32
  }
  func.func @transform_5(%arg0: i32) -> (i32, i32) {
    %c0_i32 = arith.constant 0 : i32
    %c0_i32_0 = arith.constant 0 : i32
    %c0_i32_1 = arith.constant 0 : i32
    return %c0_i32, %c0_i32_0 : i32, i32
  }
  func.func @transform_6(%arg0: i32) -> (i32, i32) {
    %c0_i32 = arith.constant 0 : i32
    %c0_i32_0 = arith.constant 0 : i32
    %c0_i32_1 = arith.constant 0 : i32
    return %c0_i32, %c0_i32_0 : i32, i32
  }
  func.func @transform_7(%arg0: i32) -> (i32, i32) {
    %c0_i32 = arith.constant 0 : i32
    %c0_i32_0 = arith.constant 0 : i32
    %c0_i32_1 = arith.constant 0 : i32
    return %c0_i32, %c0_i32_0 : i32, i32
  }
  func.func @transform_8(%arg0: i32) -> (i32, i32) {
    %c0_i32 = arith.constant 0 : i32
    %c0_i32_0 = arith.constant 0 : i32
    %c0_i32_1 = arith.constant 0 : i32
    return %c0_i32, %c0_i32_0 : i32, i32
  }
  func.func @transform_9(%arg0: i32) -> (i32, i32, i32) {
    %c0_i32 = arith.constant 0 : i32
    %c0_i32_0 = arith.constant 0 : i32
    %c0_i32_1 = arith.constant 0 : i32
    %c0_i32_2 = arith.constant 0 : i32
    return %c0_i32, %c0_i32_0, %c0_i32_1 : i32, i32, i32
  }
  func.func @transform_10(%arg0: i32) -> (i32, i32) {
    %c0_i32 = arith.constant 0 : i32
    %c0_i32_0 = arith.constant 0 : i32
    %c0_i32_1 = arith.constant 0 : i32
    return %c0_i32, %c0_i32_0 : i32, i32
  }
  func.func @transform_11(%arg0: i32) -> (i32, i32) {
    %c0_i32 = arith.constant 0 : i32
    %c0_i32_0 = arith.constant 0 : i32
    %c0_i32_1 = arith.constant 0 : i32
    return %c0_i32, %c0_i32_0 : i32, i32
  }
  func.func @transform_12(%arg0: i32) -> (i32, i32) {
    %c0_i32 = arith.constant 0 : i32
    %c0_i32_0 = arith.constant 0 : i32
    %c0_i32_1 = arith.constant 0 : i32
    return %c0_i32, %c0_i32_0 : i32, i32
  }
  func.func @transform_13(%arg0: i32) -> (i32, i32) {
    %c0_i32 = arith.constant 0 : i32
    %c0_i32_0 = arith.constant 0 : i32
    %c0_i32_1 = arith.constant 0 : i32
    return %c0_i32, %c0_i32_0 : i32, i32
  }
  func.func @transform_14(%arg0: i32) -> (i32, i32) {
    %c0_i32 = arith.constant 0 : i32
    %c0_i32_0 = arith.constant 0 : i32
    %c0_i32_1 = arith.constant 0 : i32
    return %c0_i32, %c0_i32_0 : i32, i32
  }
  func.func @transform_15(%arg0: i32) -> (i32, i32, i32) {
    %c0_i32 = arith.constant 0 : i32
    %c0_i32_0 = arith.constant 0 : i32
    %c0_i32_1 = arith.constant 0 : i32
    return %arg0, %c0_i32, %c0_i32_0 : i32, i32, i32
  }
}

</mosaic_0001>

<bundles_post_ra>
// kernel: hindi_char_net_forward.2
= control target key start
LH: loop header
LB: loop body
LE: loop exit
PB: predicated region body
PF: predicated region fallthrough
CT: control target
= control target key end

     0   :  { %s3233_s18 = smov 0   ;;  %s4470_s0 = inlined_call_operand.vmem [shape: bf16[2,4,196,32], index: 0, kind: input, shape index: {}]   ;;  %s4471_s1 = inlined_call_operand.vmem [shape: bf16[32,128], index: 1, kind: input, shape index: {}]   ;;  %s4472_s2 = inlined_call_operand.vmem [shape: f32[1,128], index: 2, kind: input, shape index: {}]   ;;  %s4473_s3 = inlined_call_operand.vmem [shape: f32[1,128], index: 3, kind: input, shape index: {}]   ;;  %s4474_s4 = inlined_call_operand.vmem [shape: f32[1,128], index: 4, kind: input, shape index: {}]   ;;  %s4475_s5 = inlined_call_operand.vmem [shape: bf16[2,196,128], index: 5, kind: output, shape index: {}]  }
   0x1 LB: > { %s2225_s19 = sadd.s32 4294967295, %s3199_s18   ;;  %p2229_p0 = scmp.ge.s32.totalorder %s3199_s18, 1  ;;  %s3199_s18 = sphi %s3233_s18, %s15_s18  }
   0x2   : > { %p187_p1 = scmp.lt.s32.totalorder %s3199_s18, 3 }
   0x4   : > { %p188_p2 = pnand %p2229_p0, %p187_p1 }
   0x6   : > { %191 = sbr.rel (%p188_p2) target bundleno = 481 (0x1e1), region = 40 }
   0xd   : > { %v2935_v0 = vld [vmem:[%s4471_s1] sm:$0xff]   ;;  %v3201_v1 = vmov 0.0   ;;  %v2936_v2 = vld [vmem:[%s4471_s1 + $0x8] sm:$0xff]   ;;  %p215_p3 = scmp.lt.s32.totalorder %s2225_s19, 1  ;;  %vm3202_vm0 = vmmov 0   ;;  %vm337_vm1 = vcmask 261120  }
   0xe   : > { %2699 = vmatprep.subr.bf16.mxu0 %v3201_v1  ;;  %2755 = vmatprep.subr.bf16.mxu1 %v3201_v1  ;;  %v3474_v55 = vld [vmem:[%s4472_s2] ss:$0 sm:$0xff] }
   0xf   : > { %2700 = vmatpush3.bf16.msra.mxu0 %v2935_v0  ;;  %2756 = vmatpush3.bf16.msra.mxu1 %v2935_v0  ;;  %s4544_s19 = smov (!%p215_p3, %s2225_s19), 1 }
  0x10   : > { %2701 = vmatprep.subr.bf16.mxu0 %v3201_v1  ;;  %2757 = vmatprep.subr.bf16.mxu1 %v3201_v1  ;;  %s2923_s24 = smul.u32 400, %s4544_s19 }
  0x11   : > { %2703 = vmatprep.mubr.msk.bf16.mxu0 %vm3202_vm0, %v3201_v1  ;;  %2759 = vmatprep.mubr.msk.bf16.mxu1 %vm3202_vm0, %v3201_v1  ;;  %s2924_s11 = smul.u32 100, %s4544_s19 }
  0x12   : > { %s3263_s27 = scalar_lea.vmem %s4470_s0, %s2923_s24 }
  0x13   : > { %2702 = vmatpush3.bf16.msra.mxu0 %v2936_v2  ;;  %2758 = vmatpush3.bf16.msra.mxu1 %v2936_v2  ;;  %v2937_v3 = vld [vmem:[%s3263_s27] sm:$0xff]   ;;  %v2939_v5 = vld [vmem:[%s3263_s27 + $0x8] sm:$0xff]   ;;  %v2941_v7 = vld [vmem:[%s3263_s27 + $0x10] sm:$0xff]   ;;  %s4042_s14 = scalar_lea.vmem %s4475_s5, %s2924_s11 }
  0x14   : > { %2811 = vmatprep.subr.bf16.mxu0 %v3201_v1  ;;  %2867 = vmatprep.subr.bf16.mxu1 %v3201_v1  ;;  %v2938_v4 = vld [vmem:[%s3263_s27 + $0x64] sm:$0xff]   ;;  %v2940_v6 = vld [vmem:[%s3263_s27 + $0x6c] sm:$0xff]   ;;  %v2942_v8 = vld [vmem:[%s3263_s27 + $0x74] sm:$0xff]  }
  0x15   : > { %v2943_v9 = vld [vmem:[%s3263_s27 + $0x18] sm:$0xff]   ;;  %v2945_v11 = vld [vmem:[%s3263_s27 + $0x20] sm:$0xff]   ;;  %v2947_v13 = vld [vmem:[%s3263_s27 + $0x28] sm:$0xff]  }
  0x16   : > { %2704 = vmatmul.mubr.msk.bf16.vlgmr.msra.gmra.mrb[0].mxu0 %vm337_vm1, %v2937_v3  ;;  %2760 = vmatmul.mubr.msk.bf16.vlgmr.msra.gmra.mrb[0].mxu1 %vm337_vm1, %v2938_v4  ;;  %v2944_v10 = vld [vmem:[%s3263_s27 + $0x7c] sm:$0xff]   ;;  %v2946_v12 = vld [vmem:[%s3263_s27 + $0x84] sm:$0xff]   ;;  %v2948_v14 = vld [vmem:[%s3263_s27 + $0x8c] sm:$0xff]  }
  0x17   : > { %2812 = vmatpush3.bf16.msra.mxu0 %v2935_v0  ;;  %2868 = vmatpush3.bf16.msra.mxu1 %v2935_v0  ;;  %v2949_v15 = vld [vmem:[%s3263_s27 + $0x30] sm:$0xff]   ;;  %v2951_v17 = vld [vmem:[%s3263_s27 + $0x38] sm:$0xff]   ;;  %v2953_v19 = vld [vmem:[%s3263_s27 + $0x40] sm:$0xff]  }
  0x18   : > { %2707 = vmatprep.mubr.msk.bf16.mxu0 %vm3202_vm0, %v3201_v1  ;;  %2763 = vmatprep.mubr.msk.bf16.mxu1 %vm3202_vm0, %v3201_v1  ;;  %v2950_v16 = vld [vmem:[%s3263_s27 + $0x94] sm:$0xff]   ;;  %v2952_v18 = vld [vmem:[%s3263_s27 + $0x9c] sm:$0xff]   ;;  %v2954_v20 = vld [vmem:[%s3263_s27 + $0xa4] sm:$0xff]  }
  0x19   : > { %2813 = vmatprep.subr.bf16.mxu0 %v3201_v1  ;;  %2869 = vmatprep.subr.bf16.mxu1 %v3201_v1  ;;  %v2955_v21 = vld [vmem:[%s3263_s27 + $0x48] sm:$0xff]   ;;  %v2957_v23 = vld [vmem:[%s3263_s27 + $0x50] sm:$0xff]   ;;  %v2959_v25 = vld [vmem:[%s3263_s27 + $0x58] sm:$0xff]  }
  0x1a   : > { %v2956_v22 = vld [vmem:[%s3263_s27 + $0xac] sm:$0xff]   ;;  %v2958_v24 = vld [vmem:[%s3263_s27 + $0xb4] sm:$0xff]   ;;  %v2960_v26 = vld [vmem:[%s3263_s27 + $0xbc] sm:$0xff]  }
  0x1b   : > { %2814 = vmatpush3.bf16.msra.mxu0 %v2936_v2  ;;  %2870 = vmatpush3.bf16.msra.mxu1 %v2936_v2  ;;  %v2961_v27 = vld [vmem:[%s3263_s27 + $0x60] ss:$0 sps:$4 sm:$0x33]   ;;  %v2962_v28 = vld [vmem:[%s3263_s27 + $0xc4] ss:$0 sps:$4 sm:$0x33]  }
  0x1c   : > { %v2963_v29 = vld [vmem:[%s3263_s27 + $0xc8] sm:$0xff]   ;;  %v2965_v31 = vld [vmem:[%s3263_s27 + $0xd0] sm:$0xff]   ;;  %v2967_v33 = vld [vmem:[%s3263_s27 + $0xd8] sm:$0xff]  }
  0x1d   : > { %v2964_v30 = vld [vmem:[%s3263_s27 + $0x12c] sm:$0xff]   ;;  %v2966_v32 = vld [vmem:[%s3263_s27 + $0x134] sm:$0xff]   ;;  %v2968_v34 = vld [vmem:[%s3263_s27 + $0x13c] sm:$0xff]  }
  0x1e   : > { %2708 = vmatmul.mubr.msk.bf16.gmra.mrb[4].mxu0 %vm337_vm1, %v2939_v5  ;;  %2764 = vmatmul.mubr.msk.bf16.gmra.mrb[4].mxu1 %vm337_vm1, %v2940_v6  ;;  %v2969_v35 = vld [vmem:[%s3263_s27 + $0xe0] sm:$0xff]   ;;  %v2971_v37 = vld [vmem:[%s3263_s27 + $0xe8] sm:$0xff]   ;;  %v2973_v39 = vld [vmem:[%s3263_s27 + $0xf0] sm:$0xff]  }
  0x1f   : > { %2711 = vmatprep.mubr.msk.bf16.mxu0 %vm3202_vm0, %v3201_v1  ;;  %2767 = vmatprep.mubr.msk.bf16.mxu1 %vm3202_vm0, %v3201_v1  ;;  %v2970_v36 = vld [vmem:[%s3263_s27 + $0x144] sm:$0xff]   ;;  %v2972_v38 = vld [vmem:[%s3263_s27 + $0x14c] sm:$0xff]   ;;  %v2974_v40 = vld [vmem:[%s3263_s27 + $0x154] sm:$0xff]  }
  0x20   : > { %v2975_v41 = vld [vmem:[%s3263_s27 + $0xf8] sm:$0xff]   ;;  %v2977_v43 = vld [vmem:[%s3263_s27 + $0x100] sm:$0xff]   ;;  %v2979_v45 = vld [vmem:[%s3263_s27 + $0x108] sm:$0xff]  }
  0x21   : > { %v2976_v42 = vld [vmem:[%s3263_s27 + $0x15c] sm:$0xff]   ;;  %v2978_v44 = vld [vmem:[%s3263_s27 + $0x164] sm:$0xff]   ;;  %v2980_v46 = vld [vmem:[%s3263_s27 + $0x16c] sm:$0xff]  }
  0x22   : > { %v2981_v47 = vld [vmem:[%s3263_s27 + $0x110] sm:$0xff]   ;;  %v2983_v49 = vld [vmem:[%s3263_s27 + $0x118] sm:$0xff]   ;;  %v2985_v51 = vld [vmem:[%s3263_s27 + $0x120] sm:$0xff]  }
  0x23   : > { %v2982_v48 = vld [vmem:[%s3263_s27 + $0x174] sm:$0xff]   ;;  %v2984_v50 = vld [vmem:[%s3263_s27 + $0x17c] sm:$0xff]   ;;  %v2986_v52 = vld [vmem:[%s3263_s27 + $0x184] sm:$0xff]  }
  0x24   : > { %v2987_v53 = vld [vmem:[%s3263_s27 + $0x128] ss:$0 sps:$4 sm:$0x33]   ;;  %v2988_v54 = vld [vmem:[%s3263_s27 + $0x18c] ss:$0 sps:$4 sm:$0x33]  }
  0x26   : > { %2712 = vmatmul.mubr.msk.bf16.gmra.mrb[8].mxu0 %vm337_vm1, %v2941_v7  ;;  %2768 = vmatmul.mubr.msk.bf16.gmra.mrb[8].mxu1 %vm337_vm1, %v2942_v8 }
  0x27   : > { %2715 = vmatprep.mubr.msk.bf16.mxu0 %vm3202_vm0, %v3201_v1  ;;  %2771 = vmatprep.mubr.msk.bf16.mxu1 %vm3202_vm0, %v3201_v1 }
  0x2e   : > { %2716 = vmatmul.mubr.msk.bf16.gmra.mrb[12].mxu0 %vm337_vm1, %v2943_v9  ;;  %2772 = vmatmul.mubr.msk.bf16.gmra.mrb[12].mxu1 %vm337_vm1, %v2944_v10 }
  0x2f   : > { %2719 = vmatprep.mubr.msk.bf16.mxu0 %vm3202_vm0, %v3201_v1  ;;  %2775 = vmatprep.mubr.msk.bf16.mxu1 %vm3202_vm0, %v3201_v1 }
  0x36   : > { %2720 = vmatmul.mubr.msk.bf16.gmra.mrb[16].mxu0 %vm337_vm1, %v2945_v11  ;;  %2776 = vmatmul.mubr.msk.bf16.gmra.mrb[16].mxu1 %vm337_vm1, %v2946_v12 }
  0x37   : > { %2723 = vmatprep.mubr.msk.bf16.mxu0 %vm3202_vm0, %v3201_v1  ;;  %2779 = vmatprep.mubr.msk.bf16.mxu1 %vm3202_vm0, %v3201_v1 }
  0x3e   : > { %2724 = vmatmul.mubr.msk.bf16.gmra.mrb[20].mxu0 %vm337_vm1, %v2947_v13  ;;  %2780 = vmatmul.mubr.msk.bf16.gmra.mrb[20].mxu1 %vm337_vm1, %v2948_v14 }
  0x3f   : > { %2727 = vmatprep.mubr.msk.bf16.mxu0 %vm3202_vm0, %v3201_v1  ;;  %2783 = vmatprep.mubr.msk.bf16.mxu1 %vm3202_vm0, %v3201_v1 }
  0x46   : > { %2728 = vmatmul.mubr.msk.bf16.gmra.mrb[24].mxu0 %vm337_vm1, %v2949_v15  ;;  %2784 = vmatmul.mubr.msk.bf16.gmra.mrb[24].mxu1 %vm337_vm1, %v2950_v16 }
  0x47   : > { %2731 = vmatprep.mubr.msk.bf16.mxu0 %vm3202_vm0, %v3201_v1  ;;  %2787 = vmatprep.mubr.msk.bf16.mxu1 %vm3202_vm0, %v3201_v1 }
  0x4e   : > { %2732 = vmatmul.mubr.msk.bf16.gmra.mrb[28].mxu0 %vm337_vm1, %v2951_v17  ;;  %2788 = vmatmul.mubr.msk.bf16.gmra.mrb[28].mxu1 %vm337_vm1, %v2952_v18 }
  0x4f   : > { %2735 = vmatprep.mubr.msk.bf16.mxu0 %vm3202_vm0, %v3201_v1  ;;  %2791 = vmatprep.mubr.msk.bf16.mxu1 %vm3202_vm0, %v3201_v1 }
  0x56   : > { %2736 = vmatmul.mubr.msk.bf16.gmra.mrb[32].mxu0 %vm337_vm1, %v2953_v19  ;;  %2792 = vmatmul.mubr.msk.bf16.gmra.mrb[32].mxu1 %vm337_vm1, %v2954_v20 }
  0x57   : > { %2739 = vmatprep.mubr.msk.bf16.mxu0 %vm3202_vm0, %v3201_v1  ;;  %2795 = vmatprep.mubr.msk.bf16.mxu1 %vm3202_vm0, %v3201_v1 }
  0x5e   : > { %2740 = vmatmul.mubr.msk.bf16.gmra.mrb[36].mxu0 %vm337_vm1, %v2955_v21  ;;  %2796 = vmatmul.mubr.msk.bf16.gmra.mrb[36].mxu1 %vm337_vm1, %v2956_v22 }
  0x5f   : > { %2743 = vmatprep.mubr.msk.bf16.mxu0 %vm3202_vm0, %v3201_v1  ;;  %2799 = vmatprep.mubr.msk.bf16.mxu1 %vm3202_vm0, %v3201_v1 }
  0x66   : > { %2744 = vmatmul.mubr.msk.bf16.gmra.mrb[40].mxu0 %vm337_vm1, %v2957_v23  ;;  %2800 = vmatmul.mubr.msk.bf16.gmra.mrb[40].mxu1 %vm337_vm1, %v2958_v24 }
  0x67   : > { %2747 = vmatprep.mubr.msk.bf16.mxu0 %vm3202_vm0, %v3201_v1  ;;  %2803 = vmatprep.mubr.msk.bf16.mxu1 %vm3202_vm0, %v3201_v1 }
  0x6e   : > { %2748 = vmatmul.mubr.msk.bf16.gmra.mrb[44].mxu0 %vm337_vm1, %v2959_v25  ;;  %2804 = vmatmul.mubr.msk.bf16.gmra.mrb[44].mxu1 %vm337_vm1, %v2960_v26 }
  0x6f   : > { %2751 = vmatprep.mubr.msk.bf16.mxu0 %vm3202_vm0, %v3201_v1  ;;  %2807 = vmatprep.mubr.msk.bf16.mxu1 %vm3202_vm0, %v3201_v1 }
  0x76   : > { %2752 = vmatmul.mubr.msk.bf16.gmra.mrb[48].mxu0 %vm337_vm1, %v2961_v27  ;;  %2808 = vmatmul.mubr.msk.bf16.gmra.mrb[48].mxu1 %vm337_vm1, %v2962_v28 }
  0x77   : > { %2815 = vmatprep.mubr.msk.bf16.mxu0 %vm3202_vm0, %v3201_v1  ;;  %2871 = vmatprep.mubr.msk.bf16.mxu1 %vm3202_vm0, %v3201_v1 }
  0x7e   : > { %2816 = vmatmul.mubr.msk.bf16.vlgmr.msra.gmra.mrb[52].mxu0 %vm337_vm1, %v2963_v29  ;;  %2872 = vmatmul.mubr.msk.bf16.vlgmr.msra.gmra.mrb[52].mxu1 %vm337_vm1, %v2964_v30 }
  0x7f   : > { %2819 = vmatprep.mubr.msk.bf16.mxu0 %vm3202_vm0, %v3201_v1  ;;  %2875 = vmatprep.mubr.msk.bf16.mxu1 %vm3202_vm0, %v3201_v1 }
  0x86   : > { %2820 = vmatmul.mubr.msk.bf16.gmra.mrb[56].mxu0 %vm337_vm1, %v2965_v31  ;;  %2876 = vmatmul.mubr.msk.bf16.gmra.mrb[56].mxu1 %vm337_vm1, %v2966_v32 }
  0x87   : > { %2823 = vmatprep.mubr.msk.bf16.mxu0 %vm3202_vm0, %v3201_v1  ;;  %2879 = vmatprep.mubr.msk.bf16.mxu1 %vm3202_vm0, %v3201_v1 }
  0x8e   : > { %2824 = vmatmul.mubr.msk.bf16.gmra.mrb[60].mxu0 %vm337_vm1, %v2967_v33  ;;  %2880 = vmatmul.mubr.msk.bf16.gmra.mrb[60].mxu1 %vm337_vm1, %v2968_v34 }
  0x8f   : > { %2827 = vmatprep.mubr.msk.bf16.mxu0 %vm3202_vm0, %v3201_v1  ;;  %2883 = vmatprep.mubr.msk.bf16.mxu1 %vm3202_vm0, %v3201_v1 }
  0x96   : > { %2828 = vmatmul.mubr.msk.bf16.gmra.mrb[64].mxu0 %vm337_vm1, %v2969_v35  ;;  %2884 = vmatmul.mubr.msk.bf16.gmra.mrb[64].mxu1 %vm337_vm1, %v2970_v36 }
  0x97   : > { %2831 = vmatprep.mubr.msk.bf16.mxu0 %vm3202_vm0, %v3201_v1  ;;  %2887 = vmatprep.mubr.msk.bf16.mxu1 %vm3202_vm0, %v3201_v1 }
  0x9e   : > { %2832 = vmatmul.mubr.msk.bf16.gmra.mrb[68].mxu0 %vm337_vm1, %v2971_v37  ;;  %2888 = vmatmul.mubr.msk.bf16.gmra.mrb[68].mxu1 %vm337_vm1, %v2972_v38 }
  0x9f   : > { %2835 = vmatprep.mubr.msk.bf16.mxu0 %vm3202_vm0, %v3201_v1  ;;  %2891 = vmatprep.mubr.msk.bf16.mxu1 %vm3202_vm0, %v3201_v1 }
  0xa6   : > { %2836 = vmatmul.mubr.msk.bf16.gmra.mrb[72].mxu0 %vm337_vm1, %v2973_v39  ;;  %2892 = vmatmul.mubr.msk.bf16.gmra.mrb[72].mxu1 %vm337_vm1, %v2974_v40 }
  0xa7   : > { %2839 = vmatprep.mubr.msk.bf16.mxu0 %vm3202_vm0, %v3201_v1  ;;  %2895 = vmatprep.mubr.msk.bf16.mxu1 %vm3202_vm0, %v3201_v1 }
  0xae   : > { %2840 = vmatmul.mubr.msk.bf16.gmra.mrb[76].mxu0 %vm337_vm1, %v2975_v41  ;;  %2896 = vmatmul.mubr.msk.bf16.gmra.mrb[76].mxu1 %vm337_vm1, %v2976_v42 }
  0xaf   : > { %2843 = vmatprep.mubr.msk.bf16.mxu0 %vm3202_vm0, %v3201_v1  ;;  %2899 = vmatprep.mubr.msk.bf16.mxu1 %vm3202_vm0, %v3201_v1 }
  0xb6   : > { %2844 = vmatmul.mubr.msk.bf16.gmra.mrb[80].mxu0 %vm337_vm1, %v2977_v43  ;;  %2900 = vmatmul.mubr.msk.bf16.gmra.mrb[80].mxu1 %vm337_vm1, %v2978_v44 }
  0xb7   : > { %2847 = vmatprep.mubr.msk.bf16.mxu0 %vm3202_vm0, %v3201_v1  ;;  %2903 = vmatprep.mubr.msk.bf16.mxu1 %vm3202_vm0, %v3201_v1 }
  0xbe   : > { %2848 = vmatmul.mubr.msk.bf16.gmra.mrb[84].mxu0 %vm337_vm1, %v2979_v45  ;;  %2904 = vmatmul.mubr.msk.bf16.gmra.mrb[84].mxu1 %vm337_vm1, %v2980_v46 }
  0xbf   : > { %2851 = vmatprep.mubr.msk.bf16.mxu0 %vm3202_vm0, %v3201_v1  ;;  %2907 = vmatprep.mubr.msk.bf16.mxu1 %vm3202_vm0, %v3201_v1 }
  0xc6   : > { %2852 = vmatmul.mubr.msk.bf16.gmra.mrb[88].mxu0 %vm337_vm1, %v2981_v47  ;;  %2908 = vmatmul.mubr.msk.bf16.gmra.mrb[88].mxu1 %vm337_vm1, %v2982_v48 }
  0xc7   : > { %2855 = vmatprep.mubr.msk.bf16.mxu0 %vm3202_vm0, %v3201_v1  ;;  %2911 = vmatprep.mubr.msk.bf16.mxu1 %vm3202_vm0, %v3201_v1 }
  0xce   : > { %2856 = vmatmul.mubr.msk.bf16.gmra.mrb[92].mxu0 %vm337_vm1, %v2983_v49  ;;  %2912 = vmatmul.mubr.msk.bf16.gmra.mrb[92].mxu1 %vm337_vm1, %v2984_v50 }
  0xcf   : > { %2859 = vmatprep.mubr.msk.bf16.mxu0 %vm3202_vm0, %v3201_v1  ;;  %2915 = vmatprep.mubr.msk.bf16.mxu1 %vm3202_vm0, %v3201_v1 }
  0xd6   : > { %2860 = vmatmul.mubr.msk.bf16.gmra.mrb[96].mxu0 %vm337_vm1, %v2985_v51  ;;  %2916 = vmatmul.mubr.msk.bf16.gmra.mrb[96].mxu1 %vm337_vm1, %v2986_v52 }
  0xd7   : > { %2863 = vmatprep.mubr.msk.bf16.mxu0 %vm3202_vm0, %v3201_v1  ;;  %2919 = vmatprep.mubr.msk.bf16.mxu1 %vm3202_vm0, %v3201_v1 }
  0xde   : > { %2864 = vmatmul.mubr.msk.bf16.gmra.mrb[100].mxu0 %vm337_vm1, %v2987_v53  ;;  %2920 = vmatmul.mubr.msk.bf16.gmra.mrb[100].mxu1 %vm337_vm1, %v2988_v54 }
  0xe9   : > { %v411_v56 = vpop.f32.mrb[0].mxu0  ;;  %v825_v58 = vpop.f32.mrb[0].mxu1 }
  0xea   : > { %v3477_v57 = vadd.f32 %v3474_v55, %v411_v56  ;;  %v2705_v59 = vpop.f32.mrb[1].mxu0  ;;  %v3480_v60 = vadd.f32 %v3474_v55, %v825_v58  ;;  %v2761_v61 = vpop.f32.mrb[1].mxu1 }
  0xeb   : > { %v414_v62 = vpop.f32.mrb[2].mxu0  ;;  %v828_v1 = vpop.f32.mrb[2].mxu1 }
  0xec   : > { %v538_v63 = vmin.f32 %v3477_v57, 0.0  ;;  %v3484_v0 = vadd.f32 %v3474_v55, %v414_v62  ;;  %v2706_v2 = vpop.f32.mrb[3].mxu0  ;;  %v952_v3 = vmin.f32 %v3480_v60, 0.0  ;;  %v3488_v4 = vadd.f32 %v3474_v55, %v828_v1  ;;  %v2762_v5 = vpop.f32.mrb[3].mxu1 }
  0xed   : > { %vm513_vm2 = vcmp.gt.f32.partialorder %v3477_v57, 0.0  ;;  %vm927_vm3 = vcmp.gt.f32.partialorder %v3480_v60, 0.0 }
  0xee   : > { %v563_v6 = vmul.f32 1.442695, %v538_v63  ;;  %v539_v7 = vmin.f32 %v3484_v0, 0.0  ;;  %v977_v8 = vmul.f32 1.442695, %v952_v3  ;;  %v953_v9 = vmin.f32 %v3488_v4, 0.0 }
  0xef   : > { %vm514_vm4 = vcmp.gt.f32.partialorder %v3484_v0, 0.0  ;;  %vm928_vm5 = vcmp.gt.f32.partialorder %v3488_v4, 0.0 }
  0xf0   : > { %2989 = vpow2.f32 %v563_v6  ;;  %v565_v10 = vmul.f32 1.442695, %v539_v7  ;;  %v979_v11 = vmul.f32 1.442695, %v953_v9 }
  0xf1   : > { %2991 = vpow2.f32 %v977_v8  ;;  %v419_v12 = vpop.f32.mrb[4].mxu0  ;;  %v833_v14 = vpop.f32.mrb[4].mxu1 }
  0xf2   : > { %2993 = vpow2.f32 %v565_v10  ;;  %v3493_v13 = vadd.f32 %v3474_v55, %v419_v12  ;;  %v2709_v15 = vpop.f32.mrb[5].mxu0  ;;  %v3496_v16 = vadd.f32 %v3474_v55, %v833_v14  ;;  %v2765_v17 = vpop.f32.mrb[5].mxu1 }
  0xf3   : > { %2995 = vpow2.f32 %v979_v11  ;;  %v422_v18 = vpop.f32.mrb[6].mxu0  ;;  %v836_v21 = vpop.f32.mrb[6].mxu1 }
  0xf4   : > { %v540_v19 = vmin.f32 %v3493_v13, 0.0  ;;  %v3500_v20 = vadd.f32 %v3474_v55, %v422_v18  ;;  %v2710_v22 = vpop.f32.mrb[7].mxu0  ;;  %v954_v23 = vmin.f32 %v3496_v16, 0.0  ;;  %v3504_v24 = vadd.f32 %v3474_v55, %v836_v21  ;;  %v2766_v25 = vpop.f32.mrb[7].mxu1 }
  0xf5   : > { %vm515_vm6 = vcmp.gt.f32.partialorder %v3493_v13, 0.0  ;;  %vm929_vm7 = vcmp.gt.f32.partialorder %v3496_v16, 0.0 }
  0xf6   : > { %v567_v26 = vmul.f32 1.442695, %v540_v19  ;;  %v541_v27 = vmin.f32 %v3500_v20, 0.0  ;;  %v981_v28 = vmul.f32 1.442695, %v954_v23  ;;  %v955_v29 = vmin.f32 %v3504_v24, 0.0 }
  0xf7   : > { %vm516_vm8 = vcmp.gt.f32.partialorder %v3500_v20, 0.0  ;;  %vm930_vm9 = vcmp.gt.f32.partialorder %v3504_v24, 0.0 }
  0xf8   : > { %2997 = vpow2.f32 %v567_v26  ;;  %v569_v30 = vmul.f32 1.442695, %v541_v27  ;;  %v983_v31 = vmul.f32 1.442695, %v955_v29 }
  0xf9   : > { %2999 = vpow2.f32 %v981_v28  ;;  %v427_v32 = vpop.f32.mrb[8].mxu0  ;;  %v841_v35 = vpop.f32.mrb[8].mxu1 }
  0xfa   : > { %v2990_v33 = vpop.eup %2989  ;;  %3001 = vpow2.f32 %v569_v30  ;;  %v3509_v34 = vadd.f32 %v3474_v55, %v427_v32  ;;  %v2713_v36 = vpop.f32.mrb[9].mxu0  ;;  %v3513_v39 = vadd.f32 %v3474_v55, %v841_v35 }
  0xfb   : > { %v2992_v37 = vpop.eup %2991  ;;  %v2261_v38 = vadd.f32 -1.0, %v2990_v33  ;;  %3003 = vpow2.f32 %v983_v31  ;;  %v2769_v40 = vpop.f32.mrb[9].mxu1 }
  0xfc   : > { %v430_v41 = vpop.f32.mrb[10].mxu0  ;;  %v2994_v42 = vpop.eup %2993  ;;  %v2337_v43 = vadd.f32 -1.0, %v2992_v37  ;;  %v542_v44 = vmin.f32 %v3509_v34, 0.0  ;;  %v956_v51 = vmin.f32 %v3513_v39, 0.0  ;;  %vm517_vm10 = vcmp.gt.f32.partialorder %v3509_v34, 0.0 }
  0xfd   : > { %v3518_v45 = vadd.f32 %v3474_v55, %v430_v41  ;;  %v844_v46 = vpop.f32.mrb[10].mxu1  ;;  %v2714_v47 = vpop.f32.mrb[11].mxu0  ;;  %v3521_v49 = vsel %vm513_vm2, %v3477_v57, %v2261_v38  ;;  %v2262_v50 = vadd.f32 -1.0, %v2994_v42  ;;  %vm931_vm11 = vcmp.gt.f32.partialorder %v3513_v39, 0.0 }
  0xfe   : > { %v2996_v48 = vpop.eup %2995  ;;  %v2770_v52 = vpop.f32.mrb[11].mxu1  ;;  %v3526_v53 = vsel %vm927_vm3, %v3480_v60, %v2337_v43  ;;  %v571_v56 = vmul.f32 1.442695, %v542_v44  ;;  %v985_v57 = vmul.f32 1.442695, %v956_v51  ;;  %v3539_v60 = vadd.f32 %v3474_v55, %v844_v46 }
  0xff   : > { %v2338_v54 = vadd.f32 -1.0, %v2996_v48  ;;  %v3532_v59 = vsel %vm514_vm4, %v3484_v0, %v2262_v50  ;;  %v543_v61 = vmin.f32 %v3518_v45, 0.0  ;;  %vm518_vm12 = vcmp.gt.f32.partialorder %v3518_v45, 0.0 }
 0x100   : > { %3005 = vpow2.f32 %v571_v56  ;;  %v957_v0 = vmin.f32 %v3539_v60, 0.0  ;;  %vm932_vm13 = vcmp.gt.f32.partialorder %v3539_v60, 0.0 }
 0x101   : > { %v3536_v62 = vsel %vm928_vm5, %v3488_v4, %v2338_v54  ;;  %3007 = vpow2.f32 %v985_v57  ;;  %v573_v1 = vmul.f32 1.442695, %v543_v61  ;;  %v435_v2 = vpop.f32.mrb[12].mxu0  ;;  %v849_v4 = vpop.f32.mrb[12].mxu1 }
 0x102   : > { %v2998_v3 = vpop.eup %2997  ;;  %v3546_v5 = vadd.f32 %v3474_v55, %v435_v2  ;;  %v2717_v6 = vpop.f32.mrb[13].mxu0  ;;  %v3550_v9 = vadd.f32 %v3474_v55, %v849_v4  ;;  %v987_v15 = vmul.f32 1.442695, %v957_v0 }
 0x103   : > { %v3000_v7 = vpop.eup %2999  ;;  %v2263_v8 = vadd.f32 -1.0, %v2998_v3  ;;  %3009 = vpow2.f32 %v573_v1  ;;  %v2773_v10 = vpop.f32.mrb[13].mxu1 }
 0x104   : > { %v438_v11 = vpop.f32.mrb[14].mxu0  ;;  %v3002_v12 = vpop.eup %3001  ;;  %v2339_v14 = vadd.f32 -1.0, %v3000_v7  ;;  %v544_v17 = vmin.f32 %v3546_v5, 0.0  ;;  %v958_v23 = vmin.f32 %v3550_v9, 0.0  ;;  %3011 = vpow2.f32 %v987_v15 }
 0x105   : > { %v852_v18 = vpop.f32.mrb[14].mxu1  ;;  %v3004_v19 = vpop.eup %3003  ;;  %v3557_v21 = vsel %vm515_vm6, %v3493_v13, %v2263_v8  ;;  %v2264_v22 = vadd.f32 -1.0, %v3002_v12  ;;  %v3574_v32 = vadd.f32 %v3474_v55, %v438_v11  ;;  %vm519_vm14 = vcmp.gt.f32.partialorder %v3546_v5, 0.0 }
 0x106   : > { %v2718_v25 = vpop.f32.mrb[15].mxu0  ;;  %v2774_v26 = vpop.f32.mrb[15].mxu1  ;;  %v3564_v27 = vsel %vm929_vm7, %v3496_v16, %v2339_v14  ;;  %v2340_v28 = vadd.f32 -1.0, %v3004_v19  ;;  %v575_v29 = vmul.f32 1.442695, %v544_v17  ;;  %v3580_v16 = vadd.f32 %v3474_v55, %v852_v18 }
 0x107   : > { %v3571_v13 = vsel %vm516_vm8, %v3500_v20, %v2264_v22  ;;  %v989_v31 = vmul.f32 1.442695, %v958_v23  ;;  %v545_v36 = vmin.f32 %v3574_v32, 0.0  ;;  %vm933_vm15 = vcmp.gt.f32.partialorder %v3550_v9, 0.0 }
 0x108   : > { %v3577_v33 = vsel %vm930_vm9, %v3504_v24, %v2340_v28  ;;  %3013 = vpow2.f32 %v575_v29  ;;  %v959_v38 = vmin.f32 %v3580_v16, 0.0  ;;  %vm520_vm0 = vcmp.gt.f32.partialorder %v3574_v32, 0.0 }
 0x109   : > { %3015 = vpow2.f32 %v989_v31  ;;  %v443_v37 = vpop.f32.mrb[16].mxu0  ;;  %v857_v41 = vpop.f32.mrb[16].mxu1  ;;  %v577_v44 = vmul.f32 1.442695, %v545_v36  ;;  %vm934_vm1 = vcmp.gt.f32.partialorder %v3580_v16, 0.0 }
 0x10a   : > { %v3006_v20 = vpop.eup %3005  ;;  %v3587_v40 = vadd.f32 %v3474_v55, %v443_v37  ;;  %v2721_v24 = vpop.f32.mrb[17].mxu0  ;;  %v3590_v46 = vadd.f32 %v3474_v55, %v857_v41  ;;  %v991_v51 = vmul.f32 1.442695, %v959_v38 }
 0x10b   : > { %v3008_v42 = vpop.eup %3007  ;;  %v2265_v43 = vadd.f32 -1.0, %v3006_v20  ;;  %v2777_v47 = vpop.f32.mrb[17].mxu1  ;;  %3017 = vpow2.f32 %v577_v44 }
 0x10c   : > { %v446_v48 = vpop.f32.mrb[18].mxu0  ;;  %v2341_v50 = vadd.f32 -1.0, %v3008_v42  ;;  %v546_v52 = vmin.f32 %v3587_v40, 0.0  ;;  %v860_v54 = vpop.f32.mrb[18].mxu1  ;;  %v960_v61 = vmin.f32 %v3590_v46, 0.0  ;;  %3019 = vpow2.f32 %v991_v51 }
 0x10d   : > { %v3010_v56 = vpop.eup %3009  ;;  %v3595_v57 = vsel %vm517_vm10, %v3509_v34, %v2265_v43  ;;  %v2722_v1 = vpop.f32.mrb[19].mxu0  ;;  %v3605_v34 = vadd.f32 %v3474_v55, %v446_v48  ;;  %v3608_v8 = vadd.f32 %v3474_v55, %v860_v54  ;;  %vm521_vm2 = vcmp.gt.f32.partialorder %v3587_v40, 0.0 }
 0x10e   : > { %v2778_v2 = vpop.f32.mrb[19].mxu1  ;;  %v3600_v3 = vsel %vm931_vm11, %v3513_v39, %v2341_v50  ;;  %v2266_v0 = vadd.f32 -1.0, %v3010_v56  ;;  %v579_v4 = vmul.f32 1.442695, %v546_v52  ;;  %v993_v7 = vmul.f32 1.442695, %v960_v61  ;;  %v3012_v10 = vpop.eup %3011 }
 0x10f   : > { %v2342_v11 = vadd.f32 -1.0, %v3012_v10  ;;  %v547_v12 = vmin.f32 %v3605_v34, 0.0  ;;  %v961_v17 = vmin.f32 %v3608_v8, 0.0  ;;  %vm935_vm3 = vcmp.gt.f32.partialorder %v3590_v46, 0.0 }
 0x110   : > { %3021 = vpow2.f32 %v579_v4  ;;  %v3612_v39 = vsel %vm518_vm12, %v3518_v45, %v2266_v0  ;;  %vm522_vm4 = vcmp.gt.f32.partialorder %v3605_v34, 0.0  ;;  %vm936_vm5 = vcmp.gt.f32.partialorder %v3608_v8, 0.0 }
 0x111   : > { %3023 = vpow2.f32 %v993_v7  ;;  %v451_v14 = vpop.f32.mrb[20].mxu0  ;;  %v865_v19 = vpop.f32.mrb[20].mxu1  ;;  %v3621_v25 = vsel %vm932_vm13, %v3539_v60, %v2342_v11  ;;  %v581_v26 = vmul.f32 1.442695, %v547_v12  ;;  %v995_v20 = vmul.f32 1.442695, %v961_v17 }
 0x112   : > { %v3014_v15 = vpop.eup %3013  ;;  %v3618_v18 = vadd.f32 %v3474_v55, %v451_v14  ;;  %v2725_v22 = vpop.f32.mrb[21].mxu0  ;;  %v3624_v28 = vadd.f32 %v3474_v55, %v865_v19 }
 0x113   : > { %v3016_v23 = vpop.eup %3015  ;;  %v2267_v45 = vadd.f32 -1.0, %v3014_v15  ;;  %v2781_v29 = vpop.f32.mrb[21].mxu1  ;;  %3025 = vpow2.f32 %v581_v26 }
 0x114   : > { %v454_v31 = vpop.f32.mrb[22].mxu0  ;;  %v2343_v37 = vadd.f32 -1.0, %v3016_v23  ;;  %v868_v38 = vpop.f32.mrb[22].mxu1  ;;  %v548_v60 = vmin.f32 %v3618_v18, 0.0  ;;  %3027 = vpow2.f32 %v995_v20  ;;  %v962_v44 = vmin.f32 %v3624_v28, 0.0 }
 0x115   : > { %v2726_v41 = vpop.f32.mrb[23].mxu0  ;;  %v3630_v24 = vsel %vm519_vm14, %v3546_v5, %v2267_v45  ;;  %v2782_v42 = vpop.f32.mrb[23].mxu1  ;;  %v3639_v47 = vadd.f32 %v3474_v55, %v454_v31  ;;  %v3644_v51 = vadd.f32 %v3474_v55, %v868_v38  ;;  %vm523_vm6 = vcmp.gt.f32.partialorder %v3618_v18, 0.0 }
 0x116   : > { %v3635_v43 = vsel %vm933_vm15, %v3550_v9, %v2343_v37  ;;  %v3018_v48 = vpop.eup %3017  ;;  %v583_v50 = vmul.f32 1.442695, %v548_v60  ;;  %v997_v9 = vmul.f32 1.442695, %v962_v44  ;;  %vm937_vm7 = vcmp.gt.f32.partialorder %v3624_v28, 0.0 }
 0x117   : > { %v3020_v52 = vpop.eup %3019  ;;  %v2268_v54 = vadd.f32 -1.0, %v3018_v48  ;;  %v549_v56 = vmin.f32 %v3639_v47, 0.0  ;;  %v963_v1 = vmin.f32 %v3644_v51, 0.0  ;;  %vm524_vm8 = vcmp.gt.f32.partialorder %v3639_v47, 0.0 }
 0x118   : > { %v2344_v61 = vadd.f32 -1.0, %v3020_v52  ;;  %3029 = vpow2.f32 %v583_v50  ;;  %vm938_vm9 = vcmp.gt.f32.partialorder %v3644_v51, 0.0 }
 0x119   : > { %v459_v2 = vpop.f32.mrb[24].mxu0  ;;  %v3651_v4 = vsel %vm520_vm0, %v3574_v32, %v2268_v54  ;;  %3031 = vpow2.f32 %v997_v9  ;;  %v585_v7 = vmul.f32 1.442695, %v549_v56  ;;  %v873_v11 = vpop.f32.mrb[24].mxu1  ;;  %v999_v19 = vmul.f32 1.442695, %v963_v1 }
 0x11a   : > { %v3022_v0 = vpop.eup %3021  ;;  %v3654_v10 = vadd.f32 %v3474_v55, %v459_v2  ;;  %v2729_v12 = vpop.f32.mrb[25].mxu0  ;;  %v3657_v15 = vsel %vm934_vm1, %v3580_v16, %v2344_v61  ;;  %v3660_v22 = vadd.f32 %v3474_v55, %v873_v11 }
 0x11b   : > { %v3024_v14 = vpop.eup %3023  ;;  %v2269_v17 = vadd.f32 -1.0, %v3022_v0  ;;  %v2785_v23 = vpop.f32.mrb[25].mxu1  ;;  %3033 = vpow2.f32 %v585_v7 }
 0x11c   : > { %v462_v45 = vpop.f32.mrb[26].mxu0  ;;  %v2345_v26 = vadd.f32 -1.0, %v3024_v14  ;;  %v876_v29 = vpop.f32.mrb[26].mxu1  ;;  %3035 = vpow2.f32 %v999_v19  ;;  %v550_v16 = vmin.f32 %v3654_v10, 0.0  ;;  %v964_v41 = vmin.f32 %v3660_v22, 0.0 }
 0x11d   : > { %v2730_v31 = vpop.f32.mrb[27].mxu0  ;;  %v3666_v37 = vsel %vm521_vm2, %v3587_v40, %v2269_v17  ;;  %v2786_v20 = vpop.f32.mrb[27].mxu1  ;;  %v3675_v60 = vadd.f32 %v3474_v55, %v462_v45  ;;  %v3678_v42 = vadd.f32 %v3474_v55, %v876_v29  ;;  %vm525_vm10 = vcmp.gt.f32.partialorder %v3654_v10, 0.0 }
 0x11e   : > { %v3671_v38 = vsel %vm935_vm3, %v3590_v46, %v2345_v26  ;;  %v3026_v44 = vpop.eup %3025  ;;  %v587_v48 = vmul.f32 1.442695, %v550_v16  ;;  %v1001_v54 = vmul.f32 1.442695, %v964_v41  ;;  %vm939_vm11 = vcmp.gt.f32.partialorder %v3660_v22, 0.0 }
 0x11f   : > { %v3028_v50 = vpop.eup %3027  ;;  %v2270_v52 = vadd.f32 -1.0, %v3026_v44  ;;  %v551_v46 = vmin.f32 %v3675_v60, 0.0  ;;  %v965_v56 = vmin.f32 %v3678_v42, 0.0  ;;  %vm526_vm12 = vcmp.gt.f32.partialorder %v3675_v60, 0.0 }
 0x120   : > { %v2346_v9 = vadd.f32 -1.0, %v3028_v50  ;;  %3037 = vpow2.f32 %v587_v48  ;;  %vm940_vm13 = vcmp.gt.f32.partialorder %v3678_v42, 0.0 }
 0x121   : > { %v467_v61 = vpop.f32.mrb[28].mxu0  ;;  %v3687_v1 = vsel %vm522_vm4, %v3605_v34, %v2270_v52  ;;  %3039 = vpow2.f32 %v1001_v54  ;;  %v589_v2 = vmul.f32 1.442695, %v551_v46  ;;  %v881_v7 = vpop.f32.mrb[28].mxu1  ;;  %v1003_v17 = vmul.f32 1.442695, %v965_v56 }
 0x122   : > { %v3690_v0 = vadd.f32 %v3474_v55, %v467_v61  ;;  %v2733_v11 = vpop.f32.mrb[29].mxu0  ;;  %v3030_v12 = vpop.eup %3029  ;;  %v3693_v14 = vsel %vm936_vm5, %v3608_v8, %v2346_v9  ;;  %v3696_v19 = vadd.f32 %v3474_v55, %v881_v7 }
 0x123   : > { %v2789_v23 = vpop.f32.mrb[29].mxu1  ;;  %v470_v45 = vpop.f32.mrb[30].mxu0  ;;  %v2271_v29 = vadd.f32 -1.0, %v3030_v12  ;;  %3041 = vpow2.f32 %v589_v2 }
 0x124   : > { %v3032_v26 = vpop.eup %3031  ;;  %v884_v31 = vpop.f32.mrb[30].mxu1  ;;  %3043 = vpow2.f32 %v1003_v17  ;;  %v552_v20 = vmin.f32 %v3690_v0, 0.0  ;;  %v966_v50 = vmin.f32 %v3696_v19, 0.0  ;;  %v3708_v52 = vadd.f32 %v3474_v55, %v470_v45 }
 0x125   : > { %v2734_v16 = vpop.f32.mrb[31].mxu0  ;;  %v2347_v8 = vadd.f32 -1.0, %v3032_v26  ;;  %v2790_v41 = vpop.f32.mrb[31].mxu1  ;;  %v3704_v48 = vsel %vm523_vm6, %v3618_v18, %v2271_v29  ;;  %v3711_v54 = vadd.f32 %v3474_v55, %v884_v31  ;;  %vm527_vm14 = vcmp.gt.f32.partialorder %v3690_v0, 0.0 }
 0x126   : > { %v3034_v44 = vpop.eup %3033  ;;  %v591_v61 = vmul.f32 1.442695, %v552_v20  ;;  %v1005_v7 = vmul.f32 1.442695, %v966_v50  ;;  %v553_v12 = vmin.f32 %v3708_v52, 0.0  ;;  %vm941_vm15 = vcmp.gt.f32.partialorder %v3696_v19, 0.0 }
 0x127   : > { %v3036_v46 = vpop.eup %3035  ;;  %v3714_v9 = vsel %vm937_vm7, %v3624_v28, %v2347_v8  ;;  %v2272_v56 = vadd.f32 -1.0, %v3034_v44  ;;  %v967_v23 = vmin.f32 %v3711_v54, 0.0  ;;  %vm528_vm0 = vcmp.gt.f32.partialorder %v3708_v52, 0.0 }
 0x128   : > { %v2348_v18 = vadd.f32 -1.0, %v3036_v46  ;;  %3045 = vpow2.f32 %v591_v61  ;;  %v593_v16 = vmul.f32 1.442695, %v553_v12  ;;  %vm942_vm1 = vcmp.gt.f32.partialorder %v3711_v54, 0.0 }
 0x129   : > { %v3720_v11 = vsel %vm524_vm8, %v3639_v47, %v2272_v56  ;;  %v475_v17 = vpop.f32.mrb[32].mxu0  ;;  %3047 = vpow2.f32 %v1005_v7  ;;  %v889_v26 = vpop.f32.mrb[32].mxu1  ;;  %v1007_v50 = vmul.f32 1.442695, %v967_v23 }
 0x12a   : > { %v3725_v28 = vsel %vm938_vm9, %v3644_v51, %v2348_v18  ;;  %v3729_v45 = vadd.f32 %v3474_v55, %v475_v17  ;;  %v2737_v29 = vpop.f32.mrb[33].mxu0  ;;  %v3038_v31 = vpop.eup %3037  ;;  %v3734_v8 = vadd.f32 %v3474_v55, %v889_v26  ;;  %3049 = vpow2.f32 %v593_v16 }
 0x12b   : > { %v2793_v20 = vpop.f32.mrb[33].mxu1  ;;  %v478_v41 = vpop.f32.mrb[34].mxu0  ;;  %v2273_v44 = vadd.f32 -1.0, %v3038_v31  ;;  %3051 = vpow2.f32 %v1007_v50 }
 0x12c   : > { %v3040_v51 = vpop.eup %3039  ;;  %v554_v46 = vmin.f32 %v3729_v45, 0.0  ;;  %v892_v56 = vpop.f32.mrb[34].mxu1  ;;  %v968_v18 = vmin.f32 %v3734_v8, 0.0  ;;  %v3744_v31 = vadd.f32 %v3474_v55, %v478_v41  ;;  %vm529_vm2 = vcmp.gt.f32.partialorder %v3729_v45, 0.0 }
 0x12d   : > { %v2349_v61 = vadd.f32 -1.0, %v3040_v51  ;;  %v2738_v7 = vpop.f32.mrb[35].mxu0  ;;  %v2794_v12 = vpop.f32.mrb[35].mxu1  ;;  %v3741_v26 = vsel %vm525_vm10, %v3654_v10, %v2273_v44  ;;  %v3750_v16 = vadd.f32 %v3474_v55, %v892_v56  ;;  %vm943_vm3 = vcmp.gt.f32.partialorder %v3734_v8, 0.0 }
 0x12e   : > { %v3042_v17 = vpop.eup %3041  ;;  %v595_v29 = vmul.f32 1.442695, %v554_v46  ;;  %v1009_v51 = vmul.f32 1.442695, %v968_v18  ;;  %vm530_vm4 = vcmp.gt.f32.partialorder %v3744_v31, 0.0 }
 0x12f   : > { %v3044_v23 = vpop.eup %3043  ;;  %v3747_v20 = vsel %vm939_vm11, %v3660_v22, %v2349_v61  ;;  %v2274_v47 = vadd.f32 -1.0, %v3042_v17  ;;  %v555_v22 = vmin.f32 %v3744_v31, 0.0  ;;  %v969_v46 = vmin.f32 %v3750_v16, 0.0 }
 0x130   : > { %v2350_v10 = vadd.f32 -1.0, %v3044_v23  ;;  %3053 = vpow2.f32 %v595_v29  ;;  %vm944_vm5 = vcmp.gt.f32.partialorder %v3750_v16, 0.0 }
 0x131   : > { %v3756_v44 = vsel %vm526_vm12, %v3675_v60, %v2274_v47  ;;  %3055 = vpow2.f32 %v1009_v51  ;;  %v483_v41 = vpop.f32.mrb[36].mxu0  ;;  %v897_v61 = vpop.f32.mrb[36].mxu1  ;;  %v597_v47 = vmul.f32 1.442695, %v555_v22 }
 0x132   : > { %v3761_v50 = vsel %vm940_vm13, %v3678_v42, %v2350_v10  ;;  %v3765_v56 = vadd.f32 %v3474_v55, %v483_v41  ;;  %v2741_v18 = vpop.f32.mrb[37].mxu0  ;;  %v3046_v12 = vpop.eup %3045  ;;  %v3770_v17 = vadd.f32 %v3474_v55, %v897_v61  ;;  %v1011_v10 = vmul.f32 1.442695, %v969_v46 }
 0x133   : > { %v2797_v29 = vpop.f32.mrb[37].mxu1  ;;  %v486_v23 = vpop.f32.mrb[38].mxu0  ;;  %v2275_v42 = vadd.f32 -1.0, %v3046_v12  ;;  %3057 = vpow2.f32 %v597_v47 }
 0x134   : > { %v3048_v51 = vpop.eup %3047  ;;  %v556_v41 = vmin.f32 %v3765_v56, 0.0  ;;  %v900_v7 = vpop.f32.mrb[38].mxu1  ;;  %v970_v60 = vmin.f32 %v3770_v17, 0.0  ;;  %3059 = vpow2.f32 %v1011_v10  ;;  %v3780_v34 = vadd.f32 %v3474_v55, %v486_v23 }
 0x135   : > { %v2351_v18 = vadd.f32 -1.0, %v3048_v51  ;;  %v2742_v22 = vpop.f32.mrb[39].mxu0  ;;  %v2798_v2 = vpop.f32.mrb[39].mxu1  ;;  %v3777_v61 = vsel %vm527_vm14, %v3690_v0, %v2275_v42  ;;  %v3786_v51 = vadd.f32 %v3474_v55, %v900_v7  ;;  %vm531_vm6 = vcmp.gt.f32.partialorder %v3765_v56, 0.0 }
 0x136   : > { %v599_v29 = vmul.f32 1.442695, %v556_v41  ;;  %v3050_v46 = vpop.eup %3049  ;;  %v1013_v40 = vmul.f32 1.442695, %v970_v60  ;;  %v557_v23 = vmin.f32 %v3780_v34, 0.0  ;;  %vm945_vm7 = vcmp.gt.f32.partialorder %v3770_v17, 0.0 }
 0x137   : > { %v3783_v12 = vsel %vm941_vm15, %v3696_v19, %v2351_v18  ;;  %v3052_v47 = vpop.eup %3051  ;;  %v2276_v22 = vadd.f32 -1.0, %v3050_v46  ;;  %v971_v7 = vmin.f32 %v3786_v51, 0.0  ;;  %vm532_vm8 = vcmp.gt.f32.partialorder %v3780_v34, 0.0 }
 0x138   : > { %3061 = vpow2.f32 %v599_v29  ;;  %v2352_v0 = vadd.f32 -1.0, %v3052_v47  ;;  %v601_v47 = vmul.f32 1.442695, %v557_v23  ;;  %vm946_vm9 = vcmp.gt.f32.partialorder %v3786_v51, 0.0 }
 0x139   : > { %3063 = vpow2.f32 %v1013_v40  ;;  %v491_v42 = vpop.f32.mrb[40].mxu0  ;;  %v3793_v19 = vsel %vm528_vm0, %v3708_v52, %v2276_v22  ;;  %v905_v41 = vpop.f32.mrb[40].mxu1  ;;  %v1015_v5 = vmul.f32 1.442695, %v971_v7 }
 0x13a   : > { %v3054_v10 = vpop.eup %3053  ;;  %v3798_v60 = vadd.f32 %v3474_v55, %v491_v42  ;;  %v2745_v18 = vpop.f32.mrb[41].mxu0  ;;  %v3801_v46 = vsel %vm942_vm1, %v3711_v54, %v2352_v0  ;;  %v3804_v2 = vadd.f32 %v3474_v55, %v905_v41  ;;  %3065 = vpow2.f32 %v601_v47 }
 0x13b   : > { %v3056_v29 = vpop.eup %3055  ;;  %v2277_v40 = vadd.f32 -1.0, %v3054_v10  ;;  %v2801_v52 = vpop.f32.mrb[41].mxu1  ;;  %3067 = vpow2.f32 %v1015_v5 }
 0x13c   : > { %v494_v22 = vpop.f32.mrb[42].mxu0  ;;  %v2353_v42 = vadd.f32 -1.0, %v3056_v29  ;;  %v908_v36 = vpop.f32.mrb[42].mxu1  ;;  %v558_v54 = vmin.f32 %v3798_v60, 0.0  ;;  %v972_v10 = vmin.f32 %v3804_v2, 0.0  ;;  %vm533_vm10 = vcmp.gt.f32.partialorder %v3798_v60, 0.0 }
 0x13d   : > { %v2746_v18 = vpop.f32.mrb[43].mxu0  ;;  %v3810_v6 = vsel %vm529_vm2, %v3729_v45, %v2277_v40  ;;  %v2802_v0 = vpop.f32.mrb[43].mxu1  ;;  %v3819_v41 = vadd.f32 %v3474_v55, %v494_v22  ;;  %v3824_v40 = vadd.f32 %v3474_v55, %v908_v36  ;;  %vm947_vm11 = vcmp.gt.f32.partialorder %v3804_v2, 0.0 }
 0x13e   : > { %v3815_v23 = vsel %vm943_vm3, %v3734_v8, %v2353_v42  ;;  %v3058_v7 = vpop.eup %3057  ;;  %v603_v29 = vmul.f32 1.442695, %v558_v54  ;;  %v1017_v8 = vmul.f32 1.442695, %v972_v10 }
 0x13f   : > { %v3060_v47 = vpop.eup %3059  ;;  %v2278_v52 = vadd.f32 -1.0, %v3058_v7  ;;  %v559_v5 = vmin.f32 %v3819_v41, 0.0  ;;  %v973_v22 = vmin.f32 %v3824_v40, 0.0  ;;  %vm534_vm12 = vcmp.gt.f32.partialorder %v3819_v41, 0.0 }
 0x140   : > { %v2354_v42 = vadd.f32 -1.0, %v3060_v47  ;;  %3069 = vpow2.f32 %v603_v29  ;;  %vm948_vm13 = vcmp.gt.f32.partialorder %v3824_v40, 0.0 }
 0x141   : > { %v499_v18 = vpop.f32.mrb[44].mxu0  ;;  %v3831_v54 = vsel %vm530_vm4, %v3744_v31, %v2278_v52  ;;  %3071 = vpow2.f32 %v1017_v8  ;;  %v605_v36 = vmul.f32 1.442695, %v559_v5  ;;  %v913_v7 = vpop.f32.mrb[44].mxu1  ;;  %v1019_v29 = vmul.f32 1.442695, %v973_v22 }
 0x142   : > { %v3062_v0 = vpop.eup %3061  ;;  %v3834_v45 = vadd.f32 %v3474_v55, %v499_v18  ;;  %v2749_v10 = vpop.f32.mrb[45].mxu0  ;;  %v3837_v35 = vsel %vm944_vm5, %v3750_v16, %v2354_v42  ;;  %v3840_v30 = vadd.f32 %v3474_v55, %v913_v7 }
 0x143   : > { %v3064_v32 = vpop.eup %3063  ;;  %4490 = vst [vmem:[#allocation2_spill] sm:$0xff] %v3837_v35  ;;  %v2279_v47 = vadd.f32 -1.0, %v3062_v0  ;;  %v2805_v63 = vpop.f32.mrb[45].mxu1  ;;  %3073 = vpow2.f32 %v605_v36 }
 0x144   : > { %v502_v58 = vpop.f32.mrb[46].mxu0  ;;  %v2355_v52 = vadd.f32 -1.0, %v3064_v32  ;;  %v916_v8 = vpop.f32.mrb[46].mxu1  ;;  %3075 = vpow2.f32 %v1019_v29  ;;  %v560_v16 = vmin.f32 %v3834_v45, 0.0  ;;  %v974_v22 = vmin.f32 %v3840_v30, 0.0 }
 0x145   : > { %v2750_v5 = vpop.f32.mrb[47].mxu0  ;;  %v3846_v18 = vsel %vm531_vm6, %v3765_v56, %v2279_v47  ;;  %v2806_v42 = vpop.f32.mrb[47].mxu1  ;;  %v3855_v0 = vadd.f32 %v3474_v55, %v502_v58  ;;  %v3858_v32 = vadd.f32 %v3474_v55, %v916_v8  ;;  %vm535_vm14 = vcmp.gt.f32.partialorder %v3834_v45, 0.0 }
 0x146   : > { %4491 = vst [vmem:[#allocation3_spill] sm:$0xff] %v3846_v18  ;;  %v3851_v63 = vsel %vm945_vm7, %v3770_v17, %v2355_v52  ;;  %v3066_v36 = vpop.eup %3065  ;;  %v607_v7 = vmul.f32 1.442695, %v560_v16  ;;  %v1021_v29 = vmul.f32 1.442695, %v974_v22  ;;  %vm949_vm15 = vcmp.gt.f32.partialorder %v3840_v30, 0.0 }
 0x147   : > { %4492 = vst [vmem:[#allocation4_spill] sm:$0xff] %v3851_v63  ;;  %v3068_v10 = vpop.eup %3067  ;;  %v2280_v47 = vadd.f32 -1.0, %v3066_v36  ;;  %v561_v17 = vmin.f32 %v3855_v0, 0.0  ;;  %v975_v58 = vmin.f32 %v3858_v32, 0.0  ;;  %vm536_vm0 = vcmp.gt.f32.partialorder %v3855_v0, 0.0 }
 0x148   : > { %v2356_v52 = vadd.f32 -1.0, %v3068_v10  ;;  %3077 = vpow2.f32 %v607_v7  ;;  %vm950_vm1 = vcmp.gt.f32.partialorder %v3858_v32, 0.0 }
 0x149   : > { %v507_v8 = vpop.f32.mrb[48].mxu0  ;;  %v3867_v5 = vsel %vm532_vm8, %v3780_v34, %v2280_v47  ;;  %3079 = vpow2.f32 %v1021_v29  ;;  %v609_v42 = vmul.f32 1.442695, %v561_v17  ;;  %v921_v56 = vpop.f32.mrb[48].mxu1  ;;  %v1023_v63 = vmul.f32 1.442695, %v975_v58 }
 0x14a   : > { %v3870_v16 = vadd.f32 %v3474_v55, %v507_v8  ;;  %v2753_v36 = vpop.f32.mrb[49].mxu0  ;;  %v3070_v22 = vpop.eup %3069  ;;  %v3873_v31 = vsel %vm946_vm9, %v3786_v51, %v2356_v52  ;;  %v3876_v7 = vadd.f32 %v3474_v55, %v921_v56 }
 0x14b   : > { %4493 = vst [vmem:[#allocation5_spill] sm:$0xff] %v3873_v31  ;;  %v2809_v10 = vpop.f32.mrb[49].mxu1  ;;  %v510_v18 = vpop.f32.mrb[50].mxu0  ;;  %v2281_v47 = vadd.f32 -1.0, %v3070_v22  ;;  %3081 = vpow2.f32 %v609_v42 }
 0x14c   : > { %v3072_v35 = vpop.eup %3071  ;;  %v924_v29 = vpop.f32.mrb[50].mxu1  ;;  %3083 = vpow2.f32 %v1023_v63  ;;  %v562_v51 = vmin.f32 %v3870_v16, 0.0  ;;  %v976_v18 = vmin.f32 %v3876_v7, 0.0  ;;  %vm537_vm2 = vcmp.gt.f32.partialorder %v3870_v16, 0.0 }
 0x14d   : > { %v2754_v17 = vpop.f32.mrb[51].mxu0  ;;  %v2357_v8 = vadd.f32 -1.0, %v3072_v35  ;;  %v2810_v52 = vpop.f32.mrb[51].mxu1  ;;  %v3883_v56 = vsel %vm533_vm10, %v3798_v60, %v2281_v47  ;;  %vm951_vm3 = vcmp.gt.f32.partialorder %v3876_v7, 0.0 }
 0x14e   : > { %v3074_v58 = vpop.eup %3073  ;;  %4494 = vst [vmem:[#allocation6_spill] sm:$0xff] %v3883_v56  ;;  %v611_v10 = vmul.f32 1.442695, %v562_v51  ;;  %v1025_v29 = vmul.f32 1.442695, %v976_v18 }
 0x14f   : > { %v3076_v36 = vpop.eup %3075  ;;  %v3888_v42 = vsel %vm947_vm11, %v3804_v2, %v2357_v8  ;;  %v2282_v22 = vadd.f32 -1.0, %v3074_v58 }
 0x150   : > { %4495 = vst [vmem:[#allocation7_spill] sm:$0xff] %v3888_v42  ;;  %v2358_v63 = vadd.f32 -1.0, %v3076_v36  ;;  %3085 = vpow2.f32 %v611_v10 }
 0x151   : > { %v3894_v60 = vsel %vm534_vm12, %v3819_v41, %v2282_v22  ;;  %v1264_v47 = vpop.f32.mrb[52].mxu0  ;;  %3087 = vpow2.f32 %v1025_v29  ;;  %v1703_v8 = vpop.f32.mrb[52].mxu1 }
 0x152   : > { %4496 = vst [vmem:[#allocation8_spill] sm:$0xff] %v3894_v60  ;;  %v3898_v17 = vsel %vm948_vm13, %v3824_v40, %v2358_v63  ;;  %v3901_v2 = vadd.f32 %v3474_v55, %v1264_v47  ;;  %v2817_v51 = vpop.f32.mrb[53].mxu0  ;;  %v3078_v52 = vpop.eup %3077  ;;  %v3906_v41 = vadd.f32 %v3474_v55, %v1703_v8  ;;  %v3912_v63 = vld [vmem:[%s4472_s2] ss:$0 sm:$0xff] }
 0x153   : > { %4497 = vst [vmem:[#allocation9_spill] sm:$0xff] %v3898_v17  ;;  %v2873_v18 = vpop.f32.mrb[53].mxu1  ;;  %v1267_v36 = vpop.f32.mrb[54].mxu0  ;;  %v2283_v10 = vadd.f32 -1.0, %v3078_v52 }
 0x154   : > { %v3080_v22 = vpop.eup %3079  ;;  %v1391_v40 = vmin.f32 %v3901_v2, 0.0  ;;  %v3915_v29 = vadd.f32 %v3912_v63, %v1267_v36  ;;  %v1706_v47 = vpop.f32.mrb[54].mxu1  ;;  %v1830_v8 = vmin.f32 %v3906_v41, 0.0  ;;  %vm1366_vm4 = vcmp.gt.f32.partialorder %v3901_v2, 0.0 }
 0x155   : > { %v2818_v51 = vpop.f32.mrb[55].mxu0  ;;  %v2359_v55 = vadd.f32 -1.0, %v3080_v22  ;;  %v3920_v18 = vadd.f32 %v3912_v63, %v1706_v47  ;;  %v2874_v52 = vpop.f32.mrb[55].mxu1  ;;  %v3923_v35 = vsel %vm535_vm14, %v3834_v45, %v2283_v10  ;;  %vm1805_vm5 = vcmp.gt.f32.partialorder %v3906_v41, 0.0 }
 0x156   : > { %v3082_v58 = vpop.eup %3081  ;;  %4498 = vst [vmem:[#allocation10_spill] sm:$0xff] %v3923_v35  ;;  %v1416_v34 = vmul.f32 1.442695, %v1391_v40  ;;  %v1392_v36 = vmin.f32 %v3915_v29, 0.0  ;;  %v1855_v60 = vmul.f32 1.442695, %v1830_v8 }
 0x157   : > { %v3084_v17 = vpop.eup %3083  ;;  %v3928_v51 = vsel %vm949_vm15, %v3840_v30, %v2359_v55  ;;  %v2284_v22 = vadd.f32 -1.0, %v3082_v58  ;;  %v1831_v40 = vmin.f32 %v3920_v18, 0.0  ;;  %vm1367_vm6 = vcmp.gt.f32.partialorder %v3915_v29, 0.0 }
 0x158   : > { %4499 = vst [vmem:[#allocation11_spill] sm:$0xff] %v3928_v51  ;;  %v2360_v52 = vadd.f32 -1.0, %v3084_v17  ;;  %3089 = vpow2.f32 %v1416_v34  ;;  %v1418_v45 = vmul.f32 1.442695, %v1392_v36  ;;  %vm1806_vm7 = vcmp.gt.f32.partialorder %v3920_v18, 0.0 }
 0x159   : > { %v3934_v10 = vsel %vm536_vm0, %v3855_v0, %v2284_v22  ;;  %3091 = vpow2.f32 %v1855_v60  ;;  %v1272_v30 = vpop.f32.mrb[56].mxu0  ;;  %v1711_v8 = vpop.f32.mrb[56].mxu1  ;;  %v1857_v36 = vmul.f32 1.442695, %v1831_v40 }
 0x15a   : > { %4500 = vst [vmem:[#allocation12_spill] sm:$0xff] %v3934_v10  ;;  %v3939_v55 = vsel %vm950_vm1, %v3858_v32, %v2360_v52  ;;  %3093 = vpow2.f32 %v1418_v45  ;;  %v3942_v58 = vadd.f32 %v3912_v63, %v1272_v30  ;;  %v2821_v17 = vpop.f32.mrb[57].mxu0  ;;  %v3086_v34 = vpop.eup %3085  ;;  %v3947_v22 = vadd.f32 %v3912_v63, %v1711_v8 }
 0x15b   : > { %4501 = vst [vmem:[#allocation13_spill] sm:$0xff] %v3939_v55  ;;  %v2877_v60 = vpop.f32.mrb[57].mxu1  ;;  %v1275_v47 = vpop.f32.mrb[58].mxu0  ;;  %v2285_v35 = vadd.f32 -1.0, %v3086_v34  ;;  %3095 = vpow2.f32 %v1857_v36 }
 0x15c   : > { %v3088_v51 = vpop.eup %3087  ;;  %v1393_v32 = vmin.f32 %v3942_v58, 0.0  ;;  %v3951_v52 = vadd.f32 %v3912_v63, %v1275_v47  ;;  %v1714_v45 = vpop.f32.mrb[58].mxu1  ;;  %v1832_v40 = vmin.f32 %v3947_v22, 0.0  ;;  %vm1368_vm8 = vcmp.gt.f32.partialorder %v3942_v58, 0.0 }
 0x15d   : > { %v2822_v30 = vpop.f32.mrb[59].mxu0  ;;  %v2361_v17 = vadd.f32 -1.0, %v3088_v51  ;;  %v2878_v0 = vpop.f32.mrb[59].mxu1  ;;  %v3956_v8 = vsel %vm537_vm2, %v3870_v16, %v2285_v35  ;;  %vm1807_vm9 = vcmp.gt.f32.partialorder %v3947_v22, 0.0 }
 0x15e   : > { %4502 = vst [vmem:[#allocation14_spill] sm:$0xff] %v3956_v8  ;;  %v1420_v34 = vmul.f32 1.442695, %v1393_v32  ;;  %v1394_v60 = vmin.f32 %v3951_v52, 0.0  ;;  %v1859_v55 = vmul.f32 1.442695, %v1832_v40  ;;  %v3964_v30 = vadd.f32 %v3912_v63, %v1714_v45 }
 0x15f   : > { %v3961_v47 = vsel %vm951_vm3, %v3876_v7, %v2361_v17  ;;  %vm1369_vm10 = vcmp.gt.f32.partialorder %v3951_v52, 0.0 }
 0x160   : > { %4503 = vst [vmem:[#allocation15_spill] sm:$0xff] %v3961_v47  ;;  %3097 = vpow2.f32 %v1420_v34  ;;  %v1422_v0 = vmul.f32 1.442695, %v1394_v60  ;;  %v1833_v16 = vmin.f32 %v3964_v30, 0.0  ;;  %vm1808_vm11 = vcmp.gt.f32.partialorder %v3964_v30, 0.0 }
 0x161   : > { %3099 = vpow2.f32 %v1859_v55  ;;  %v1280_v35 = vpop.f32.mrb[60].mxu0  ;;  %v1719_v7 = vpop.f32.mrb[60].mxu1 }
 0x162   : > { %v3090_v36 = vpop.eup %3089  ;;  %3101 = vpow2.f32 %v1422_v0  ;;  %v3970_v32 = vadd.f32 %v3912_v63, %v1280_v35  ;;  %v2825_v17 = vpop.f32.mrb[61].mxu0  ;;  %v1861_v45 = vmul.f32 1.442695, %v1833_v16  ;;  %v3973_v42 = vadd.f32 %v3912_v63, %v1719_v7 }
 0x163   : > { %v3092_v40 = vpop.eup %3091  ;;  %v2413_v10 = vadd.f32 -1.0, %v3090_v36  ;;  %v2881_v51 = vpop.f32.mrb[61].mxu1 }
 0x164   : > { %v1283_v34 = vpop.f32.mrb[62].mxu0  ;;  %v3094_v60 = vpop.eup %3093  ;;  %v2489_v55 = vadd.f32 -1.0, %v3092_v40  ;;  %v1395_v47 = vmin.f32 %v3970_v32, 0.0  ;;  %3103 = vpow2.f32 %v1861_v45  ;;  %v4504_v51 = vmax.f32 %v3521_v49, %v3526_v53 }
 0x165   : > { %v3978_v0 = vadd.f32 %v3912_v63, %v1283_v34  ;;  %v1722_v35 = vpop.f32.mrb[62].mxu1  ;;  %v2826_v8 = vpop.f32.mrb[63].mxu0  ;;  %v1491_v17 = vsel %vm1366_vm4, %v3901_v2, %v2413_v10  ;;  %v2414_v16 = vadd.f32 -1.0, %v3094_v60  ;;  %v1834_v56 = vmin.f32 %v3973_v42, 0.0  ;;  %v3991_v2 = vld [vmem:[%s4473_s3] ss:$0 sm:$0xff] }
 0x166   : > { %v2882_v36 = vpop.f32.mrb[63].mxu1  ;;  %v1516_v7 = vmax.f32 %v4504_v51, %v1491_v17  ;;  %v1424_v40 = vmul.f32 1.442695, %v1395_v47  ;;  %v3096_v34 = vpop.eup %3095  ;;  %v1930_v31 = vsel %vm1805_vm5, %v3906_v41, %v2489_v55  ;;  %v3996_v49 = vadd.f32 %v3912_v63, %v1722_v35 }
 0x167   : > { %v1492_v10 = vsel %vm1367_vm6, %v3915_v29, %v2414_v16  ;;  %v1396_v8 = vmin.f32 %v3978_v0, 0.0  ;;  %v4505_v47 = vmax.f32 %v3532_v59, %v3536_v62  ;;  %v2490_v60 = vadd.f32 -1.0, %v3096_v34 }
 0x168   : > { %v1955_v53 = vmax.f32 %v1516_v7, %v1930_v31  ;;  %3105 = vpow2.f32 %v1424_v40  ;;  %v1863_v41 = vmul.f32 1.442695, %v1834_v56  ;;  %v1835_v17 = vmin.f32 %v3996_v49, 0.0  ;;  %v4007_v31 = vld [vmem:[%s4474_s4] ss:$0 sm:$0xff] }
 0x169   : > { %v1517_v45 = vmax.f32 %v4505_v47, %v1492_v10  ;;  %v1426_v55 = vmul.f32 1.442695, %v1396_v8  ;;  %v1931_v59 = vsel %vm1806_vm7, %v3920_v18, %v2490_v60  ;;  %v1288_v62 = vpop.f32.mrb[64].mxu0  ;;  %v1727_v56 = vpop.f32.mrb[64].mxu1  ;;  %vm1370_vm12 = vcmp.gt.f32.partialorder %v3970_v32, 0.0 }
 0x16a   : > { %v3098_v36 = vpop.eup %3097  ;;  %v1987_v29 = vmul.f32 %v3991_v2, %v1955_v53  ;;  %3107 = vpow2.f32 %v1863_v41  ;;  %v1865_v7 = vmul.f32 1.442695, %v1835_v17  ;;  %v2829_v40 = vpop.f32.mrb[65].mxu0  ;;  %v4015_v18 = vadd.f32 %v3912_v63, %v1288_v62 }
 0x16b   : > { %v3100_v35 = vpop.eup %3099  ;;  %v1956_v16 = vmax.f32 %v1517_v45, %v1931_v59  ;;  %v2415_v51 = vadd.f32 -1.0, %v3098_v36  ;;  %v2885_v34 = vpop.f32.mrb[65].mxu1  ;;  %3109 = vpow2.f32 %v1426_v55  ;;  %v4506_v55 = vmax.f32 %v3557_v21, %v3564_v27 }
 0x16c   : > { %v3102_v10 = vpop.eup %3101  ;;  %v2491_v8 = vadd.f32 -1.0, %v3100_v35  ;;  %v1291_v53 = vpop.f32.mrb[66].mxu0  ;;  %3111 = vpow2.f32 %v1865_v7  ;;  %v2019_v59 = vadd.f32 %v4007_v31, %v1987_v29  ;;  %v4507_v27 = vmax.f32 %v3571_v13, %v3577_v33 }
 0x16d   : > { %v1730_v47 = vpop.f32.mrb[66].mxu1  ;;  %v1988_v60 = vmul.f32 %v3991_v2, %v1956_v16  ;;  %v1493_v45 = vsel %vm1368_vm8, %v3942_v58, %v2415_v51  ;;  %v2416_v41 = vadd.f32 -1.0, %v3102_v10  ;;  %v2830_v17 = vpop.f32.mrb[67].mxu0  ;;  %v1397_v16 = vmin.f32 %v4015_v18, 0.0 }
 0x16e   : > { %v2886_v36 = vpop.f32.mrb[67].mxu1  ;;  %v1518_v35 = vmax.f32 %v4506_v55, %v1493_v45  ;;  %v1932_v62 = vsel %vm1807_vm9, %v3947_v22, %v2491_v8  ;;  %v3104_v40 = vpop.eup %3103  ;;  %v4034_v51 = vadd.f32 %v3912_v63, %v1727_v56  ;;  %v4037_v29 = vadd.f32 %v3912_v63, %v1291_v53 }
 0x16f   : > { %v2020_v34 = vadd.f32 %v4007_v31, %v1988_v60  ;;  %v1494_v58 = vsel %vm1369_vm10, %v3951_v52, %v2416_v41  ;;  %v2492_v7 = vadd.f32 -1.0, %v3104_v40  ;;  %v1428_v10 = vmul.f32 1.442695, %v1397_v16 }
 0x170   : > { %v1957_v21 = vmax.f32 %v1518_v35, %v1932_v62  ;;  %v1519_v22 = vmax.f32 %v4507_v27, %v1494_v58  ;;  %v1836_v56 = vmin.f32 %v4034_v51, 0.0  ;;  %v1398_v13 = vmin.f32 %v4037_v29, 0.0 }
 0x171   : > { %v2571_v52 = vpack.c.bf16 %v2020_v34, %v2019_v59  ;;  %v1296_v8 = vpop.f32.mrb[68].mxu0  ;;  %v1933_v45 = vsel %vm1808_vm11, %v3964_v30, %v2492_v7  ;;  %3113 = vpow2.f32 %v1428_v10  ;;  %v1735_v33 = vpop.f32.mrb[68].mxu1  ;;  %v4055_v55 = vadd.f32 %v3912_v63, %v1730_v47 }
 0x172   : > { %v3106_v53 = vpop.eup %3105  ;;  %v1989_v60 = vmul.f32 %v3991_v2, %v1957_v21  ;;  %v2833_v41 = vpop.f32.mrb[69].mxu0  ;;  %v1958_v17 = vmax.f32 %v1519_v22, %v1933_v45  ;;  %v1867_v59 = vmul.f32 1.442695, %v1836_v56  ;;  %vm1809_vm13 = vcmp.gt.f32.partialorder %v3973_v42, 0.0 }
 0x173   : > { %2572 = vst [vmem:[%s4042_s14] sm:$0xff] %v2571_v52   ;;  %v2417_v36 = vadd.f32 -1.0, %v3106_v53  ;;  %v2889_v35 = vpop.f32.mrb[69].mxu1  ;;  %v1299_v62 = vpop.f32.mrb[70].mxu0  ;;  %vm1371_vm14 = vcmp.gt.f32.partialorder %v3978_v0, 0.0  ;;  %v1430_v16 = vmul.f32 1.442695, %v1398_v13  ;;  %v4060_v30 = vadd.f32 %v3912_v63, %v1296_v8 }
 0x174   : > { %v1738_v40 = vpop.f32.mrb[70].mxu1  ;;  %v2834_v34 = vpop.f32.mrb[71].mxu0  ;;  %v1990_v21 = vmul.f32 %v3991_v2, %v1958_v17  ;;  %3115 = vpow2.f32 %v1867_v59  ;;  %v4067_v27 = vadd.f32 %v3912_v63, %v1735_v33  ;;  %v4508_v10 = vmax.f32 %v3595_v57, %v3600_v3 }
 0x175   : > { %v3108_v58 = vpop.eup %3107  ;;  %v1495_v47 = vsel %vm1370_vm12, %v3970_v32, %v2417_v36  ;;  %v2890_v22 = vpop.f32.mrb[71].mxu1  ;;  %3117 = vpow2.f32 %v1430_v16  ;;  %v1837_v8 = vmin.f32 %v4055_v55, 0.0  ;;  %v2021_v45 = vadd.f32 %v4007_v31, %v1989_v60 }
 0x176   : > { %v3110_v7 = vpop.eup %3109  ;;  %v1520_v52 = vmax.f32 %v4508_v10, %v1495_v47  ;;  %v2493_v56 = vadd.f32 -1.0, %v3108_v58  ;;  %v2022_v13 = vadd.f32 %v4007_v31, %v1990_v21  ;;  %v1399_v41 = vmin.f32 %v4060_v30, 0.0 }
 0x177   : > { %v3112_v53 = vpop.eup %3111  ;;  %v2418_v32 = vadd.f32 -1.0, %v3110_v7  ;;  %vm1810_vm15 = vcmp.gt.f32.partialorder %v3996_v49, 0.0  ;;  %v1869_v3 = vmul.f32 1.442695, %v1837_v8  ;;  %v4509_v16 = vmax.f32 %v3612_v39, %v3621_v25 }
 0x178   : > { %v1934_v33 = vsel %vm1809_vm13, %v3973_v42, %v2493_v56  ;;  %v2494_v57 = vadd.f32 -1.0, %v3112_v53  ;;  %v2576_v17 = vpack.c.bf16 %v2022_v13, %v2021_v45  ;;  %v1432_v59 = vmul.f32 1.442695, %v1399_v41 }
 0x179   : > { %v1959_v36 = vmax.f32 %v1520_v52, %v1934_v33  ;;  %v1496_v60 = vsel %vm1371_vm14, %v3978_v0, %v2418_v32  ;;  %v1304_v35 = vpop.f32.mrb[72].mxu0  ;;  %3119 = vpow2.f32 %v1869_v3  ;;  %v1838_v42 = vmin.f32 %v4067_v27, 0.0  ;;  %v1743_v21 = vpop.f32.mrb[72].mxu1 }
 0x17a   : > { %v1521_v34 = vmax.f32 %v4509_v16, %v1496_v60  ;;  %v1935_v58 = vsel %vm1810_vm15, %v3996_v49, %v2494_v57  ;;  %v2837_v47 = vpop.f32.mrb[73].mxu0  ;;  %2628 = vst [vmem:[%s4042_s14 + $0x8] sm:$0xff] %v2576_v17   ;;  %3121 = vpow2.f32 %v1432_v59  ;;  %v4091_v7 = vadd.f32 %v3912_v63, %v1299_v62  ;;  %v2893_v10 = vpop.f32.mrb[73].mxu1 }
 0x17b   : > { %v1991_v22 = vmul.f32 %v3991_v2, %v1959_v36  ;;  %v4094_v0 = vadd.f32 %v3912_v63, %v1738_v40  ;;  %v1307_v39 = vpop.f32.mrb[74].mxu0  ;;  %v3114_v25 = vpop.eup %3113  ;;  %vm1372_vm0 = vcmp.gt.f32.partialorder %v4015_v18, 0.0  ;;  %v1871_v49 = vmul.f32 1.442695, %v1838_v42 }
 0x17c   : > { %v1960_v52 = vmax.f32 %v1521_v34, %v1935_v58  ;;  %v4098_v56 = vadd.f32 %v3912_v63, %v1304_v35  ;;  %v1746_v8 = vpop.f32.mrb[74].mxu1  ;;  %v2838_v53 = vpop.f32.mrb[75].mxu0  ;;  %v2419_v45 = vadd.f32 -1.0, %v3114_v25  ;;  %vm1811_vm1 = vcmp.gt.f32.partialorder %v4034_v51, 0.0 }
 0x17d   : > { %vm1373_vm2 = vcmp.gt.f32.partialorder %v4037_v29, 0.0  ;;  %v1400_v62 = vmin.f32 %v4091_v7, 0.0  ;;  %v2894_v40 = vpop.f32.mrb[75].mxu1  ;;  %3123 = vpow2.f32 %v1871_v49  ;;  %v1839_v32 = vmin.f32 %v4094_v0, 0.0 }
 0x17e   : > { %v1992_v13 = vmul.f32 %v3991_v2, %v1960_v52  ;;  %v4106_v41 = vadd.f32 %v3912_v63, %v1743_v21  ;;  %v3116_v33 = vpop.eup %3115  ;;  %v2023_v57 = vadd.f32 %v4007_v31, %v1991_v22  ;;  %v1497_v3 = vsel %vm1372_vm0, %v4015_v18, %v2419_v45 }
 0x17f   : > { %v1434_v17 = vmul.f32 1.442695, %v1400_v62  ;;  %v1401_v36 = vmin.f32 %v4098_v56, 0.0  ;;  %v3118_v60 = vpop.eup %3117  ;;  %v4510_v35 = vmax.f32 %v3630_v24, %v3635_v43  ;;  %v2495_v34 = vadd.f32 -1.0, %v3116_v33 }
 0x180   : > { %v2024_v59 = vadd.f32 %v4007_v31, %v1992_v13  ;;  %v1873_v58 = vmul.f32 1.442695, %v1839_v32  ;;  %v2420_v42 = vadd.f32 -1.0, %v3118_v60  ;;  %vm1812_vm3 = vcmp.gt.f32.partialorder %v4055_v55, 0.0 }
 0x181   : > { %v1522_v16 = vmax.f32 %v4510_v35, %v1497_v3  ;;  %3125 = vpow2.f32 %v1434_v17  ;;  %v1436_v21 = vmul.f32 1.442695, %v1401_v36  ;;  %v1312_v47 = vpop.f32.mrb[76].mxu0  ;;  %v1936_v22 = vsel %vm1811_vm1, %v4034_v51, %v2495_v34  ;;  %v1751_v25 = vpop.f32.mrb[76].mxu1 }
 0x182   : > { %v2581_v18 = vpack.c.bf16 %v2024_v59, %v2023_v57  ;;  %3127 = vpow2.f32 %v1873_v58  ;;  %v1840_v10 = vmin.f32 %v4106_v41, 0.0  ;;  %v2841_v24 = vpop.f32.mrb[77].mxu0  ;;  %v1498_v52 = vsel %vm1373_vm2, %v4037_v29, %v2420_v42  ;;  %v2897_v53 = vpop.f32.mrb[77].mxu1 }
 0x183   : > { %v1961_v43 = vmax.f32 %v1522_v16, %v1936_v22  ;;  %3129 = vpow2.f32 %v1436_v21  ;;  %v4126_v49 = vadd.f32 %v3912_v63, %v1307_v39  ;;  %v1315_v45 = vpop.f32.mrb[78].mxu0  ;;  %v3120_v62 = vpop.eup %3119  ;;  %v4511_v51 = vmax.f32 %v3651_v4, %v3657_v15 }
 0x184   : > { %2629 = vst [vmem:[%s4042_s14 + $0x10] sm:$0xff] %v2581_v18   ;;  %v1875_v13 = vmul.f32 1.442695, %v1840_v10  ;;  %v4133_v32 = vadd.f32 %v3912_v63, %v1746_v8  ;;  %v4136_v33 = vadd.f32 %v3912_v63, %v1312_v47  ;;  %v1754_v29 = vpop.f32.mrb[78].mxu1  ;;  %v2842_v57 = vpop.f32.mrb[79].mxu0  ;;  %v2496_v39 = vadd.f32 -1.0, %v3120_v62 }
 0x185   : > { %v1523_v40 = vmax.f32 %v4511_v51, %v1498_v52  ;;  %v3122_v3 = vpop.eup %3121  ;;  %vm1374_vm4 = vcmp.gt.f32.partialorder %v4060_v30, 0.0  ;;  %vm1813_vm5 = vcmp.gt.f32.partialorder %v4067_v27, 0.0  ;;  %v1402_v17 = vmin.f32 %v4126_v49, 0.0  ;;  %v2898_v36 = vpop.f32.mrb[79].mxu1 }
 0x186   : > { %v2421_v4 = vadd.f32 -1.0, %v3122_v3  ;;  %vm1375_vm6 = vcmp.gt.f32.partialorder %v4091_v7, 0.0  ;;  %3131 = vpow2.f32 %v1875_v13  ;;  %v1841_v15 = vmin.f32 %v4133_v32, 0.0 }
 0x187   : > { %v1993_v8 = vmul.f32 %v3991_v2, %v1961_v43  ;;  %v1937_v60 = vsel %vm1812_vm3, %v4055_v55, %v2496_v39  ;;  %vm1814_vm7 = vcmp.gt.f32.partialorder %v4094_v0, 0.0  ;;  %v1438_v59 = vmul.f32 1.442695, %v1402_v17  ;;  %v3124_v35 = vpop.eup %3123 }
 0x188   : > { %v1962_v16 = vmax.f32 %v1523_v40, %v1937_v60  ;;  %v1499_v34 = vsel %vm1374_vm4, %v4060_v30, %v2421_v4  ;;  %v1877_v58 = vmul.f32 1.442695, %v1841_v15  ;;  %v1403_v42 = vmin.f32 %v4136_v33, 0.0 }
 0x189   : > { %v4512_v21 = vmax.f32 %v3666_v37, %v3671_v38  ;;  %v2497_v18 = vadd.f32 -1.0, %v3124_v35  ;;  %3133 = vpow2.f32 %v1438_v59  ;;  %v4154_v22 = vadd.f32 %v3912_v63, %v1751_v25  ;;  %v1320_v55 = vpop.f32.mrb[80].mxu0  ;;  %v1759_v30 = vpop.f32.mrb[80].mxu1 }
 0x18a   : > { %v1994_v10 = vmul.f32 %v3991_v2, %v1962_v16  ;;  %3135 = vpow2.f32 %v1877_v58  ;;  %v1440_v24 = vmul.f32 1.442695, %v1403_v42  ;;  %v4158_v43 = vadd.f32 %v3912_v63, %v1315_v45  ;;  %v2845_v52 = vpop.f32.mrb[81].mxu0  ;;  %v2901_v51 = vpop.f32.mrb[81].mxu1 }
 0x18b   : > { %v1524_v47 = vmax.f32 %v4512_v21, %v1499_v34  ;;  %v3126_v53 = vpop.eup %3125  ;;  %v2025_v62 = vadd.f32 %v4007_v31, %v1993_v8  ;;  %v1938_v37 = vsel %vm1813_vm5, %v4067_v27, %v2497_v18  ;;  %v1842_v38 = vmin.f32 %v4154_v22, 0.0  ;;  %v1323_v40 = vpop.f32.mrb[82].mxu0 }
 0x18c   : > { %v4166_v25 = vadd.f32 %v3912_v63, %v1754_v29  ;;  %v3128_v13 = vpop.eup %3127  ;;  %v2026_v45 = vadd.f32 %v4007_v31, %v1994_v10  ;;  %v2422_v3 = vadd.f32 -1.0, %v3126_v53  ;;  %3137 = vpow2.f32 %v1440_v24  ;;  %v1762_v39 = vpop.f32.mrb[82].mxu1 }
 0x18d   : > { %v1963_v57 = vmax.f32 %v1524_v47, %v1938_v37  ;;  %v2846_v17 = vpop.f32.mrb[83].mxu0  ;;  %v3130_v36 = vpop.eup %3129  ;;  %v2498_v4 = vadd.f32 -1.0, %v3128_v13  ;;  %vm1376_vm8 = vcmp.gt.f32.partialorder %v4098_v56, 0.0  ;;  %v1879_v27 = vmul.f32 1.442695, %v1842_v38 }
 0x18e   : > { %v1404_v15 = vmin.f32 %v4158_v43, 0.0  ;;  %v2902_v29 = vpop.f32.mrb[83].mxu1  ;;  %v2586_v8 = vpack.c.bf16 %v2026_v45, %v2025_v62  ;;  %v1500_v60 = vsel %vm1375_vm6, %v4091_v7, %v2422_v3  ;;  %v2423_v59 = vadd.f32 -1.0, %v3130_v36 }
 0x18f   : > { %vm1815_vm9 = vcmp.gt.f32.partialorder %v4106_v41, 0.0  ;;  %v1995_v35 = vmul.f32 %v3991_v2, %v1963_v57  ;;  %v4513_v16 = vmax.f32 %v3687_v1, %v3693_v14  ;;  %3139 = vpow2.f32 %v1879_v27 }
 0x190   : > { %v1442_v58 = vmul.f32 1.442695, %v1404_v15  ;;  %v3132_v42 = vpop.eup %3131  ;;  %2630 = vst [vmem:[%s4042_s14 + $0x18] sm:$0xff] %v2586_v8   ;;  %v1939_v21 = vsel %vm1814_vm7, %v4094_v0, %v2498_v4  ;;  %v1501_v47 = vsel %vm1376_vm8, %v4098_v56, %v2423_v59  ;;  %vm1377_vm10 = vcmp.gt.f32.partialorder %v4126_v49, 0.0 }
 0x191   : > { %v1525_v34 = vmax.f32 %v4513_v16, %v1500_v60  ;;  %v1843_v7 = vmin.f32 %v4166_v25, 0.0  ;;  %v4514_v10 = vmax.f32 %v3704_v48, %v3714_v9  ;;  %v2499_v14 = vadd.f32 -1.0, %v3132_v42  ;;  %v1328_v24 = vpop.f32.mrb[84].mxu0  ;;  %v4196_v56 = vpop.f32.mrb[84].mxu1 }
 0x192   : > { %3141 = vpow2.f32 %v1442_v58  ;;  %vm1816_vm11 = vcmp.gt.f32.partialorder %v4133_v32, 0.0  ;;  %v4191_v53 = vadd.f32 %v3912_v63, %v1320_v55  ;;  %v4194_v0 = vadd.f32 %v3912_v63, %v1759_v30  ;;  %v2849_v62 = vpop.f32.mrb[85].mxu0  ;;  %v2905_v51 = vpop.f32.mrb[85].mxu1 }
 0x193   : > { %v1964_v18 = vmax.f32 %v1525_v34, %v1939_v21  ;;  %v1526_v1 = vmax.f32 %v4514_v10, %v1501_v47  ;;  %v1881_v52 = vmul.f32 1.442695, %v1843_v7  ;;  %v3134_v37 = vpop.eup %3133  ;;  %v2027_v38 = vadd.f32 %v4007_v31, %v1995_v35  ;;  %v1331_v55 = vpop.f32.mrb[86].mxu0 }
 0x194   : > { %v1940_v9 = vsel %vm1815_vm9, %v4106_v41, %v2499_v14  ;;  %vm1378_vm12 = vcmp.gt.f32.partialorder %v4136_v33, 0.0  ;;  %v3136_v13 = vpop.eup %3135  ;;  %v2424_v30 = vadd.f32 -1.0, %v3134_v37  ;;  %v4205_v57 = vadd.f32 %v3912_v63, %v1323_v40  ;;  %v1770_v3 = vpop.f32.mrb[86].mxu1 }
 0x195   : > { %v1996_v48 = vmul.f32 %v3991_v2, %v1964_v18  ;;  %v1965_v45 = vmax.f32 %v1526_v1, %v1940_v9  ;;  %3143 = vpow2.f32 %v1881_v52  ;;  %v2850_v17 = vpop.f32.mrb[87].mxu0  ;;  %v2500_v4 = vadd.f32 -1.0, %v3136_v13  ;;  %v2906_v15 = vpop.f32.mrb[87].mxu1 }
 0x196   : > { %v1405_v27 = vmin.f32 %v4191_v53, 0.0  ;;  %v4210_v41 = vadd.f32 %v3912_v63, %v1762_v39  ;;  %v3138_v29 = vpop.eup %3137  ;;  %v1502_v8 = vsel %vm1377_vm10, %v4126_v49, %v2424_v30  ;;  %vm1817_vm13 = vcmp.gt.f32.partialorder %v4154_v22, 0.0 }
 0x197   : > { %v2028_v36 = vadd.f32 %v4007_v31, %v1996_v48  ;;  %v1844_v40 = vmin.f32 %v4194_v0, 0.0  ;;  %v4218_v60 = vadd.f32 %v3912_v63, %v1328_v24  ;;  %v1997_v35 = vmul.f32 %v3991_v2, %v1965_v45 }
 0x198   : > { %v4515_v39 = vmax.f32 %v3720_v11, %v3725_v28  ;;  %v2425_v34 = vadd.f32 -1.0, %v3138_v29  ;;  %v1941_v58 = vsel %vm1816_vm11, %v4133_v32, %v2500_v4  ;;  %v1444_v49 = vmul.f32 1.442695, %v1405_v27 }
 0x199   : > { %v2591_v59 = vpack.c.bf16 %v2028_v36, %v2027_v38  ;;  %v1883_v42 = vmul.f32 1.442695, %v1844_v40  ;;  %v1406_v21 = vmin.f32 %v4205_v57, 0.0  ;;  %v3140_v47 = vpop.eup %3139  ;;  %vm1379_vm14 = vcmp.gt.f32.partialorder %v4158_v43, 0.0  ;;  %v1336_v28 = vpop.f32.mrb[88].mxu0 }
 0x19a   : > { %v1527_v16 = vmax.f32 %v4515_v39, %v1502_v8  ;;  %v1503_v18 = vsel %vm1378_vm12, %v4136_v33, %v2425_v34  ;;  %v1845_v11 = vmin.f32 %v4210_v41, 0.0  ;;  %v4516_v10 = vmax.f32 %v3741_v26, %v3747_v20  ;;  %v1775_v24 = vpop.f32.mrb[88].mxu1  ;;  %v2853_v52 = vpop.f32.mrb[89].mxu0 }
 0x19b   : > { %2631 = vst [vmem:[%s4042_s14 + $0x20] sm:$0xff] %v2591_v59   ;;  %v2501_v1 = vadd.f32 -1.0, %v3140_v47  ;;  %3145 = vpow2.f32 %v1444_v49  ;;  %v1446_v14 = vmul.f32 1.442695, %v1406_v21  ;;  %v2029_v37 = vadd.f32 %v4007_v31, %v1997_v35  ;;  %v2909_v48 = vpop.f32.mrb[89].mxu1  ;;  %v1339_v9 = vpop.f32.mrb[90].mxu0 }
 0x19c   : > { %v1966_v7 = vmax.f32 %v1527_v16, %v1941_v58  ;;  %v1528_v32 = vmax.f32 %v4516_v10, %v1503_v18  ;;  %v3142_v62 = vpop.eup %3141  ;;  %3147 = vpow2.f32 %v1883_v42  ;;  %v1885_v33 = vmul.f32 1.442695, %v1845_v11  ;;  %v1778_v13 = vpop.f32.mrb[90].mxu1 }
 0x19d   : > { %v1942_v51 = vsel %vm1817_vm13, %v4154_v22, %v2501_v1  ;;  %v2426_v26 = vadd.f32 -1.0, %v3142_v62  ;;  %3149 = vpow2.f32 %v1446_v14  ;;  %v1407_v20 = vmin.f32 %v4218_v60, 0.0  ;;  %v2854_v45 = vpop.f32.mrb[91].mxu0  ;;  %v2910_v4 = vpop.f32.mrb[91].mxu1 }
 0x19e   : > { %v1998_v38 = vmul.f32 %v3991_v2, %v1966_v7  ;;  %v1967_v17 = vmax.f32 %v1528_v32, %v1942_v51  ;;  %3151 = vpow2.f32 %v1885_v33  ;;  %v4246_v36 = vadd.f32 %v3912_v63, %v4196_v56 }
 0x19f   : > { %v3144_v27 = vpop.eup %3143  ;;  %v1504_v22 = vsel %vm1379_vm14, %v4158_v43, %v2426_v26  ;;  %v1448_v15 = vmul.f32 1.442695, %v1407_v20  ;;  %v4252_v29 = vadd.f32 %v3912_v63, %v1331_v55  ;;  %v4255_v8 = vadd.f32 %v3912_v63, %v1770_v3 }
 0x1a0   : > { %v2030_v30 = vadd.f32 %v4007_v31, %v1998_v38  ;;  %v4517_v59 = vmax.f32 %v3756_v44, %v3761_v50  ;;  %v2502_v56 = vadd.f32 -1.0, %v3144_v27  ;;  %v1999_v39 = vmul.f32 %v3991_v2, %v1967_v17 }
 0x1a1   : > { %vm1818_vm15 = vcmp.gt.f32.partialorder %v4166_v25, 0.0  ;;  %3153 = vpow2.f32 %v1448_v15  ;;  %v1846_v43 = vmin.f32 %v4246_v36, 0.0  ;;  %vm1380_vm0 = vcmp.gt.f32.partialorder %v4191_v53, 0.0  ;;  %v1344_v16 = vpop.f32.mrb[92].mxu0  ;;  %v1783_v49 = vpop.f32.mrb[92].mxu1 }
 0x1a2   : > { %v2596_v40 = vpack.c.bf16 %v2030_v30, %v2029_v37  ;;  %v1529_v35 = vmax.f32 %v4517_v59, %v1504_v22  ;;  %v1943_v55 = vsel %vm1818_vm15, %v4166_v25, %v2502_v56  ;;  %vm1819_vm1 = vcmp.gt.f32.partialorder %v4194_v0, 0.0  ;;  %v2857_v42 = vpop.f32.mrb[93].mxu0  ;;  %v2913_v47 = vpop.f32.mrb[93].mxu1 }
 0x1a3   : > { %v1408_v3 = vmin.f32 %v4252_v29, 0.0  ;;  %v1887_v50 = vmul.f32 1.442695, %v1846_v43  ;;  %v1847_v34 = vmin.f32 %v4255_v8, 0.0  ;;  %v4270_v58 = vadd.f32 %v3912_v63, %v1336_v28  ;;  %v1347_v7 = vpop.f32.mrb[94].mxu0  ;;  %v4280_v32 = vpop.f32.mrb[94].mxu1 }
 0x1a4   : > { %2632 = vst [vmem:[%s4042_s14 + $0x28] sm:$0xff] %v2596_v40   ;;  %v1968_v44 = vmax.f32 %v1529_v35, %v1943_v55  ;;  %vm1381_vm2 = vcmp.gt.f32.partialorder %v4205_v57, 0.0  ;;  %vm1820_vm3 = vcmp.gt.f32.partialorder %v4210_v41, 0.0  ;;  %v4275_v21 = vadd.f32 %v3912_v63, %v1775_v24  ;;  %v2858_v1 = vpop.f32.mrb[95].mxu0  ;;  %v2914_v37 = vpop.f32.mrb[95].mxu1 }
 0x1a5   : > { %v1450_v25 = vmul.f32 1.442695, %v1408_v3  ;;  %v3146_v18 = vpop.eup %3145  ;;  %v2031_v11 = vadd.f32 %v4007_v31, %v1999_v39  ;;  %vm1382_vm4 = vcmp.gt.f32.partialorder %v4218_v60, 0.0  ;;  %3155 = vpow2.f32 %v1887_v50 }
 0x1a6   : > { %v2000_v10 = vmul.f32 %v3991_v2, %v1968_v44  ;;  %v1889_v28 = vmul.f32 1.442695, %v1847_v34  ;;  %v3148_v14 = vpop.eup %3147  ;;  %v2427_v52 = vadd.f32 -1.0, %v3146_v18  ;;  %v1409_v24 = vmin.f32 %v4270_v58, 0.0 }
 0x1a7   : > { %3157 = vpow2.f32 %v1450_v25  ;;  %v4284_v62 = vadd.f32 %v3912_v63, %v1339_v9  ;;  %v3150_v38 = vpop.eup %3149  ;;  %v2503_v48 = vadd.f32 -1.0, %v3148_v14  ;;  %v1848_v51 = vmin.f32 %v4275_v21, 0.0 }
 0x1a8   : > { %v2032_v33 = vadd.f32 %v4007_v31, %v2000_v10  ;;  %3159 = vpow2.f32 %v1889_v28  ;;  %v3152_v26 = vpop.eup %3151  ;;  %v1505_v20 = vsel %vm1380_vm0, %v4191_v53, %v2427_v52  ;;  %v2428_v45 = vadd.f32 -1.0, %v3150_v38 }
 0x1a9   : > { %v1452_v30 = vmul.f32 1.442695, %v1409_v24  ;;  %v4292_v17 = vadd.f32 %v3912_v63, %v1778_v13  ;;  %v4518_v4 = vmax.f32 %v3777_v61, %v3783_v12  ;;  %v1944_v22 = vsel %vm1819_vm1, %v4194_v0, %v2503_v48  ;;  %v4304_v13 = vpop.f32.mrb[96].mxu0 }
 0x1aa   : > { %v2601_v9 = vpack.c.bf16 %v2032_v33, %v2031_v11  ;;  %v2504_v15 = vadd.f32 -1.0, %v3152_v26  ;;  %v1506_v40 = vsel %vm1381_vm2, %v4205_v57, %v2428_v45  ;;  %v1891_v53 = vmul.f32 1.442695, %v1848_v51  ;;  %v4314_v57 = vpop.f32.mrb[96].mxu1  ;;  %v2861_v39 = vpop.f32.mrb[97].mxu0 }
 0x1ab   : > { %v1530_v27 = vmax.f32 %v4518_v4, %v1505_v20  ;;  %3161 = vpow2.f32 %v1452_v30  ;;  %v1410_v59 = vmin.f32 %v4284_v62, 0.0  ;;  %v3154_v35 = vpop.eup %3153  ;;  %v4519_v61 = vmax.f32 %v3793_v19, %v3801_v46  ;;  %v2917_v44 = vpop.f32.mrb[97].mxu1 }
 0x1ac   : > { %2633 = vst [vmem:[%s4042_s14 + $0x30] sm:$0xff] %v2601_v9   ;;  %v1945_v0 = vsel %vm1820_vm3, %v4210_v41, %v2504_v15  ;;  %vm1821_vm5 = vcmp.gt.f32.partialorder %v4246_v36, 0.0  ;;  %v2429_v43 = vadd.f32 -1.0, %v3154_v35  ;;  %3163 = vpow2.f32 %v1891_v53  ;;  %v4317_v50 = vpop.f32.mrb[98].mxu0  ;;  %v4326_v42 = vpop.f32.mrb[98].mxu1 }
 0x1ad   : > { %v1969_v56 = vmax.f32 %v1530_v27, %v1944_v22  ;;  %v1531_v12 = vmax.f32 %v4519_v61, %v1506_v40  ;;  %v1454_v55 = vmul.f32 1.442695, %v1410_v59  ;;  %v1849_v3 = vmin.f32 %v4292_v17, 0.0  ;;  %v2862_v25 = vpop.f32.mrb[99].mxu0  ;;  %v2918_v10 = vpop.f32.mrb[99].mxu1 }
 0x1ae   : > { %v4321_v34 = vadd.f32 %v3912_v63, %v1344_v16  ;;  %v4324_v41 = vadd.f32 %v3912_v63, %v1783_v49  ;;  %v1507_v47 = vsel %vm1382_vm4, %v4218_v60, %v2429_v43  ;;  %v4332_v11 = vadd.f32 %v3912_v63, %v1347_v7  ;;  %v3190_v61 = vld [vmem:[%s4472_s2] ss:$0 sm:$0xff]  ;;  %v4523_v25 = vld [vmem:[#allocation3_spill] sm:$0xff] }
 0x1af   : > { %v2001_v19 = vmul.f32 %v3991_v2, %v1969_v56  ;;  %v1970_v46 = vmax.f32 %v1531_v12, %v1945_v0  ;;  %3165 = vpow2.f32 %v1454_v55  ;;  %v1893_v18 = vmul.f32 1.442695, %v1849_v3  ;;  %v3156_v28 = vpop.eup %3155 }
 0x1b0   : > { %v4520_v49 = vmax.f32 %v3810_v6, %v3815_v23  ;;  %vm1383_vm6 = vcmp.gt.f32.partialorder %v4252_v29, 0.0  ;;  %vm1822_vm7 = vcmp.gt.f32.partialorder %v4255_v8, 0.0  ;;  %v2505_v52 = vadd.f32 -1.0, %v3156_v28 }
 0x1b1   : > { %v2002_v16 = vmul.f32 %v3991_v2, %v1970_v46  ;;  %v3158_v14 = vpop.eup %3157  ;;  %vm1384_vm8 = vcmp.gt.f32.partialorder %v4270_v58, 0.0  ;;  %3167 = vpow2.f32 %v1893_v18  ;;  %v1411_v63 = vmin.f32 %v4321_v34, 0.0  ;;  %v4349_v51 = vpop.f32.mrb[100].mxu0 }
 0x1b2   : > { %v1532_v1 = vmax.f32 %v4520_v49, %v1507_v47  ;;  %v3160_v60 = vpop.eup %3159  ;;  %v2033_v7 = vadd.f32 %v4007_v31, %v2001_v19  ;;  %v2430_v37 = vadd.f32 -1.0, %v3158_v14  ;;  %v1850_v6 = vmin.f32 %v4324_v41, 0.0  ;;  %v4354_v9 = vpop.f32.mrb[100].mxu1  ;;  %v4524_v47 = vld [vmem:[#allocation4_spill] sm:$0xff] }
 0x1b3   : > { %v2034_v24 = vadd.f32 %v4007_v31, %v2002_v16  ;;  %v1946_v23 = vsel %vm1821_vm5, %v4246_v36, %v2505_v52  ;;  %v2506_v38 = vadd.f32 -1.0, %v3160_v60  ;;  %v1456_v33 = vmul.f32 1.442695, %v1411_v63  ;;  %v2865_v4 = vpop.f32.mrb[101].mxu0  ;;  %v4521_v36 = vld [vmem:[#allocation2_spill] sm:$0xff]  ;;  %v2921_v59 = vpop.f32.mrb[101].mxu1 }
 0x1b4   : > { %v1412_v48 = vmin.f32 %v4332_v11, 0.0  ;;  %v1971_v20 = vmax.f32 %v1532_v1, %v1946_v23  ;;  %v1508_v45 = vsel %vm1383_vm6, %v4252_v29, %v2430_v37  ;;  %v1895_v30 = vmul.f32 1.442695, %v1850_v6  ;;  %v1363_v35 = vpop.f32.mrb[102].mxu0  ;;  %v1802_v12 = vpop.f32.mrb[102].mxu1 }
 0x1b5   : > { %v2606_v26 = vpack.c.bf16 %v2034_v24, %v2033_v7  ;;  %v3162_v27 = vpop.eup %3161  ;;  %v4522_v22 = vmax.f32 %v3831_v54, %v4521_v36  ;;  %v1947_v40 = vsel %vm1822_vm7, %v4255_v8, %v2506_v38  ;;  %3169 = vpow2.f32 %v1456_v33  ;;  %v2866_v0 = vpop.f32.mrb[103].mxu0  ;;  %v4529_v35 = vld [vmem:[#allocation7_spill] sm:$0xff] }
 0x1b6   : > { %v1458_v53 = vmul.f32 1.442695, %v1412_v48  ;;  %v2003_v29 = vmul.f32 %v3991_v2, %v1971_v20  ;;  %v2431_v56 = vadd.f32 -1.0, %v3162_v27  ;;  %3171 = vpow2.f32 %v1895_v30  ;;  %v3164_v39 = vpop.eup %3163  ;;  %v2922_v3 = vpop.f32.mrb[103].mxu1 }
 0x1b7   : > { %v1533_v15 = vmax.f32 %v4522_v22, %v1508_v45  ;;  %2634 = vst [vmem:[%s4042_s14 + $0x38] sm:$0xff] %v2606_v26   ;;  %v4368_v54 = vadd.f32 %v3190_v61, %v4280_v32  ;;  %v4371_v43 = vadd.f32 %v3190_v61, %v4304_v13  ;;  %v4374_v55 = vadd.f32 %v3190_v61, %v4314_v57  ;;  %v4532_v3 = vld [vmem:[#allocation9_spill] sm:$0xff] }
 0x1b8   : > { %3173 = vpow2.f32 %v1458_v53  ;;  %v1509_v44 = vsel %vm1384_vm8, %v4270_v58, %v2431_v56  ;;  %vm1823_vm9 = vcmp.gt.f32.partialorder %v4275_v21, 0.0  ;;  %v2507_v32 = vadd.f32 -1.0, %v3164_v39 }
 0x1b9   : > { %v1972_v8 = vmax.f32 %v1533_v15, %v1947_v40  ;;  %v3166_v19 = vpop.eup %3165  ;;  %v4525_v18 = vmax.f32 %v4523_v25, %v4524_v47  ;;  %vm1385_vm10 = vcmp.gt.f32.partialorder %v4284_v62, 0.0  ;;  %v1851_v13 = vmin.f32 %v4368_v54, 0.0 }
 0x1ba   : > { %v2035_v57 = vadd.f32 %v4007_v31, %v2003_v29  ;;  %v1948_v28 = vsel %vm1823_vm9, %v4275_v21, %v2507_v32  ;;  %v2432_v16 = vadd.f32 -1.0, %v3166_v19  ;;  %v1413_v58 = vmin.f32 %v4371_v43, 0.0  ;;  %v4526_v21 = vld [vmem:[#allocation5_spill] sm:$0xff] }
 0x1bb   : > { %v2004_v46 = vmul.f32 %v3991_v2, %v1972_v8  ;;  %v1534_v10 = vmax.f32 %v4525_v18, %v1509_v44  ;;  %v3168_v49 = vpop.eup %3167  ;;  %v1897_v52 = vmul.f32 1.442695, %v1851_v13  ;;  %v1852_v63 = vmin.f32 %v4374_v55, 0.0  ;;  %v4531_v8 = vld [vmem:[#allocation8_spill] sm:$0xff]  ;;  %v3191_v13 = vld [vmem:[%s4473_s3] ss:$0 sm:$0xff] }
 0x1bc   : > { %v1510_v60 = vsel %vm1385_vm10, %v4284_v62, %v2432_v16  ;;  %v2508_v7 = vadd.f32 -1.0, %v3168_v49  ;;  %v1460_v24 = vmul.f32 1.442695, %v1413_v58  ;;  %v4393_v37 = vadd.f32 %v3190_v61, %v4317_v50  ;;  %v4534_v49 = vld [vmem:[#allocation10_spill] sm:$0xff] }
 0x1bd   : > { %v2036_v1 = vadd.f32 %v4007_v31, %v2004_v46  ;;  %v1973_v14 = vmax.f32 %v1534_v10, %v1948_v28  ;;  %v4527_v23 = vmax.f32 %v3867_v5, %v4526_v21  ;;  %vm1824_vm11 = vcmp.gt.f32.partialorder %v4292_v17, 0.0 }
 0x1be   : > { %3175 = vpow2.f32 %v1897_v52  ;;  %v1949_v33 = vsel %vm1824_vm11, %v4292_v17, %v2508_v7  ;;  %vm1386_vm12 = vcmp.gt.f32.partialorder %v4321_v34, 0.0  ;;  %v1899_v48 = vmul.f32 1.442695, %v1852_v63 }
 0x1bf   : > { %v2611_v6 = vpack.c.bf16 %v2036_v1, %v2035_v57  ;;  %v1535_v38 = vmax.f32 %v4527_v23, %v1510_v60  ;;  %3177 = vpow2.f32 %v1460_v24  ;;  %v3170_v62 = vpop.eup %3169  ;;  %v2005_v26 = vmul.f32 %v3991_v2, %v1973_v14  ;;  %v4535_v1 = vld [vmem:[#allocation11_spill] sm:$0xff] }
 0x1c0   : > { %v1414_v20 = vmin.f32 %v4393_v37, 0.0  ;;  %v4405_v45 = vadd.f32 %v3190_v61, %v4326_v42  ;;  %v3172_v5 = vpop.eup %3171  ;;  %v2433_v30 = vadd.f32 -1.0, %v3170_v62  ;;  %vm1825_vm13 = vcmp.gt.f32.partialorder %v4324_v41, 0.0  ;;  %v4538_v62 = vld [vmem:[#allocation13_spill] sm:$0xff] }
 0x1c1   : > { %2635 = vst [vmem:[%s4042_s14 + $0x40] sm:$0xff] %v2611_v6   ;;  %v1974_v50 = vmax.f32 %v1535_v38, %v1949_v33  ;;  %3179 = vpow2.f32 %v1899_v48  ;;  %v4409_v17 = vadd.f32 %v3190_v61, %v4349_v51  ;;  %v2509_v36 = vadd.f32 -1.0, %v3172_v5  ;;  %v3192_v6 = vld [vmem:[%s4474_s4] ss:$0 sm:$0xff]  ;;  %v4537_v48 = vld [vmem:[#allocation12_spill] sm:$0xff] }
 0x1c2   : > { %v3174_v4 = vpop.eup %3173  ;;  %v1462_v22 = vmul.f32 1.442695, %v1414_v20  ;;  %v4413_v15 = vadd.f32 %v3190_v61, %v4354_v9  ;;  %v1511_v42 = vsel %vm1386_vm12, %v4321_v34, %v2433_v30  ;;  %vm1387_vm14 = vcmp.gt.f32.partialorder %v4332_v11, 0.0 }
 0x1c3   : > { %v2006_v27 = vmul.f32 %v3991_v2, %v1974_v50  ;;  %v2434_v40 = vadd.f32 -1.0, %v3174_v4  ;;  %v1853_v53 = vmin.f32 %v4405_v45, 0.0  ;;  %v2037_v51 = vadd.f32 %v4007_v31, %v2005_v26  ;;  %v4528_v2 = vld [vmem:[#allocation6_spill] sm:$0xff] }
 0x1c4   : > { %v4530_v29 = vmax.f32 %v4528_v2, %v4529_v35  ;;  %3181 = vpow2.f32 %v1462_v22  ;;  %v1950_v9 = vsel %vm1825_vm13, %v4324_v41, %v2509_v36  ;;  %v1415_v12 = vmin.f32 %v4409_v17, 0.0 }
 0x1c5   : > { %v2038_v59 = vadd.f32 %v4007_v31, %v2006_v27  ;;  %v1512_v34 = vsel %vm1387_vm14, %v4332_v11, %v2434_v40  ;;  %v1901_v61 = vmul.f32 1.442695, %v1853_v53  ;;  %v4533_v44 = vmax.f32 %v4531_v8, %v4532_v3  ;;  %v4540_v40 = vld [vmem:[#allocation14_spill] sm:$0xff]  ;;  %v4541_v53 = vld [vmem:[#allocation15_spill] sm:$0xff] }
 0x1c6   : > { %v1536_v56 = vmax.f32 %v4530_v29, %v1511_v42  ;;  %v1854_v32 = vmin.f32 %v4413_v15, 0.0  ;;  %v1464_v19 = vmul.f32 1.442695, %v1415_v12  ;;  %vm1826_vm15 = vcmp.gt.f32.partialorder %v4368_v54, 0.0 }
 0x1c7   : > { %v2616_v0 = vpack.c.bf16 %v2038_v59, %v2037_v51  ;;  %v1537_v31 = vmax.f32 %v4533_v44, %v1512_v34  ;;  %3183 = vpow2.f32 %v1901_v61  ;;  %vm1388_vm0 = vcmp.gt.f32.partialorder %v4371_v43, 0.0 }
 0x1c8   : > { %v1975_v39 = vmax.f32 %v1536_v56, %v1950_v9  ;;  %v3176_v46 = vpop.eup %3175  ;;  %v1903_v25 = vmul.f32 1.442695, %v1854_v32  ;;  %3185 = vpow2.f32 %v1464_v19  ;;  %v4536_v14 = vmax.f32 %v4534_v49, %v4535_v1 }
 0x1c9   : > { %2636 = vst [vmem:[%s4042_s14 + $0x48] sm:$0xff] %v2616_v0   ;;  %v3178_v47 = vpop.eup %3177  ;;  %v2510_v41 = vadd.f32 -1.0, %v3176_v46  ;;  %vm1827_vm1 = vcmp.gt.f32.partialorder %v4374_v55, 0.0  ;;  %vm1389_vm2 = vcmp.gt.f32.partialorder %v4393_v37, 0.0  ;;  %v4539_v26 = vmax.f32 %v4537_v48, %v4538_v62 }
 0x1ca   : > { %v2435_v11 = vadd.f32 -1.0, %v3178_v47  ;;  %3187 = vpow2.f32 %v1903_v25  ;;  %v2007_v57 = vmul.f32 %v3191_v13, %v1975_v39  ;;  %vm1828_vm3 = vcmp.gt.f32.partialorder %v4405_v45, 0.0 }
 0x1cb   : > { %v3180_v18 = vpop.eup %3179  ;;  %v1951_v10 = vsel %vm1826_vm15, %v4368_v54, %v2510_v41  ;;  %vm1390_vm4 = vcmp.gt.f32.partialorder %v4409_v17, 0.0  ;;  %v4542_v51 = vmax.f32 %v4540_v40, %v4541_v53  ;;  %vm1829_vm5 = vcmp.gt.f32.partialorder %v4413_v15, 0.0 }
 0x1cc   : > { %v1976_v28 = vmax.f32 %v1537_v31, %v1951_v10  ;;  %v1513_v16 = vsel %vm1388_vm0, %v4371_v43, %v2435_v11  ;;  %v2511_v58 = vadd.f32 -1.0, %v3180_v18  ;;  %v2039_v21 = vadd.f32 %v3192_v6, %v2007_v57 }
 0x1cd   : > { %v1538_v52 = vmax.f32 %v4536_v14, %v1513_v16 }
 0x1ce   : > { %v3182_v63 = vpop.eup %3181  ;;  %v2008_v60 = vmul.f32 %v3191_v13, %v1976_v28  ;;  %v1952_v54 = vsel %vm1827_vm1, %v4374_v55, %v2511_v58 }
 0x1cf   : > { %v1977_v7 = vmax.f32 %v1538_v52, %v1952_v54  ;;  %v2436_v24 = vadd.f32 -1.0, %v3182_v63 }
 0x1d0   : > { %v2040_v43 = vadd.f32 %v3192_v6, %v2008_v60 }
 0x1d1   : > { %v3184_v23 = vpop.eup %3183  ;;  %v1514_v38 = vsel %vm1389_vm2, %v4393_v37, %v2436_v24  ;;  %v2009_v27 = vmul.f32 %v3191_v13, %v1977_v7 }
 0x1d2   : > { %v2621_v33 = vpack.c.bf16 %v2040_v43, %v2039_v21  ;;  %v1539_v50 = vmax.f32 %v4539_v26, %v1514_v38  ;;  %v2512_v20 = vadd.f32 -1.0, %v3184_v23  ;;  %v3186_v55 = vpop.eup %3185 }
 0x1d3   : > { %v2437_v4 = vadd.f32 -1.0, %v3186_v55 }
 0x1d4   : > { %v3188_v5 = vpop.eup %3187  ;;  %2637 = vst [vmem:[%s4042_s14 + $0x50] sm:$0xff] %v2621_v33   ;;  %v1953_v30 = vsel %vm1828_vm3, %v4405_v45, %v2512_v20  ;;  %v2041_v45 = vadd.f32 %v3192_v6, %v2009_v27 }
 0x1d5   : > { %v1978_v36 = vmax.f32 %v1539_v50, %v1953_v30  ;;  %v2513_v37 = vadd.f32 -1.0, %v3188_v5  ;;  %v1515_v22 = vsel %vm1390_vm4, %v4409_v17, %v2437_v4 }
 0x1d6   : > { %v1540_v59 = vmax.f32 %v4542_v51, %v1515_v22 }
 0x1d7   : > { %v2010_v42 = vmul.f32 %v3191_v13, %v1978_v36  ;;  %v1954_v2 = vsel %vm1829_vm5, %v4413_v15, %v2513_v37 }
 0x1d8   : > { %v1979_v29 = vmax.f32 %v1540_v59, %v1954_v2 }
 0x1d9   : > { %v2042_v35 = vadd.f32 %v3192_v6, %v2010_v42 }
 0x1da   : > { %v2011_v9 = vmul.f32 %v3191_v13, %v1979_v29 }
 0x1db   : > { %v2626_v56 = vpack.c.bf16 %v2042_v35, %v2041_v45 }
 0x1dc   : > { %v2043_v34 = vadd.f32 %v3192_v6, %v2011_v9 }
 0x1dd   : > { %2638 = vst [vmem:[%s4042_s14 + $0x58] sm:$0xff] %v2626_v56  }
 0x1de   : > { %v2567_v61 = vpack.c.bf16 %v2043_v34, %v2043_v34 }
 0x1e0   : > { %2169 = vst [vmem:[%s4042_s14 + $0x60] sm:$0x3] %v2567_v61 }
 0x1e1 PF: > { %s15_s18 = sadd.s32 1, %s3199_s18  }
 0x1e2   : > { %p12_p4 = scmp.ge.s32.totalorder %s15_s18, 4  }
 0x1e4   :  { %14 = sbr.rel (!%p12_p4) target bundleno = 1 (0x1), region = 73 }

// kernel: hindi_char_net_forward.3
= control target key start
LH: loop header
LB: loop body
LE: loop exit
PB: predicated region body
PF: predicated region fallthrough
CT: control target
= control target key end

     0   :  { %20 = vsyncpa [#allocation3], 0  ;;  %s14901_s0 = inlined_call_operand.vmem [shape: bf16[2,4,36,1152], index: 0, kind: input, shape index: {}]   ;;  %s14902_s1 = inlined_call_operand.vmem [shape: bf16[1152,256], index: 1, kind: input, shape index: {}]   ;;  %s14903_s2 = inlined_call_operand.vmem [shape: f32[1,256], index: 2, kind: input, shape index: {}]   ;;  %s14904_s3 = inlined_call_operand.vmem [shape: f32[1,256], index: 3, kind: input, shape index: {}]   ;;  %s14905_s4 = inlined_call_operand.vmem [shape: f32[1,256], index: 4, kind: input, shape index: {}]   ;;  %s14906_s5 = inlined_call_operand.vmem [shape: bf16[256,256], index: 5, kind: input, shape index: {}]   ;;  %s14907_s6 = inlined_call_operand.vmem [shape: f32[1,256], index: 6, kind: input, shape index: {}]   ;;  %s14908_s7 = inlined_call_operand.vmem [shape: f32[1,256], index: 7, kind: input, shape index: {}]   ;;  %s14909_s8 = inlined_call_operand.vmem [shape: f32[1,256], index: 8, kind: input, shape index: {}]   ;;  %s14910_s9 = inlined_call_operand.vmem [shape: bf16[9,256,384], index: 9, kind: input, shape index: {}]   ;;  %s14911_s10 = inlined_call_operand.vmem [shape: f32[1,384], index: 10, kind: input, shape index: {}]   ;;  %s14912_s11 = inlined_call_operand.vmem [shape: f32[1,384], index: 11, kind: input, shape index: {}]   ;;  %s14913_s12 = inlined_call_operand.vmem [shape: f32[1,384], index: 12, kind: input, shape index: {}]   ;;  %s14914_s13 = inlined_call_operand.vmem [shape: bf16[384,128], index: 13, kind: input, shape index: {}]   ;;  %s14915_s14 = inlined_call_operand.vmem [shape: f32[1,128], index: 14, kind: input, shape index: {}]   ;;  %s14916_s15 = inlined_call_operand.hbm [shape: f32[2,1,128], index: 15, kind: output, shape index: {}]  }
   0x1   :  { %22 = vsyncpa [#allocation3 + $0x1], 0  ;;  %s11497_s18 = smov 0   ;;  %s11499_s19 = smov 0  }
   0x2   :  { %s11501_s20 = smov 0   ;;  %s11503_s21 = smov 0  }
   0x3 LB: > { %14985 = sst [smem:[#allocation5_spill]] %s11399_s18  ;;  %s11518_s22 = sadd.s32 4294967295, %s11411_s21   ;;  %s11411_s21 = sphi %s11503_s21, %s15070_s21   ;;  %s11407_s20 = sphi %s11501_s20, %s15072_s20   ;;  %s11403_s19 = sphi %s11499_s19, %s15074_s19   ;;  %s11399_s18 = sphi %s11497_s18, %s15073_s18  }
   0x4   : > { %14986 = sst [smem:[#allocation6_spill]] %s11407_s20  ;;  %s8165_s23 = sadd.s32 4294967294, %s11411_s21  }
   0x5   : > { %s11522_s24 = sadd.s32 1, %s11411_s21   ;;  %s355_s25 = sadd.s32 1, %s11407_s20 }
   0x6   : > { %14987 = sst [smem:[#allocation7_spill]] %s11522_s24  ;;  %s352_s26 = ssub.s32 %s11411_s21, %s11522_s24 }
   0x7   : > { %p365_p0 = scmp.ne.s32.totalorder %s11407_s20, %s11403_s19  ;;  %p353_p1 = scmp.eq.s32.totalorder %s352_s26, 0 }
   0x8   : > { %p366_p2 = scmp.eq.s32.totalorder %s11518_s22, 1  ;;  %p371_p3 = scmp.ne.s32.totalorder %s11403_s19, %s11399_s18 }
   0x9   : > { %p372_p4 = scmp.eq.s32.totalorder %s8165_s23, 1  ;;  %p8168_p7 = scmp.ge.s32.totalorder %s11411_s21, 1 }
   0xa   : > { %s11533_s27 = scalar_select %p353_p1, %s11407_s20, %s355_s25  }
   0xb   : > { %p11535_p5 = por %p366_p2, %p365_p0  ;;  %p11539_p6 = por %p372_p4, %p371_p3 }
   0xc   : > { %14988 = sst [smem:[#allocation8_spill]] %s11533_s27  ;;  %p440_p8 = scmp.lt.s32.totalorder %s11411_s21, 3 }
   0xd   : > { %s14990_s29 = scalar_select %p11539_p6, 1, 0 }
   0xe   : > { %p441_p9 = pnand %p8168_p7, %p440_p8 }
   0xf   : > { %14991 = sst [smem:[#allocation9_spill]] %s14990_s29 }
  0x10   : > { %444 = sbr.rel (%p441_p9) target bundleno = 2034 (0x7f2), region = 80 }
  0x17   : > { %v10083_v0 = vld [vmem:[%s14902_s1 + $0x4] ss:$8 sps:$4 sm:$0xff]   ;;  %v10085_v1 = vld [vmem:[%s14902_s1] ss:$8 sps:$4 sm:$0xff]   ;;  %v10086_v2 = vld [vmem:[%s14902_s1 + $0x14] ss:$8 sps:$4 sm:$0xff]  }
  0x18   : > { %1518 = vmatprep.subr.bf16.mxu0 %v10083_v0  ;;  %2033 = vmatprep.subr.bf16.mxu1 %v10083_v0  ;;  %v10088_v3 = vld [vmem:[%s14902_s1 + $0x10] ss:$8 sps:$4 sm:$0xff]   ;;  %v10089_v4 = vld [vmem:[%s14902_s1 + $0x24] ss:$8 sps:$4 sm:$0xff]   ;;  %v10091_v5 = vld [vmem:[%s14902_s1 + $0x20] ss:$8 sps:$4 sm:$0xff]  }
  0x19   : > { %1519 = vmatpush1.bf16.msra.mxu0 %v10085_v1  ;;  %2034 = vmatpush1.bf16.msra.mxu1 %v10085_v1  ;;  %p487_p10 = scmp.lt.s32.totalorder %s11518_s22, 1  ;;  %v10092_v6 = vld [vmem:[%s14902_s1 + $0x34] ss:$8 sps:$4 sm:$0xff]   ;;  %v10094_v7 = vld [vmem:[%s14902_s1 + $0x30] ss:$8 sps:$4 sm:$0xff]   ;;  %s485_s27 = sand.u32 1, %s11403_s19  }
  0x1a   : > { %1520 = vmatprep.subr.bf16.mxu0 %v10086_v2  ;;  %2035 = vmatprep.subr.bf16.mxu1 %v10086_v2  ;;  %v10095_v8 = vld [vmem:[%s14902_s1 + $0x44] ss:$8 sps:$4 sm:$0xff]   ;;  %v10097_v9 = vld [vmem:[%s14902_s1 + $0x40] ss:$8 sps:$4 sm:$0xff]   ;;  %v10098_v10 = vld [vmem:[%s14902_s1 + $0x54] ss:$8 sps:$4 sm:$0xff]  }
  0x1b   : > { %s488_s30 = scalar_select %p487_p10, %s11518_s22, 1  ;;  %v10100_v11 = vld [vmem:[%s14902_s1 + $0x50] ss:$8 sps:$4 sm:$0xff]   ;;  %v10101_v12 = vld [vmem:[%s14902_s1 + $0x64] ss:$8 sps:$4 sm:$0xff]  }
  0x1c   : > { %v10103_v14 = vld [vmem:[%s14902_s1 + $0x60] ss:$8 sps:$4 sm:$0xff]   ;;  %v10104_v15 = vld [vmem:[%s14902_s1 + $0x74] ss:$8 sps:$4 sm:$0xff]   ;;  %v10106_v17 = vld [vmem:[%s14902_s1 + $0x70] ss:$8 sps:$4 sm:$0xff]  }
  0x1d   : > { %1521 = vmatpush1.bf16.msra.mxu0 %v10088_v3  ;;  %2036 = vmatpush1.bf16.msra.mxu1 %v10088_v3  ;;  %s10040_s25 = smul.u32 720, %s488_s30  ;;  %v10107_v18 = vld [vmem:[%s14902_s1 + $0x84] ss:$8 sps:$4 sm:$0xff]   ;;  %v10109_v19 = vld [vmem:[%s14902_s1 + $0x80] ss:$8 sps:$4 sm:$0xff]   ;;  %s9556_s30 = sshll.u32 %s11518_s22, 4 }
  0x1e   : > { %1522 = vmatprep.subr.bf16.mxu0 %v10089_v4  ;;  %2037 = vmatprep.subr.bf16.mxu1 %v10089_v4  ;;  %v10110_v20 = vld [vmem:[%s14902_s1 + $0x94] ss:$8 sps:$4 sm:$0xff]   ;;  %v10112_v21 = vld [vmem:[%s14902_s1 + $0x90] ss:$8 sps:$4 sm:$0xff]   ;;  %v10113_v22 = vld [vmem:[%s14902_s1 + $0xa4] ss:$8 sps:$4 sm:$0xff]  }
  0x1f   : > { %s11586_s18 = scalar_lea.vmem %s14901_s0, %s10040_s25  ;;  %v10115_v23 = vld [vmem:[%s14902_s1 + $0xa0] ss:$8 sps:$4 sm:$0xff]   ;;  %v10116_v24 = vld [vmem:[%s14902_s1 + $0xb4] ss:$8 sps:$4 sm:$0xff]   ;;  %v10118_v25 = vld [vmem:[%s14902_s1 + $0xb0] ss:$8 sps:$4 sm:$0xff]   ;;  %s14859_s25 = scalar_lea.hbm %s14916_s15, %s9556_s30 }
  0x20   : > { %v10133_v13 = vld [vmem:[%s11586_s18 + $0x4] ss:$36 sps:$4 sm:$0xff]   ;;  %v10138_v16 = vld [vmem:[%s11586_s18 + $0xb8] ss:$36 sps:$4 sm:$0xff]   ;;  %v10173_v39 = vld [vmem:[%s11586_s18 + $0x4c] ss:$36 sps:$4 sm:$0xff]  }
  0x21   : > { %1523 = vmatpush1.bf16.msra.mxu0 %v10091_v5  ;;  %2038 = vmatpush1.bf16.msra.mxu1 %v10091_v5  ;;  %v10119_v26 = vld [vmem:[%s14902_s1 + $0xc4] ss:$8 sps:$4 sm:$0xff]   ;;  %v10121_v27 = vld [vmem:[%s14902_s1 + $0xc0] ss:$8 sps:$4 sm:$0xff]   ;;  %v10122_v28 = vld [vmem:[%s14902_s1 + $0xd4] ss:$8 sps:$4 sm:$0xff]  }
  0x22   : > { %1524 = vmatprep.subr.bf16.mxu0 %v10092_v6  ;;  %2039 = vmatprep.subr.bf16.mxu1 %v10092_v6  ;;  %v10124_v29 = vld [vmem:[%s14902_s1 + $0xd0] ss:$8 sps:$4 sm:$0xff]   ;;  %v10125_v30 = vld [vmem:[%s14902_s1 + $0xe4] ss:$8 sps:$4 sm:$0xff]   ;;  %v10127_v31 = vld [vmem:[%s14902_s1 + $0xe0] ss:$8 sps:$4 sm:$0xff]  }
  0x23   : > { %1550 = vmatprep.mubr.bf16.mxu0 %v10133_v13  ;;  %2065 = vmatprep.mubr.bf16.mxu1 %v10138_v16  ;;  %v10128_v32 = vld [vmem:[%s14902_s1 + $0xf4] ss:$8 sps:$4 sm:$0xff]   ;;  %v10130_v33 = vld [vmem:[%s14902_s1 + $0xf0] ss:$8 sps:$4 sm:$0xff]   ;;  %v10134_v34 = vld [vmem:[%s14902_s1 + $0x104] ss:$8 sps:$4 sm:$0xff]  }
  0x24   : > { %v10131_v35 = vld [vmem:[%s11586_s18] ss:$36 sps:$4 sm:$0xff]   ;;  %v10136_v36 = vld [vmem:[%s11586_s18 + $0xb4] ss:$36 sps:$4 sm:$0xff]   ;;  %v10179_v43 = vld [vmem:[%s11586_s18 + $0x48] ss:$36 sps:$4 sm:$0xff]  }
  0x25   : > { %1525 = vmatpush1.bf16.msra.mxu0 %v10094_v7  ;;  %2040 = vmatpush1.bf16.msra.mxu1 %v10094_v7  ;;  %v10139_v37 = vld [vmem:[%s14902_s1 + $0x100] ss:$8 sps:$4 sm:$0xff]   ;;  %v10140_v38 = vld [vmem:[%s14902_s1 + $0x114] ss:$8 sps:$4 sm:$0xff]   ;;  %v10142_v41 = vld [vmem:[%s14902_s1 + $0x110] ss:$8 sps:$4 sm:$0xff]  }
  0x26   : > { %1526 = vmatprep.subr.bf16.mxu0 %v10095_v8  ;;  %2041 = vmatprep.subr.bf16.mxu1 %v10095_v8  ;;  %v10177_v40 = vld [vmem:[%s11586_s18 + $0x100] ss:$36 sps:$4 sm:$0xff]   ;;  %v658_v45 = vld [vmem:[%s11586_s18 + $0x90] sm:$0x33]  ;;  %s486_s17 = scalar_lea.vmem [#allocation2], %s485_s27  ;;  %s11416_s22 = smov [#allocation2]  }
  0x27   : > { %v10143_v42 = vld [vmem:[%s14902_s1 + $0x124] ss:$8 sps:$4 sm:$0xff]   ;;  %v10181_v44 = vld [vmem:[%s11586_s18 + $0xfc] ss:$36 sps:$4 sm:$0xff]   ;;  %v8189_v49 = vcombine.high %v658_v45, %v658_v45  ;;  %v10148_v51 = vld [vmem:[%s14902_s1 + $0x130] ss:$8 sps:$4 sm:$0xff]   ;;  %v8188_v53 = vcombine.low %v658_v45, %v658_v45 }
  0x28   : > { %v8371_v46 = vld [vmem:[%s11586_s18 + $0x144] sm:$0x33]  ;;  %v10146_v48 = vld [vmem:[%s14902_s1 + $0x134] ss:$8 sps:$4 sm:$0xff]   ;;  %v10197_v57 = vld [vmem:[%s11586_s18 + $0xc] ss:$36 sps:$4 sm:$0xff]  }
  0x29   : > { %1527 = vmatpush1.bf16.msra.mxu0 %v10097_v9  ;;  %2042 = vmatpush1.bf16.msra.mxu1 %v10097_v9  ;;  %v10145_v47 = vld [vmem:[%s14902_s1 + $0x120] ss:$8 sps:$4 sm:$0xff]   ;;  %v8395_v50 = vcombine.high %v8371_v46, %v8371_v46  ;;  %v10149_v52 = vld [vmem:[%s14902_s1 + $0x144] ss:$8 sps:$4 sm:$0xff]   ;;  %v8394_v54 = vcombine.low %v8371_v46, %v8371_v46  ;;  %v10152_v56 = vld [vmem:[%s14902_s1 + $0x154] ss:$8 sps:$4 sm:$0xff]  }
  0x2a   : > { %1528 = vmatprep.subr.bf16.mxu0 %v10098_v10  ;;  %2043 = vmatprep.subr.bf16.mxu1 %v10098_v10  ;;  %v10151_v55 = vld [vmem:[%s14902_s1 + $0x140] ss:$8 sps:$4 sm:$0xff]   ;;  %v10154_v59 = vld [vmem:[%s14902_s1 + $0x150] ss:$8 sps:$4 sm:$0xff]   ;;  %v10155_v60 = vld [vmem:[%s14902_s1 + $0x164] ss:$8 sps:$4 sm:$0xff]  }
  0x2b   : > { %v10202_v58 = vld [vmem:[%s11586_s18 + $0xc0] ss:$36 sps:$4 sm:$0xff]   ;;  %v10158_v62 = vld [vmem:[%s14902_s1 + $0x174] ss:$8 sps:$4 sm:$0xff]   ;;  %v10160_v63 = vld [vmem:[%s14902_s1 + $0x170] ss:$8 sps:$4 sm:$0xff]  }
  0x2c   : > { %v10157_v61 = vld [vmem:[%s14902_s1 + $0x160] ss:$8 sps:$4 sm:$0xff]   ;;  %v10161_v0 = vld [vmem:[%s14902_s1 + $0x184] ss:$8 sps:$4 sm:$0xff]   ;;  %v10164_v2 = vld [vmem:[%s14902_s1 + $0x194] ss:$8 sps:$4 sm:$0xff]  }
  0x2d   : > { %1529 = vmatpush1.bf16.msra.mxu0 %v10100_v11  ;;  %2044 = vmatpush1.bf16.msra.mxu1 %v10100_v11  ;;  %v10163_v1 = vld [vmem:[%s14902_s1 + $0x180] ss:$8 sps:$4 sm:$0xff]   ;;  %v10166_v3 = vld [vmem:[%s14902_s1 + $0x190] ss:$8 sps:$4 sm:$0xff]   ;;  %v10167_v4 = vld [vmem:[%s14902_s1 + $0x1a4] ss:$8 sps:$4 sm:$0xff]  }
  0x2e   : > { %1530 = vmatprep.subr.bf16.mxu0 %v10101_v12  ;;  %2045 = vmatprep.subr.bf16.mxu1 %v10101_v12  ;;  %v10169_v5 = vld [vmem:[%s14902_s1 + $0x1a0] ss:$8 sps:$4 sm:$0xff]   ;;  %v10170_v6 = vld [vmem:[%s14902_s1 + $0x1b4] ss:$8 sps:$4 sm:$0xff]   ;;  %v10172_v7 = vld [vmem:[%s14902_s1 + $0x1b0] ss:$8 sps:$4 sm:$0xff]  }
  0x2f   : > { %v10175_v8 = vld [vmem:[%s14902_s1 + $0x1c4] ss:$8 sps:$4 sm:$0xff]   ;;  %v10180_v9 = vld [vmem:[%s14902_s1 + $0x1c0] ss:$8 sps:$4 sm:$0xff]   ;;  %v10182_v10 = vld [vmem:[%s14902_s1 + $0x1d4] ss:$8 sps:$4 sm:$0xff]  }
  0x30   : > { %v10184_v11 = vld [vmem:[%s14902_s1 + $0x1d0] ss:$8 sps:$4 sm:$0xff]   ;;  %v10186_v12 = vld [vmem:[%s14902_s1 + $0x1e4] ss:$8 sps:$4 sm:$0xff]   ;;  %v10190_v13 = vld [vmem:[%s14902_s1 + $0x1e0] ss:$8 sps:$4 sm:$0xff]  }
  0x31   : > { %1531 = vmatpush1.bf16.msra.mxu0 %v10103_v14  ;;  %2046 = vmatpush1.bf16.msra.mxu1 %v10103_v14  ;;  %v10192_v14 = vld [vmem:[%s14902_s1 + $0x1f4] ss:$8 sps:$4 sm:$0xff]   ;;  %v10198_v16 = vld [vmem:[%s14902_s1 + $0x204] ss:$8 sps:$4 sm:$0xff]   ;;  %v10224_v45 = vld [vmem:[%s14902_s1 + $0x270] ss:$8 sps:$4 sm:$0xff]  }
  0x32   : > { %1532 = vmatprep.subr.bf16.mxu0 %v10104_v15  ;;  %2047 = vmatprep.subr.bf16.mxu1 %v10104_v15  ;;  %v10194_v15 = vld [vmem:[%s14902_s1 + $0x1f0] ss:$8 sps:$4 sm:$0xff]   ;;  %v10225_v46 = vld [vmem:[%s14902_s1 + $0x284] ss:$8 sps:$4 sm:$0xff]   ;;  %s8110_s29 = sshll.u32 %s486_s17, 4  ;;  %s11353_s24 = sshll.u32 %s11416_s22, 4  ;;  %s14861_s29 = int_to_ptr.vmem [resolvable:$true] %s8110_s29  ;;  %s11354_s24 = int_to_ptr.vmem [resolvable:$false] %s11353_s24 }
  0x33   : > { %s11349_s20 = scalar_lea.vmem %s14861_s29, 16  ;;  %s11355_s16 = scalar_lea.vmem %s11354_s24, 32 }
  0x34   : > { %p11350_p11 = scmp.ne.s32.totalorder %s14861_s29, %s11349_s20  ;;  %p11356_p0 = scmp.lt.s32.totalorder %s14861_s29, %s11354_s24 }
  0x35   : > { %1533 = vmatpush1.bf16.msra.mxu0 %v10106_v17  ;;  %2048 = vmatpush1.bf16.msra.mxu1 %v10106_v17  ;;  %v10195_v17 = vld [vmem:[%s11586_s18 + $0x8] ss:$36 sps:$4 sm:$0xff]   ;;  %p11357_p1 = scmp.lt.s32.totalorder %s11355_s16, %s11349_s20 }
  0x36   : > { %1534 = vmatprep.subr.bf16.mxu0 %v10107_v18  ;;  %2049 = vmatprep.subr.bf16.mxu1 %v10107_v18  ;;  %v10200_v18 = vld [vmem:[%s11586_s18 + $0xbc] ss:$36 sps:$4 sm:$0xff]   ;;  %p11351_p12 = pnand %p11350_p11, %p11535_p5 }
  0x37   : > { %p11358_p2 = por %p11357_p1, %p11356_p0 }
  0x38   : > { %p11352_p13 = pneg %p11351_p12 }
  0x39   : > { %1535 = vmatpush1.bf16.msra.mxu0 %v10109_v19  ;;  %2050 = vmatpush1.bf16.msra.mxu1 %v10109_v19  ;;  %v10203_v19 = vld [vmem:[%s14902_s1 + $0x200] ss:$8 sps:$4 sm:$0xff]  }
  0x3a   : > { %1536 = vmatprep.subr.bf16.mxu0 %v10110_v20  ;;  %2051 = vmatprep.subr.bf16.mxu1 %v10110_v20  ;;  %v10204_v20 = vld [vmem:[%s14902_s1 + $0x214] ss:$8 sps:$4 sm:$0xff]   ;;  %p11359_p3 = pnand %p11358_p2, %p11352_p13 }
  0x3d   : > { %1537 = vmatpush1.bf16.msra.mxu0 %v10112_v21  ;;  %2052 = vmatpush1.bf16.msra.mxu1 %v10112_v21  ;;  %v10237_v21 = vld [vmem:[%s11586_s18 + $0x54] ss:$36 sps:$4 sm:$0xff]  }
  0x3e   : > { %1538 = vmatprep.subr.bf16.mxu0 %v10113_v22  ;;  %2053 = vmatprep.subr.bf16.mxu1 %v10113_v22  ;;  %v10206_v22 = vld [vmem:[%s14902_s1 + $0x210] ss:$8 sps:$4 sm:$0xff]  }
  0x41   : > { %1539 = vmatpush1.bf16.msra.mxu0 %v10115_v23  ;;  %2054 = vmatpush1.bf16.msra.mxu1 %v10115_v23  ;;  %v10241_v23 = vld [vmem:[%s11586_s18 + $0x108] ss:$36 sps:$4 sm:$0xff]  }
  0x42   : > { %1540 = vmatprep.subr.bf16.mxu0 %v10116_v24  ;;  %2055 = vmatprep.subr.bf16.mxu1 %v10116_v24  ;;  %v10207_v24 = vld [vmem:[%s14902_s1 + $0x224] ss:$8 sps:$4 sm:$0xff]  }
  0x45   : > { %1541 = vmatpush1.bf16.msra.mxu0 %v10118_v25  ;;  %2056 = vmatpush1.bf16.msra.mxu1 %v10118_v25  ;;  %v10243_v25 = vld [vmem:[%s11586_s18 + $0x50] ss:$36 sps:$4 sm:$0xff]  }
  0x46   : > { %1542 = vmatprep.subr.bf16.mxu0 %v10119_v26  ;;  %2057 = vmatprep.subr.bf16.mxu1 %v10119_v26  ;;  %v10245_v26 = vld [vmem:[%s11586_s18 + $0x104] ss:$36 sps:$4 sm:$0xff]  }
  0x49   : > { %1543 = vmatpush1.bf16.msra.mxu0 %v10121_v27  ;;  %2058 = vmatpush1.bf16.msra.mxu1 %v10121_v27  ;;  %v659_v27 = vld [vmem:[%s11586_s18 + $0x98] sm:$0x33] }
  0x4a   : > { %1544 = vmatprep.subr.bf16.mxu0 %v10122_v28  ;;  %2059 = vmatprep.subr.bf16.mxu1 %v10122_v28  ;;  %v8372_v28 = vld [vmem:[%s11586_s18 + $0x14c] sm:$0x33] }
  0x4d   : > { %1545 = vmatpush1.bf16.msra.mxu0 %v10124_v29  ;;  %2060 = vmatpush1.bf16.msra.mxu1 %v10124_v29  ;;  %v10209_v29 = vld [vmem:[%s14902_s1 + $0x220] ss:$8 sps:$4 sm:$0xff]  }
  0x4e   : > { %1546 = vmatprep.subr.bf16.mxu0 %v10125_v30  ;;  %2061 = vmatprep.subr.bf16.mxu1 %v10125_v30  ;;  %v10210_v30 = vld [vmem:[%s14902_s1 + $0x234] ss:$8 sps:$4 sm:$0xff]  }
  0x51   : > { %1547 = vmatpush1.bf16.msra.mxu0 %v10127_v31  ;;  %2062 = vmatpush1.bf16.msra.mxu1 %v10127_v31  ;;  %v8191_v31 = vcombine.high %v659_v27, %v659_v27 }
  0x52   : > { %1548 = vmatprep.subr.bf16.mxu0 %v10128_v32  ;;  %2063 = vmatprep.subr.bf16.mxu1 %v10128_v32  ;;  %v8397_v32 = vcombine.high %v8372_v28, %v8372_v28 }
  0x55   : > { %1549 = vmatpush1.bf16.msra.mxu0 %v10130_v33  ;;  %2064 = vmatpush1.bf16.msra.mxu1 %v10130_v33  ;;  %v10212_v33 = vld [vmem:[%s14902_s1 + $0x230] ss:$8 sps:$4 sm:$0xff]  }
  0x56   : > { %1579 = vmatprep.subr.bf16.mxu0 %v10134_v34  ;;  %2094 = vmatprep.subr.bf16.mxu1 %v10134_v34  ;;  %v10213_v34 = vld [vmem:[%s14902_s1 + $0x244] ss:$8 sps:$4 sm:$0xff]  }
  0x58   : > { %1551 = vmatmul.mubr.bf16.vlgmr.msra.gmra.mrb[0].mxu0 %v10131_v35  ;;  %2066 = vmatmul.mubr.bf16.vlgmr.msra.gmra.mrb[0].mxu1 %v10136_v36  ;;  %v8190_v35 = vcombine.low %v659_v27, %v659_v27  ;;  %v8396_v36 = vcombine.low %v8372_v28, %v8372_v28  ;;  %v10288_v27 = vld [vmem:[%s14902_s1 + $0x370] ss:$8 sps:$4 sm:$0xff]   ;;  %v10289_v28 = vld [vmem:[%s14902_s1 + $0x384] ss:$8 sps:$4 sm:$0xff]  }
  0x59   : > { %1580 = vmatpush1.bf16.msra.mxu0 %v10139_v37  ;;  %2095 = vmatpush1.bf16.msra.mxu1 %v10139_v37  ;;  %v10215_v37 = vld [vmem:[%s14902_s1 + $0x240] ss:$8 sps:$4 sm:$0xff]  }
  0x5a   : > { %1581 = vmatprep.subr.bf16.mxu0 %v10140_v38  ;;  %2096 = vmatprep.subr.bf16.mxu1 %v10140_v38  ;;  %v10216_v38 = vld [vmem:[%s14902_s1 + $0x254] ss:$8 sps:$4 sm:$0xff]  }
  0x5b   : > { %1560 = vmatprep.mubr.bf16.mxu0 %v10173_v39  ;;  %2075 = vmatprep.mubr.bf16.mxu1 %v10177_v40  ;;  %v10261_v39 = vld [vmem:[%s11586_s18 + $0x14] ss:$36 sps:$4 sm:$0xff]   ;;  %v10266_v40 = vld [vmem:[%s11586_s18 + $0xc8] ss:$36 sps:$4 sm:$0xff]  }
  0x5d   : > { %1582 = vmatpush1.bf16.msra.mxu0 %v10142_v41  ;;  %2097 = vmatpush1.bf16.msra.mxu1 %v10142_v41  ;;  %v10218_v41 = vld [vmem:[%s14902_s1 + $0x250] ss:$8 sps:$4 sm:$0xff]  }
  0x5e   : > { %1583 = vmatprep.subr.bf16.mxu0 %v10143_v42  ;;  %2098 = vmatprep.subr.bf16.mxu1 %v10143_v42  ;;  %v10219_v42 = vld [vmem:[%s14902_s1 + $0x264] ss:$8 sps:$4 sm:$0xff]  }
  0x60   : > { %1561 = vmatmul.mubr.bf16.gmra.mrb[4].mxu0 %v10179_v43  ;;  %2076 = vmatmul.mubr.bf16.gmra.mrb[4].mxu1 %v10181_v44  ;;  %v10221_v43 = vld [vmem:[%s14902_s1 + $0x260] ss:$8 sps:$4 sm:$0xff]   ;;  %v10222_v44 = vld [vmem:[%s14902_s1 + $0x274] ss:$8 sps:$4 sm:$0xff]  }
  0x61   : > { %1584 = vmatpush1.bf16.msra.mxu0 %v10145_v47  ;;  %2099 = vmatpush1.bf16.msra.mxu1 %v10145_v47  ;;  %v10227_v47 = vld [vmem:[%s14902_s1 + $0x280] ss:$8 sps:$4 sm:$0xff]  }
  0x62   : > { %1585 = vmatprep.subr.bf16.mxu0 %v10146_v48  ;;  %2100 = vmatprep.subr.bf16.mxu1 %v10146_v48  ;;  %v10228_v48 = vld [vmem:[%s14902_s1 + $0x294] ss:$8 sps:$4 sm:$0xff]  }
  0x63   : > { %1570 = vmatprep.mubr.bf16.mxu0 %v8189_v49  ;;  %2085 = vmatprep.mubr.bf16.mxu1 %v8395_v50  ;;  %v10230_v49 = vld [vmem:[%s14902_s1 + $0x290] ss:$8 sps:$4 sm:$0xff]   ;;  %v10231_v50 = vld [vmem:[%s14902_s1 + $0x2a4] ss:$8 sps:$4 sm:$0xff]  }
  0x65   : > { %1586 = vmatpush1.bf16.msra.mxu0 %v10148_v51  ;;  %2101 = vmatpush1.bf16.msra.mxu1 %v10148_v51  ;;  %v10233_v51 = vld [vmem:[%s14902_s1 + $0x2a0] ss:$8 sps:$4 sm:$0xff]  }
  0x66   : > { %1587 = vmatprep.subr.bf16.mxu0 %v10149_v52  ;;  %2102 = vmatprep.subr.bf16.mxu1 %v10149_v52  ;;  %v10234_v52 = vld [vmem:[%s14902_s1 + $0x2b4] ss:$8 sps:$4 sm:$0xff]  }
  0x68   : > { %1571 = vmatmul.mubr.bf16.gmra.mrb[8].mxu0 %v8188_v53  ;;  %2086 = vmatmul.mubr.bf16.gmra.mrb[8].mxu1 %v8394_v54  ;;  %v10236_v53 = vld [vmem:[%s14902_s1 + $0x2b0] ss:$8 sps:$4 sm:$0xff]   ;;  %v10239_v54 = vld [vmem:[%s14902_s1 + $0x2c4] ss:$8 sps:$4 sm:$0xff]  }
  0x69   : > { %1588 = vmatpush1.bf16.msra.mxu0 %v10151_v55  ;;  %2103 = vmatpush1.bf16.msra.mxu1 %v10151_v55  ;;  %v10244_v55 = vld [vmem:[%s14902_s1 + $0x2c0] ss:$8 sps:$4 sm:$0xff]  }
  0x6a   : > { %1589 = vmatprep.subr.bf16.mxu0 %v10152_v56  ;;  %2104 = vmatprep.subr.bf16.mxu1 %v10152_v56  ;;  %v10246_v56 = vld [vmem:[%s14902_s1 + $0x2d4] ss:$8 sps:$4 sm:$0xff]  }
  0x6b   : > { %1611 = vmatprep.mubr.bf16.mxu0 %v10197_v57  ;;  %2126 = vmatprep.mubr.bf16.mxu1 %v10202_v58  ;;  %v10248_v57 = vld [vmem:[%s14902_s1 + $0x2d0] ss:$8 sps:$4 sm:$0xff]   ;;  %v10250_v58 = vld [vmem:[%s14902_s1 + $0x2e4] ss:$8 sps:$4 sm:$0xff]  }
  0x6d   : > { %1590 = vmatpush1.bf16.msra.mxu0 %v10154_v59  ;;  %2105 = vmatpush1.bf16.msra.mxu1 %v10154_v59  ;;  %v10254_v59 = vld [vmem:[%s14902_s1 + $0x2e0] ss:$8 sps:$4 sm:$0xff]  }
  0x6e   : > { %1591 = vmatprep.subr.bf16.mxu0 %v10155_v60  ;;  %2106 = vmatprep.subr.bf16.mxu1 %v10155_v60  ;;  %v10256_v60 = vld [vmem:[%s14902_s1 + $0x2f4] ss:$8 sps:$4 sm:$0xff]  }
  0x71   : > { %1592 = vmatpush1.bf16.msra.mxu0 %v10157_v61  ;;  %2107 = vmatpush1.bf16.msra.mxu1 %v10157_v61  ;;  %v10258_v61 = vld [vmem:[%s14902_s1 + $0x2f0] ss:$8 sps:$4 sm:$0xff]  }
  0x72   : > { %1593 = vmatprep.subr.bf16.mxu0 %v10158_v62  ;;  %2108 = vmatprep.subr.bf16.mxu1 %v10158_v62  ;;  %v10262_v62 = vld [vmem:[%s14902_s1 + $0x304] ss:$8 sps:$4 sm:$0xff]  }
  0x75   : > { %1594 = vmatpush1.bf16.msra.mxu0 %v10160_v63  ;;  %2109 = vmatpush1.bf16.msra.mxu1 %v10160_v63  ;;  %v10259_v63 = vld [vmem:[%s11586_s18 + $0x10] ss:$36 sps:$4 sm:$0xff]  }
  0x76   : > { %1595 = vmatprep.subr.bf16.mxu0 %v10161_v0  ;;  %2110 = vmatprep.subr.bf16.mxu1 %v10161_v0  ;;  %v10264_v0 = vld [vmem:[%s11586_s18 + $0xc4] ss:$36 sps:$4 sm:$0xff]  }
  0x79   : > { %1596 = vmatpush1.bf16.msra.mxu0 %v10163_v1  ;;  %2111 = vmatpush1.bf16.msra.mxu1 %v10163_v1  ;;  %v10267_v1 = vld [vmem:[%s14902_s1 + $0x300] ss:$8 sps:$4 sm:$0xff]  }
  0x7a   : > { %1597 = vmatprep.subr.bf16.mxu0 %v10164_v2  ;;  %2112 = vmatprep.subr.bf16.mxu1 %v10164_v2  ;;  %v10268_v2 = vld [vmem:[%s14902_s1 + $0x314] ss:$8 sps:$4 sm:$0xff]  }
  0x7d   : > { %1598 = vmatpush1.bf16.msra.mxu0 %v10166_v3  ;;  %2113 = vmatpush1.bf16.msra.mxu1 %v10166_v3  ;;  %v10301_v3 = vld [vmem:[%s11586_s18 + $0x5c] ss:$36 sps:$4 sm:$0xff]  }
  0x7e   : > { %1599 = vmatprep.subr.bf16.mxu0 %v10167_v4  ;;  %2114 = vmatprep.subr.bf16.mxu1 %v10167_v4  ;;  %v10305_v4 = vld [vmem:[%s11586_s18 + $0x110] ss:$36 sps:$4 sm:$0xff]  }
  0x81   : > { %1600 = vmatpush1.bf16.msra.mxu0 %v10169_v5  ;;  %2115 = vmatpush1.bf16.msra.mxu1 %v10169_v5  ;;  %v10270_v5 = vld [vmem:[%s14902_s1 + $0x310] ss:$8 sps:$4 sm:$0xff]  }
  0x82   : > { %1601 = vmatprep.subr.bf16.mxu0 %v10170_v6  ;;  %2116 = vmatprep.subr.bf16.mxu1 %v10170_v6  ;;  %v10271_v6 = vld [vmem:[%s14902_s1 + $0x324] ss:$8 sps:$4 sm:$0xff]  }
  0x85   : > { %1602 = vmatpush1.bf16.msra.mxu0 %v10172_v7  ;;  %2117 = vmatpush1.bf16.msra.mxu1 %v10172_v7  ;;  %v10307_v7 = vld [vmem:[%s11586_s18 + $0x58] ss:$36 sps:$4 sm:$0xff]  }
  0x86   : > { %1603 = vmatprep.subr.bf16.mxu0 %v10175_v8  ;;  %2118 = vmatprep.subr.bf16.mxu1 %v10175_v8  ;;  %v10309_v8 = vld [vmem:[%s11586_s18 + $0x10c] ss:$36 sps:$4 sm:$0xff]  }
  0x89   : > { %1604 = vmatpush1.bf16.msra.mxu0 %v10180_v9  ;;  %2119 = vmatpush1.bf16.msra.mxu1 %v10180_v9  ;;  %v660_v9 = vld [vmem:[%s11586_s18 + $0xa0] sm:$0x33] }
  0x8a   : > { %1605 = vmatprep.subr.bf16.mxu0 %v10182_v10  ;;  %2120 = vmatprep.subr.bf16.mxu1 %v10182_v10  ;;  %v8373_v10 = vld [vmem:[%s11586_s18 + $0x154] sm:$0x33] }
  0x8d   : > { %1606 = vmatpush1.bf16.msra.mxu0 %v10184_v11  ;;  %2121 = vmatpush1.bf16.msra.mxu1 %v10184_v11  ;;  %v10273_v11 = vld [vmem:[%s14902_s1 + $0x320] ss:$8 sps:$4 sm:$0xff]  }
  0x8e   : > { %1607 = vmatprep.subr.bf16.mxu0 %v10186_v12  ;;  %2122 = vmatprep.subr.bf16.mxu1 %v10186_v12  ;;  %v10274_v12 = vld [vmem:[%s14902_s1 + $0x334] ss:$8 sps:$4 sm:$0xff]  }
  0x91   : > { %1608 = vmatpush1.bf16.msra.mxu0 %v10190_v13  ;;  %2123 = vmatpush1.bf16.msra.mxu1 %v10190_v13  ;;  %v10276_v13 = vld [vmem:[%s14902_s1 + $0x330] ss:$8 sps:$4 sm:$0xff]  }
  0x92   : > { %1609 = vmatprep.subr.bf16.mxu0 %v10192_v14  ;;  %2124 = vmatprep.subr.bf16.mxu1 %v10192_v14  ;;  %v8193_v14 = vcombine.high %v660_v9, %v660_v9 }
  0x95   : > { %1610 = vmatpush1.bf16.msra.mxu0 %v10194_v15  ;;  %2125 = vmatpush1.bf16.msra.mxu1 %v10194_v15  ;;  %v8399_v15 = vcombine.high %v8373_v10, %v8373_v10 }
  0x96   : > { %1640 = vmatprep.subr.bf16.mxu0 %v10198_v16  ;;  %2155 = vmatprep.subr.bf16.mxu1 %v10198_v16  ;;  %v10277_v16 = vld [vmem:[%s14902_s1 + $0x344] ss:$8 sps:$4 sm:$0xff]  }
  0x98   : > { %1612 = vmatmul.mubr.bf16.vlgmr.msra.gmra.mrb[0].mxu0 %v10195_v17  ;;  %2127 = vmatmul.mubr.bf16.vlgmr.msra.gmra.mrb[0].mxu1 %v10200_v18  ;;  %v10279_v17 = vld [vmem:[%s14902_s1 + $0x340] ss:$8 sps:$4 sm:$0xff]   ;;  %v10280_v18 = vld [vmem:[%s14902_s1 + $0x354] ss:$8 sps:$4 sm:$0xff]  }
  0x99   : > { %1641 = vmatpush1.bf16.msra.mxu0 %v10203_v19  ;;  %2156 = vmatpush1.bf16.msra.mxu1 %v10203_v19  ;;  %v8192_v19 = vcombine.low %v660_v9, %v660_v9  ;;  %v10363_v9 = vld [vmem:[%s11586_s18 + $0x20] ss:$36 sps:$4 sm:$0xff]  }
  0x9a   : > { %1642 = vmatprep.subr.bf16.mxu0 %v10204_v20  ;;  %2157 = vmatprep.subr.bf16.mxu1 %v10204_v20  ;;  %v8398_v20 = vcombine.low %v8373_v10, %v8373_v10  ;;  %v10364_v10 = vld [vmem:[%s11586_s18 + $0xd4] ss:$36 sps:$4 sm:$0xff]  }
  0x9b   : > { %1621 = vmatprep.mubr.bf16.mxu0 %v10237_v21  ;;  %2136 = vmatprep.mubr.bf16.mxu1 %v10241_v23  ;;  %v10325_v21 = vld [vmem:[%s11586_s18 + $0x1c] ss:$36 sps:$4 sm:$0xff]   ;;  %v10282_v23 = vld [vmem:[%s14902_s1 + $0x350] ss:$8 sps:$4 sm:$0xff]  }
  0x9d   : > { %1643 = vmatpush1.bf16.msra.mxu0 %v10206_v22  ;;  %2158 = vmatpush1.bf16.msra.mxu1 %v10206_v22  ;;  %v10330_v22 = vld [vmem:[%s11586_s18 + $0xd0] ss:$36 sps:$4 sm:$0xff]  }
  0x9e   : > { %1644 = vmatprep.subr.bf16.mxu0 %v10207_v24  ;;  %2159 = vmatprep.subr.bf16.mxu1 %v10207_v24  ;;  %v10283_v24 = vld [vmem:[%s14902_s1 + $0x364] ss:$8 sps:$4 sm:$0xff]  }
  0xa0   : > { %1622 = vmatmul.mubr.bf16.gmra.mrb[4].mxu0 %v10243_v25  ;;  %2137 = vmatmul.mubr.bf16.gmra.mrb[4].mxu1 %v10245_v26  ;;  %v10285_v25 = vld [vmem:[%s14902_s1 + $0x360] ss:$8 sps:$4 sm:$0xff]   ;;  %v10286_v26 = vld [vmem:[%s14902_s1 + $0x374] ss:$8 sps:$4 sm:$0xff]  }
  0xa1   : > { %1645 = vmatpush1.bf16.msra.mxu0 %v10209_v29  ;;  %2160 = vmatpush1.bf16.msra.mxu1 %v10209_v29  ;;  %v10291_v29 = vld [vmem:[%s14902_s1 + $0x380] ss:$8 sps:$4 sm:$0xff]  }
  0xa2   : > { %1646 = vmatprep.subr.bf16.mxu0 %v10210_v30  ;;  %2161 = vmatprep.subr.bf16.mxu1 %v10210_v30  ;;  %v10292_v30 = vld [vmem:[%s14902_s1 + $0x394] ss:$8 sps:$4 sm:$0xff]  }
  0xa3   : > { %1631 = vmatprep.mubr.bf16.mxu0 %v8191_v31  ;;  %2146 = vmatprep.mubr.bf16.mxu1 %v8397_v32  ;;  %v10294_v31 = vld [vmem:[%s14902_s1 + $0x390] ss:$8 sps:$4 sm:$0xff]   ;;  %v10295_v32 = vld [vmem:[%s14902_s1 + $0x3a4] ss:$8 sps:$4 sm:$0xff]  }
  0xa5   : > { %1647 = vmatpush1.bf16.msra.mxu0 %v10212_v33  ;;  %2162 = vmatpush1.bf16.msra.mxu1 %v10212_v33  ;;  %v10297_v33 = vld [vmem:[%s14902_s1 + $0x3a0] ss:$8 sps:$4 sm:$0xff]  }
  0xa6   : > { %1648 = vmatprep.subr.bf16.mxu0 %v10213_v34  ;;  %2163 = vmatprep.subr.bf16.mxu1 %v10213_v34  ;;  %v10298_v34 = vld [vmem:[%s14902_s1 + $0x3b4] ss:$8 sps:$4 sm:$0xff]  }
  0xa8   : > { %1632 = vmatmul.mubr.bf16.gmra.mrb[8].mxu0 %v8190_v35  ;;  %2147 = vmatmul.mubr.bf16.gmra.mrb[8].mxu1 %v8396_v36  ;;  %v10300_v35 = vld [vmem:[%s14902_s1 + $0x3b0] ss:$8 sps:$4 sm:$0xff]   ;;  %v10303_v36 = vld [vmem:[%s14902_s1 + $0x3c4] ss:$8 sps:$4 sm:$0xff]  }
  0xa9   : > { %1649 = vmatpush1.bf16.msra.mxu0 %v10215_v37  ;;  %2164 = vmatpush1.bf16.msra.mxu1 %v10215_v37  ;;  %v10308_v37 = vld [vmem:[%s14902_s1 + $0x3c0] ss:$8 sps:$4 sm:$0xff]  }
  0xaa   : > { %1650 = vmatprep.subr.bf16.mxu0 %v10216_v38  ;;  %2165 = vmatprep.subr.bf16.mxu1 %v10216_v38  ;;  %v10310_v38 = vld [vmem:[%s14902_s1 + $0x3d4] ss:$8 sps:$4 sm:$0xff]  }
  0xab   : > { %1672 = vmatprep.mubr.bf16.mxu0 %v10261_v39  ;;  %2187 = vmatprep.mubr.bf16.mxu1 %v10266_v40  ;;  %v10312_v39 = vld [vmem:[%s14902_s1 + $0x3d0] ss:$8 sps:$4 sm:$0xff]   ;;  %v10314_v40 = vld [vmem:[%s14902_s1 + $0x3e4] ss:$8 sps:$4 sm:$0xff]  }
  0xad   : > { %1651 = vmatpush1.bf16.msra.mxu0 %v10218_v41  ;;  %2166 = vmatpush1.bf16.msra.mxu1 %v10218_v41  ;;  %v10318_v41 = vld [vmem:[%s14902_s1 + $0x3e0] ss:$8 sps:$4 sm:$0xff]  }
  0xae   : > { %1652 = vmatprep.subr.bf16.mxu0 %v10219_v42  ;;  %2167 = vmatprep.subr.bf16.mxu1 %v10219_v42  ;;  %v10320_v42 = vld [vmem:[%s14902_s1 + $0x3f4] ss:$8 sps:$4 sm:$0xff]  }
  0xb1   : > { %1653 = vmatpush1.bf16.msra.mxu0 %v10221_v43  ;;  %2168 = vmatpush1.bf16.msra.mxu1 %v10221_v43  ;;  %v10322_v43 = vld [vmem:[%s14902_s1 + $0x3f0] ss:$8 sps:$4 sm:$0xff]  }
  0xb2   : > { %1654 = vmatprep.subr.bf16.mxu0 %v10222_v44  ;;  %2169 = vmatprep.subr.bf16.mxu1 %v10222_v44  ;;  %v10326_v44 = vld [vmem:[%s14902_s1 + $0x404] ss:$8 sps:$4 sm:$0xff]  }
  0xb5   : > { %1655 = vmatpush1.bf16.msra.mxu0 %v10224_v45  ;;  %2170 = vmatpush1.bf16.msra.mxu1 %v10224_v45  ;;  %v10323_v45 = vld [vmem:[%s11586_s18 + $0x18] ss:$36 sps:$4 sm:$0xff]  }
  0xb6   : > { %1656 = vmatprep.subr.bf16.mxu0 %v10225_v46  ;;  %2171 = vmatprep.subr.bf16.mxu1 %v10225_v46  ;;  %v10328_v46 = vld [vmem:[%s11586_s18 + $0xcc] ss:$36 sps:$4 sm:$0xff]  }
  0xb9   : > { %1657 = vmatpush1.bf16.msra.mxu0 %v10227_v47  ;;  %2172 = vmatpush1.bf16.msra.mxu1 %v10227_v47  ;;  %v10331_v47 = vld [vmem:[%s14902_s1 + $0x400] ss:$8 sps:$4 sm:$0xff]  }
  0xba   : > { %1658 = vmatprep.subr.bf16.mxu0 %v10228_v48  ;;  %2173 = vmatprep.subr.bf16.mxu1 %v10228_v48  ;;  %v10332_v48 = vld [vmem:[%s14902_s1 + $0x414] ss:$8 sps:$4 sm:$0xff]  }
  0xbd   : > { %1659 = vmatpush1.bf16.msra.mxu0 %v10230_v49  ;;  %2174 = vmatpush1.bf16.msra.mxu1 %v10230_v49  ;;  %v10341_v49 = vld [vmem:[%s11586_s18 + $0x64] ss:$36 sps:$4 sm:$0xff]  }
  0xbe   : > { %1660 = vmatprep.subr.bf16.mxu0 %v10231_v50  ;;  %2175 = vmatprep.subr.bf16.mxu1 %v10231_v50  ;;  %v10343_v50 = vld [vmem:[%s11586_s18 + $0x118] ss:$36 sps:$4 sm:$0xff]  }
  0xc1   : > { %1661 = vmatpush1.bf16.msra.mxu0 %v10233_v51  ;;  %2176 = vmatpush1.bf16.msra.mxu1 %v10233_v51  ;;  %v10334_v51 = vld [vmem:[%s14902_s1 + $0x410] ss:$8 sps:$4 sm:$0xff]  }
  0xc2   : > { %1662 = vmatprep.subr.bf16.mxu0 %v10234_v52  ;;  %2177 = vmatprep.subr.bf16.mxu1 %v10234_v52  ;;  %v10335_v52 = vld [vmem:[%s14902_s1 + $0x424] ss:$8 sps:$4 sm:$0xff]  }
  0xc5   : > { %1663 = vmatpush1.bf16.msra.mxu0 %v10236_v53  ;;  %2178 = vmatpush1.bf16.msra.mxu1 %v10236_v53  ;;  %v10345_v53 = vld [vmem:[%s11586_s18 + $0x60] ss:$36 sps:$4 sm:$0xff]  }
  0xc6   : > { %1664 = vmatprep.subr.bf16.mxu0 %v10239_v54  ;;  %2179 = vmatprep.subr.bf16.mxu1 %v10239_v54  ;;  %v10348_v54 = vld [vmem:[%s11586_s18 + $0x114] ss:$36 sps:$4 sm:$0xff]  }
  0xc9   : > { %1665 = vmatpush1.bf16.msra.mxu0 %v10244_v55  ;;  %2180 = vmatpush1.bf16.msra.mxu1 %v10244_v55  ;;  %v661_v55 = vld [vmem:[%s11586_s18 + $0xa8] sm:$0x33] }
  0xca   : > { %1666 = vmatprep.subr.bf16.mxu0 %v10246_v56  ;;  %2181 = vmatprep.subr.bf16.mxu1 %v10246_v56  ;;  %v8374_v56 = vld [vmem:[%s11586_s18 + $0x15c] sm:$0x33] }
  0xcd   : > { %1667 = vmatpush1.bf16.msra.mxu0 %v10248_v57  ;;  %2182 = vmatpush1.bf16.msra.mxu1 %v10248_v57  ;;  %v10337_v57 = vld [vmem:[%s14902_s1 + $0x420] ss:$8 sps:$4 sm:$0xff]  }
  0xce   : > { %1668 = vmatprep.subr.bf16.mxu0 %v10250_v58  ;;  %2183 = vmatprep.subr.bf16.mxu1 %v10250_v58  ;;  %v10338_v58 = vld [vmem:[%s14902_s1 + $0x434] ss:$8 sps:$4 sm:$0xff]  }
  0xd1   : > { %1669 = vmatpush1.bf16.msra.mxu0 %v10254_v59  ;;  %2184 = vmatpush1.bf16.msra.mxu1 %v10254_v59  ;;  %v10340_v59 = vld [vmem:[%s14902_s1 + $0x430] ss:$8 sps:$4 sm:$0xff]  }
  0xd2   : > { %1670 = vmatprep.subr.bf16.mxu0 %v10256_v60  ;;  %2185 = vmatprep.subr.bf16.mxu1 %v10256_v60  ;;  %v8195_v60 = vcombine.high %v661_v55, %v661_v55 }
  0xd5   : > { %1671 = vmatpush1.bf16.msra.mxu0 %v10258_v61  ;;  %2186 = vmatpush1.bf16.msra.mxu1 %v10258_v61  ;;  %v8401_v61 = vcombine.high %v8374_v56, %v8374_v56 }
  0xd6   : > { %1701 = vmatprep.subr.bf16.mxu0 %v10262_v62  ;;  %2216 = vmatprep.subr.bf16.mxu1 %v10262_v62  ;;  %v10346_v62 = vld [vmem:[%s14902_s1 + $0x444] ss:$8 sps:$4 sm:$0xff]  }
  0xd8   : > { %1673 = vmatmul.mubr.bf16.vlgmr.msra.gmra.mrb[0].mxu0 %v10259_v63  ;;  %2188 = vmatmul.mubr.bf16.vlgmr.msra.gmra.mrb[0].mxu1 %v10264_v0  ;;  %v8194_v63 = vcombine.low %v661_v55, %v661_v55  ;;  %v8400_v0 = vcombine.low %v8374_v56, %v8374_v56  ;;  %v11239_v55 = vld [vmem:[%s14902_s1 + $0x114] ss:$8 sps:$4 sm:$0xff]  }
  0xd9   : > { %1702 = vmatpush1.bf16.msra.mxu0 %v10267_v1  ;;  %2217 = vmatpush1.bf16.msra.mxu1 %v10267_v1  ;;  %v10349_v1 = vld [vmem:[%s14902_s1 + $0x440] ss:$8 sps:$4 sm:$0xff]   ;;  %v10379_v56 = vld [vmem:[%s11586_s18 + $0x1b0] ss:$36 sps:$4 sm:$0xff]  }
  0xda   : > { %1703 = vmatprep.subr.bf16.mxu0 %v10268_v2  ;;  %2218 = vmatprep.subr.bf16.mxu1 %v10268_v2  ;;  %v10350_v2 = vld [vmem:[%s14902_s1 + $0x454] ss:$8 sps:$4 sm:$0xff]  }
  0xdb   : > { %1682 = vmatprep.mubr.bf16.mxu0 %v10301_v3  ;;  %2197 = vmatprep.mubr.bf16.mxu1 %v10305_v4  ;;  %v10352_v3 = vld [vmem:[%s14902_s1 + $0x450] ss:$8 sps:$4 sm:$0xff]   ;;  %v10356_v4 = vld [vmem:[%s14902_s1 + $0x464] ss:$8 sps:$4 sm:$0xff]  }
  0xdd   : > { %1704 = vmatpush1.bf16.msra.mxu0 %v10270_v5  ;;  %2219 = vmatpush1.bf16.msra.mxu1 %v10270_v5  ;;  %v11413_v5 = vmov 0  }
  0xde   : > { %1705 = vmatprep.subr.bf16.mxu0 %v10271_v6  ;;  %2220 = vmatprep.subr.bf16.mxu1 %v10271_v6  ;;  %v10359_v6 = vld [vmem:[%s14902_s1 + $0x460] ss:$8 sps:$4 sm:$0xff]  }
  0xe0   : > { %1683 = vmatmul.mubr.bf16.gmra.mrb[4].mxu0 %v10307_v7  ;;  %2198 = vmatmul.mubr.bf16.gmra.mrb[4].mxu1 %v10309_v8  ;;  %v10360_v7 = vld [vmem:[%s14902_s1 + $0x474] ss:$8 sps:$4 sm:$0xff]   ;;  %v10362_v8 = vld [vmem:[%s14902_s1 + $0x470] ss:$8 sps:$4 sm:$0xff]  }
  0xe1   : > { %1706 = vmatpush1.bf16.msra.mxu0 %v10273_v11  ;;  %2221 = vmatpush1.bf16.msra.mxu1 %v10273_v11  ;;  %v11205_v11 = vld [vmem:[%s14902_s1 + $0x4] ss:$8 sps:$4 sm:$0xff]  }
  0xe2   : > { %1707 = vmatprep.subr.bf16.mxu0 %v10274_v12  ;;  %2222 = vmatprep.subr.bf16.mxu1 %v10274_v12  ;;  %v11206_v12 = vld [vmem:[%s14902_s1] ss:$8 sps:$4 sm:$0xff]  }
  0xe3   : > { %1692 = vmatprep.mubr.bf16.mxu0 %v8193_v14  ;;  %2207 = vmatprep.mubr.bf16.mxu1 %v8399_v15  ;;  %v10365_v14 = vld [vmem:[%s11586_s18 + $0x68] ss:$36 sps:$4 sm:$0xff]   ;;  %v10366_v15 = vld [vmem:[%s11586_s18 + $0x11c] ss:$36 sps:$4 sm:$0xff]  }
  0xe5   : > { %1708 = vmatpush1.bf16.msra.mxu0 %v10276_v13  ;;  %2223 = vmatpush1.bf16.msra.mxu1 %v10276_v13  ;;  %v11207_v13 = vld [vmem:[%s14902_s1 + $0x14] ss:$8 sps:$4 sm:$0xff]  }
  0xe6   : > { %1709 = vmatprep.subr.bf16.mxu0 %v10277_v16  ;;  %2224 = vmatprep.subr.bf16.mxu1 %v10277_v16  ;;  %v11208_v16 = vld [vmem:[%s14902_s1 + $0x10] ss:$8 sps:$4 sm:$0xff]  }
  0xe8   : > { %1693 = vmatmul.mubr.bf16.gmra.mrb[8].mxu0 %v8192_v19  ;;  %2208 = vmatmul.mubr.bf16.gmra.mrb[8].mxu1 %v8398_v20  ;;  %v11211_v19 = vld [vmem:[%s14902_s1 + $0x34] ss:$8 sps:$4 sm:$0xff]   ;;  %v10367_v20 = vld [vmem:[%s11586_s18 + $0xb0] ss:$0 sps:$4 sm:$0x33]  }
  0xe9   : > { %1710 = vmatpush1.bf16.msra.mxu0 %v10279_v17  ;;  %2225 = vmatpush1.bf16.msra.mxu1 %v10279_v17  ;;  %v11209_v17 = vld [vmem:[%s14902_s1 + $0x24] ss:$8 sps:$4 sm:$0xff]  }
  0xea   : > { %1711 = vmatprep.subr.bf16.mxu0 %v10280_v18  ;;  %2226 = vmatprep.subr.bf16.mxu1 %v10280_v18  ;;  %v11210_v18 = vld [vmem:[%s14902_s1 + $0x20] ss:$8 sps:$4 sm:$0xff]  }
  0xeb   : > { %1733 = vmatprep.mubr.bf16.mxu0 %v10325_v21  ;;  %2248 = vmatprep.mubr.bf16.mxu1 %v10330_v22  ;;  %v10368_v21 = vld [vmem:[%s11586_s18 + $0x164] ss:$0 sps:$4 sm:$0x33]   ;;  %v11212_v22 = vld [vmem:[%s14902_s1 + $0x30] ss:$8 sps:$4 sm:$0xff]  }
  0xed   : > { %1712 = vmatpush1.bf16.msra.mxu0 %v10282_v23  ;;  %2227 = vmatpush1.bf16.msra.mxu1 %v10282_v23  ;;  %v10371_v23 = vld [vmem:[%s11586_s18 + $0x16c] ss:$36 sps:$4 sm:$0xff]  }
  0xee   : > { %1713 = vmatprep.subr.bf16.mxu0 %v10283_v24  ;;  %2228 = vmatprep.subr.bf16.mxu1 %v10283_v24  ;;  %v10374_v24 = vld [vmem:[%s11586_s18 + $0x220] ss:$36 sps:$4 sm:$0xff]  }
  0xf1   : > { %1714 = vmatpush1.bf16.msra.mxu0 %v10285_v25  ;;  %2229 = vmatpush1.bf16.msra.mxu1 %v10285_v25  ;;  %v11213_v25 = vld [vmem:[%s14902_s1 + $0x44] ss:$8 sps:$4 sm:$0xff]  }
  0xf2   : > { %1715 = vmatprep.subr.bf16.mxu0 %v10286_v26  ;;  %2230 = vmatprep.subr.bf16.mxu1 %v10286_v26  ;;  %v11214_v26 = vld [vmem:[%s14902_s1 + $0x40] ss:$8 sps:$4 sm:$0xff]  }
  0xf5   : > { %1716 = vmatpush1.bf16.msra.mxu0 %v10288_v27  ;;  %2231 = vmatpush1.bf16.msra.mxu1 %v10288_v27  ;;  %v11215_v27 = vld [vmem:[%s14902_s1 + $0x54] ss:$8 sps:$4 sm:$0xff]  }
  0xf6   : > { %1717 = vmatprep.subr.bf16.mxu0 %v10289_v28  ;;  %2232 = vmatprep.subr.bf16.mxu1 %v10289_v28  ;;  %v11216_v28 = vld [vmem:[%s14902_s1 + $0x50] ss:$8 sps:$4 sm:$0xff]  }
  0xf9   : > { %1718 = vmatpush1.bf16.msra.mxu0 %v10291_v29  ;;  %2233 = vmatpush1.bf16.msra.mxu1 %v10291_v29  ;;  %v11217_v29 = vld [vmem:[%s14902_s1 + $0x64] ss:$8 sps:$4 sm:$0xff]  }
  0xfa   : > { %1719 = vmatprep.subr.bf16.mxu0 %v10292_v30  ;;  %2234 = vmatprep.subr.bf16.mxu1 %v10292_v30  ;;  %v11218_v30 = vld [vmem:[%s14902_s1 + $0x60] ss:$8 sps:$4 sm:$0xff]  }
  0xfd   : > { %1720 = vmatpush1.bf16.msra.mxu0 %v10294_v31  ;;  %2235 = vmatpush1.bf16.msra.mxu1 %v10294_v31  ;;  %v11219_v31 = vld [vmem:[%s14902_s1 + $0x74] ss:$8 sps:$4 sm:$0xff]  }
  0xfe   : > { %1721 = vmatprep.subr.bf16.mxu0 %v10295_v32  ;;  %2236 = vmatprep.subr.bf16.mxu1 %v10295_v32  ;;  %v11220_v32 = vld [vmem:[%s14902_s1 + $0x70] ss:$8 sps:$4 sm:$0xff]  }
 0x101   : > { %1722 = vmatpush1.bf16.msra.mxu0 %v10297_v33  ;;  %2237 = vmatpush1.bf16.msra.mxu1 %v10297_v33  ;;  %v11221_v33 = vld [vmem:[%s14902_s1 + $0x84] ss:$8 sps:$4 sm:$0xff]  }
 0x102   : > { %1723 = vmatprep.subr.bf16.mxu0 %v10298_v34  ;;  %2238 = vmatprep.subr.bf16.mxu1 %v10298_v34  ;;  %v11222_v34 = vld [vmem:[%s14902_s1 + $0x80] ss:$8 sps:$4 sm:$0xff]  }
 0x105   : > { %1724 = vmatpush1.bf16.msra.mxu0 %v10300_v35  ;;  %2239 = vmatpush1.bf16.msra.mxu1 %v10300_v35  ;;  %v11223_v35 = vld [vmem:[%s14902_s1 + $0x94] ss:$8 sps:$4 sm:$0xff]  }
 0x106   : > { %1725 = vmatprep.subr.bf16.mxu0 %v10303_v36  ;;  %2240 = vmatprep.subr.bf16.mxu1 %v10303_v36  ;;  %v11224_v36 = vld [vmem:[%s14902_s1 + $0x90] ss:$8 sps:$4 sm:$0xff]  }
 0x109   : > { %1726 = vmatpush1.bf16.msra.mxu0 %v10308_v37  ;;  %2241 = vmatpush1.bf16.msra.mxu1 %v10308_v37  ;;  %v11225_v37 = vld [vmem:[%s14902_s1 + $0xa4] ss:$8 sps:$4 sm:$0xff]  }
 0x10a   : > { %1727 = vmatprep.subr.bf16.mxu0 %v10310_v38  ;;  %2242 = vmatprep.subr.bf16.mxu1 %v10310_v38  ;;  %v11226_v38 = vld [vmem:[%s14902_s1 + $0xa0] ss:$8 sps:$4 sm:$0xff]  }
 0x10d   : > { %1728 = vmatpush1.bf16.msra.mxu0 %v10312_v39  ;;  %2243 = vmatpush1.bf16.msra.mxu1 %v10312_v39  ;;  %v11227_v39 = vld [vmem:[%s14902_s1 + $0xb4] ss:$8 sps:$4 sm:$0xff]  }
 0x10e   : > { %1729 = vmatprep.subr.bf16.mxu0 %v10314_v40  ;;  %2244 = vmatprep.subr.bf16.mxu1 %v10314_v40  ;;  %v11228_v40 = vld [vmem:[%s14902_s1 + $0xb0] ss:$8 sps:$4 sm:$0xff]  }
 0x111   : > { %1730 = vmatpush1.bf16.msra.mxu0 %v10318_v41  ;;  %2245 = vmatpush1.bf16.msra.mxu1 %v10318_v41  ;;  %v11229_v41 = vld [vmem:[%s14902_s1 + $0xc4] ss:$8 sps:$4 sm:$0xff]  }
 0x112   : > { %1731 = vmatprep.subr.bf16.mxu0 %v10320_v42  ;;  %2246 = vmatprep.subr.bf16.mxu1 %v10320_v42  ;;  %v11230_v42 = vld [vmem:[%s14902_s1 + $0xc0] ss:$8 sps:$4 sm:$0xff]  }
 0x115   : > { %1732 = vmatpush1.bf16.msra.mxu0 %v10322_v43  ;;  %2247 = vmatpush1.bf16.msra.mxu1 %v10322_v43  ;;  %v11231_v43 = vld [vmem:[%s14902_s1 + $0xd4] ss:$8 sps:$4 sm:$0xff]  }
 0x116   : > { %1762 = vmatprep.subr.bf16.mxu0 %v10326_v44  ;;  %2277 = vmatprep.subr.bf16.mxu1 %v10326_v44  ;;  %v11232_v44 = vld [vmem:[%s14902_s1 + $0xd0] ss:$8 sps:$4 sm:$0xff]  }
 0x118   : > { %1734 = vmatmul.mubr.bf16.vlgmr.msra.gmra.mrb[0].mxu0 %v10323_v45  ;;  %2249 = vmatmul.mubr.bf16.vlgmr.msra.gmra.mrb[0].mxu1 %v10328_v46  ;;  %v11233_v45 = vld [vmem:[%s14902_s1 + $0xe4] ss:$8 sps:$4 sm:$0xff]   ;;  %v11234_v46 = vld [vmem:[%s14902_s1 + $0xe0] ss:$8 sps:$4 sm:$0xff]  }
 0x119   : > { %1763 = vmatpush1.bf16.msra.mxu0 %v10331_v47  ;;  %2278 = vmatpush1.bf16.msra.mxu1 %v10331_v47  ;;  %v11235_v47 = vld [vmem:[%s14902_s1 + $0xf4] ss:$8 sps:$4 sm:$0xff]  }
 0x11a   : > { %1764 = vmatprep.subr.bf16.mxu0 %v10332_v48  ;;  %2279 = vmatprep.subr.bf16.mxu1 %v10332_v48  ;;  %v10369_v48 = vld [vmem:[%s11586_s18 + $0x168] ss:$36 sps:$4 sm:$0xff]  }
 0x11b   : > { %1743 = vmatprep.mubr.bf16.mxu0 %v10341_v49  ;;  %2258 = vmatprep.mubr.bf16.mxu1 %v10343_v50  ;;  %v10372_v49 = vld [vmem:[%s11586_s18 + $0x21c] ss:$36 sps:$4 sm:$0xff]   ;;  %v11236_v50 = vld [vmem:[%s14902_s1 + $0xf0] ss:$8 sps:$4 sm:$0xff]  }
 0x11d   : > { %1765 = vmatpush1.bf16.msra.mxu0 %v10334_v51  ;;  %2280 = vmatpush1.bf16.msra.mxu1 %v10334_v51  ;;  %v11237_v51 = vld [vmem:[%s14902_s1 + $0x104] ss:$8 sps:$4 sm:$0xff]  }
 0x11e   : > { %1766 = vmatprep.subr.bf16.mxu0 %v10335_v52  ;;  %2281 = vmatprep.subr.bf16.mxu1 %v10335_v52  ;;  %v10375_v52 = vld [vmem:[%s11586_s18 + $0x1b4] ss:$36 sps:$4 sm:$0xff]  }
 0x120   : > { %1744 = vmatmul.mubr.bf16.gmra.mrb[4].mxu0 %v10345_v53  ;;  %2259 = vmatmul.mubr.bf16.gmra.mrb[4].mxu1 %v10348_v54  ;;  %v10377_v53 = vld [vmem:[%s11586_s18 + $0x268] ss:$36 sps:$4 sm:$0xff]  }
 0x121   : > { %1767 = vmatpush1.bf16.msra.mxu0 %v10337_v57  ;;  %2282 = vmatpush1.bf16.msra.mxu1 %v10337_v57  ;;  %v11238_v54 = vld [vmem:[%s14902_s1 + $0x100] ss:$8 sps:$4 sm:$0xff]  }
 0x122   : > { %1768 = vmatprep.subr.bf16.mxu0 %v10338_v58  ;;  %2283 = vmatprep.subr.bf16.mxu1 %v10338_v58  ;;  %v10380_v57 = vld [vmem:[%s11586_s18 + $0x264] ss:$36 sps:$4 sm:$0xff]   ;;  %v8433_v58 = vld [vmem:[%s11586_s18 + $0x1f8] sm:$0x33] }
 0x123   : > { %1753 = vmatprep.mubr.bf16.mxu0 %v8195_v60  ;;  %2268 = vmatprep.mubr.bf16.mxu1 %v8401_v61  ;;  %v11240_v60 = vld [vmem:[%s14902_s1 + $0x110] ss:$8 sps:$4 sm:$0xff]   ;;  %v11241_v61 = vld [vmem:[%s14902_s1 + $0x124] ss:$8 sps:$4 sm:$0xff]  }
 0x125   : > { %1769 = vmatpush1.bf16.msra.mxu0 %v10340_v59  ;;  %2284 = vmatpush1.bf16.msra.mxu1 %v10340_v59  ;;  %v8495_v59 = vld [vmem:[%s11586_s18 + $0x2ac] sm:$0x33] }
 0x126   : > { %1770 = vmatprep.subr.bf16.mxu0 %v10346_v62  ;;  %2285 = vmatprep.subr.bf16.mxu1 %v10346_v62  ;;  %v8457_v62 = vcombine.high %v8433_v58, %v8433_v58 }
 0x128   : > { %1754 = vmatmul.mubr.bf16.gmra.mrb[8].mxu0 %v8194_v63  ;;  %2269 = vmatmul.mubr.bf16.gmra.mrb[8].mxu1 %v8400_v0  ;;  %v8519_v63 = vcombine.high %v8495_v59, %v8495_v59  ;;  %v11242_v0 = vld [vmem:[%s14902_s1 + $0x120] ss:$8 sps:$4 sm:$0xff]  }
 0x129   : > { %1771 = vmatpush1.bf16.msra.mxu0 %v10349_v1  ;;  %2286 = vmatpush1.bf16.msra.mxu1 %v10349_v1  ;;  %v11243_v1 = vld [vmem:[%s14902_s1 + $0x134] ss:$8 sps:$4 sm:$0xff]  }
 0x12a   : > { %1772 = vmatprep.subr.bf16.mxu0 %v10350_v2  ;;  %2287 = vmatprep.subr.bf16.mxu1 %v10350_v2  ;;  %v8456_v2 = vcombine.low %v8433_v58, %v8433_v58  ;;  %v11281_v58 = vld [vmem:[%s14902_s1 + $0x264] ss:$8 sps:$4 sm:$0xff]  }
 0x12b   : > { %1794 = vmatprep.mubr.bf16.mxu0 %v11413_v5  ;;  %2309 = vmatprep.mubr.bf16.mxu1 %v11413_v5 }
 0x12d   : > { %1773 = vmatpush1.bf16.msra.mxu0 %v10352_v3  ;;  %2288 = vmatpush1.bf16.msra.mxu1 %v10352_v3  ;;  %v8518_v3 = vcombine.low %v8495_v59, %v8495_v59  ;;  %v11282_v59 = vld [vmem:[%s14902_s1 + $0x260] ss:$8 sps:$4 sm:$0xff]  }
 0x12e   : > { %1774 = vmatprep.subr.bf16.mxu0 %v10356_v4  ;;  %2289 = vmatprep.subr.bf16.mxu1 %v10356_v4  ;;  %v11244_v4 = vld [vmem:[%s14902_s1 + $0x130] ss:$8 sps:$4 sm:$0xff]  }
 0x131   : > { %1775 = vmatpush1.bf16.msra.mxu0 %v10359_v6  ;;  %2290 = vmatpush1.bf16.msra.mxu1 %v10359_v6  ;;  %v11245_v6 = vld [vmem:[%s14902_s1 + $0x144] ss:$8 sps:$4 sm:$0xff]  }
 0x132   : > { %1776 = vmatprep.subr.bf16.mxu0 %v10360_v7  ;;  %2291 = vmatprep.subr.bf16.mxu1 %v10360_v7  ;;  %v10387_v7 = vld [vmem:[%s11586_s18 + $0x174] ss:$36 sps:$4 sm:$0xff]  }
 0x135   : > { %1777 = vmatpush1.bf16.msra.mxu0 %v10362_v8  ;;  %2292 = vmatpush1.bf16.msra.mxu1 %v10362_v8  ;;  %v10390_v8 = vld [vmem:[%s11586_s18 + $0x228] ss:$36 sps:$4 sm:$0xff]  }
 0x136   : > { %2558 = vmatprep.subr.bf16.mxu0 %v11205_v11  ;;  %3083 = vmatprep.subr.bf16.mxu1 %v11205_v11  ;;  %v11248_v11 = vld [vmem:[%s14902_s1 + $0x150] ss:$8 sps:$4 sm:$0xff]  }
 0x138   : > { %1795 = vmatmul.mubr.bf16.vlgmr.msra.gmra.mrb[0].mxu0 %v10363_v9  ;;  %2310 = vmatmul.mubr.bf16.vlgmr.msra.gmra.mrb[0].mxu1 %v10364_v10  ;;  %v11246_v9 = vld [vmem:[%s14902_s1 + $0x140] ss:$8 sps:$4 sm:$0xff]   ;;  %v11247_v10 = vld [vmem:[%s14902_s1 + $0x154] ss:$8 sps:$4 sm:$0xff]  }
 0x139   : > { %2559 = vmatpush1.bf16.msra.mxu0 %v11206_v12  ;;  %3084 = vmatpush1.bf16.msra.mxu1 %v11206_v12  ;;  %v11249_v12 = vld [vmem:[%s14902_s1 + $0x164] ss:$8 sps:$4 sm:$0xff]  }
 0x13a   : > { %2560 = vmatprep.subr.bf16.mxu0 %v11207_v13  ;;  %3085 = vmatprep.subr.bf16.mxu1 %v11207_v13  ;;  %v11250_v13 = vld [vmem:[%s14902_s1 + $0x160] ss:$8 sps:$4 sm:$0xff]  }
 0x13b   : > { %1804 = vmatprep.mubr.bf16.mxu0 %v11413_v5  ;;  %2319 = vmatprep.mubr.bf16.mxu1 %v11413_v5 }
 0x13d   : > { %2561 = vmatpush1.bf16.msra.mxu0 %v11208_v16  ;;  %3086 = vmatpush1.bf16.msra.mxu1 %v11208_v16  ;;  %v11253_v16 = vld [vmem:[%s14902_s1 + $0x184] ss:$8 sps:$4 sm:$0xff]  }
 0x13e   : > { %2562 = vmatprep.subr.bf16.mxu0 %v11209_v17  ;;  %3087 = vmatprep.subr.bf16.mxu1 %v11209_v17  ;;  %v11254_v17 = vld [vmem:[%s14902_s1 + $0x180] ss:$8 sps:$4 sm:$0xff]  }
 0x140   : > { %1805 = vmatmul.mubr.bf16.gmra.mrb[4].mxu0 %v10365_v14  ;;  %2320 = vmatmul.mubr.bf16.gmra.mrb[4].mxu1 %v10366_v15  ;;  %v11251_v14 = vld [vmem:[%s14902_s1 + $0x174] ss:$8 sps:$4 sm:$0xff]   ;;  %v11252_v15 = vld [vmem:[%s14902_s1 + $0x170] ss:$8 sps:$4 sm:$0xff]  }
 0x141   : > { %2563 = vmatpush1.bf16.msra.mxu0 %v11210_v18  ;;  %3088 = vmatpush1.bf16.msra.mxu1 %v11210_v18  ;;  %v11255_v18 = vld [vmem:[%s14902_s1 + $0x194] ss:$8 sps:$4 sm:$0xff]  }
 0x142   : > { %2564 = vmatprep.subr.bf16.mxu0 %v11211_v19  ;;  %3089 = vmatprep.subr.bf16.mxu1 %v11211_v19  ;;  %v11256_v19 = vld [vmem:[%s14902_s1 + $0x190] ss:$8 sps:$4 sm:$0xff]  }
 0x143   : > { %1814 = vmatprep.mubr.bf16.mxu0 %v11413_v5  ;;  %2329 = vmatprep.mubr.bf16.mxu1 %v11413_v5 }
 0x145   : > { %2565 = vmatpush1.bf16.msra.mxu0 %v11212_v22  ;;  %3090 = vmatpush1.bf16.msra.mxu1 %v11212_v22  ;;  %v11259_v22 = vld [vmem:[%s14902_s1 + $0x1b4] ss:$8 sps:$4 sm:$0xff]  }
 0x146   : > { %2566 = vmatprep.subr.bf16.mxu0 %v11213_v25  ;;  %3091 = vmatprep.subr.bf16.mxu1 %v11213_v25  ;;  %v11262_v25 = vld [vmem:[%s14902_s1 + $0x1c0] ss:$8 sps:$4 sm:$0xff]  }
 0x148   : > { %1815 = vmatmul.mubr.bf16.gmra.mrb[8].mxu0 %v10367_v20  ;;  %2330 = vmatmul.mubr.bf16.gmra.mrb[8].mxu1 %v10368_v21  ;;  %v11257_v20 = vld [vmem:[%s14902_s1 + $0x1a4] ss:$8 sps:$4 sm:$0xff]   ;;  %v11258_v21 = vld [vmem:[%s14902_s1 + $0x1a0] ss:$8 sps:$4 sm:$0xff]  }
 0x149   : > { %2567 = vmatpush1.bf16.msra.mxu0 %v11214_v26  ;;  %3092 = vmatpush1.bf16.msra.mxu1 %v11214_v26  ;;  %v11263_v26 = vld [vmem:[%s14902_s1 + $0x1d4] ss:$8 sps:$4 sm:$0xff]  }
 0x14a   : > { %2568 = vmatprep.subr.bf16.mxu0 %v11215_v27  ;;  %3093 = vmatprep.subr.bf16.mxu1 %v11215_v27  ;;  %v11264_v27 = vld [vmem:[%s14902_s1 + $0x1d0] ss:$8 sps:$4 sm:$0xff]  }
 0x14b   : > { %2590 = vmatprep.mubr.bf16.mxu0 %v10371_v23  ;;  %3115 = vmatprep.mubr.bf16.mxu1 %v10374_v24  ;;  %v11260_v23 = vld [vmem:[%s14902_s1 + $0x1b0] ss:$8 sps:$4 sm:$0xff]   ;;  %v11261_v24 = vld [vmem:[%s14902_s1 + $0x1c4] ss:$8 sps:$4 sm:$0xff]  }
 0x14d   : > { %2569 = vmatpush1.bf16.msra.mxu0 %v11216_v28  ;;  %3094 = vmatpush1.bf16.msra.mxu1 %v11216_v28  ;;  %v11265_v28 = vld [vmem:[%s14902_s1 + $0x1e4] ss:$8 sps:$4 sm:$0xff]  }
 0x14e   : > { %2570 = vmatprep.subr.bf16.mxu0 %v11217_v29  ;;  %3095 = vmatprep.subr.bf16.mxu1 %v11217_v29  ;;  %v11266_v29 = vld [vmem:[%s14902_s1 + $0x1e0] ss:$8 sps:$4 sm:$0xff]  }
 0x151   : > { %2571 = vmatpush1.bf16.msra.mxu0 %v11218_v30  ;;  %3096 = vmatpush1.bf16.msra.mxu1 %v11218_v30  ;;  %v11267_v30 = vld [vmem:[%s14902_s1 + $0x1f4] ss:$8 sps:$4 sm:$0xff]  }
 0x152   : > { %2572 = vmatprep.subr.bf16.mxu0 %v11219_v31  ;;  %3097 = vmatprep.subr.bf16.mxu1 %v11219_v31  ;;  %v10385_v31 = vld [vmem:[%s11586_s18 + $0x170] ss:$36 sps:$4 sm:$0xff]  }
 0x155   : > { %2573 = vmatpush1.bf16.msra.mxu0 %v11220_v32  ;;  %3098 = vmatpush1.bf16.msra.mxu1 %v11220_v32  ;;  %v10388_v32 = vld [vmem:[%s11586_s18 + $0x224] ss:$36 sps:$4 sm:$0xff]  }
 0x156   : > { %2574 = vmatprep.subr.bf16.mxu0 %v11221_v33  ;;  %3099 = vmatprep.subr.bf16.mxu1 %v11221_v33  ;;  %v11268_v33 = vld [vmem:[%s14902_s1 + $0x1f0] ss:$8 sps:$4 sm:$0xff]  }
 0x159   : > { %2575 = vmatpush1.bf16.msra.mxu0 %v11222_v34  ;;  %3100 = vmatpush1.bf16.msra.mxu1 %v11222_v34  ;;  %v11269_v34 = vld [vmem:[%s14902_s1 + $0x204] ss:$8 sps:$4 sm:$0xff]  }
 0x15a   : > { %2576 = vmatprep.subr.bf16.mxu0 %v11223_v35  ;;  %3101 = vmatprep.subr.bf16.mxu1 %v11223_v35  ;;  %v10391_v35 = vld [vmem:[%s11586_s18 + $0x1bc] ss:$36 sps:$4 sm:$0xff]  }
 0x15d   : > { %2577 = vmatpush1.bf16.msra.mxu0 %v11224_v36  ;;  %3102 = vmatpush1.bf16.msra.mxu1 %v11224_v36  ;;  %v10393_v36 = vld [vmem:[%s11586_s18 + $0x270] ss:$36 sps:$4 sm:$0xff]  }
 0x15e   : > { %2578 = vmatprep.subr.bf16.mxu0 %v11225_v37  ;;  %3103 = vmatprep.subr.bf16.mxu1 %v11225_v37  ;;  %v11270_v37 = vld [vmem:[%s14902_s1 + $0x200] ss:$8 sps:$4 sm:$0xff]  }
 0x161   : > { %2579 = vmatpush1.bf16.msra.mxu0 %v11226_v38  ;;  %3104 = vmatpush1.bf16.msra.mxu1 %v11226_v38  ;;  %v11271_v38 = vld [vmem:[%s14902_s1 + $0x214] ss:$8 sps:$4 sm:$0xff]  }
 0x162   : > { %2580 = vmatprep.subr.bf16.mxu0 %v11227_v39  ;;  %3105 = vmatprep.subr.bf16.mxu1 %v11227_v39  ;;  %v10395_v39 = vld [vmem:[%s11586_s18 + $0x1b8] ss:$36 sps:$4 sm:$0xff]  }
 0x165   : > { %2581 = vmatpush1.bf16.msra.mxu0 %v11228_v40  ;;  %3106 = vmatpush1.bf16.msra.mxu1 %v11228_v40  ;;  %v10396_v40 = vld [vmem:[%s11586_s18 + $0x26c] ss:$36 sps:$4 sm:$0xff]  }
 0x166   : > { %2582 = vmatprep.subr.bf16.mxu0 %v11229_v41  ;;  %3107 = vmatprep.subr.bf16.mxu1 %v11229_v41  ;;  %v8434_v41 = vld [vmem:[%s11586_s18 + $0x200] sm:$0x33] }
 0x169   : > { %2583 = vmatpush1.bf16.msra.mxu0 %v11230_v42  ;;  %3108 = vmatpush1.bf16.msra.mxu1 %v11230_v42  ;;  %v8496_v42 = vld [vmem:[%s11586_s18 + $0x2b4] sm:$0x33] }
 0x16a   : > { %2584 = vmatprep.subr.bf16.mxu0 %v11231_v43  ;;  %3109 = vmatprep.subr.bf16.mxu1 %v11231_v43  ;;  %v11272_v43 = vld [vmem:[%s14902_s1 + $0x210] ss:$8 sps:$4 sm:$0xff]  }
 0x16d   : > { %2585 = vmatpush1.bf16.msra.mxu0 %v11232_v44  ;;  %3110 = vmatpush1.bf16.msra.mxu1 %v11232_v44  ;;  %v11273_v44 = vld [vmem:[%s14902_s1 + $0x224] ss:$8 sps:$4 sm:$0xff]  }
 0x16e   : > { %2586 = vmatprep.subr.bf16.mxu0 %v11233_v45  ;;  %3111 = vmatprep.subr.bf16.mxu1 %v11233_v45  ;;  %v8459_v45 = vcombine.high %v8434_v41, %v8434_v41 }
 0x171   : > { %2587 = vmatpush1.bf16.msra.mxu0 %v11234_v46  ;;  %3112 = vmatpush1.bf16.msra.mxu1 %v11234_v46  ;;  %v8521_v46 = vcombine.high %v8496_v42, %v8496_v42 }
 0x172   : > { %2588 = vmatprep.subr.bf16.mxu0 %v11235_v47  ;;  %3113 = vmatprep.subr.bf16.mxu1 %v11235_v47  ;;  %v11274_v47 = vld [vmem:[%s14902_s1 + $0x220] ss:$8 sps:$4 sm:$0xff]  }
 0x175   : > { %2589 = vmatpush1.bf16.msra.mxu0 %v11236_v50  ;;  %3114 = vmatpush1.bf16.msra.mxu1 %v11236_v50  ;;  %v8520_v50 = vcombine.low %v8496_v42, %v8496_v42  ;;  %v10422_v42 = vld [vmem:[%s11586_s18 + $0x238] ss:$36 sps:$4 sm:$0xff]  }
 0x176   : > { %2619 = vmatprep.subr.bf16.mxu0 %v11237_v51  ;;  %3144 = vmatprep.subr.bf16.mxu1 %v11237_v51  ;;  %v11276_v51 = vld [vmem:[%s14902_s1 + $0x230] ss:$8 sps:$4 sm:$0xff]  }
 0x178   : > { %2591 = vmatmul.mubr.bf16.vlgmr.msra.gmra.mrb[12].mxu0 %v10369_v48  ;;  %3116 = vmatmul.mubr.bf16.vlgmr.msra.gmra.mrb[12].mxu1 %v10372_v49  ;;  %v11275_v48 = vld [vmem:[%s14902_s1 + $0x234] ss:$8 sps:$4 sm:$0xff]   ;;  %v8458_v49 = vcombine.low %v8434_v41, %v8434_v41  ;;  %v10419_v41 = vld [vmem:[%s11586_s18 + $0x184] ss:$36 sps:$4 sm:$0xff]  }
 0x179   : > { %2620 = vmatpush1.bf16.msra.mxu0 %v11238_v54  ;;  %3145 = vmatpush1.bf16.msra.mxu1 %v11238_v54  ;;  %v10406_v54 = vld [vmem:[%s11586_s18 + $0x230] ss:$36 sps:$4 sm:$0xff]  }
 0x17a   : > { %2621 = vmatprep.subr.bf16.mxu0 %v11239_v55  ;;  %3146 = vmatprep.subr.bf16.mxu1 %v11239_v55  ;;  %v11278_v55 = vld [vmem:[%s14902_s1 + $0x240] ss:$8 sps:$4 sm:$0xff]  }
 0x17b   : > { %2600 = vmatprep.mubr.bf16.mxu0 %v10375_v52  ;;  %3125 = vmatprep.mubr.bf16.mxu1 %v10377_v53  ;;  %v11277_v52 = vld [vmem:[%s14902_s1 + $0x244] ss:$8 sps:$4 sm:$0xff]   ;;  %v10403_v53 = vld [vmem:[%s11586_s18 + $0x17c] ss:$36 sps:$4 sm:$0xff]  }
 0x17d   : > { %2622 = vmatpush1.bf16.msra.mxu0 %v11240_v60  ;;  %3147 = vmatpush1.bf16.msra.mxu1 %v11240_v60  ;;  %v11283_v60 = vld [vmem:[%s14902_s1 + $0x274] ss:$8 sps:$4 sm:$0xff]  }
 0x17e   : > { %2623 = vmatprep.subr.bf16.mxu0 %v11241_v61  ;;  %3148 = vmatprep.subr.bf16.mxu1 %v11241_v61  ;;  %v11284_v61 = vld [vmem:[%s14902_s1 + $0x270] ss:$8 sps:$4 sm:$0xff]  }
 0x180   : > { %2601 = vmatmul.mubr.bf16.gmra.mrb[16].mxu0 %v10379_v56  ;;  %3126 = vmatmul.mubr.bf16.gmra.mrb[16].mxu1 %v10380_v57  ;;  %v11279_v56 = vld [vmem:[%s14902_s1 + $0x254] ss:$8 sps:$4 sm:$0xff]   ;;  %v11280_v57 = vld [vmem:[%s14902_s1 + $0x250] ss:$8 sps:$4 sm:$0xff]  }
 0x181   : > { %2624 = vmatpush1.bf16.msra.mxu0 %v11242_v0  ;;  %3149 = vmatpush1.bf16.msra.mxu1 %v11242_v0  ;;  %v11287_v0 = vld [vmem:[%s14902_s1 + $0x294] ss:$8 sps:$4 sm:$0xff]  }
 0x182   : > { %2625 = vmatprep.subr.bf16.mxu0 %v11243_v1  ;;  %3150 = vmatprep.subr.bf16.mxu1 %v11243_v1  ;;  %v11288_v1 = vld [vmem:[%s14902_s1 + $0x290] ss:$8 sps:$4 sm:$0xff]  }
 0x183   : > { %2610 = vmatprep.mubr.bf16.mxu0 %v8457_v62  ;;  %3135 = vmatprep.mubr.bf16.mxu1 %v8519_v63  ;;  %v11285_v62 = vld [vmem:[%s14902_s1 + $0x284] ss:$8 sps:$4 sm:$0xff]   ;;  %v11286_v63 = vld [vmem:[%s14902_s1 + $0x280] ss:$8 sps:$4 sm:$0xff]  }
 0x185   : > { %2626 = vmatpush1.bf16.msra.mxu0 %v11244_v4  ;;  %3151 = vmatpush1.bf16.msra.mxu1 %v11244_v4  ;;  %v11291_v4 = vld [vmem:[%s14902_s1 + $0x2b4] ss:$8 sps:$4 sm:$0xff]  }
 0x186   : > { %2627 = vmatprep.subr.bf16.mxu0 %v11245_v6  ;;  %3152 = vmatprep.subr.bf16.mxu1 %v11245_v6  ;;  %v11292_v6 = vld [vmem:[%s14902_s1 + $0x2b0] ss:$8 sps:$4 sm:$0xff]  }
 0x188   : > { %2611 = vmatmul.mubr.bf16.gmra.mrb[20].mxu0 %v8456_v2  ;;  %3136 = vmatmul.mubr.bf16.gmra.mrb[20].mxu1 %v8518_v3  ;;  %v11289_v2 = vld [vmem:[%s14902_s1 + $0x2a4] ss:$8 sps:$4 sm:$0xff]   ;;  %v11290_v3 = vld [vmem:[%s14902_s1 + $0x2a0] ss:$8 sps:$4 sm:$0xff]  }
 0x189   : > { %2628 = vmatpush1.bf16.msra.mxu0 %v11246_v9  ;;  %3153 = vmatpush1.bf16.msra.mxu1 %v11246_v9  ;;  %v11295_v9 = vld [vmem:[%s14902_s1 + $0x2d4] ss:$8 sps:$4 sm:$0xff]  }
 0x18a   : > { %2629 = vmatprep.subr.bf16.mxu0 %v11247_v10  ;;  %3154 = vmatprep.subr.bf16.mxu1 %v11247_v10  ;;  %v11296_v10 = vld [vmem:[%s14902_s1 + $0x2d0] ss:$8 sps:$4 sm:$0xff]  }
 0x18b   : > { %2651 = vmatprep.mubr.bf16.mxu0 %v10387_v7  ;;  %3176 = vmatprep.mubr.bf16.mxu1 %v10390_v8  ;;  %v11293_v7 = vld [vmem:[%s14902_s1 + $0x2c4] ss:$8 sps:$4 sm:$0xff]   ;;  %v11294_v8 = vld [vmem:[%s14902_s1 + $0x2c0] ss:$8 sps:$4 sm:$0xff]  }
 0x18d   : > { %2630 = vmatpush1.bf16.msra.mxu0 %v11248_v11  ;;  %3155 = vmatpush1.bf16.msra.mxu1 %v11248_v11  ;;  %v11297_v11 = vld [vmem:[%s14902_s1 + $0x2e4] ss:$8 sps:$4 sm:$0xff]  }
 0x18e   : > { %2631 = vmatprep.subr.bf16.mxu0 %v11249_v12  ;;  %3156 = vmatprep.subr.bf16.mxu1 %v11249_v12  ;;  %v11298_v12 = vld [vmem:[%s14902_s1 + $0x2e0] ss:$8 sps:$4 sm:$0xff]  }
 0x191   : > { %2632 = vmatpush1.bf16.msra.mxu0 %v11250_v13  ;;  %3157 = vmatpush1.bf16.msra.mxu1 %v11250_v13  ;;  %v11299_v13 = vld [vmem:[%s14902_s1 + $0x2f4] ss:$8 sps:$4 sm:$0xff]  }
 0x192   : > { %2633 = vmatprep.subr.bf16.mxu0 %v11251_v14  ;;  %3158 = vmatprep.subr.bf16.mxu1 %v11251_v14  ;;  %v10401_v14 = vld [vmem:[%s11586_s18 + $0x178] ss:$36 sps:$4 sm:$0xff]  }
 0x195   : > { %2634 = vmatpush1.bf16.msra.mxu0 %v11252_v15  ;;  %3159 = vmatpush1.bf16.msra.mxu1 %v11252_v15  ;;  %v10404_v15 = vld [vmem:[%s11586_s18 + $0x22c] ss:$36 sps:$4 sm:$0xff]  }
 0x196   : > { %2635 = vmatprep.subr.bf16.mxu0 %v11253_v16  ;;  %3160 = vmatprep.subr.bf16.mxu1 %v11253_v16  ;;  %v11300_v16 = vld [vmem:[%s14902_s1 + $0x2f0] ss:$8 sps:$4 sm:$0xff]  }
 0x199   : > { %2636 = vmatpush1.bf16.msra.mxu0 %v11254_v17  ;;  %3161 = vmatpush1.bf16.msra.mxu1 %v11254_v17  ;;  %v11301_v17 = vld [vmem:[%s14902_s1 + $0x304] ss:$8 sps:$4 sm:$0xff]  }
 0x19a   : > { %2637 = vmatprep.subr.bf16.mxu0 %v11255_v18  ;;  %3162 = vmatprep.subr.bf16.mxu1 %v11255_v18  ;;  %v10407_v18 = vld [vmem:[%s11586_s18 + $0x1c4] ss:$36 sps:$4 sm:$0xff]  }
 0x19d   : > { %2638 = vmatpush1.bf16.msra.mxu0 %v11256_v19  ;;  %3163 = vmatpush1.bf16.msra.mxu1 %v11256_v19  ;;  %v10409_v19 = vld [vmem:[%s11586_s18 + $0x278] ss:$36 sps:$4 sm:$0xff]  }
 0x19e   : > { %2639 = vmatprep.subr.bf16.mxu0 %v11257_v20  ;;  %3164 = vmatprep.subr.bf16.mxu1 %v11257_v20  ;;  %v11302_v20 = vld [vmem:[%s14902_s1 + $0x300] ss:$8 sps:$4 sm:$0xff]  }
 0x1a1   : > { %2640 = vmatpush1.bf16.msra.mxu0 %v11258_v21  ;;  %3165 = vmatpush1.bf16.msra.mxu1 %v11258_v21  ;;  %v11303_v21 = vld [vmem:[%s14902_s1 + $0x314] ss:$8 sps:$4 sm:$0xff]  }
 0x1a2   : > { %2641 = vmatprep.subr.bf16.mxu0 %v11259_v22  ;;  %3166 = vmatprep.subr.bf16.mxu1 %v11259_v22  ;;  %v10411_v22 = vld [vmem:[%s11586_s18 + $0x1c0] ss:$36 sps:$4 sm:$0xff]  }
 0x1a5   : > { %2642 = vmatpush1.bf16.msra.mxu0 %v11260_v23  ;;  %3167 = vmatpush1.bf16.msra.mxu1 %v11260_v23  ;;  %v664_v23 = vlaneseq }
 0x1a6   : > { %2643 = vmatprep.subr.bf16.mxu0 %v11261_v24  ;;  %3168 = vmatprep.subr.bf16.mxu1 %v11261_v24  ;;  %v10412_v24 = vld [vmem:[%s11586_s18 + $0x274] ss:$36 sps:$4 sm:$0xff]  }
 0x1a9   : > { %2644 = vmatpush1.bf16.msra.mxu0 %v11262_v25  ;;  %3169 = vmatpush1.bf16.msra.mxu1 %v11262_v25  ;;  %v8435_v25 = vld [vmem:[%s11586_s18 + $0x208] sm:$0x33] }
 0x1aa   : > { %2645 = vmatprep.subr.bf16.mxu0 %v11263_v26  ;;  %3170 = vmatprep.subr.bf16.mxu1 %v11263_v26  ;;  %v8497_v26 = vld [vmem:[%s11586_s18 + $0x2bc] sm:$0x33] }
 0x1ad   : > { %2646 = vmatpush1.bf16.msra.mxu0 %v11264_v27  ;;  %3171 = vmatpush1.bf16.msra.mxu1 %v11264_v27  ;;  %v11304_v27 = vld [vmem:[%s14902_s1 + $0x310] ss:$8 sps:$4 sm:$0xff]  }
 0x1ae   : > { %2647 = vmatprep.subr.bf16.mxu0 %v11265_v28  ;;  %3172 = vmatprep.subr.bf16.mxu1 %v11265_v28  ;;  %v11305_v28 = vld [vmem:[%s14902_s1 + $0x324] ss:$8 sps:$4 sm:$0xff]  }
 0x1b1   : > { %2648 = vmatpush1.bf16.msra.mxu0 %v11266_v29  ;;  %3173 = vmatpush1.bf16.msra.mxu1 %v11266_v29  ;;  %v8461_v29 = vcombine.high %v8435_v25, %v8435_v25 }
 0x1b2   : > { %2649 = vmatprep.subr.bf16.mxu0 %v11267_v30  ;;  %3174 = vmatprep.subr.bf16.mxu1 %v11267_v30  ;;  %v8523_v30 = vcombine.high %v8497_v26, %v8497_v26 }
 0x1b5   : > { %2650 = vmatpush1.bf16.msra.mxu0 %v11268_v33  ;;  %3175 = vmatpush1.bf16.msra.mxu1 %v11268_v33  ;;  %v11307_v33 = vld [vmem:[%s14902_s1 + $0x334] ss:$8 sps:$4 sm:$0xff]  }
 0x1b6   : > { %2680 = vmatprep.subr.bf16.mxu0 %v11269_v34  ;;  %3205 = vmatprep.subr.bf16.mxu1 %v11269_v34 }
 0x1b8   : > { %2652 = vmatmul.mubr.bf16.vlgmr.msra.gmra.mrb[12].mxu0 %v10385_v31  ;;  %3177 = vmatmul.mubr.bf16.vlgmr.msra.gmra.mrb[12].mxu1 %v10388_v32  ;;  %v12369_v31 = vshrl.u32 %v664_v23, 7  ;;  %v11306_v32 = vld [vmem:[%s14902_s1 + $0x320] ss:$8 sps:$4 sm:$0xff]  }
 0x1b9   : > { %2681 = vmatpush1.bf16.msra.mxu0 %v11270_v37  ;;  %3206 = vmatpush1.bf16.msra.mxu1 %v11270_v37  ;;  %v11308_v37 = vld [vmem:[%s14902_s1 + $0x330] ss:$8 sps:$4 sm:$0xff]  }
 0x1ba   : > { %2682 = vmatprep.subr.bf16.mxu0 %v11271_v38  ;;  %3207 = vmatprep.subr.bf16.mxu1 %v11271_v38  ;;  %14992 = vst [vmem:[#allocation10_spill] sm:$0xff] %v12369_v31  ;;  %v12378_v34 = vsub.s32 0, %v12369_v31  ;;  %v637_v38 = vld [vmem:[%s14903_s2] sm:$0x3] }
 0x1bb   : > { %2661 = vmatprep.mubr.bf16.mxu0 %v10391_v35  ;;  %3186 = vmatprep.mubr.bf16.mxu1 %v10393_v36  ;;  %v8460_v35 = vcombine.low %v8435_v25, %v8435_v25  ;;  %v8522_v36 = vcombine.low %v8497_v26, %v8497_v26  ;;  %v11316_v26 = vld [vmem:[%s14902_s1 + $0x370] ss:$8 sps:$4 sm:$0xff]  }
 0x1bc   : > { %14993 = vst [vmem:[#allocation11_spill] sm:$0xff] %v12378_v34 }
 0x1bd   : > { %2683 = vmatpush1.bf16.msra.mxu0 %v11272_v43  ;;  %3208 = vmatpush1.bf16.msra.mxu1 %v11272_v43  ;;  %v12395_v43 = vrot.slane %v637_v38, %v12378_v34 }
 0x1be   : > { %2684 = vmatprep.subr.bf16.mxu0 %v11273_v44  ;;  %3209 = vmatprep.subr.bf16.mxu1 %v11273_v44  ;;  %v11310_v44 = vld [vmem:[%s14902_s1 + $0x340] ss:$8 sps:$4 sm:$0xff]  }
 0x1c0   : > { %2662 = vmatmul.mubr.bf16.gmra.mrb[16].mxu0 %v10395_v39  ;;  %3187 = vmatmul.mubr.bf16.gmra.mrb[16].mxu1 %v10396_v40  ;;  %v12387_v39 = vsub.s32 1, %v12369_v31  ;;  %v11309_v40 = vld [vmem:[%s14902_s1 + $0x344] ss:$8 sps:$4 sm:$0xff]  }
 0x1c1   : > { %2685 = vmatpush1.bf16.msra.mxu0 %v11274_v47  ;;  %3210 = vmatpush1.bf16.msra.mxu1 %v11274_v47 }
 0x1c2   : > { %2686 = vmatprep.subr.bf16.mxu0 %v11275_v48  ;;  %3211 = vmatprep.subr.bf16.mxu1 %v11275_v48  ;;  %14994 = vst [vmem:[#allocation12_spill] sm:$0xff] %v12387_v39 }
 0x1c3   : > { %2671 = vmatprep.mubr.bf16.mxu0 %v8459_v45  ;;  %3196 = vmatprep.mubr.bf16.mxu1 %v8521_v46  ;;  %v12401_v45 = vrot.slane %v637_v38, %v12387_v39  ;;  %v11311_v46 = vld [vmem:[%s14902_s1 + $0x354] ss:$8 sps:$4 sm:$0xff]  }
 0x1c5   : > { %2687 = vmatpush1.bf16.msra.mxu0 %v11276_v51  ;;  %3212 = vmatpush1.bf16.msra.mxu1 %v11276_v51 }
 0x1c6   : > { %2688 = vmatprep.subr.bf16.mxu0 %v11277_v52  ;;  %3213 = vmatprep.subr.bf16.mxu1 %v11277_v52 }
 0x1c8   : > { %2672 = vmatmul.mubr.bf16.gmra.mrb[20].mxu0 %v8458_v49  ;;  %3197 = vmatmul.mubr.bf16.gmra.mrb[20].mxu1 %v8520_v50 }
 0x1c9   : > { %2689 = vmatpush1.bf16.msra.mxu0 %v11278_v55  ;;  %3214 = vmatpush1.bf16.msra.mxu1 %v11278_v55 }
 0x1ca   : > { %2690 = vmatprep.subr.bf16.mxu0 %v11279_v56  ;;  %3215 = vmatprep.subr.bf16.mxu1 %v11279_v56 }
 0x1cb   : > { %2712 = vmatprep.mubr.bf16.mxu0 %v10403_v53  ;;  %3237 = vmatprep.mubr.bf16.mxu1 %v10406_v54 }
 0x1cd   : > { %2691 = vmatpush1.bf16.msra.mxu0 %v11280_v57  ;;  %3216 = vmatpush1.bf16.msra.mxu1 %v11280_v57  ;;  %v11312_v57 = vld [vmem:[%s14902_s1 + $0x350] ss:$8 sps:$4 sm:$0xff]  }
 0x1ce   : > { %2692 = vmatprep.subr.bf16.mxu0 %v11281_v58  ;;  %3217 = vmatprep.subr.bf16.mxu1 %v11281_v58 }
 0x1d1   : > { %2693 = vmatpush1.bf16.msra.mxu0 %v11282_v59  ;;  %3218 = vmatpush1.bf16.msra.mxu1 %v11282_v59 }
 0x1d2   : > { %2694 = vmatprep.subr.bf16.mxu0 %v11283_v60  ;;  %3219 = vmatprep.subr.bf16.mxu1 %v11283_v60 }
 0x1d5   : > { %2695 = vmatpush1.bf16.msra.mxu0 %v11284_v61  ;;  %3220 = vmatpush1.bf16.msra.mxu1 %v11284_v61 }
 0x1d6   : > { %2696 = vmatprep.subr.bf16.mxu0 %v11285_v62  ;;  %3221 = vmatprep.subr.bf16.mxu1 %v11285_v62  ;;  %v11313_v62 = vld [vmem:[%s14902_s1 + $0x364] ss:$8 sps:$4 sm:$0xff]  }
 0x1d9   : > { %2697 = vmatpush1.bf16.msra.mxu0 %v11286_v63  ;;  %3222 = vmatpush1.bf16.msra.mxu1 %v11286_v63 }
 0x1da   : > { %2698 = vmatprep.subr.bf16.mxu0 %v11287_v0  ;;  %3223 = vmatprep.subr.bf16.mxu1 %v11287_v0 }
 0x1dd   : > { %2699 = vmatpush1.bf16.msra.mxu0 %v11288_v1  ;;  %3224 = vmatpush1.bf16.msra.mxu1 %v11288_v1 }
 0x1de   : > { %2700 = vmatprep.subr.bf16.mxu0 %v11289_v2  ;;  %3225 = vmatprep.subr.bf16.mxu1 %v11289_v2 }
 0x1e1   : > { %2701 = vmatpush1.bf16.msra.mxu0 %v11290_v3  ;;  %3226 = vmatpush1.bf16.msra.mxu1 %v11290_v3 }
 0x1e2   : > { %2702 = vmatprep.subr.bf16.mxu0 %v11291_v4  ;;  %3227 = vmatprep.subr.bf16.mxu1 %v11291_v4 }
 0x1e5   : > { %2703 = vmatpush1.bf16.msra.mxu0 %v11292_v6  ;;  %3228 = vmatpush1.bf16.msra.mxu1 %v11292_v6 }
 0x1e6   : > { %2704 = vmatprep.subr.bf16.mxu0 %v11293_v7  ;;  %3229 = vmatprep.subr.bf16.mxu1 %v11293_v7 }
 0x1e9   : > { %2705 = vmatpush1.bf16.msra.mxu0 %v11294_v8  ;;  %3230 = vmatpush1.bf16.msra.mxu1 %v11294_v8 }
 0x1ea   : > { %2706 = vmatprep.subr.bf16.mxu0 %v11295_v9  ;;  %3231 = vmatprep.subr.bf16.mxu1 %v11295_v9 }
 0x1ed   : > { %2707 = vmatpush1.bf16.msra.mxu0 %v11296_v10  ;;  %3232 = vmatpush1.bf16.msra.mxu1 %v11296_v10  ;;  %v11314_v10 = vld [vmem:[%s14902_s1 + $0x360] ss:$8 sps:$4 sm:$0xff]  }
 0x1ee   : > { %2708 = vmatprep.subr.bf16.mxu0 %v11297_v11  ;;  %3233 = vmatprep.subr.bf16.mxu1 %v11297_v11 }
 0x1f1   : > { %2709 = vmatpush1.bf16.msra.mxu0 %v11298_v12  ;;  %3234 = vmatpush1.bf16.msra.mxu1 %v11298_v12  ;;  %v11315_v12 = vld [vmem:[%s14902_s1 + $0x374] ss:$8 sps:$4 sm:$0xff]  }
 0x1f2   : > { %2710 = vmatprep.subr.bf16.mxu0 %v11299_v13  ;;  %3235 = vmatprep.subr.bf16.mxu1 %v11299_v13 }
 0x1f5   : > { %2711 = vmatpush1.bf16.msra.mxu0 %v11300_v16  ;;  %3236 = vmatpush1.bf16.msra.mxu1 %v11300_v16 }
 0x1f6   : > { %2741 = vmatprep.subr.bf16.mxu0 %v11301_v17  ;;  %3266 = vmatprep.subr.bf16.mxu1 %v11301_v17 }
 0x1f8   : > { %2713 = vmatmul.mubr.bf16.vlgmr.msra.gmra.mrb[12].mxu0 %v10401_v14  ;;  %3238 = vmatmul.mubr.bf16.vlgmr.msra.gmra.mrb[12].mxu1 %v10404_v15 }
 0x1f9   : > { %2742 = vmatpush1.bf16.msra.mxu0 %v11302_v20  ;;  %3267 = vmatpush1.bf16.msra.mxu1 %v11302_v20 }
 0x1fa   : > { %2743 = vmatprep.subr.bf16.mxu0 %v11303_v21  ;;  %3268 = vmatprep.subr.bf16.mxu1 %v11303_v21 }
 0x1fb   : > { %2722 = vmatprep.mubr.bf16.mxu0 %v10407_v18  ;;  %3247 = vmatprep.mubr.bf16.mxu1 %v10409_v19 }
 0x1fd   : > { %2744 = vmatpush1.bf16.msra.mxu0 %v11304_v27  ;;  %3269 = vmatpush1.bf16.msra.mxu1 %v11304_v27 }
 0x1fe   : > { %2745 = vmatprep.subr.bf16.mxu0 %v11305_v28  ;;  %3270 = vmatprep.subr.bf16.mxu1 %v11305_v28 }
 0x200   : > { %2723 = vmatmul.mubr.bf16.gmra.mrb[16].mxu0 %v10411_v22  ;;  %3248 = vmatmul.mubr.bf16.gmra.mrb[16].mxu1 %v10412_v24 }
 0x201   : > { %2746 = vmatpush1.bf16.msra.mxu0 %v11306_v32  ;;  %3271 = vmatpush1.bf16.msra.mxu1 %v11306_v32 }
 0x202   : > { %2747 = vmatprep.subr.bf16.mxu0 %v11307_v33  ;;  %3272 = vmatprep.subr.bf16.mxu1 %v11307_v33  ;;  %v11317_v33 = vld [vmem:[%s14902_s1 + $0x384] ss:$8 sps:$4 sm:$0xff]  }
 0x203   : > { %2732 = vmatprep.mubr.bf16.mxu0 %v8461_v29  ;;  %3257 = vmatprep.mubr.bf16.mxu1 %v8523_v30 }
 0x205   : > { %2748 = vmatpush1.bf16.msra.mxu0 %v11308_v37  ;;  %3273 = vmatpush1.bf16.msra.mxu1 %v11308_v37 }
 0x206   : > { %2749 = vmatprep.subr.bf16.mxu0 %v11309_v40  ;;  %3274 = vmatprep.subr.bf16.mxu1 %v11309_v40 }
 0x208   : > { %2733 = vmatmul.mubr.bf16.gmra.mrb[20].mxu0 %v8460_v35  ;;  %3258 = vmatmul.mubr.bf16.gmra.mrb[20].mxu1 %v8522_v36 }
 0x209   : > { %2750 = vmatpush1.bf16.msra.mxu0 %v11310_v44  ;;  %3275 = vmatpush1.bf16.msra.mxu1 %v11310_v44 }
 0x20a   : > { %2751 = vmatprep.subr.bf16.mxu0 %v11311_v46  ;;  %3276 = vmatprep.subr.bf16.mxu1 %v11311_v46 }
 0x20b   : > { %v1796_v47 = vpop.f32.mrb[0].mxu0  ;;  %v2311_v48 = vpop.f32.mrb[0].mxu1  ;;  %2773 = vmatprep.mubr.bf16.mxu0 %v10419_v41  ;;  %3298 = vmatprep.mubr.bf16.mxu1 %v10422_v42  ;;  %v11318_v41 = vld [vmem:[%s14902_s1 + $0x380] ss:$8 sps:$4 sm:$0xff]  }
 0x20c   : > { %v12407_v49 = vadd.f32 %v1796_v47, %v12395_v43  ;;  %v12410_v50 = vadd.f32 %v2311_v48, %v12395_v43  ;;  %v1798_v51 = vpop.f32.mrb[1].mxu0  ;;  %v2313_v52 = vpop.f32.mrb[1].mxu1  ;;  %v11319_v48 = vld [vmem:[%s14902_s1 + $0x394] ss:$8 sps:$4 sm:$0xff]  }
 0x20d   : > { %v12413_v53 = vadd.f32 %v1798_v51, %v12401_v45  ;;  %v12416_v54 = vadd.f32 %v2313_v52, %v12401_v45  ;;  %v1800_v55 = vpop.f32.mrb[2].mxu0  ;;  %v2315_v56 = vpop.f32.mrb[2].mxu1  ;;  %2752 = vmatpush1.bf16.msra.mxu0 %v11312_v57  ;;  %3277 = vmatpush1.bf16.msra.mxu1 %v11312_v57 }
 0x20e   : > { %v1833_v58 = vmin.f32 %v12407_v49, 0.0  ;;  %v2348_v59 = vmin.f32 %v12410_v50, 0.0  ;;  %v1802_v60 = vpop.f32.mrb[3].mxu0  ;;  %v2317_v61 = vpop.f32.mrb[3].mxu1  ;;  %2753 = vmatprep.subr.bf16.mxu0 %v11313_v62  ;;  %3278 = vmatprep.subr.bf16.mxu1 %v11313_v62  ;;  %v12429_v3 = vadd.f32 %v1800_v55, %v12395_v43  ;;  %v12432_v4 = vadd.f32 %v2315_v56, %v12395_v43 }
 0x20f   : > { %v1834_v63 = vmin.f32 %v12413_v53, 0.0  ;;  %v2349_v0 = vmin.f32 %v12416_v54, 0.0  ;;  %v12435_v8 = vadd.f32 %v1802_v60, %v12401_v45  ;;  %v12438_v9 = vadd.f32 %v2317_v61, %v12401_v45 }
 0x210   : > { %v1843_v1 = vmul.f32 1.442695, %v1833_v58  ;;  %v2358_v2 = vmul.f32 1.442695, %v2348_v59  ;;  %v1835_v11 = vmin.f32 %v12429_v3, 0.0  ;;  %v2350_v13 = vmin.f32 %v12432_v4, 0.0 }
 0x211   : > { %v1845_v6 = vmul.f32 1.442695, %v1834_v63  ;;  %v2360_v7 = vmul.f32 1.442695, %v2349_v0  ;;  %2754 = vmatpush1.bf16.msra.mxu0 %v11314_v10  ;;  %3279 = vmatpush1.bf16.msra.mxu1 %v11314_v10  ;;  %v1836_v14 = vmin.f32 %v12435_v8, 0.0  ;;  %v2351_v18 = vmin.f32 %v12438_v9, 0.0 }
 0x212   : > { %11087 = vpow2.f32 %v1843_v1  ;;  %2755 = vmatprep.subr.bf16.mxu0 %v11315_v12  ;;  %3280 = vmatprep.subr.bf16.mxu1 %v11315_v12  ;;  %v1847_v17 = vmul.f32 1.442695, %v1835_v11  ;;  %v2362_v21 = vmul.f32 1.442695, %v2350_v13  ;;  %vm1823_vm0 = vcmp.gt.f32.partialorder %v12407_v49, 0.0 }
 0x213   : > { %11089 = vpow2.f32 %v2358_v2  ;;  %v1806_v15 = vpop.f32.mrb[4].mxu0  ;;  %v2321_v16 = vpop.f32.mrb[4].mxu1  ;;  %v1849_v22 = vmul.f32 1.442695, %v1836_v14  ;;  %v2364_v27 = vmul.f32 1.442695, %v2351_v18 }
 0x214   : > { %11091 = vpow2.f32 %v1845_v6  ;;  %v1808_v19 = vpop.f32.mrb[5].mxu0  ;;  %v2323_v20 = vpop.f32.mrb[5].mxu1  ;;  %v12451_v23 = vadd.f32 %v1806_v15, %v12395_v43  ;;  %v12457_v28 = vadd.f32 %v2321_v16, %v12395_v43  ;;  %vm2338_vm1 = vcmp.gt.f32.partialorder %v12410_v50, 0.0  ;;  %v11320_v6 = vld [vmem:[%s14902_s1 + $0x390] ss:$8 sps:$4 sm:$0xff]  }
 0x215   : > { %11093 = vpow2.f32 %v2360_v7  ;;  %v1810_v24 = vpop.f32.mrb[6].mxu0  ;;  %v2325_v25 = vpop.f32.mrb[6].mxu1  ;;  %2756 = vmatpush1.bf16.msra.mxu0 %v11316_v26  ;;  %3281 = vmatpush1.bf16.msra.mxu1 %v11316_v26  ;;  %v12460_v29 = vadd.f32 %v1808_v19, %v12401_v45  ;;  %v12468_v36 = vadd.f32 %v2323_v20, %v12401_v45  ;;  %vm1824_vm2 = vcmp.gt.f32.partialorder %v12413_v53, 0.0  ;;  %v11321_v15 = vld [vmem:[%s14902_s1 + $0x3a4] ss:$8 sps:$4 sm:$0xff]  }
 0x216   : > { %11095 = vpow2.f32 %v1847_v17  ;;  %v1812_v30 = vpop.f32.mrb[7].mxu0  ;;  %v2327_v32 = vpop.f32.mrb[7].mxu1  ;;  %2757 = vmatprep.subr.bf16.mxu0 %v11317_v33  ;;  %3282 = vmatprep.subr.bf16.mxu1 %v11317_v33  ;;  %v1837_v35 = vmin.f32 %v12451_v23, 0.0  ;;  %v2352_v37 = vmin.f32 %v12457_v28, 0.0  ;;  %vm2339_vm3 = vcmp.gt.f32.partialorder %v12416_v54, 0.0 }
 0x217   : > { %11097 = vpow2.f32 %v2362_v21  ;;  %v1838_v40 = vmin.f32 %v12460_v29, 0.0  ;;  %vm1825_vm4 = vcmp.gt.f32.partialorder %v12429_v3, 0.0  ;;  %v2353_v44 = vmin.f32 %v12468_v36, 0.0 }
 0x218   : > { %11099 = vpow2.f32 %v1849_v22  ;;  %v1851_v38 = vmul.f32 1.442695, %v1837_v35  ;;  %v2366_v42 = vmul.f32 1.442695, %v2352_v37  ;;  %v12481_v46 = vadd.f32 %v1810_v24, %v12395_v43 }
 0x219   : > { %11101 = vpow2.f32 %v2364_v27  ;;  %2758 = vmatpush1.bf16.msra.mxu0 %v11318_v41  ;;  %3283 = vmatpush1.bf16.msra.mxu1 %v11318_v41  ;;  %v12484_v47 = vadd.f32 %v2325_v25, %v12395_v43  ;;  %vm2340_vm5 = vcmp.gt.f32.partialorder %v12432_v4, 0.0  ;;  %v1853_v51 = vmul.f32 1.442695, %v1838_v40 }
 0x21a   : > { %2759 = vmatprep.subr.bf16.mxu0 %v11319_v48  ;;  %3284 = vmatprep.subr.bf16.mxu1 %v11319_v48  ;;  %11103 = vpow2.f32 %v1851_v38  ;;  %v12491_v52 = vadd.f32 %v1812_v30, %v12401_v45  ;;  %vm1826_vm6 = vcmp.gt.f32.partialorder %v12435_v8, 0.0  ;;  %v2368_v58 = vmul.f32 1.442695, %v2353_v44 }
 0x21b   : > { %v1816_v55 = vpop.f32.mrb[8].mxu0  ;;  %v12493_v56 = vpop.f32.mrb[8].mxu1  ;;  %11105 = vpow2.f32 %v2366_v42  ;;  %v1839_v59 = vmin.f32 %v12481_v46, 0.0  ;;  %vm2341_vm7 = vcmp.gt.f32.partialorder %v12438_v9, 0.0  ;;  %v2354_v0 = vmin.f32 %v12484_v47, 0.0 }
 0x21c   : > { %v11088_v57 = vpop.eup %11087  ;;  %v12497_v60 = vpop.f32.mrb[9].mxu0  ;;  %11107 = vpow2.f32 %v1853_v51  ;;  %v12507_v12 = vadd.f32 %v2327_v32, %v12401_v45  ;;  %v1840_v20 = vmin.f32 %v12491_v52, 0.0  ;;  %vm1827_vm8 = vcmp.gt.f32.partialorder %v12451_v23, 0.0 }
 0x21d   : > { %v12499_v61 = vpop.f32.mrb[9].mxu1  ;;  %v11090_v62 = vpop.eup %11089  ;;  %v8341_v63 = vadd.f32 -1.0, %v11088_v57  ;;  %2760 = vmatpush1.bf16.msra.mxu0 %v11320_v6  ;;  %3285 = vmatpush1.bf16.msra.mxu1 %v11320_v6  ;;  %11109 = vpow2.f32 %v2368_v58  ;;  %v1855_v11 = vmul.f32 1.442695, %v1839_v59  ;;  %v2370_v19 = vmul.f32 1.442695, %v2354_v0 }
 0x21e   : > { %v1820_v1 = vpop.f32.mrb[10].mxu0  ;;  %v2335_v2 = vpop.f32.mrb[10].mxu1  ;;  %v8403_v10 = vadd.f32 -1.0, %v11090_v62  ;;  %2761 = vmatprep.subr.bf16.mxu0 %v11321_v15  ;;  %3286 = vmatprep.subr.bf16.mxu1 %v11321_v15  ;;  %v1857_v35 = vmul.f32 1.442695, %v1840_v20  ;;  %v2355_v37 = vmin.f32 %v12507_v12, 0.0  ;;  %v12551_v42 = vadd.f32 %v1816_v55, %v12395_v43 }
 0x21f   : > { %v11092_v7 = vpop.eup %11091  ;;  %v1821_v13 = vpop.f32.mrb[11].mxu0  ;;  %v12515_v17 = vsel %vm1823_vm0, %v12407_v49, %v8341_v63  ;;  %11111 = vpow2.f32 %v1855_v11  ;;  %vm2342_vm9 = vcmp.gt.f32.partialorder %v12457_v28, 0.0  ;;  %v11325_v0 = vld [vmem:[%s14902_s1 + $0x3c4] ss:$8 sps:$4 sm:$0xff]   ;;  %vm1828_vm10 = vcmp.gt.f32.partialorder %v12460_v29, 0.0 }
 0x220   : > { %v2336_v14 = vpop.f32.mrb[11].mxu1  ;;  %v11094_v16 = vpop.eup %11093  ;;  %v8342_v18 = vadd.f32 -1.0, %v11092_v7  ;;  %v12521_v22 = vsel %vm2338_vm1, %v12410_v50, %v8403_v10  ;;  %11113 = vpow2.f32 %v2370_v19  ;;  %v11322_v50 = vld [vmem:[%s14902_s1 + $0x3a0] ss:$8 sps:$4 sm:$0xff]   ;;  %v2372_v51 = vmul.f32 1.442695, %v2355_v37 }
 0x221   : > { %v11096_v21 = vpop.eup %11095  ;;  %v8404_v24 = vadd.f32 -1.0, %v11094_v16  ;;  %2762 = vmatpush1.bf16.msra.mxu0 %v11322_v50  ;;  %3287 = vmatpush1.bf16.msra.mxu1 %v11322_v50  ;;  %11115 = vpow2.f32 %v1857_v35  ;;  %v1841_v55 = vmin.f32 %v12551_v42, 0.0  ;;  %vm2343_vm11 = vcmp.gt.f32.partialorder %v12468_v36, 0.0  ;;  %v11326_v15 = vld [vmem:[%s14902_s1 + $0x3c0] ss:$8 sps:$4 sm:$0xff]  }
 0x222   : > { %v11098_v25 = vpop.eup %11097  ;;  %v12529_v49 = vsel %vm1824_vm2, %v12413_v53, %v8342_v18  ;;  %v8343_v27 = vadd.f32 -1.0, %v11096_v21  ;;  %v11323_v53 = vld [vmem:[%s14902_s1 + $0x3b4] ss:$8 sps:$4 sm:$0xff]   ;;  %11117 = vpow2.f32 %v2372_v51  ;;  %vm1829_vm12 = vcmp.gt.f32.partialorder %v12481_v46, 0.0  ;;  %v11328_v35 = vld [vmem:[%s14902_s1 + $0x3d0] ss:$8 sps:$4 sm:$0xff]  }
 0x223   : > { %v11100_v30 = vpop.eup %11099  ;;  %v12537_v32 = vsel %vm2339_vm3, %v12416_v54, %v8404_v24  ;;  %v8405_v33 = vadd.f32 -1.0, %v11098_v25  ;;  %2763 = vmatprep.subr.bf16.mxu0 %v11323_v53  ;;  %3288 = vmatprep.subr.bf16.mxu1 %v11323_v53  ;;  %v1859_v7 = vmul.f32 1.442695, %v1841_v55  ;;  %v11327_v20 = vld [vmem:[%s14902_s1 + $0x3d4] ss:$8 sps:$4 sm:$0xff]   ;;  %vm2344_vm13 = vcmp.gt.f32.partialorder %v12484_v47, 0.0 }
 0x224   : > { %v11102_v38 = vpop.eup %11101  ;;  %v12548_v41 = vsel %vm1825_vm4, %v12429_v3, %v8343_v27  ;;  %v8344_v54 = vadd.f32 -1.0, %v11100_v30  ;;  %vm1830_vm14 = vcmp.gt.f32.partialorder %v12491_v52, 0.0  ;;  %vm2345_vm15 = vcmp.gt.f32.partialorder %v12507_v12, 0.0  ;;  %v11331_v55 = vld [vmem:[%s14902_s1 + $0x3f4] ss:$8 sps:$4 sm:$0xff]  }
 0x225   : > { %v12556_v44 = vsel %vm2340_vm5, %v12432_v4, %v8405_v33  ;;  %v8406_v48 = vadd.f32 -1.0, %v11102_v38  ;;  %v11104_v57 = vpop.eup %11103  ;;  %v11324_v4 = vld [vmem:[%s14902_s1 + $0x3b0] ss:$8 sps:$4 sm:$0xff]   ;;  %11119 = vpow2.f32 %v1859_v7  ;;  %vm1831_vm0 = vcmp.gt.f32.partialorder %v12551_v42, 0.0 }
 0x226   : > { %v12563_v3 = vsel %vm1826_vm6, %v12435_v8, %v8344_v54  ;;  %2764 = vmatpush1.bf16.msra.mxu0 %v11324_v4  ;;  %3289 = vmatpush1.bf16.msra.mxu1 %v11324_v4  ;;  %v11106_v59 = vpop.eup %11105  ;;  %v8345_v63 = vadd.f32 -1.0, %v11104_v57  ;;  %v12577_v8 = vadd.f32 %v12493_v56, %v12395_v43  ;;  %v11330_v57 = vld [vmem:[%s14902_s1 + $0x3e0] ss:$8 sps:$4 sm:$0xff]  }
 0x227   : > { %v12573_v62 = vsel %vm2341_vm7, %v12438_v9, %v8406_v48  ;;  %2765 = vmatprep.subr.bf16.mxu0 %v11325_v0  ;;  %3290 = vmatprep.subr.bf16.mxu1 %v11325_v0  ;;  %v11108_v1 = vpop.eup %11107  ;;  %v8407_v6 = vadd.f32 -1.0, %v11106_v59  ;;  %v12586_v9 = vadd.f32 %v12497_v60, %v12401_v45  ;;  %v10417_v0 = vld [vmem:[%s11586_s18 + $0x180] ss:$36 sps:$4 sm:$0xff]   ;;  %v12964_v59 = vld [vmem:[%s14906_s5 + $0xf0] ss:$8 sps:$4 sm:$0xff]  }
 0x228   : > { %v11110_v10 = vpop.eup %11109  ;;  %v12591_v56 = vsel %vm1827_vm8, %v12451_v23, %v8345_v63  ;;  %v8346_v11 = vadd.f32 -1.0, %v11108_v1  ;;  %v2356_v13 = vmin.f32 %v12577_v8, 0.0  ;;  %v10420_v1 = vld [vmem:[%s11586_s18 + $0x234] ss:$36 sps:$4 sm:$0xff]   ;;  %vm2346_vm1 = vcmp.gt.f32.partialorder %v12577_v8, 0.0  ;;  %15024 = vst [vmem:[#allocation42_spill] sm:$0xff] %v12964_v59 }
 0x229   : > { %v12598_v14 = vsel %vm2342_vm9, %v12457_v28, %v8407_v6  ;;  %v8408_v60 = vadd.f32 -1.0, %v11110_v10  ;;  %v11112_v23 = vpop.eup %11111  ;;  %v1842_v28 = vmin.f32 %v12586_v9, 0.0  ;;  %v11332_v6 = vld [vmem:[%s14902_s1 + $0x3f0] ss:$8 sps:$4 sm:$0xff]   ;;  %vm1832_vm2 = vcmp.gt.f32.partialorder %v12586_v9, 0.0 }
 0x22a   : > { %2766 = vmatpush1.bf16.msra.mxu0 %v11326_v15  ;;  %3291 = vmatpush1.bf16.msra.mxu1 %v11326_v15  ;;  %v12607_v18 = vsel %vm1828_vm10, %v12460_v29, %v8346_v11  ;;  %v2374_v19 = vmul.f32 1.442695, %v2356_v13  ;;  %v11114_v21 = vpop.eup %11113  ;;  %v8347_v25 = vadd.f32 -1.0, %v11112_v23  ;;  %v12619_v29 = vadd.f32 %v12499_v61, %v12401_v45  ;;  %v10423_v13 = vld [vmem:[%s11586_s18 + $0x1cc] ss:$36 sps:$4 sm:$0xff]  }
 0x22b   : > { %2767 = vmatprep.subr.bf16.mxu0 %v11327_v20  ;;  %3292 = vmatprep.subr.bf16.mxu1 %v11327_v20  ;;  %v12614_v24 = vsel %vm2343_vm11, %v12468_v36, %v8408_v60  ;;  %v8409_v50 = vadd.f32 -1.0, %v11114_v21  ;;  %v1861_v30 = vmul.f32 1.442695, %v1842_v28  ;;  %v11116_v61 = vpop.eup %11115  ;;  %v10425_v60 = vld [vmem:[%s11586_s18 + $0x280] ss:$36 sps:$4 sm:$0xff]  }
 0x22c   : > { %11121 = vpow2.f32 %v2374_v19  ;;  %v12624_v33 = vsel %vm1829_vm12, %v12481_v46, %v8347_v25  ;;  %v2357_v36 = vmin.f32 %v12619_v29, 0.0  ;;  %v11329_v46 = vld [vmem:[%s14902_s1 + $0x3e4] ss:$8 sps:$4 sm:$0xff]   ;;  %v8348_v38 = vadd.f32 -1.0, %v11116_v61  ;;  %v11118_v48 = vpop.eup %11117  ;;  %v11335_v20 = vld [vmem:[%s14902_s1 + $0x414] ss:$8 sps:$4 sm:$0xff]  }
 0x22d   : > { %v12632_v37 = vsel %vm2344_vm13, %v12484_v47, %v8409_v50  ;;  %11123 = vpow2.f32 %v1861_v30  ;;  %v8410_v51 = vadd.f32 -1.0, %v11118_v48  ;;  %v10427_v21 = vld [vmem:[%s11586_s18 + $0x1c8] ss:$36 sps:$4 sm:$0xff]   ;;  %v10428_v25 = vld [vmem:[%s11586_s18 + $0x27c] ss:$36 sps:$4 sm:$0xff]   ;;  %vm2347_vm3 = vcmp.gt.f32.partialorder %v12619_v29, 0.0 }
 0x22e   : > { %2768 = vmatpush1.bf16.msra.mxu0 %v11328_v35  ;;  %3293 = vmatpush1.bf16.msra.mxu1 %v11328_v35  ;;  %v2376_v54 = vmul.f32 1.442695, %v2357_v36  ;;  %v12641_v47 = vsel %vm1830_vm14, %v12491_v52, %v8348_v38  ;;  %v8436_v36 = vld [vmem:[%s11586_s18 + $0x210] sm:$0x33]  ;;  %v8498_v35 = vld [vmem:[%s11586_s18 + $0x2c4] sm:$0x33] }
 0x22f   : > { %2769 = vmatprep.subr.bf16.mxu0 %v11329_v46  ;;  %3294 = vmatprep.subr.bf16.mxu1 %v11329_v46  ;;  %v11120_v4 = vpop.eup %11119  ;;  %v12651_v52 = vsel %vm2345_vm15, %v12507_v12, %v8410_v51  ;;  %v11333_v12 = vld [vmem:[%s14902_s1 + $0x404] ss:$8 sps:$4 sm:$0xff]   ;;  %v11336_v61 = vld [vmem:[%s14902_s1 + $0x410] ss:$8 sps:$4 sm:$0xff]   ;;  %v8525_v48 = vcombine.high %v8498_v35, %v8498_v35  ;;  %v11338_v51 = vld [vmem:[%s14902_s1 + $0x420] ss:$8 sps:$4 sm:$0xff]  }
 0x230   : > { %11125 = vpow2.f32 %v2376_v54  ;;  %v8349_v63 = vadd.f32 -1.0, %v11120_v4  ;;  %v11337_v38 = vld [vmem:[%s14902_s1 + $0x424] ss:$8 sps:$4 sm:$0xff]   ;;  %v8463_v54 = vcombine.high %v8436_v36, %v8436_v36  ;;  %v11340_v4 = vld [vmem:[%s14902_s1 + $0x430] ss:$8 sps:$4 sm:$0xff]  }
 0x231   : > { %v12959_v28 = vld [vmem:[%s14906_s5 + $0xf4] ss:$8 sps:$4 sm:$0xff]  }
 0x232   : > { %2770 = vmatpush1.bf16.msra.mxu0 %v11330_v57  ;;  %3295 = vmatpush1.bf16.msra.mxu1 %v11330_v57  ;;  %v12665_v10 = vsel %vm1831_vm0, %v12551_v42, %v8349_v63  ;;  %v11334_v42 = vld [vmem:[%s14902_s1 + $0x400] ss:$8 sps:$4 sm:$0xff]   ;;  %v8462_v57 = vcombine.low %v8436_v36, %v8436_v36  ;;  %v11341_v63 = vld [vmem:[%s14902_s1 + $0x444] ss:$8 sps:$4 sm:$0xff]   ;;  %15023 = vst [vmem:[#allocation41_spill] sm:$0xff] %v12959_v28 }
 0x233   : > { %2771 = vmatprep.subr.bf16.mxu0 %v11331_v55  ;;  %3296 = vmatprep.subr.bf16.mxu1 %v11331_v55  ;;  %v8524_v55 = vcombine.low %v8498_v35, %v8498_v35  ;;  %v12777_v36 = vld [vmem:[%s14906_s5 + $0x20] ss:$8 sps:$4 sm:$0xff]   ;;  %v12784_v35 = vld [vmem:[%s14906_s5 + $0x34] ss:$8 sps:$4 sm:$0xff]  }
 0x234   : > { %14998 = vst [vmem:[#allocation16_spill] sm:$0xff] %v12777_v36  ;;  %14999 = vst [vmem:[#allocation17_spill] sm:$0xff] %v12784_v35 }
 0x236   : > { %2772 = vmatpush1.bf16.msra.mxu0 %v11332_v6  ;;  %3297 = vmatpush1.bf16.msra.mxu1 %v11332_v6  ;;  %v11122_v7 = vpop.eup %11121  ;;  %v11344_v6 = vld [vmem:[%s14902_s1 + $0x450] ss:$8 sps:$4 sm:$0xff]  }
 0x237   : > { %2802 = vmatprep.subr.bf16.mxu0 %v11333_v12  ;;  %3327 = vmatprep.subr.bf16.mxu1 %v11333_v12  ;;  %v8411_v11 = vadd.f32 -1.0, %v11122_v7  ;;  %v11124_v15 = vpop.eup %11123  ;;  %v11345_v7 = vld [vmem:[%s14902_s1 + $0x464] ss:$8 sps:$4 sm:$0xff]   ;;  %v11346_v12 = vld [vmem:[%s14902_s1 + $0x460] ss:$8 sps:$4 sm:$0xff]  }
 0x238   : > { %v8350_v19 = vadd.f32 -1.0, %v11124_v15  ;;  %v10434_v15 = vld [vmem:[%s11586_s18 + $0x23c] ss:$36 sps:$4 sm:$0xff]  }
 0x239   : > { %2774 = vmatmul.mubr.bf16.vlgmr.msra.gmra.mrb[12].mxu0 %v10417_v0  ;;  %3299 = vmatmul.mubr.bf16.vlgmr.msra.gmra.mrb[12].mxu1 %v10420_v1  ;;  %v12671_v23 = vsel %vm2346_vm1, %v12577_v8, %v8411_v11  ;;  %v11342_v0 = vld [vmem:[%s14902_s1 + $0x440] ss:$8 sps:$4 sm:$0xff]   ;;  %v11343_v1 = vld [vmem:[%s14902_s1 + $0x454] ss:$8 sps:$4 sm:$0xff]  }
 0x23a   : > { %2803 = vmatpush1.bf16.msra.mxu0 %v11334_v42  ;;  %3328 = vmatpush1.bf16.msra.mxu1 %v11334_v42  ;;  %v11126_v8 = vpop.eup %11125  ;;  %v12685_v50 = vsel %vm1832_vm2, %v12586_v9, %v8350_v19  ;;  %v11347_v11 = vld [vmem:[%s14902_s1 + $0x474] ss:$8 sps:$4 sm:$0xff]   ;;  %v11348_v19 = vld [vmem:[%s14902_s1 + $0x470] ss:$8 sps:$4 sm:$0xff]   ;;  %v12747_v42 = vld [vmem:[%s14906_s5] ss:$8 sps:$4 sm:$0xff]  }
 0x23b   : > { %2804 = vmatprep.subr.bf16.mxu0 %v11335_v20  ;;  %3329 = vmatprep.subr.bf16.mxu1 %v11335_v20  ;;  %14995 = vst [vmem:[#allocation13_spill] sm:$0xff] %v12685_v50  ;;  %v8412_v30 = vadd.f32 -1.0, %v11126_v8  ;;  %v12753_v20 = vld [vmem:[%s14906_s5 + $0x14] ss:$8 sps:$4 sm:$0xff]   ;;  %v12761_v8 = vld [vmem:[%s14906_s5 + $0x10] ss:$8 sps:$4 sm:$0xff]  }
 0x23c   : > { %2783 = vmatprep.mubr.bf16.mxu0 %v10423_v13  ;;  %3308 = vmatprep.mubr.bf16.mxu1 %v10425_v60  ;;  %v12736_v13 = vld [vmem:[%s14906_s5 + $0x4] ss:$8 sps:$4 sm:$0xff]   ;;  %v12950_v9 = vld [vmem:[%s14906_s5 + $0xe0] ss:$8 sps:$4 sm:$0xff]  }
 0x23d   : > { %v12694_v46 = vsel %vm2347_vm3, %v12619_v29, %v8412_v30  ;;  %v11339_v29 = vld [vmem:[%s14902_s1 + $0x434] ss:$8 sps:$4 sm:$0xff]   ;;  %v10433_v60 = vld [vmem:[%s11586_s18 + $0x188] ss:$36 sps:$4 sm:$0xff]   ;;  %15022 = vst [vmem:[#allocation40_spill] sm:$0xff] %v12950_v9 }
 0x23e   : > { %2805 = vmatpush1.bf16.msra.mxu0 %v11336_v61  ;;  %3330 = vmatpush1.bf16.msra.mxu1 %v11336_v61  ;;  %14996 = vst [vmem:[#allocation14_spill] sm:$0xff] %v12694_v46  ;;  %v10436_v30 = vld [vmem:[%s11586_s18 + $0x284] ss:$36 sps:$4 sm:$0xff]   ;;  %v12793_v61 = vld [vmem:[%s14906_s5 + $0x30] ss:$8 sps:$4 sm:$0xff]  }
 0x23f   : > { %2806 = vmatprep.subr.bf16.mxu0 %v11337_v38  ;;  %3331 = vmatprep.subr.bf16.mxu1 %v11337_v38  ;;  %15000 = vst [vmem:[#allocation18_spill] sm:$0xff] %v12793_v61  ;;  %v12800_v38 = vld [vmem:[%s14906_s5 + $0x44] ss:$8 sps:$4 sm:$0xff]  }
 0x240   : > { %15001 = vst [vmem:[#allocation19_spill] sm:$0xff] %v12800_v38 }
 0x241   : > { %2784 = vmatmul.mubr.bf16.gmra.mrb[16].mxu0 %v10427_v21  ;;  %3309 = vmatmul.mubr.bf16.gmra.mrb[16].mxu1 %v10428_v25  ;;  %v12768_v21 = vld [vmem:[%s14906_s5 + $0x24] ss:$8 sps:$4 sm:$0xff]   ;;  %v10435_v25 = vld [vmem:[%s11586_s18 + $0x1d0] ss:$36 sps:$4 sm:$0xff]  }
 0x242   : > { %2807 = vmatpush1.bf16.msra.mxu0 %v11338_v51  ;;  %3332 = vmatpush1.bf16.msra.mxu1 %v11338_v51  ;;  %14997 = vst [vmem:[#allocation15_spill] sm:$0xff] %v12768_v21  ;;  %v12816_v51 = vld [vmem:[%s14906_s5 + $0x54] ss:$8 sps:$4 sm:$0xff]  }
 0x243   : > { %2808 = vmatprep.subr.bf16.mxu0 %v11339_v29  ;;  %3333 = vmatprep.subr.bf16.mxu1 %v11339_v29  ;;  %15003 = vst [vmem:[#allocation21_spill] sm:$0xff] %v12816_v51  ;;  %v12823_v29 = vld [vmem:[%s14906_s5 + $0x50] ss:$8 sps:$4 sm:$0xff]  }
 0x244   : > { %2793 = vmatprep.mubr.bf16.mxu0 %v8463_v54  ;;  %3318 = vmatprep.mubr.bf16.mxu1 %v8525_v48  ;;  %v10437_v54 = vld [vmem:[%s11586_s18 + $0x218] ss:$0 sps:$4 sm:$0x33]   ;;  %v12809_v48 = vld [vmem:[%s14906_s5 + $0x40] ss:$8 sps:$4 sm:$0xff]   ;;  %15004 = vst [vmem:[#allocation22_spill] sm:$0xff] %v12823_v29 }
 0x245   : > { %15002 = vst [vmem:[#allocation20_spill] sm:$0xff] %v12809_v48 }
 0x246   : > { %2809 = vmatpush1.bf16.msra.mxu0 %v11340_v4  ;;  %3334 = vmatpush1.bf16.msra.mxu1 %v11340_v4  ;;  %v12844_v4 = vld [vmem:[%s14906_s5 + $0x74] ss:$8 sps:$4 sm:$0xff]  }
 0x247   : > { %2810 = vmatprep.subr.bf16.mxu0 %v11341_v63  ;;  %3335 = vmatprep.subr.bf16.mxu1 %v11341_v63  ;;  %15007 = vst [vmem:[#allocation25_spill] sm:$0xff] %v12844_v4  ;;  %v12851_v63 = vld [vmem:[%s14906_s5 + $0x70] ss:$8 sps:$4 sm:$0xff]  }
 0x248   : > { %15008 = vst [vmem:[#allocation26_spill] sm:$0xff] %v12851_v63 }
 0x249   : > { %2794 = vmatmul.mubr.bf16.gmra.mrb[20].mxu0 %v8462_v57  ;;  %3319 = vmatmul.mubr.bf16.gmra.mrb[20].mxu1 %v8524_v55  ;;  %v12830_v57 = vld [vmem:[%s14906_s5 + $0x64] ss:$8 sps:$4 sm:$0xff]   ;;  %v12837_v55 = vld [vmem:[%s14906_s5 + $0x60] ss:$8 sps:$4 sm:$0xff]  }
 0x24a   : > { %2811 = vmatpush1.bf16.msra.mxu0 %v11342_v0  ;;  %3336 = vmatpush1.bf16.msra.mxu1 %v11342_v0  ;;  %15005 = vst [vmem:[#allocation23_spill] sm:$0xff] %v12830_v57  ;;  %15006 = vst [vmem:[#allocation24_spill] sm:$0xff] %v12837_v55  ;;  %v12861_v0 = vld [vmem:[%s14906_s5 + $0x84] ss:$8 sps:$4 sm:$0xff]  }
 0x24b   : > { %2812 = vmatprep.subr.bf16.mxu0 %v11343_v1  ;;  %3337 = vmatprep.subr.bf16.mxu1 %v11343_v1  ;;  %15009 = vst [vmem:[#allocation27_spill] sm:$0xff] %v12861_v0  ;;  %v12866_v1 = vld [vmem:[%s14906_s5 + $0x80] ss:$8 sps:$4 sm:$0xff]  }
 0x24c   : > { %2834 = vmatprep.mubr.bf16.mxu0 %v11413_v5  ;;  %3359 = vmatprep.mubr.bf16.mxu1 %v11413_v5  ;;  %15010 = vst [vmem:[#allocation28_spill] sm:$0xff] %v12866_v1 }
 0x24e   : > { %2813 = vmatpush1.bf16.msra.mxu0 %v11344_v6  ;;  %3338 = vmatpush1.bf16.msra.mxu1 %v11344_v6  ;;  %v12875_v6 = vld [vmem:[%s14906_s5 + $0x94] ss:$8 sps:$4 sm:$0xff]  }
 0x24f   : > { %2814 = vmatprep.subr.bf16.mxu0 %v11345_v7  ;;  %3339 = vmatprep.subr.bf16.mxu1 %v11345_v7  ;;  %15011 = vst [vmem:[#allocation29_spill] sm:$0xff] %v12875_v6  ;;  %v12880_v7 = vld [vmem:[%s14906_s5 + $0x90] ss:$8 sps:$4 sm:$0xff]  }
 0x250   : > { %15012 = vst [vmem:[#allocation30_spill] sm:$0xff] %v12880_v7 }
 0x252   : > { %2815 = vmatpush1.bf16.msra.mxu0 %v11346_v12  ;;  %3340 = vmatpush1.bf16.msra.mxu1 %v11346_v12  ;;  %v12889_v12 = vld [vmem:[%s14906_s5 + $0xa4] ss:$8 sps:$4 sm:$0xff]  }
 0x253   : > { %2816 = vmatprep.subr.bf16.mxu0 %v11347_v11  ;;  %3341 = vmatprep.subr.bf16.mxu1 %v11347_v11  ;;  %15013 = vst [vmem:[#allocation31_spill] sm:$0xff] %v12889_v12  ;;  %v12894_v11 = vld [vmem:[%s14906_s5 + $0xa0] ss:$8 sps:$4 sm:$0xff]  }
 0x254   : > { %15014 = vst [vmem:[#allocation32_spill] sm:$0xff] %v12894_v11 }
 0x256   : > { %2817 = vmatpush1.bf16.msra.mxu0 %v11348_v19  ;;  %3342 = vmatpush1.bf16.msra.mxu1 %v11348_v19  ;;  %v12917_v19 = vld [vmem:[%s14906_s5 + $0xc4] ss:$8 sps:$4 sm:$0xff]  }
 0x257   : > { %3708 = vmatprep.subr.bf16.mxu0 %v12736_v13  ;;  %3793 = vmatprep.subr.bf16.mxu1 %v12736_v13  ;;  %15017 = vst [vmem:[#allocation35_spill] sm:$0xff] %v12917_v19 }
 0x259   : > { %2835 = vmatmul.mubr.bf16.vlgmr.msra.gmra.mrb[12].mxu0 %v10433_v60  ;;  %3360 = vmatmul.mubr.bf16.vlgmr.msra.gmra.mrb[12].mxu1 %v10434_v15  ;;  %v12903_v60 = vld [vmem:[%s14906_s5 + $0xb4] ss:$8 sps:$4 sm:$0xff]   ;;  %v12908_v15 = vld [vmem:[%s14906_s5 + $0xb0] ss:$8 sps:$4 sm:$0xff]  }
 0x25a   : > { %2844 = vmatprep.mubr.bf16.mxu0 %v11413_v5  ;;  %3369 = vmatprep.mubr.bf16.mxu1 %v11413_v5  ;;  %15015 = vst [vmem:[#allocation33_spill] sm:$0xff] %v12903_v60  ;;  %15016 = vst [vmem:[#allocation34_spill] sm:$0xff] %v12908_v15 }
 0x25b   : > { %3709 = vmatpush1.bf16.msra.mxu0 %v12747_v42  ;;  %3794 = vmatpush1.bf16.msra.mxu1 %v12747_v42 }
 0x25c   : > { %3710 = vmatprep.subr.bf16.mxu0 %v12753_v20  ;;  %3795 = vmatprep.subr.bf16.mxu1 %v12753_v20 }
 0x25f   : > { %3711 = vmatpush1.bf16.msra.mxu0 %v12761_v8  ;;  %3796 = vmatpush1.bf16.msra.mxu1 %v12761_v8 }
 0x260   : > { %3712 = vmatprep.subr.bf16.mxu0 %v12768_v21  ;;  %3797 = vmatprep.subr.bf16.mxu1 %v12768_v21 }
 0x261   : > { %2845 = vmatmul.mubr.bf16.gmra.mrb[16].mxu0 %v10435_v25  ;;  %3370 = vmatmul.mubr.bf16.gmra.mrb[16].mxu1 %v10436_v30  ;;  %v12922_v25 = vld [vmem:[%s14906_s5 + $0xc0] ss:$8 sps:$4 sm:$0xff]   ;;  %v12931_v30 = vld [vmem:[%s14906_s5 + $0xd4] ss:$8 sps:$4 sm:$0xff]  }
 0x262   : > { %2854 = vmatprep.mubr.bf16.mxu0 %v11413_v5  ;;  %3379 = vmatprep.mubr.bf16.mxu1 %v11413_v5  ;;  %v10438_v5 = vld [vmem:[%s11586_s18 + $0x2cc] ss:$0 sps:$4 sm:$0x33]   ;;  %15018 = vst [vmem:[#allocation36_spill] sm:$0xff] %v12922_v25  ;;  %15019 = vst [vmem:[#allocation37_spill] sm:$0xff] %v12931_v30  ;;  %s8098_s18 = scalar_lea.sflag [#allocation3], %s485_s27 }
 0x263   : > { %3713 = vmatpush1.bf16.msra.mxu0 %v12777_v36  ;;  %3798 = vmatpush1.bf16.msra.mxu1 %v12777_v36 }
 0x264   : > { %3714 = vmatprep.subr.bf16.mxu0 %v12784_v35  ;;  %3799 = vmatprep.subr.bf16.mxu1 %v12784_v35 }
 0x267   : > { %3715 = vmatpush1.bf16.msra.mxu0 %v12793_v61  ;;  %3800 = vmatpush1.bf16.msra.mxu1 %v12793_v61 }
 0x268   : > { %3716 = vmatprep.subr.bf16.mxu0 %v12800_v38  ;;  %3801 = vmatprep.subr.bf16.mxu1 %v12800_v38 }
 0x269   : > { %2855 = vmatmul.mubr.bf16.gmra.mrb[20].mxu0 %v10437_v54  ;;  %3380 = vmatmul.mubr.bf16.gmra.mrb[20].mxu1 %v10438_v5  ;;  %v12936_v54 = vld [vmem:[%s14906_s5 + $0xd0] ss:$8 sps:$4 sm:$0xff]   ;;  %v12945_v5 = vld [vmem:[%s14906_s5 + $0xe4] ss:$8 sps:$4 sm:$0xff]  }
 0x26a   : > { %15020 = vst [vmem:[#allocation38_spill] sm:$0xff] %v12936_v54  ;;  %15021 = vst [vmem:[#allocation39_spill] sm:$0xff] %v12945_v5 }
 0x26b   : > { %3717 = vmatpush1.bf16.msra.mxu0 %v12809_v48  ;;  %3802 = vmatpush1.bf16.msra.mxu1 %v12809_v48 }
 0x26c   : > { %3718 = vmatprep.subr.bf16.mxu0 %v12816_v51  ;;  %3803 = vmatprep.subr.bf16.mxu1 %v12816_v51 }
 0x26f   : > { %3719 = vmatpush1.bf16.msra.mxu0 %v12823_v29  ;;  %3804 = vmatpush1.bf16.msra.mxu1 %v12823_v29 }
 0x270   : > { %3720 = vmatprep.subr.bf16.mxu0 %v12830_v57  ;;  %3805 = vmatprep.subr.bf16.mxu1 %v12830_v57 }
 0x273   : > { %3721 = vmatpush1.bf16.msra.mxu0 %v12837_v55  ;;  %3806 = vmatpush1.bf16.msra.mxu1 %v12837_v55 }
 0x274   : > { %3722 = vmatprep.subr.bf16.mxu0 %v12844_v4  ;;  %3807 = vmatprep.subr.bf16.mxu1 %v12844_v4 }
 0x277   : > { %3723 = vmatpush1.bf16.msra.mxu0 %v12851_v63  ;;  %3808 = vmatpush1.bf16.msra.mxu1 %v12851_v63 }
 0x278   : > { %3724 = vmatprep.subr.bf16.mxu0 %v12861_v0  ;;  %3809 = vmatprep.subr.bf16.mxu1 %v12861_v0 }
 0x27b   : > { %3725 = vmatpush1.bf16.msra.mxu0 %v12866_v1  ;;  %3810 = vmatpush1.bf16.msra.mxu1 %v12866_v1 }
 0x27c   : > { %3726 = vmatprep.subr.bf16.mxu0 %v12875_v6  ;;  %3811 = vmatprep.subr.bf16.mxu1 %v12875_v6 }
 0x27f   : > { %3727 = vmatpush1.bf16.msra.mxu0 %v12880_v7  ;;  %3812 = vmatpush1.bf16.msra.mxu1 %v12880_v7 }
 0x280   : > { %3728 = vmatprep.subr.bf16.mxu0 %v12889_v12  ;;  %3813 = vmatprep.subr.bf16.mxu1 %v12889_v12 }
 0x283   : > { %3729 = vmatpush1.bf16.msra.mxu0 %v12894_v11  ;;  %3814 = vmatpush1.bf16.msra.mxu1 %v12894_v11 }
 0x284   : > { %3730 = vmatprep.subr.bf16.mxu0 %v12903_v60  ;;  %3815 = vmatprep.subr.bf16.mxu1 %v12903_v60 }
 0x287   : > { %3731 = vmatpush1.bf16.msra.mxu0 %v12908_v15  ;;  %3816 = vmatpush1.bf16.msra.mxu1 %v12908_v15 }
 0x288   : > { %3732 = vmatprep.subr.bf16.mxu0 %v12917_v19  ;;  %3817 = vmatprep.subr.bf16.mxu1 %v12917_v19 }
 0x28b   : > { %3733 = vmatpush1.bf16.msra.mxu0 %v12922_v25  ;;  %3818 = vmatpush1.bf16.msra.mxu1 %v12922_v25 }
 0x28c   : > { %3734 = vmatprep.subr.bf16.mxu0 %v12931_v30  ;;  %3819 = vmatprep.subr.bf16.mxu1 %v12931_v30 }
 0x28f   : > { %3735 = vmatpush1.bf16.msra.mxu0 %v12936_v54  ;;  %3820 = vmatpush1.bf16.msra.mxu1 %v12936_v54 }
 0x290   : > { %3736 = vmatprep.subr.bf16.mxu0 %v12945_v5  ;;  %3821 = vmatprep.subr.bf16.mxu1 %v12945_v5 }
 0x293   : > { %3737 = vmatpush1.bf16.msra.mxu0 %v12950_v9  ;;  %3822 = vmatpush1.bf16.msra.mxu1 %v12950_v9 }
 0x294   : > { %3738 = vmatprep.subr.bf16.mxu0 %v12959_v28  ;;  %3823 = vmatprep.subr.bf16.mxu1 %v12959_v28 }
 0x297   : > { %3739 = vmatpush1.bf16.msra.mxu0 %v12964_v59  ;;  %3824 = vmatpush1.bf16.msra.mxu1 %v12964_v59 }
 0x298   : > { %3872 = vmatprep.subr.bf16.mxu0 %v12736_v13  ;;  %3963 = vmatprep.subr.bf16.mxu1 %v12736_v13 }
 0x32c   : > { %v2836_v53 = vpop.f32.mrb[12].mxu0  ;;  %v3361_v27 = vpop.f32.mrb[12].mxu1 }
 0x32d   : > { %v12973_v16 = vadd.f32 %v2836_v53, %v12395_v43  ;;  %v12976_v2 = vadd.f32 %v3361_v27, %v12395_v43  ;;  %v2838_v58 = vpop.f32.mrb[13].mxu0  ;;  %v3363_v40 = vpop.f32.mrb[13].mxu1  ;;  %v3458_v27 = vld [vmem:[%s14904_s3] sm:$0x3] }
 0x32e   : > { %v12979_v26 = vadd.f32 %v2838_v58, %v12401_v45  ;;  %v12982_v31 = vadd.f32 %v3363_v40, %v12401_v45  ;;  %v2840_v59 = vpop.f32.mrb[14].mxu0  ;;  %v3365_v28 = vpop.f32.mrb[14].mxu1  ;;  %v3480_v40 = vld [vmem:[%s14905_s4] sm:$0x3]  ;;  %v13017_v0 = vrot.slane %v3458_v27, %v12387_v39 }
 0x32f   : > { %v2873_v13 = vmin.f32 %v12973_v16, 0.0  ;;  %v3398_v9 = vmin.f32 %v12976_v2, 0.0  ;;  %v2842_v5 = vpop.f32.mrb[15].mxu0  ;;  %v3367_v53 = vpop.f32.mrb[15].mxu1  ;;  %v12995_v19 = vadd.f32 %v2840_v59, %v12395_v43  ;;  %v12998_v15 = vadd.f32 %v3365_v28, %v12395_v43 }
 0x330   : > { %v2874_v54 = vmin.f32 %v12979_v26, 0.0  ;;  %v3399_v58 = vmin.f32 %v12982_v31, 0.0  ;;  %v13001_v12 = vadd.f32 %v2842_v5, %v12401_v45  ;;  %v13004_v7 = vadd.f32 %v3367_v53, %v12401_v45 }
 0x331   : > { %v2883_v30 = vmul.f32 1.442695, %v2873_v13  ;;  %v3408_v25 = vmul.f32 1.442695, %v3398_v9  ;;  %v13007_v9 = vrot.slane %v3458_v27, %v12378_v34  ;;  %v2875_v13 = vmin.f32 %v12995_v19, 0.0 }
 0x332   : > { %v2885_v60 = vmul.f32 1.442695, %v2874_v54  ;;  %v3410_v11 = vmul.f32 1.442695, %v3399_v58  ;;  %v13011_v59 = vrot.slane %v3480_v40, %v12378_v34  ;;  %v3400_v28 = vmin.f32 %v12998_v15, 0.0 }
 0x333   : > { %11127 = vpow2.f32 %v2883_v30  ;;  %v2876_v54 = vmin.f32 %v13001_v12, 0.0  ;;  %v2887_v6 = vmul.f32 1.442695, %v2875_v13  ;;  %v3401_v53 = vmin.f32 %v13004_v7, 0.0 }
 0x334   : > { %11129 = vpow2.f32 %v3408_v25  ;;  %v2846_v58 = vpop.f32.mrb[16].mxu0  ;;  %v3371_v5 = vpop.f32.mrb[16].mxu1  ;;  %v3412_v25 = vmul.f32 1.442695, %v3400_v28  ;;  %v13033_v28 = vrot.slane %v3480_v40, %v12387_v39  ;;  %vm2863_vm4 = vcmp.gt.f32.partialorder %v12973_v16, 0.0 }
 0x335   : > { %11131 = vpow2.f32 %v2885_v60  ;;  %v2848_v30 = vpop.f32.mrb[17].mxu0  ;;  %v3373_v1 = vpop.f32.mrb[17].mxu1  ;;  %v2889_v63 = vmul.f32 1.442695, %v2876_v54  ;;  %v13020_v34 = vadd.f32 %v2846_v58, %v12395_v43  ;;  %v3414_v57 = vmul.f32 1.442695, %v3401_v53 }
 0x336   : > { %11133 = vpow2.f32 %v3410_v11  ;;  %v2850_v4 = vpop.f32.mrb[18].mxu0  ;;  %v3375_v55 = vpop.f32.mrb[18].mxu1  ;;  %v13023_v60 = vadd.f32 %v3371_v5, %v12395_v43  ;;  %v13026_v13 = vadd.f32 %v2848_v30, %v12401_v45  ;;  %v13030_v27 = vadd.f32 %v3373_v1, %v12401_v45 }
 0x337   : > { %11135 = vpow2.f32 %v2887_v6  ;;  %v2852_v29 = vpop.f32.mrb[19].mxu0  ;;  %v3377_v51 = vpop.f32.mrb[19].mxu1  ;;  %v2877_v11 = vmin.f32 %v13020_v34, 0.0  ;;  %vm3388_vm5 = vcmp.gt.f32.partialorder %v12976_v2, 0.0  ;;  %vm2864_vm6 = vcmp.gt.f32.partialorder %v12979_v26, 0.0 }
 0x338   : > { %11137 = vpow2.f32 %v3412_v25  ;;  %v3402_v6 = vmin.f32 %v13023_v60, 0.0  ;;  %v2878_v58 = vmin.f32 %v13026_v13, 0.0  ;;  %vm3389_vm7 = vcmp.gt.f32.partialorder %v12982_v31, 0.0 }
 0x339   : > { %11139 = vpow2.f32 %v2889_v63  ;;  %v2891_v54 = vmul.f32 1.442695, %v2877_v11  ;;  %v3403_v5 = vmin.f32 %v13030_v27, 0.0  ;;  %v13043_v40 = vadd.f32 %v2850_v4, %v12395_v43 }
 0x33a   : > { %11141 = vpow2.f32 %v3414_v57  ;;  %v3416_v1 = vmul.f32 1.442695, %v3402_v6  ;;  %v13046_v53 = vadd.f32 %v3375_v55, %v12395_v43  ;;  %vm2865_vm8 = vcmp.gt.f32.partialorder %v12995_v19, 0.0 }
 0x33b   : > { %11143 = vpow2.f32 %v2891_v54  ;;  %v2893_v63 = vmul.f32 1.442695, %v2878_v58  ;;  %v13050_v57 = vadd.f32 %v2852_v29, %v12401_v45  ;;  %vm3390_vm9 = vcmp.gt.f32.partialorder %v12998_v15, 0.0 }
 0x33c   : > { %v13052_v30 = vpop.f32.mrb[20].mxu0  ;;  %v13054_v25 = vpop.f32.mrb[20].mxu1  ;;  %11145 = vpow2.f32 %v3416_v1  ;;  %v3418_v4 = vmul.f32 1.442695, %v3403_v5  ;;  %v2879_v6 = vmin.f32 %v13043_v40, 0.0  ;;  %vm2866_vm10 = vcmp.gt.f32.partialorder %v13001_v12, 0.0 }
 0x33d   : > { %v11128_v11 = vpop.eup %11127  ;;  %v13058_v55 = vpop.f32.mrb[21].mxu0  ;;  %11147 = vpow2.f32 %v2893_v63  ;;  %v3404_v29 = vmin.f32 %v13046_v53, 0.0  ;;  %vm3391_vm11 = vcmp.gt.f32.partialorder %v13004_v7, 0.0  ;;  %v13066_v5 = vadd.f32 %v3377_v51, %v12401_v45 }
 0x33e   : > { %v13060_v39 = vpop.f32.mrb[21].mxu1  ;;  %v11130_v54 = vpop.eup %11129  ;;  %v8465_v58 = vadd.f32 -1.0, %v11128_v11  ;;  %11149 = vpow2.f32 %v3418_v4  ;;  %v2895_v1 = vmul.f32 1.442695, %v2879_v6  ;;  %vm2867_vm12 = vcmp.gt.f32.partialorder %v13020_v34, 0.0 }
 0x33f   : > { %v2860_v48 = vpop.f32.mrb[22].mxu0  ;;  %v3385_v38 = vpop.f32.mrb[22].mxu1  ;;  %v8527_v35 = vadd.f32 -1.0, %v11130_v54  ;;  %v15025_v4 = vmax.f32 %v12515_v17, %v12521_v22  ;;  %vm3392_vm13 = vcmp.gt.f32.partialorder %v13023_v60, 0.0  ;;  %v15026_v17 = vmax.f32 %v12529_v49, %v12537_v32 }
 0x340   : > { %v11132_v61 = vpop.eup %11131  ;;  %v2861_v36 = vpop.f32.mrb[23].mxu0  ;;  %v2913_v63 = vsel %vm2863_vm4, %v12973_v16, %v8465_v58  ;;  %v3420_v38 = vmul.f32 1.442695, %v3404_v29  ;;  %v2880_v48 = vmin.f32 %v13050_v57, 0.0  ;;  %11151 = vpow2.f32 %v2895_v1 }
 0x341   : > { %v3386_v46 = vpop.f32.mrb[23].mxu1  ;;  %v11134_v50 = vpop.eup %11133  ;;  %v8466_v11 = vadd.f32 -1.0, %v11132_v61  ;;  %v2923_v6 = vmax.f32 %v15025_v4, %v2913_v63  ;;  %vm2868_vm14 = vcmp.gt.f32.partialorder %v13026_v13, 0.0  ;;  %v15027_v32 = vmax.f32 %v12548_v41, %v12556_v44 }
 0x342   : > { %v11136_v54 = vpop.eup %11135  ;;  %v3438_v46 = vsel %vm3388_vm5, %v12976_v2, %v8527_v35  ;;  %v8528_v36 = vadd.f32 -1.0, %v11134_v50  ;;  %11153 = vpow2.f32 %v3420_v38  ;;  %v2897_v58 = vmul.f32 1.442695, %v2880_v48 }
 0x343   : > { %v11138_v51 = vpop.eup %11137  ;;  %v2914_v16 = vsel %vm2864_vm6, %v12979_v26, %v8466_v11  ;;  %v8467_v61 = vadd.f32 -1.0, %v11136_v54  ;;  %v3448_v21 = vmax.f32 %v2923_v6, %v3438_v46  ;;  %vm3393_vm15 = vcmp.gt.f32.partialorder %v13030_v27, 0.0 }
 0x344   : > { %v11140_v29 = vpop.eup %11139  ;;  %v13086_v22 = vmax.f32 %v15026_v17, %v2914_v16  ;;  %v8529_v2 = vadd.f32 -1.0, %v11138_v51  ;;  %v13092_v26 = vsel %vm3389_vm7, %v12982_v31, %v8528_v36  ;;  %11155 = vpow2.f32 %v2897_v58 }
 0x345   : > { %v11142_v50 = vpop.eup %11141  ;;  %v2915_v35 = vsel %vm2865_vm8, %v12995_v19, %v8467_v61  ;;  %v8468_v1 = vadd.f32 -1.0, %v11140_v29  ;;  %vm2869_vm0 = vcmp.gt.f32.partialorder %v13043_v40, 0.0  ;;  %v3405_v48 = vmin.f32 %v13066_v5, 0.0 }
 0x346   : > { %v3449_v49 = vmax.f32 %v13086_v22, %v13092_v26  ;;  %v2925_v63 = vmax.f32 %v15027_v32, %v2915_v35  ;;  %v11144_v11 = vpop.eup %11143  ;;  %v3440_v31 = vsel %vm3390_vm9, %v12998_v15, %v8529_v2  ;;  %v8530_v38 = vadd.f32 -1.0, %v11142_v50 }
 0x347   : > { %v2916_v19 = vsel %vm2866_vm10, %v13001_v12, %v8468_v1  ;;  %v11146_v54 = vpop.eup %11145  ;;  %v15028_v41 = vmax.f32 %v12563_v3, %v12573_v62  ;;  %v8469_v6 = vadd.f32 -1.0, %v11144_v11  ;;  %vm3394_vm1 = vcmp.gt.f32.partialorder %v13046_v53, 0.0 }
 0x348   : > { %v3450_v4 = vmax.f32 %v2925_v63, %v3440_v31  ;;  %v13117_v46 = vadd.f32 %v13052_v30, %v12395_v43  ;;  %v11148_v15 = vpop.eup %11147  ;;  %v3470_v36 = vmul.f32 %v13007_v9, %v3448_v21  ;;  %v3441_v12 = vsel %vm3391_vm11, %v13004_v7, %v8530_v38 }
 0x349   : > { %v2926_v44 = vmax.f32 %v15028_v41, %v2916_v19  ;;  %v8531_v51 = vadd.f32 -1.0, %v11146_v54  ;;  %v3422_v16 = vmul.f32 1.442695, %v3405_v48  ;;  %v11150_v61 = vpop.eup %11149  ;;  %v2917_v3 = vsel %vm2867_vm12, %v13020_v34, %v8469_v6 }
 0x34a   : > { %v8470_v62 = vadd.f32 -1.0, %v11148_v15  ;;  %vm2870_vm2 = vcmp.gt.f32.partialorder %v13050_v57, 0.0  ;;  %v3472_v30 = vmul.f32 %v13007_v9, %v3450_v4  ;;  %v15029_v21 = vmax.f32 %v12591_v56, %v12598_v14  ;;  %v11152_v7 = vpop.eup %11151 }
 0x34b   : > { %v3451_v58 = vmax.f32 %v2926_v44, %v3441_v12  ;;  %v8532_v17 = vadd.f32 -1.0, %v11150_v61  ;;  %11157 = vpow2.f32 %v3422_v16  ;;  %v3442_v2 = vsel %vm3392_vm13, %v13023_v60, %v8531_v51 }
 0x34c   : > { %v2927_v29 = vmax.f32 %v15029_v21, %v2917_v3  ;;  %v2918_v34 = vsel %vm2868_vm14, %v13026_v13, %v8470_v62  ;;  %v2881_v50 = vmin.f32 %v13117_v46, 0.0  ;;  %v13140_v35 = vadd.f32 %v13054_v25, %v12395_v43  ;;  %v11154_v1 = vpop.eup %11153 }
 0x34d   : > { %v3492_v56 = vadd.f32 %v13011_v59, %v3470_v36  ;;  %v15030_v32 = vmax.f32 %v12607_v18, %v12614_v24  ;;  %v8471_v11 = vadd.f32 -1.0, %v11152_v7  ;;  %v3443_v60 = vsel %vm3393_vm15, %v13030_v27, %v8532_v17 }
 0x34e   : > { %v3452_v14 = vmax.f32 %v2927_v29, %v3442_v2  ;;  %v8533_v13 = vadd.f32 -1.0, %v11154_v1  ;;  %v2899_v31 = vmul.f32 1.442695, %v2881_v50  ;;  %v3406_v19 = vmin.f32 %v13140_v35, 0.0  ;;  %v11156_v38 = vpop.eup %11155 }
 0x34f   : > { %v2928_v63 = vmax.f32 %v15030_v32, %v2918_v34  ;;  %v2919_v48 = vsel %vm2869_vm0, %v13043_v40, %v8471_v11  ;;  %v13156_v18 = vadd.f32 %v13058_v55, %v12401_v45  ;;  %v3494_v24 = vadd.f32 %v13011_v59, %v3472_v30 }
 0x350   : > { %v3474_v43 = vmul.f32 %v13007_v9, %v3452_v14  ;;  %v15031_v27 = vmax.f32 %v12624_v33, %v12632_v37  ;;  %v8472_v4 = vadd.f32 -1.0, %v11156_v38  ;;  %11159 = vpow2.f32 %v2899_v31 }
 0x351   : > { %v3453_v25 = vmax.f32 %v2928_v63, %v3443_v60  ;;  %v3444_v40 = vsel %vm3394_vm1, %v13046_v53, %v8533_v13  ;;  %v3424_v6 = vmul.f32 1.442695, %v3406_v19  ;;  %v2882_v33 = vmin.f32 %v13156_v18, 0.0 }
 0x352   : > { %v2929_v54 = vmax.f32 %v15031_v27, %v2919_v48  ;;  %v13163_v41 = vadd.f32 %v13011_v59, %v3474_v43  ;;  %v2920_v15 = vsel %vm2870_vm2, %v13050_v57, %v8472_v4  ;;  %v13175_v37 = vadd.f32 %v13060_v39, %v12401_v45 }
 0x353   : > { %v3475_v44 = vmul.f32 %v13017_v0, %v3453_v25  ;;  %v15032_v12 = vmax.f32 %v12641_v47, %v12651_v52  ;;  %11161 = vpow2.f32 %v3424_v6  ;;  %v3471_v53 = vmul.f32 %v13017_v0, %v3449_v49  ;;  %v15036_v6 = vld [vmem:[#allocation14_spill] sm:$0xff] }
 0x354   : > { %v3454_v55 = vmax.f32 %v2929_v54, %v3444_v40  ;;  %v3775_v36 = vpack.c.bf16 %v13163_v41, %v3494_v24  ;;  %v2901_v16 = vmul.f32 1.442695, %v2882_v33  ;;  %v3407_v61 = vmin.f32 %v13175_v37, 0.0 }
 0x355   : > { %v2930_v51 = vmax.f32 %v15032_v12, %v2920_v15  ;;  %v11158_v3 = vpop.eup %11157  ;;  %v3473_v39 = vmul.f32 %v13017_v0, %v3451_v58  ;;  %v3535_v45 = vpack.c.bf16 %v3494_v24, %v3492_v56  ;;  %v3497_v47 = vadd.f32 %v13033_v28, %v3475_v44  ;;  %v15038_v12 = vld [vmem:[#allocation16_spill] sm:$0xff] }
 0x356   : > { %v3476_v57 = vmul.f32 %v13007_v9, %v3454_v55  ;;  %v8534_v62 = vadd.f32 -1.0, %v11158_v3  ;;  %11163 = vpow2.f32 %v2901_v16  ;;  %v3426_v30 = vmul.f32 1.442695, %v3407_v61 }
 0x357   : > { %vm3395_vm3 = vcmp.gt.f32.partialorder %v13066_v5, 0.0  ;;  %v3493_v52 = vadd.f32 %v13033_v28, %v3471_v53  ;;  %v3495_v22 = vadd.f32 %v13033_v28, %v3473_v39  ;;  %v3780_v49 = vshll.u32 %v3775_v36, 16  ;;  %v15040_v53 = vld [vmem:[#allocation18_spill] sm:$0xff] }
 0x358   : > { %v13193_v26 = vadd.f32 %v13011_v59, %v3476_v57  ;;  %v3445_v21 = vsel %vm3395_vm3, %v13066_v5, %v8534_v62  ;;  %11165 = vpow2.f32 %v3426_v30  ;;  %vm2871_vm4 = vcmp.gt.f32.partialorder %v13117_v46, 0.0  ;;  %v15042_v57 = vld [vmem:[#allocation20_spill] sm:$0xff]  ;;  %v15047_v30 = vld [vmem:[#allocation25_spill] sm:$0xff] }
 0x359   : > { %v3455_v58 = vmax.f32 %v2930_v51, %v3445_v21  ;;  %v3536_v29 = vpack.c.bf16 %v3495_v22, %v3493_v52  ;;  %v3776_v17 = vpack.c.bf16 %v3497_v47, %v3495_v22  ;;  %v3782_v56 = vrot.slane %v3780_v49, 1  ;;  %v15046_v62 = vld [vmem:[#allocation24_spill] sm:$0xff]  ;;  %v15049_v52 = vld [vmem:[#allocation27_spill] sm:$0xff]  ;;  %v15051_v49 = vld [vmem:[#allocation29_spill] sm:$0xff] }
 0x35a   : > { %v11160_v7 = vpop.eup %11159  ;;  %v3864_v2 = vpack.c.bf16 %v13193_v26, %v13163_v41  ;;  %v15033_v60 = vmax.f32 %v12665_v10, %v12671_v23  ;;  %v3778_v19 = vshrl.u32 %v3775_v36, 16  ;;  %vm3396_vm5 = vcmp.gt.f32.partialorder %v13140_v35, 0.0  ;;  %v15034_v23 = vld [vmem:[#allocation15_spill] sm:$0xff]  ;;  %v15050_v22 = vld [vmem:[#allocation28_spill] sm:$0xff]  ;;  %v15052_v21 = vld [vmem:[#allocation30_spill] sm:$0xff] }
 0x35b   : > { %v3477_v34 = vmul.f32 %v13017_v0, %v3455_v58  ;;  %v8473_v50 = vadd.f32 -1.0, %v11160_v7  ;;  %3740 = vmatprep.mubr.bf16.mxu0 %v3536_v29  ;;  %v3787_v1 = vshll.u32 %v3776_v17, 16  ;;  %v3785_v63 = vshrl.u32 %v3776_v17, 16  ;;  %v15053_v58 = vld [vmem:[#allocation31_spill] sm:$0xff]  ;;  %v15054_v29 = vld [vmem:[#allocation32_spill] sm:$0xff]  ;;  %v15055_v17 = vld [vmem:[#allocation33_spill] sm:$0xff] }
 0x35c   : > { %3741 = vmatmul.mubr.bf16.vlgmr.msra.gmra.mrb[24].mxu0 %v3535_v45  ;;  %v3783_v48 = vor.u32 %v3782_v56, %v3778_v19  ;;  %vm2872_vm6 = vcmp.gt.f32.partialorder %v13156_v18, 0.0  ;;  %vm3397_vm7 = vcmp.gt.f32.partialorder %v13175_v37, 0.0  ;;  %v15045_v45 = vld [vmem:[#allocation23_spill] sm:$0xff]  ;;  %v15056_v7 = vld [vmem:[#allocation34_spill] sm:$0xff] }
 0x35d   : > { %v11162_v14 = vpop.eup %11161  ;;  %v2921_v5 = vsel %vm2871_vm4, %v13117_v46, %v8473_v50  ;;  %3873 = vmatpush1.bf16.msra.mxu0 %v12747_v42  ;;  %v3499_v32 = vadd.f32 %v13033_v28, %v3477_v34  ;;  %v3789_v11 = vrot.slane %v3787_v1, 1  ;;  %v15057_v34 = vld [vmem:[#allocation35_spill] sm:$0xff]  ;;  %v15058_v50 = vld [vmem:[#allocation36_spill] sm:$0xff]  ;;  %v15059_v1 = vld [vmem:[#allocation37_spill] sm:$0xff] }
 0x35e   : > { %v2931_v13 = vmax.f32 %v15033_v60, %v2921_v5  ;;  %v8535_v31 = vadd.f32 -1.0, %v11162_v14  ;;  %3874 = vmatprep.subr.bf16.mxu0 %v12753_v20  ;;  %v15060_v56 = vld [vmem:[#allocation38_spill] sm:$0xff]  ;;  %v15061_v14 = vld [vmem:[#allocation39_spill] sm:$0xff]  ;;  %v15062_v5 = vld [vmem:[#allocation40_spill] sm:$0xff] }
 0x35f   : > { %v3865_v38 = vpack.c.bf16 %v3499_v32, %v3497_v47  ;;  %v3790_v43 = vor.u32 %v3789_v11, %v3785_v63  ;;  %v15048_v47 = vld [vmem:[#allocation26_spill] sm:$0xff] }
 0x360   : > { %v11164_v25 = vpop.eup %11163  ;;  %v3446_v46 = vsel %vm3396_vm5, %v13140_v35, %v8535_v31  ;;  %v15035_v35 = vld [vmem:[#allocation13_spill] sm:$0xff]  ;;  %v15064_v60 = vld [vmem:[#allocation42_spill] sm:$0xff] }
 0x361   : > { %v3456_v24 = vmax.f32 %v2931_v13, %v3446_v46  ;;  %v8474_v27 = vadd.f32 -1.0, %v11164_v25  ;;  %3875 = vmatpush1.bf16.msra.mxu0 %v12761_v8  ;;  %v3869_v54 = vrot.slane %v3865_v38, 1  ;;  %3825 = vmatprep.mubr.bf16.mxu1 %v3790_v43  ;;  %v15037_v55 = vmax.f32 %v15035_v35, %v15036_v6  ;;  %v10487_v43 = vld [vmem:[%s14910_s9 + $0x180] ss:$12 sps:$4 sm:$0xff]   ;;  %v10489_v41 = vld [vmem:[%s14910_s9 + $0x184] ss:$12 sps:$4 sm:$0xff]  }
 0x362   : > { %v11166_v10 = vpop.eup %11165  ;;  %3876 = vmatprep.subr.bf16.mxu0 %v15034_v23  ;;  %3826 = vmatmul.mubr.bf16.vlgmr.msra.gmra.mrb[24].mxu1 %v3783_v48  ;;  %v3868_v13 = vrot.slane %v3864_v2, 1  ;;  %v10490_v2 = vld [vmem:[%s14910_s9 + $0x198] ss:$12 sps:$4 sm:$0xff]   ;;  %v10495_v25 = vld [vmem:[%s14910_s9 + $0x1b4] ss:$12 sps:$4 sm:$0xff]  }
 0x363   : > { %v3478_v4 = vmul.f32 %v13007_v9, %v3456_v24  ;;  %v2922_v44 = vsel %vm2872_vm6, %v13156_v18, %v8474_v27  ;;  %v8536_v40 = vadd.f32 -1.0, %v11166_v10  ;;  %3904 = vmatprep.mubr.bf16.mxu0 %v3869_v54  ;;  %3964 = vmatpush1.bf16.msra.mxu1 %v12747_v42  ;;  %v15039_v18 = vld [vmem:[#allocation17_spill] sm:$0xff]  ;;  %v10496_v24 = vld [vmem:[%s14910_s9 + $0x1c8] ss:$12 sps:$4 sm:$0xff]   ;;  %v10501_v27 = vld [vmem:[%s14910_s9 + $0x1e4] ss:$12 sps:$4 sm:$0xff]  }
 0x364   : > { %v2932_v15 = vmax.f32 %v15037_v55, %v2922_v44  ;;  %3965 = vmatprep.subr.bf16.mxu1 %v12753_v20  ;;  %v10493_v46 = vld [vmem:[%s14910_s9 + $0x1b0] ss:$12 sps:$4 sm:$0xff]   ;;  %v10498_v48 = vld [vmem:[%s14910_s9 + $0x1cc] ss:$12 sps:$4 sm:$0xff]   ;;  %v10508_v35 = vld [vmem:[%s14910_s9 + $0x228] ss:$12 sps:$4 sm:$0xff]  }
 0x365   : > { %v3500_v33 = vadd.f32 %v13011_v59, %v3478_v4  ;;  %v3447_v36 = vsel %vm3397_vm7, %v13175_v37, %v8536_v40  ;;  %3877 = vmatpush1.bf16.msra.mxu0 %v15038_v12  ;;  %v15041_v59 = vld [vmem:[#allocation19_spill] sm:$0xff]  ;;  %v10507_v4 = vld [vmem:[%s14910_s9 + $0x214] ss:$12 sps:$4 sm:$0xff]  }
 0x366   : > { %v3457_v9 = vmax.f32 %v2932_v15, %v3447_v36  ;;  %3878 = vmatprep.subr.bf16.mxu0 %v15039_v18  ;;  %v10499_v54 = vld [vmem:[%s14910_s9 + $0x1e0] ss:$12 sps:$4 sm:$0xff]   ;;  %v10504_v10 = vld [vmem:[%s14910_s9 + $0x1fc] ss:$12 sps:$4 sm:$0xff]   ;;  %v10513_v6 = vld [vmem:[%s14910_s9 + $0x244] ss:$12 sps:$4 sm:$0xff]  }
 0x367   : > { %3966 = vmatpush1.bf16.msra.mxu1 %v12761_v8  ;;  %v13226_v42 = vpack.c.bf16 %v3500_v33, %v13193_v26  ;;  %v15043_v8 = vld [vmem:[#allocation21_spill] sm:$0xff]  ;;  %v10514_v55 = vld [vmem:[%s14910_s9 + $0x248] ss:$12 sps:$4 sm:$0xff]  }
 0x368   : > { %v3479_v51 = vmul.f32 %v13017_v0, %v3457_v9  ;;  %3967 = vmatprep.subr.bf16.mxu1 %v15034_v23  ;;  %v10492_v26 = vld [vmem:[%s14910_s9 + $0x19c] ss:$12 sps:$4 sm:$0xff]   ;;  %v10502_v23 = vld [vmem:[%s14910_s9 + $0x1f8] ss:$12 sps:$4 sm:$0xff]   ;;  %v10511_v15 = vld [vmem:[%s14910_s9 + $0x240] ss:$12 sps:$4 sm:$0xff]  }
 0x369   : > { %3879 = vmatpush1.bf16.msra.mxu0 %v15040_v53  ;;  %v3946_v63 = vshrl.u32 %v13226_v42, 16  ;;  %v3949_v11 = vshll.u32 %v13226_v42, 16  ;;  %v10505_v44 = vld [vmem:[%s14910_s9 + $0x210] ss:$12 sps:$4 sm:$0xff]   ;;  %v10510_v40 = vld [vmem:[%s14910_s9 + $0x22c] ss:$12 sps:$4 sm:$0xff]  }
 0x36a   : > { %v3501_v20 = vadd.f32 %v13033_v28, %v3479_v51  ;;  %3880 = vmatprep.subr.bf16.mxu0 %v15041_v59  ;;  %v15044_v28 = vld [vmem:[#allocation22_spill] sm:$0xff] }
 0x36b   : > { %3968 = vmatpush1.bf16.msra.mxu1 %v15038_v12  ;;  %v3948_v31 = vrot.slane %v3946_v63, 1  ;;  %v3951_v19 = vrot.slane %v3949_v11, 2  ;;  %v10515_v33 = vld [vmem:[%s14910_s9 + $0x188] ss:$12 sps:$4 sm:$0xff]   ;;  %v10519_v12 = vld [vmem:[%s14910_s9 + $0x260] ss:$12 sps:$4 sm:$0xff]  }
 0x36c   : > { %v3944_v37 = vpack.c.bf16 %v3501_v20, %v3499_v32  ;;  %3969 = vmatprep.subr.bf16.mxu1 %v15039_v18  ;;  %v15063_v32 = vld [vmem:[#allocation41_spill] sm:$0xff] }
 0x36d   : > { %3881 = vmatpush1.bf16.msra.mxu0 %v15042_v57  ;;  %v3952_v38 = vor.u32 %v3951_v19, %v3948_v31  ;;  %v10518_v36 = vld [vmem:[%s14910_s9 + $0x25c] ss:$12 sps:$4 sm:$0xff]   ;;  %v10516_v9 = vld [vmem:[%s14910_s9 + $0x258] ss:$12 sps:$4 sm:$0xff]   ;;  %v10520_v18 = vld [vmem:[%s14910_s9 + $0x1a0] ss:$12 sps:$4 sm:$0xff]  }
 0x36e   : > { %3882 = vmatprep.subr.bf16.mxu0 %v15043_v8  ;;  %v3954_v16 = vshrl.u32 %v3944_v37, 16  ;;  %v3957_v61 = vshll.u32 %v3944_v37, 16  ;;  %v10523_v42 = vld [vmem:[%s14910_s9 + $0x274] ss:$12 sps:$4 sm:$0xff]   ;;  %v10524_v51 = vld [vmem:[%s14910_s9 + $0x278] ss:$12 sps:$4 sm:$0xff]  }
 0x36f   : > { %3970 = vmatpush1.bf16.msra.mxu1 %v15040_v53  ;;  %v10521_v53 = vld [vmem:[%s14910_s9 + $0x270] ss:$12 sps:$4 sm:$0xff]   ;;  %v10525_v20 = vld [vmem:[%s14910_s9 + $0x1b8] ss:$12 sps:$4 sm:$0xff]  }
 0x370   : > { %v3956_v0 = vrot.slane %v3954_v16, 1  ;;  %v3959_v3 = vrot.slane %v3957_v61, 2  ;;  %3971 = vmatprep.subr.bf16.mxu1 %v15041_v59  ;;  %v10528_v59 = vld [vmem:[%s14910_s9 + $0x28c] ss:$12 sps:$4 sm:$0xff]   ;;  %v10529_v37 = vld [vmem:[%s14910_s9 + $0x290] ss:$12 sps:$4 sm:$0xff]  }
 0x371   : > { %3883 = vmatpush1.bf16.msra.mxu0 %v15044_v28  ;;  %v10533_v16 = vld [vmem:[%s14910_s9 + $0x2a4] ss:$12 sps:$4 sm:$0xff]   ;;  %v10534_v61 = vld [vmem:[%s14910_s9 + $0x2a8] ss:$12 sps:$4 sm:$0xff]  }
 0x372   : > { %v3960_v39 = vor.u32 %v3959_v3, %v3956_v0  ;;  %3884 = vmatprep.subr.bf16.mxu0 %v15045_v45  ;;  %v10531_v0 = vld [vmem:[%s14910_s9 + $0x2a0] ss:$12 sps:$4 sm:$0xff]   ;;  %v10535_v3 = vld [vmem:[%s14910_s9 + $0x1e8] ss:$12 sps:$4 sm:$0xff]  }
 0x373   : > { %3972 = vmatpush1.bf16.msra.mxu1 %v15042_v57  ;;  %v10526_v57 = vld [vmem:[%s14910_s9 + $0x288] ss:$12 sps:$4 sm:$0xff]  }
 0x374   : > { %3995 = vmatprep.mubr.bf16.mxu1 %v3960_v39  ;;  %3973 = vmatprep.subr.bf16.mxu1 %v15043_v8  ;;  %v10530_v8 = vld [vmem:[%s14910_s9 + $0x1d0] ss:$12 sps:$4 sm:$0xff]   ;;  %v10539_v39 = vld [vmem:[%s14910_s9 + $0x2c0] ss:$12 sps:$4 sm:$0xff]  }
 0x375   : > { %3885 = vmatpush1.bf16.msra.mxu0 %v15046_v62 }
 0x376   : > { %3886 = vmatprep.subr.bf16.mxu0 %v15047_v30 }
 0x377   : > { %3974 = vmatpush1.bf16.msra.mxu1 %v15044_v28  ;;  %v10538_v28 = vld [vmem:[%s14910_s9 + $0x2bc] ss:$12 sps:$4 sm:$0xff]  }
 0x378   : > { %3975 = vmatprep.subr.bf16.mxu1 %v15045_v45  ;;  %v10536_v45 = vld [vmem:[%s14910_s9 + $0x2b8] ss:$12 sps:$4 sm:$0xff]  }
 0x379   : > { %3887 = vmatpush1.bf16.msra.mxu0 %v15048_v47 }
 0x37a   : > { %3888 = vmatprep.subr.bf16.mxu0 %v15049_v52 }
 0x37b   : > { %3976 = vmatpush1.bf16.msra.mxu1 %v15046_v62  ;;  %v10540_v62 = vld [vmem:[%s14910_s9 + $0x200] ss:$12 sps:$4 sm:$0xff]  }
 0x37c   : > { %3977 = vmatprep.subr.bf16.mxu1 %v15047_v30  ;;  %v10543_v30 = vld [vmem:[%s14910_s9 + $0x2d4] ss:$12 sps:$4 sm:$0xff]  }
 0x37d   : > { %3889 = vmatpush1.bf16.msra.mxu0 %v15050_v22 }
 0x37e   : > { %3890 = vmatprep.subr.bf16.mxu0 %v15051_v49 }
 0x37f   : > { %3978 = vmatpush1.bf16.msra.mxu1 %v15048_v47  ;;  %v10544_v47 = vld [vmem:[%s14910_s9 + $0x2d8] ss:$12 sps:$4 sm:$0xff]  }
 0x380   : > { %3979 = vmatprep.subr.bf16.mxu1 %v15049_v52  ;;  %v10541_v52 = vld [vmem:[%s14910_s9 + $0x2d0] ss:$12 sps:$4 sm:$0xff]  }
 0x381   : > { %3891 = vmatpush1.bf16.msra.mxu0 %v15052_v21 }
 0x382   : > { %3892 = vmatprep.subr.bf16.mxu0 %v15053_v58 }
 0x383   : > { %3980 = vmatpush1.bf16.msra.mxu1 %v15050_v22  ;;  %v10545_v22 = vld [vmem:[%s14910_s9 + $0x218] ss:$12 sps:$4 sm:$0xff]  }
 0x384   : > { %3981 = vmatprep.subr.bf16.mxu1 %v15051_v49  ;;  %v10548_v49 = vld [vmem:[%s14910_s9 + $0x2ec] ss:$12 sps:$4 sm:$0xff]  }
 0x385   : > { %3893 = vmatpush1.bf16.msra.mxu0 %v15054_v29 }
 0x386   : > { %3894 = vmatprep.subr.bf16.mxu0 %v15055_v17 }
 0x387   : > { %3982 = vmatpush1.bf16.msra.mxu1 %v15052_v21  ;;  %v10549_v21 = vld [vmem:[%s14910_s9 + $0x2f0] ss:$12 sps:$4 sm:$0xff]  }
 0x388   : > { %3983 = vmatprep.subr.bf16.mxu1 %v15053_v58  ;;  %v10546_v58 = vld [vmem:[%s14910_s9 + $0x2e8] ss:$12 sps:$4 sm:$0xff]  }
 0x389   : > { %3895 = vmatpush1.bf16.msra.mxu0 %v15056_v7 }
 0x38a   : > { %3896 = vmatprep.subr.bf16.mxu0 %v15057_v34 }
 0x38b   : > { %3984 = vmatpush1.bf16.msra.mxu1 %v15054_v29  ;;  %v10550_v29 = vld [vmem:[%s14910_s9 + $0x230] ss:$12 sps:$4 sm:$0xff]  }
 0x38c   : > { %3985 = vmatprep.subr.bf16.mxu1 %v15055_v17  ;;  %v10553_v17 = vld [vmem:[%s14910_s9 + $0x4] ss:$12 sps:$4 sm:$0xff]  }
 0x38d   : > { %3897 = vmatpush1.bf16.msra.mxu0 %v15058_v50 }
 0x38e   : > { %3898 = vmatprep.subr.bf16.mxu0 %v15059_v1 }
 0x38f   : > { %3986 = vmatpush1.bf16.msra.mxu1 %v15056_v7  ;;  %v10554_v7 = vld [vmem:[%s14910_s9 + $0xc8] ss:$12 sps:$4 sm:$0xff]  }
 0x390   : > { %3987 = vmatprep.subr.bf16.mxu1 %v15057_v34  ;;  %v3534_v34 = vld [vmem:[%s14907_s6] sm:$0x3] }
 0x391   : > { %3899 = vmatpush1.bf16.msra.mxu0 %v15060_v56 }
 0x392   : > { %3900 = vmatprep.subr.bf16.mxu0 %v15061_v14 }
 0x393   : > { %3988 = vmatpush1.bf16.msra.mxu1 %v15058_v50  ;;  %v15065_v50 = vld [vmem:[#allocation11_spill] sm:$0xff] }
 0x394   : > { %3989 = vmatprep.subr.bf16.mxu1 %v15059_v1  ;;  %v13442_v1 = vrot.slane %v3534_v34, %v15065_v50 }
 0x395   : > { %3901 = vmatpush1.bf16.msra.mxu0 %v15062_v5 }
 0x396   : > { %3902 = vmatprep.subr.bf16.mxu0 %v15063_v32 }
 0x397   : > { %3990 = vmatpush1.bf16.msra.mxu1 %v15060_v56  ;;  %v15066_v56 = vld [vmem:[#allocation12_spill] sm:$0xff] }
 0x398   : > { %3991 = vmatprep.subr.bf16.mxu1 %v15061_v14  ;;  %v13445_v14 = vrot.slane %v3534_v34, %v15066_v56 }
 0x399   : > { %3903 = vmatpush1.bf16.msra.mxu0 %v15064_v60 }
 0x39a   : > { %4461 = vmatprep.subr.bf16.mxu0 %v10489_v41 }
 0x39b   : > { %3992 = vmatpush1.bf16.msra.mxu1 %v15062_v5 }
 0x39c   : > { %3905 = vmatmul.mubr.bf16.vlgmr.msra.gmra.mrb[28].mxu0 %v3868_v13  ;;  %3993 = vmatprep.subr.bf16.mxu1 %v15063_v32 }
 0x39d   : > { %4462 = vmatpush1.bf16.msra.mxu0 %v10487_v43 }
 0x39e   : > { %4463 = vmatprep.subr.bf16.mxu0 %v10492_v26 }
 0x39f   : > { %3994 = vmatpush1.bf16.msra.mxu1 %v15064_v60 }
 0x3a0   : > { %9559 = vmatprep.subr.bf16.mxu1 %v10514_v55 }
 0x3a1   : > { %4464 = vmatpush1.bf16.msra.mxu0 %v10490_v2 }
 0x3a2   : > { %3996 = vmatmul.mubr.bf16.vlgmr.msra.gmra.mrb[28].mxu1 %v3952_v38  ;;  %4465 = vmatprep.subr.bf16.mxu0 %v10495_v25 }
 0x3a3   : > { %9560 = vmatpush3.bf16.msra.mxu1 %v10515_v33 }
 0x3a4   : > { %9561 = vmatprep.subr.bf16.mxu1 %v10519_v12 }
 0x3a5   : > { %4466 = vmatpush1.bf16.msra.mxu0 %v10493_v46 }
 0x3a6   : > { %4467 = vmatprep.subr.bf16.mxu0 %v10498_v48 }
 0x3a7   : > { %9562 = vmatpush3.bf16.msra.mxu1 %v10520_v18 }
 0x3a8   : > { %9563 = vmatprep.subr.bf16.mxu1 %v10524_v51 }
 0x3a9   : > { %4468 = vmatpush1.bf16.msra.mxu0 %v10496_v24 }
 0x3aa   : > { %4469 = vmatprep.subr.bf16.mxu0 %v10501_v27 }
 0x3ab   : > { %9564 = vmatpush3.bf16.msra.mxu1 %v10525_v20 }
 0x3ac   : > { %9565 = vmatprep.subr.bf16.mxu1 %v10529_v37 }
 0x3ad   : > { %4470 = vmatpush1.bf16.msra.mxu0 %v10499_v54 }
 0x3ae   : > { %4471 = vmatprep.subr.bf16.mxu0 %v10504_v10 }
 0x3af   : > { %9566 = vmatpush3.bf16.msra.mxu1 %v10530_v8 }
 0x3b0   : > { %9567 = vmatprep.subr.bf16.mxu1 %v10534_v61 }
 0x3b1   : > { %4472 = vmatpush1.bf16.msra.mxu0 %v10502_v23 }
 0x3b2   : > { %4473 = vmatprep.subr.bf16.mxu0 %v10507_v4 }
 0x3b3   : > { %9568 = vmatpush3.bf16.msra.mxu1 %v10535_v3 }
 0x3b4   : > { %9569 = vmatprep.subr.bf16.mxu1 %v10539_v39 }
 0x3b5   : > { %4474 = vmatpush1.bf16.msra.mxu0 %v10505_v44 }
 0x3b6   : > { %4475 = vmatprep.subr.bf16.mxu0 %v10510_v40 }
 0x3b7   : > { %9570 = vmatpush3.bf16.msra.mxu1 %v10540_v62 }
 0x3b8   : > { %9571 = vmatprep.subr.bf16.mxu1 %v10544_v47 }
 0x3b9   : > { %4476 = vmatpush1.bf16.msra.mxu0 %v10508_v35 }
 0x3ba   : > { %4477 = vmatprep.subr.bf16.mxu0 %v10513_v6 }
 0x3bb   : > { %9572 = vmatpush3.bf16.msra.mxu1 %v10545_v22 }
 0x3bc   : > { %9573 = vmatprep.subr.bf16.mxu1 %v10549_v21 }
 0x3bd   : > { %4478 = vmatpush1.bf16.msra.mxu0 %v10511_v15 }
 0x3be   : > { %4479 = vmatprep.subr.bf16.mxu0 %v10518_v36 }
 0x3bf   : > { %9574 = vmatpush3.bf16.msra.mxu1 %v10550_v29 }
 0x3c0   : > { %4798 = vmatprep.subr.bf16.mxu1 %v10553_v17 }
 0x3c1   : > { %4480 = vmatpush1.bf16.msra.mxu0 %v10516_v9 }
 0x3c2   : > { %4481 = vmatprep.subr.bf16.mxu0 %v10523_v42 }
 0x3c5   : > { %4482 = vmatpush1.bf16.msra.mxu0 %v10521_v53 }
 0x3c6   : > { %4483 = vmatprep.subr.bf16.mxu0 %v10528_v59 }
 0x3c9   : > { %4484 = vmatpush1.bf16.msra.mxu0 %v10526_v57 }
 0x3ca   : > { %4485 = vmatprep.subr.bf16.mxu0 %v10533_v16 }
 0x3cd   : > { %4486 = vmatpush1.bf16.msra.mxu0 %v10531_v0 }
 0x3ce   : > { %4487 = vmatprep.subr.bf16.mxu0 %v10538_v28 }
 0x3d1   : > { %4488 = vmatpush1.bf16.msra.mxu0 %v10536_v45 }
 0x3d2   : > { %4489 = vmatprep.subr.bf16.mxu0 %v10543_v30 }
 0x3d5   : > { %4490 = vmatpush1.bf16.msra.mxu0 %v10541_v52 }
 0x3d6   : > { %4491 = vmatprep.subr.bf16.mxu0 %v10548_v49 }
 0x3d9   : > { %4492 = vmatpush1.bf16.msra.mxu0 %v10546_v58 }
 0x3da   : > { %9581 = vmatprep.subr.bf16.mxu0 %v10554_v7 }
 0x42f   : > { %v3742_v5 = vpop.f32.mrb[24].mxu0 }
 0x430   : > { %v3743_v32 = vadd.f32 %v3742_v5, %v13442_v1  ;;  %v3744_v63 = vpop.f32.mrb[25].mxu0 }
 0x431   : > { %v3745_v11 = vadd.f32 %v3744_v63, %v13445_v14  ;;  %v3746_v60 = vpop.f32.mrb[26].mxu0 }
 0x432   : > { %v3755_v13 = vmin.f32 %v3743_v32, 0.0  ;;  %v13450_v31 = vadd.f32 %v3746_v60, %v13442_v1  ;;  %v3748_v19 = vpop.f32.mrb[27].mxu0  ;;  %vm3751_vm8 = vcmp.gt.f32.partialorder %v3743_v32, 0.0 }
 0x433   : > { %v3756_v38 = vmin.f32 %v3745_v11, 0.0  ;;  %v13453_v43 = vadd.f32 %v3748_v19, %v13445_v14  ;;  %vm3752_vm9 = vcmp.gt.f32.partialorder %v3745_v11, 0.0 }
 0x434   : > { %v3759_v41 = vmul.f32 1.442695, %v3755_v13  ;;  %v3757_v26 = vmin.f32 %v13450_v31, 0.0  ;;  %vm3753_vm10 = vcmp.gt.f32.partialorder %v13450_v31, 0.0 }
 0x435   : > { %v3761_v2 = vmul.f32 1.442695, %v3756_v38  ;;  %v3758_v25 = vmin.f32 %v13453_v43, 0.0  ;;  %v3827_v46 = vpop.f32.mrb[24].mxu1  ;;  %vm3754_vm11 = vcmp.gt.f32.partialorder %v13453_v43, 0.0 }
 0x436   : > { %v3763_v48 = vmul.f32 1.442695, %v3757_v26  ;;  %v3828_v24 = vadd.f32 %v3827_v46, %v13442_v1  ;;  %v3829_v27 = vpop.f32.mrb[25].mxu1  ;;  %11167 = vpow2.f32 %v3759_v41 }
 0x437   : > { %v3765_v54 = vmul.f32 1.442695, %v3758_v25  ;;  %v3830_v10 = vadd.f32 %v3829_v27, %v13445_v14  ;;  %v3831_v23 = vpop.f32.mrb[26].mxu1  ;;  %11169 = vpow2.f32 %v3761_v2 }
 0x438   : > { %v3840_v4 = vmin.f32 %v3828_v24, 0.0  ;;  %v3832_v44 = vadd.f32 %v3831_v23, %v13442_v1  ;;  %v3833_v40 = vpop.f32.mrb[27].mxu1  ;;  %11171 = vpow2.f32 %v3763_v48  ;;  %vm3836_vm12 = vcmp.gt.f32.partialorder %v3828_v24, 0.0 }
 0x439   : > { %v3841_v35 = vmin.f32 %v3830_v10, 0.0  ;;  %v3834_v6 = vadd.f32 %v3833_v40, %v13445_v14  ;;  %11173 = vpow2.f32 %v3765_v54  ;;  %vm3837_vm13 = vcmp.gt.f32.partialorder %v3830_v10, 0.0 }
 0x43a   : > { %v3844_v55 = vmul.f32 1.442695, %v3840_v4  ;;  %v3842_v15 = vmin.f32 %v3832_v44, 0.0  ;;  %vm3838_vm14 = vcmp.gt.f32.partialorder %v3832_v44, 0.0 }
 0x43b   : > { %v3846_v33 = vmul.f32 1.442695, %v3841_v35  ;;  %v3843_v36 = vmin.f32 %v3834_v6, 0.0  ;;  %vm3839_vm15 = vcmp.gt.f32.partialorder %v3834_v6, 0.0 }
 0x43c   : > { %11175 = vpow2.f32 %v3844_v55  ;;  %v3848_v12 = vmul.f32 1.442695, %v3842_v15 }
 0x43d   : > { %11177 = vpow2.f32 %v3846_v33  ;;  %v3850_v9 = vmul.f32 1.442695, %v3843_v36 }
 0x43e   : > { %11179 = vpow2.f32 %v3848_v12 }
 0x43f   : > { %11181 = vpow2.f32 %v3850_v9 }
 0x440   : > { %v11168_v18 = vpop.eup %11167 }
 0x441   : > { %v11170_v42 = vpop.eup %11169  ;;  %v8569_v20 = vadd.f32 -1.0, %v11168_v18 }
 0x442   : > { %v11172_v51 = vpop.eup %11171  ;;  %v8570_v37 = vadd.f32 -1.0, %v11170_v42 }
 0x443   : > { %v11174_v53 = vpop.eup %11173  ;;  %v8571_v8 = vadd.f32 -1.0, %v11172_v51  ;;  %v13463_v39 = vsel %vm3751_vm8, %v3743_v32, %v8569_v20  ;;  %vm11415_vm8 = vmmov 0  }
 0x444   : > { %v8572_v0 = vadd.f32 -1.0, %v11174_v53  ;;  %v13468_v30 = vsel %vm3752_vm9, %v3745_v11, %v8570_v37 }
 0x445   : > { %v13477_v49 = vsel %vm3753_vm10, %v13450_v31, %v8571_v8 }
 0x446   : > { %v11176_v59 = vpop.eup %11175  ;;  %v13486_v29 = vsel %vm3754_vm11, %v13453_v43, %v8572_v0  ;;  %v4034_v0 = vld [vmem:[%s14908_s7] sm:$0x3] }
 0x447   : > { %v11178_v57 = vpop.eup %11177  ;;  %v8573_v16 = vadd.f32 -1.0, %v11176_v59 }
 0x448   : > { %v11180_v61 = vpop.eup %11179  ;;  %v8574_v3 = vadd.f32 -1.0, %v11178_v57 }
 0x449   : > { %v11182_v28 = vpop.eup %11181  ;;  %v13465_v45 = vsel %vm3836_vm12, %v3828_v24, %v8573_v16  ;;  %v8575_v62 = vadd.f32 -1.0, %v11180_v61 }
 0x44a   : > { %v3860_v47 = vmax.f32 %v13463_v39, %v13465_v45  ;;  %v13472_v52 = vsel %vm3837_vm13, %v3830_v10, %v8574_v3  ;;  %v8576_v22 = vadd.f32 -1.0, %v11182_v28  ;;  %v4050_v3 = vld [vmem:[%s14909_s8] sm:$0x3] }
 0x44b   : > { %v3861_v21 = vmax.f32 %v13468_v30, %v13472_v52  ;;  %v13481_v58 = vsel %vm3838_vm14, %v3832_v44, %v8575_v62 }
 0x44c   : > { %v3862_v17 = vmax.f32 %v13477_v49, %v13481_v58  ;;  %v13490_v7 = vsel %vm3839_vm15, %v3834_v6, %v8576_v22  ;;  %v4039_v22 = vrot.slane %v4034_v0, %v15065_v50  ;;  %v4043_v49 = vrot.slane %v4034_v0, %v15066_v56  ;;  %v10585_v0 = vld [vmem:[%s14910_s9 + $0x98] ss:$12 sps:$4 sm:$0xff]  }
 0x44d   : > { %v3863_v34 = vmax.f32 %v13486_v29, %v13490_v7  ;;  %v4059_v7 = vrot.slane %v4050_v3, %v15066_v56 }
 0x46f   : > { %v3906_v5 = vpop.f32.mrb[28].mxu0 }
 0x470   : > { %v3907_v32 = vadd.f32 %v3906_v5, %v13442_v1  ;;  %v3908_v63 = vpop.f32.mrb[29].mxu0 }
 0x471   : > { %v3909_v11 = vadd.f32 %v3908_v63, %v13445_v14  ;;  %v3910_v60 = vpop.f32.mrb[30].mxu0 }
 0x472   : > { %v3919_v13 = vmin.f32 %v3907_v32, 0.0  ;;  %v3911_v31 = vadd.f32 %v3910_v60, %v13442_v1  ;;  %v3912_v19 = vpop.f32.mrb[31].mxu0  ;;  %vm3915_vm0 = vcmp.gt.f32.partialorder %v3907_v32, 0.0 }
 0x473   : > { %v3920_v38 = vmin.f32 %v3909_v11, 0.0  ;;  %v3913_v43 = vadd.f32 %v3912_v19, %v13445_v14  ;;  %vm3916_vm1 = vcmp.gt.f32.partialorder %v3909_v11, 0.0 }
 0x474   : > { %v3923_v41 = vmul.f32 1.442695, %v3919_v13  ;;  %v3921_v26 = vmin.f32 %v3911_v31, 0.0  ;;  %vm3917_vm2 = vcmp.gt.f32.partialorder %v3911_v31, 0.0 }
 0x475   : > { %v3925_v2 = vmul.f32 1.442695, %v3920_v38  ;;  %v3922_v25 = vmin.f32 %v3913_v43, 0.0  ;;  %v3997_v46 = vpop.f32.mrb[28].mxu1  ;;  %vm3918_vm3 = vcmp.gt.f32.partialorder %v3913_v43, 0.0 }
 0x476   : > { %11183 = vpow2.f32 %v3923_v41  ;;  %v3927_v48 = vmul.f32 1.442695, %v3921_v26  ;;  %v3998_v24 = vadd.f32 %v3997_v46, %v13442_v1  ;;  %v3999_v27 = vpop.f32.mrb[29].mxu1 }
 0x477   : > { %11185 = vpow2.f32 %v3925_v2  ;;  %v3929_v54 = vmul.f32 1.442695, %v3922_v25  ;;  %v4000_v10 = vadd.f32 %v3999_v27, %v13445_v14  ;;  %v4001_v23 = vpop.f32.mrb[30].mxu1 }
 0x478   : > { %11187 = vpow2.f32 %v3927_v48  ;;  %v4010_v4 = vmin.f32 %v3998_v24, 0.0  ;;  %v4002_v44 = vadd.f32 %v4001_v23, %v13442_v1  ;;  %v4003_v40 = vpop.f32.mrb[31].mxu1  ;;  %vm4006_vm4 = vcmp.gt.f32.partialorder %v3998_v24, 0.0  ;;  %v10555_v23 = vld [vmem:[%s14910_s9 + $0x8] ss:$12 sps:$4 sm:$0xff]  }
 0x479   : > { %11189 = vpow2.f32 %v3929_v54  ;;  %v4011_v35 = vmin.f32 %v4000_v10, 0.0  ;;  %v4004_v6 = vadd.f32 %v4003_v40, %v13445_v14  ;;  %vm4007_vm5 = vcmp.gt.f32.partialorder %v4000_v10, 0.0  ;;  %v10559_v40 = vld [vmem:[%s14910_s9 + $0xe0] ss:$12 sps:$4 sm:$0xff]  }
 0x47a   : > { %v4014_v55 = vmul.f32 1.442695, %v4010_v4  ;;  %v4012_v15 = vmin.f32 %v4002_v44, 0.0  ;;  %vm4008_vm6 = vcmp.gt.f32.partialorder %v4002_v44, 0.0 }
 0x47b   : > { %v4016_v33 = vmul.f32 1.442695, %v4011_v35  ;;  %v4013_v36 = vmin.f32 %v4004_v6, 0.0  ;;  %vm4009_vm7 = vcmp.gt.f32.partialorder %v4004_v6, 0.0  ;;  %v10556_v35 = vld [vmem:[%s14910_s9 + $0x18] ss:$12 sps:$4 sm:$0xff]  }
 0x47c   : > { %11191 = vpow2.f32 %v4014_v55  ;;  %v4018_v12 = vmul.f32 1.442695, %v4012_v15  ;;  %v10563_v55 = vld [vmem:[%s14910_s9 + $0x34] ss:$12 sps:$4 sm:$0xff]   ;;  %v10564_v15 = vld [vmem:[%s14910_s9 + $0xf8] ss:$12 sps:$4 sm:$0xff]  }
 0x47d   : > { %11193 = vpow2.f32 %v4016_v33  ;;  %v4020_v9 = vmul.f32 1.442695, %v4013_v36  ;;  %v10561_v33 = vld [vmem:[%s14910_s9 + $0x30] ss:$12 sps:$4 sm:$0xff]   ;;  %v10565_v36 = vld [vmem:[%s14910_s9 + $0x38] ss:$12 sps:$4 sm:$0xff]  }
 0x47e   : > { %11195 = vpow2.f32 %v4018_v12  ;;  %v10568_v12 = vld [vmem:[%s14910_s9 + $0x4c] ss:$12 sps:$4 sm:$0xff]  }
 0x47f   : > { %11197 = vpow2.f32 %v4020_v9  ;;  %v10569_v9 = vld [vmem:[%s14910_s9 + $0x110] ss:$12 sps:$4 sm:$0xff]  }
 0x480   : > { %v11184_v18 = vpop.eup %11183 }
 0x481   : > { %v11186_v42 = vpop.eup %11185  ;;  %v8577_v51 = vadd.f32 -1.0, %v11184_v18  ;;  %v10566_v18 = vld [vmem:[%s14910_s9 + $0x48] ss:$12 sps:$4 sm:$0xff]  }
 0x482   : > { %v11188_v53 = vpop.eup %11187  ;;  %v8578_v1 = vadd.f32 -1.0, %v11186_v42  ;;  %v10570_v42 = vld [vmem:[%s14910_s9 + $0x50] ss:$12 sps:$4 sm:$0xff]  }
 0x483   : > { %v11190_v20 = vpop.eup %11189  ;;  %v3935_v59 = vsel %vm3915_vm0, %v3907_v32, %v8577_v51  ;;  %v8579_v14 = vadd.f32 -1.0, %v11188_v53  ;;  %v10573_v51 = vld [vmem:[%s14910_s9 + $0x64] ss:$12 sps:$4 sm:$0xff]   ;;  %v10574_v53 = vld [vmem:[%s14910_s9 + $0x128] ss:$12 sps:$4 sm:$0xff]  }
 0x484   : > { %v3939_v37 = vmax.f32 %v3860_v47, %v3935_v59  ;;  %v3936_v57 = vsel %vm3916_vm1, %v3909_v11, %v8578_v1  ;;  %v8580_v8 = vadd.f32 -1.0, %v11190_v20  ;;  %v10571_v1 = vld [vmem:[%s14910_s9 + $0x60] ss:$12 sps:$4 sm:$0xff]   ;;  %v10575_v20 = vld [vmem:[%s14910_s9 + $0x68] ss:$12 sps:$4 sm:$0xff]  }
 0x485   : > { %v3940_v16 = vmax.f32 %v3861_v21, %v3936_v57  ;;  %v3937_v61 = vsel %vm3917_vm2, %v3911_v31, %v8579_v14  ;;  %v4055_v21 = vrot.slane %v4050_v3, %v15065_v50  ;;  %v10578_v59 = vld [vmem:[%s14910_s9 + $0x7c] ss:$12 sps:$4 sm:$0xff]   ;;  %v10579_v14 = vld [vmem:[%s14910_s9 + $0x140] ss:$12 sps:$4 sm:$0xff]  }
 0x486   : > { %v11192_v28 = vpop.eup %11191  ;;  %v3941_v39 = vmax.f32 %v3862_v17, %v3937_v61  ;;  %v3938_v45 = vsel %vm3918_vm3, %v3913_v43, %v8580_v8  ;;  %v10580_v57 = vld [vmem:[%s14910_s9 + $0x80] ss:$12 sps:$4 sm:$0xff]   ;;  %v10581_v61 = vld [vmem:[%s14910_s9 + $0x90] ss:$12 sps:$4 sm:$0xff]  }
 0x487   : > { %v11194_v62 = vpop.eup %11193  ;;  %v3942_v30 = vmax.f32 %v3863_v34, %v3938_v45  ;;  %v8581_v47 = vadd.f32 -1.0, %v11192_v28  ;;  %v10583_v8 = vld [vmem:[%s14910_s9 + $0x94] ss:$12 sps:$4 sm:$0xff]   ;;  %v10588_v3 = vld [vmem:[%s14910_s9 + $0xac] ss:$12 sps:$4 sm:$0xff]  }
 0x488   : > { %v11196_v52 = vpop.eup %11195  ;;  %v8582_v5 = vadd.f32 -1.0, %v11194_v62  ;;  %v10589_v28 = vld [vmem:[%s14910_s9 + $0x170] ss:$12 sps:$4 sm:$0xff]  }
 0x489   : > { %v11198_v32 = vpop.eup %11197  ;;  %v4026_v63 = vsel %vm4006_vm4, %v3998_v24, %v8581_v47  ;;  %v8583_v58 = vadd.f32 -1.0, %v11196_v52  ;;  %v10590_v45 = vld [vmem:[%s14910_s9 + $0xb0] ss:$12 sps:$4 sm:$0xff]   ;;  %v10591_v47 = vld [vmem:[%s14910_s9 + $0xc0] ss:$12 sps:$4 sm:$0xff]  }
 0x48a   : > { %v4030_v17 = vmax.f32 %v3939_v37, %v4026_v63  ;;  %v4027_v11 = vsel %vm4007_vm5, %v4000_v10, %v8582_v5  ;;  %v8584_v60 = vadd.f32 -1.0, %v11198_v32  ;;  %v10551_v10 = vld [vmem:[%s14910_s9] ss:$12 sps:$4 sm:$0xff]   ;;  %v10576_v37 = vld [vmem:[%s14910_s9 + $0x78] ss:$12 sps:$4 sm:$0xff]  }
 0x48b   : > { %v4031_v29 = vmax.f32 %v3940_v16, %v4027_v11  ;;  %v4028_v34 = vsel %vm4008_vm6, %v4002_v44, %v8583_v58  ;;  %v10558_v44 = vld [vmem:[%s14910_s9 + $0x1c] ss:$12 sps:$4 sm:$0xff]   ;;  %v10584_v16 = vld [vmem:[%s14910_s9 + $0x158] ss:$12 sps:$4 sm:$0xff]   ;;  %v10594_v52 = vld [vmem:[%s14910_s9 + $0x300] ss:$12 sps:$4 sm:$0xff]  }
 0x48c   : > { %v4046_v13 = vmul.f32 %v4039_v22, %v4030_v17  ;;  %v4032_v31 = vmax.f32 %v3941_v39, %v4028_v34  ;;  %v4029_v19 = vsel %vm4009_vm7, %v4004_v6, %v8584_v60  ;;  %v10560_v6 = vld [vmem:[%s14910_s9 + $0x20] ss:$12 sps:$4 sm:$0xff]   ;;  %v10586_v39 = vld [vmem:[%s14910_s9 + $0xa8] ss:$12 sps:$4 sm:$0xff]   ;;  %v10593_v62 = vld [vmem:[%s14910_s9 + $0xc4] ss:$12 sps:$4 sm:$0xff]  }
 0x48d   : > { %v4047_v38 = vmul.f32 %v4043_v49, %v4031_v29  ;;  %v4033_v43 = vmax.f32 %v3942_v30, %v4029_v19  ;;  %v10596_v30 = vld [vmem:[%s14910_s9 + $0x304] ss:$12 sps:$4 sm:$0xff]   ;;  %v10608_v58 = vld [vmem:[%s14910_s9 + $0x334] ss:$12 sps:$4 sm:$0xff]   ;;  %v10611_v60 = vld [vmem:[%s14910_s9 + $0x10c] ss:$12 sps:$4 sm:$0xff]  }
 0x48e   : > { %v4062_v41 = vadd.f32 %v4055_v21, %v4046_v13  ;;  %v4048_v26 = vmul.f32 %v4039_v22, %v4032_v31  ;;  %v10599_v22 = vld [vmem:[%s14910_s9 + $0xdc] ss:$12 sps:$4 sm:$0xff]   ;;  %v10597_v32 = vld [vmem:[%s14910_s9 + $0xd8] ss:$12 sps:$4 sm:$0xff]   ;;  %v10615_v19 = vld [vmem:[%s14910_s9 + $0x120] ss:$12 sps:$4 sm:$0xff]  }
 0x48f   : > { %v4063_v2 = vadd.f32 %v4059_v7, %v4047_v38  ;;  %v4049_v25 = vmul.f32 %v4043_v49, %v4033_v43  ;;  %v10600_v63 = vld [vmem:[%s14910_s9 + $0x318] ss:$12 sps:$4 sm:$0xff]   ;;  %v10605_v49 = vld [vmem:[%s14910_s9 + $0xf4] ss:$12 sps:$4 sm:$0xff]   ;;  %v10603_v17 = vld [vmem:[%s14910_s9 + $0xf0] ss:$12 sps:$4 sm:$0xff]  }
 0x490   : > { %v13518_v46 = vpack.c.bf16 %v4062_v41, %v4062_v41  ;;  %v13520_v48 = vadd.f32 %v4055_v21, %v4048_v26  ;;  %v10602_v21 = vld [vmem:[%s14910_s9 + $0x31c] ss:$12 sps:$4 sm:$0xff]   ;;  %v10614_v29 = vld [vmem:[%s14910_s9 + $0x34c] ss:$12 sps:$4 sm:$0xff]   ;;  %v10617_v13 = vld [vmem:[%s14910_s9 + $0x124] ss:$12 sps:$4 sm:$0xff]  }
 0x491   : > { %v13522_v24 = vpack.c.bf16 %v4063_v2, %v4063_v2  ;;  %v13524_v27 = vadd.f32 %v4059_v7, %v4049_v25  ;;  %v10606_v11 = vld [vmem:[%s14910_s9 + $0x330] ss:$12 sps:$4 sm:$0xff]   ;;  %v10609_v7 = vld [vmem:[%s14910_s9 + $0x108] ss:$12 sps:$4 sm:$0xff]   ;;  %v10618_v38 = vld [vmem:[%s14910_s9 + $0x360] ss:$12 sps:$4 sm:$0xff]  }
 0x492   : > { %v13536_v4 = vshrl.u32 %v13518_v46, 16  ;;  %v10612_v34 = vld [vmem:[%s14910_s9 + $0x348] ss:$12 sps:$4 sm:$0xff]   ;;  %v10620_v31 = vld [vmem:[%s14910_s9 + $0x364] ss:$12 sps:$4 sm:$0xff]  }
 0x493   : > { %v13527_v54 = vshrl.u32 %v13522_v24, 16  ;;  %v4947_v5 = vrot.slane %v13522_v24, 1  ;;  %v10623_v43 = vld [vmem:[%s14910_s9 + $0x13c] ss:$12 sps:$4 sm:$0xff]   ;;  %v10621_v26 = vld [vmem:[%s14910_s9 + $0x138] ss:$12 sps:$4 sm:$0xff]  }
 0x494   : > { %v10626_v41 = vld [vmem:[%s14910_s9 + $0x37c] ss:$12 sps:$4 sm:$0xff]   ;;  %v10624_v2 = vld [vmem:[%s14910_s9 + $0x378] ss:$12 sps:$4 sm:$0xff]   ;;  %v10629_v25 = vld [vmem:[%s14910_s9 + $0x154] ss:$12 sps:$4 sm:$0xff]  }
 0x495   : > { %4493 = vmatprep.mubr.bf16.mxu0 %v13527_v54  ;;  %4534 = vmatprep.mubr.bf16.mxu1 %v13527_v54 }
 0x496   : > { %4494 = vmatmul.mubr.bf16.vlgmr.msra.gmra.mrb[32].mxu0 %v13536_v4  ;;  %4535 = vmatmul.mubr.bf16.vlgmr.msra.gmra.mrb[32].mxu1 %v13536_v4 }
 0x497   : > { %4799 = vmatpush1.bf16.msra.mxu1 %v10551_v10  ;;  %9582 = vmatpush3.bf16.msra.mxu0 %v10555_v23  ;;  %v10632_v10 = vld [vmem:[%s14910_s9 + $0x394] ss:$12 sps:$4 sm:$0xff]   ;;  %v10627_v23 = vld [vmem:[%s14910_s9 + $0x150] ss:$12 sps:$4 sm:$0xff]  }
 0x498   : > { %4830 = vmatprep.mubr.bf16.mxu1 %v13522_v24  ;;  %4871 = vmatprep.mubr.bf16.mxu0 %v13522_v24 }
 0x499   : > { %4800 = vmatprep.subr.bf16.mxu1 %v10558_v44  ;;  %9583 = vmatprep.subr.bf16.mxu0 %v10559_v40  ;;  %v10630_v44 = vld [vmem:[%s14910_s9 + $0x390] ss:$12 sps:$4 sm:$0xff]   ;;  %v10635_v40 = vld [vmem:[%s14910_s9 + $0x16c] ss:$12 sps:$4 sm:$0xff]  }
 0x49b   : > { %4801 = vmatpush1.bf16.msra.mxu1 %v10556_v35  ;;  %9584 = vmatpush3.bf16.msra.mxu0 %v10560_v6  ;;  %v10638_v35 = vld [vmem:[%s14910_s9 + $0x3ac] ss:$12 sps:$4 sm:$0xff]   ;;  %v10633_v6 = vld [vmem:[%s14910_s9 + $0x168] ss:$12 sps:$4 sm:$0xff]  }
 0x49c   : > { %4802 = vmatprep.subr.bf16.mxu1 %v10563_v55  ;;  %9585 = vmatprep.subr.bf16.mxu0 %v10564_v15  ;;  %v10636_v55 = vld [vmem:[%s14910_s9 + $0x3a8] ss:$12 sps:$4 sm:$0xff]   ;;  %v10641_v15 = vld [vmem:[%s14910_s9 + $0x3c4] ss:$12 sps:$4 sm:$0xff]  }
 0x49f   : > { %4803 = vmatpush1.bf16.msra.mxu1 %v10561_v33  ;;  %9586 = vmatpush3.bf16.msra.mxu0 %v10565_v36  ;;  %v10642_v33 = vld [vmem:[%s14910_s9 + $0x3c8] ss:$12 sps:$4 sm:$0xff]   ;;  %v10639_v36 = vld [vmem:[%s14910_s9 + $0x3c0] ss:$12 sps:$4 sm:$0xff]  }
 0x4a0   : > { %4804 = vmatprep.subr.bf16.mxu1 %v10568_v12  ;;  %9587 = vmatprep.subr.bf16.mxu0 %v10569_v9  ;;  %v10643_v12 = vld [vmem:[%s14910_s9 + $0x308] ss:$12 sps:$4 sm:$0xff]  }
 0x4a1   : > { %v10646_v9 = vld [vmem:[%s14910_s9 + $0x3dc] ss:$12 sps:$4 sm:$0xff]  }
 0x4a3   : > { %4805 = vmatpush1.bf16.msra.mxu1 %v10566_v18  ;;  %9588 = vmatpush3.bf16.msra.mxu0 %v10570_v42  ;;  %v10647_v18 = vld [vmem:[%s14910_s9 + $0x3e0] ss:$12 sps:$4 sm:$0xff]   ;;  %v10644_v42 = vld [vmem:[%s14910_s9 + $0x3d8] ss:$12 sps:$4 sm:$0xff]  }
 0x4a4   : > { %4806 = vmatprep.subr.bf16.mxu1 %v10573_v51  ;;  %9589 = vmatprep.subr.bf16.mxu0 %v10574_v53  ;;  %v10648_v51 = vld [vmem:[%s14910_s9 + $0x320] ss:$12 sps:$4 sm:$0xff]  }
 0x4a5   : > { %v10651_v53 = vld [vmem:[%s14910_s9 + $0x3f4] ss:$12 sps:$4 sm:$0xff]  }
 0x4a7   : > { %4807 = vmatpush1.bf16.msra.mxu1 %v10571_v1  ;;  %9590 = vmatpush3.bf16.msra.mxu0 %v10575_v20  ;;  %v10652_v1 = vld [vmem:[%s14910_s9 + $0x3f8] ss:$12 sps:$4 sm:$0xff]   ;;  %v10649_v20 = vld [vmem:[%s14910_s9 + $0x3f0] ss:$12 sps:$4 sm:$0xff]  }
 0x4a8   : > { %4808 = vmatprep.subr.bf16.mxu1 %v10578_v59  ;;  %9591 = vmatprep.subr.bf16.mxu0 %v10579_v14  ;;  %v10653_v59 = vld [vmem:[%s14910_s9 + $0x338] ss:$12 sps:$4 sm:$0xff]  }
 0x4a9   : > { %v10656_v14 = vld [vmem:[%s14910_s9 + $0x40c] ss:$12 sps:$4 sm:$0xff]  }
 0x4ab   : > { %4809 = vmatpush1.bf16.msra.mxu1 %v10576_v37  ;;  %9592 = vmatpush3.bf16.msra.mxu0 %v10580_v57  ;;  %v10657_v37 = vld [vmem:[%s14910_s9 + $0x410] ss:$12 sps:$4 sm:$0xff]   ;;  %v10654_v57 = vld [vmem:[%s14910_s9 + $0x408] ss:$12 sps:$4 sm:$0xff]  }
 0x4ac   : > { %4810 = vmatprep.subr.bf16.mxu1 %v10583_v8  ;;  %9593 = vmatprep.subr.bf16.mxu0 %v10584_v16  ;;  %v10658_v8 = vld [vmem:[%s14910_s9 + $0x350] ss:$12 sps:$4 sm:$0xff]  }
 0x4ad   : > { %v10661_v16 = vld [vmem:[%s14910_s9 + $0x424] ss:$12 sps:$4 sm:$0xff]  }
 0x4af   : > { %4811 = vmatpush1.bf16.msra.mxu1 %v10581_v61  ;;  %9594 = vmatpush3.bf16.msra.mxu0 %v10585_v0  ;;  %v10662_v61 = vld [vmem:[%s14910_s9 + $0x428] ss:$12 sps:$4 sm:$0xff]   ;;  %v10659_v0 = vld [vmem:[%s14910_s9 + $0x420] ss:$12 sps:$4 sm:$0xff]  }
 0x4b0   : > { %4812 = vmatprep.subr.bf16.mxu1 %v10588_v3  ;;  %9595 = vmatprep.subr.bf16.mxu0 %v10589_v28  ;;  %v10663_v3 = vld [vmem:[%s14910_s9 + $0x368] ss:$12 sps:$4 sm:$0xff]  }
 0x4b1   : > { %v10666_v28 = vld [vmem:[%s14910_s9 + $0x43c] ss:$12 sps:$4 sm:$0xff]  }
 0x4b3   : > { %4813 = vmatpush1.bf16.msra.mxu1 %v10586_v39  ;;  %9596 = vmatpush3.bf16.msra.mxu0 %v10590_v45  ;;  %v10667_v39 = vld [vmem:[%s14910_s9 + $0x440] ss:$12 sps:$4 sm:$0xff]   ;;  %v10664_v45 = vld [vmem:[%s14910_s9 + $0x438] ss:$12 sps:$4 sm:$0xff]  }
 0x4b4   : > { %4814 = vmatprep.subr.bf16.mxu1 %v10593_v62  ;;  %5206 = vmatprep.subr.bf16.mxu0 %v10596_v30  ;;  %v10668_v62 = vld [vmem:[%s14910_s9 + $0x380] ss:$12 sps:$4 sm:$0xff]  }
 0x4b5   : > { %v10671_v30 = vld [vmem:[%s14910_s9 + $0x454] ss:$12 sps:$4 sm:$0xff]  }
 0x4b6   : > { %4872 = vmatmul.mubr.bf16.vlgmr.msra.gmra.mrb[36].mxu0 %v13518_v46 }
 0x4b7   : > { %4815 = vmatpush1.bf16.msra.mxu1 %v10591_v47  ;;  %5207 = vmatpush1.bf16.msra.mxu0 %v10594_v52  ;;  %v10672_v47 = vld [vmem:[%s14910_s9 + $0x458] ss:$12 sps:$4 sm:$0xff]   ;;  %v10669_v52 = vld [vmem:[%s14910_s9 + $0x450] ss:$12 sps:$4 sm:$0xff]  }
 0x4b8   : > { %5238 = vmatprep.mubr.bf16.mxu0 %v4947_v5  ;;  %4816 = vmatprep.subr.bf16.mxu1 %v10599_v22  ;;  %v10673_v22 = vld [vmem:[%s14910_s9 + $0x398] ss:$12 sps:$4 sm:$0xff]  }
 0x4b9   : > { %5208 = vmatprep.subr.bf16.mxu0 %v10602_v21  ;;  %v10676_v21 = vld [vmem:[%s14910_s9 + $0x46c] ss:$12 sps:$4 sm:$0xff]  }
 0x4bb   : > { %4817 = vmatpush1.bf16.msra.mxu1 %v10597_v32  ;;  %5209 = vmatpush1.bf16.msra.mxu0 %v10600_v63  ;;  %v10674_v32 = vld [vmem:[%s14910_s9 + $0x468] ss:$12 sps:$4 sm:$0xff]   ;;  %v10678_v63 = vld [vmem:[%s14910_s9 + $0x3b0] ss:$12 sps:$4 sm:$0xff]  }
 0x4bc   : > { %4818 = vmatprep.subr.bf16.mxu1 %v10605_v49  ;;  %5210 = vmatprep.subr.bf16.mxu0 %v10608_v58  ;;  %v10681_v49 = vld [vmem:[%s14910_s9 + $0x484] ss:$12 sps:$4 sm:$0xff]   ;;  %v10682_v58 = vld [vmem:[%s14910_s9 + $0x548] ss:$12 sps:$4 sm:$0xff]  }
 0x4bf   : > { %4819 = vmatpush1.bf16.msra.mxu1 %v10603_v17  ;;  %5211 = vmatpush1.bf16.msra.mxu0 %v10606_v11  ;;  %v10679_v17 = vld [vmem:[%s14910_s9 + $0x480] ss:$12 sps:$4 sm:$0xff]   ;;  %v4946_v11 = vrot.slane %v13518_v46, 1 }
 0x4c0   : > { %4820 = vmatprep.subr.bf16.mxu1 %v10611_v60  ;;  %5212 = vmatprep.subr.bf16.mxu0 %v10614_v29  ;;  %v10683_v60 = vld [vmem:[%s14910_s9 + $0x488] ss:$12 sps:$4 sm:$0xff]   ;;  %v5356_v29 = vrot.slane %v13527_v54, 1 }
 0x4c3   : > { %4821 = vmatpush1.bf16.msra.mxu1 %v10609_v7  ;;  %5213 = vmatpush1.bf16.msra.mxu0 %v10612_v34  ;;  %v10686_v7 = vld [vmem:[%s14910_s9 + $0x49c] ss:$12 sps:$4 sm:$0xff]   ;;  %v10687_v34 = vld [vmem:[%s14910_s9 + $0x560] ss:$12 sps:$4 sm:$0xff]  }
 0x4c4   : > { %4822 = vmatprep.subr.bf16.mxu1 %v10617_v13  ;;  %5214 = vmatprep.subr.bf16.mxu0 %v10620_v31  ;;  %v10684_v13 = vld [vmem:[%s14910_s9 + $0x498] ss:$12 sps:$4 sm:$0xff]   ;;  %v10688_v31 = vld [vmem:[%s14910_s9 + $0x4a0] ss:$12 sps:$4 sm:$0xff]  }
 0x4c7   : > { %4823 = vmatpush1.bf16.msra.mxu1 %v10615_v19  ;;  %5215 = vmatpush1.bf16.msra.mxu0 %v10618_v38  ;;  %v10691_v19 = vld [vmem:[%s14910_s9 + $0x4b4] ss:$12 sps:$4 sm:$0xff]   ;;  %v10692_v38 = vld [vmem:[%s14910_s9 + $0x578] ss:$12 sps:$4 sm:$0xff]  }
 0x4c8   : > { %4824 = vmatprep.subr.bf16.mxu1 %v10623_v43  ;;  %5216 = vmatprep.subr.bf16.mxu0 %v10626_v41  ;;  %v10689_v43 = vld [vmem:[%s14910_s9 + $0x4b0] ss:$12 sps:$4 sm:$0xff]   ;;  %v10693_v41 = vld [vmem:[%s14910_s9 + $0x4b8] ss:$12 sps:$4 sm:$0xff]  }
 0x4cb   : > { %4825 = vmatpush1.bf16.msra.mxu1 %v10621_v26  ;;  %5217 = vmatpush1.bf16.msra.mxu0 %v10624_v2  ;;  %v10696_v26 = vld [vmem:[%s14910_s9 + $0x4cc] ss:$12 sps:$4 sm:$0xff]   ;;  %v10697_v2 = vld [vmem:[%s14910_s9 + $0x590] ss:$12 sps:$4 sm:$0xff]  }
 0x4cc   : > { %4826 = vmatprep.subr.bf16.mxu1 %v10629_v25  ;;  %5218 = vmatprep.subr.bf16.mxu0 %v10632_v10  ;;  %v10694_v25 = vld [vmem:[%s14910_s9 + $0x4c8] ss:$12 sps:$4 sm:$0xff]   ;;  %v10698_v10 = vld [vmem:[%s14910_s9 + $0x4d0] ss:$12 sps:$4 sm:$0xff]  }
 0x4cf   : > { %4827 = vmatpush1.bf16.msra.mxu1 %v10627_v23  ;;  %5219 = vmatpush1.bf16.msra.mxu0 %v10630_v44  ;;  %v10701_v23 = vld [vmem:[%s14910_s9 + $0x4e4] ss:$12 sps:$4 sm:$0xff]   ;;  %v10702_v44 = vld [vmem:[%s14910_s9 + $0x5a8] ss:$12 sps:$4 sm:$0xff]  }
 0x4d0   : > { %4828 = vmatprep.subr.bf16.mxu1 %v10635_v40  ;;  %5220 = vmatprep.subr.bf16.mxu0 %v10638_v35  ;;  %v10699_v40 = vld [vmem:[%s14910_s9 + $0x4e0] ss:$12 sps:$4 sm:$0xff]   ;;  %v10703_v35 = vld [vmem:[%s14910_s9 + $0x4e8] ss:$12 sps:$4 sm:$0xff]  }
 0x4d3   : > { %4829 = vmatpush1.bf16.msra.mxu1 %v10633_v6  ;;  %5221 = vmatpush1.bf16.msra.mxu0 %v10636_v55  ;;  %v10706_v6 = vld [vmem:[%s14910_s9 + $0x4fc] ss:$12 sps:$4 sm:$0xff]   ;;  %v10707_v55 = vld [vmem:[%s14910_s9 + $0x5c0] ss:$12 sps:$4 sm:$0xff]  }
 0x4d4   : > { %5222 = vmatprep.subr.bf16.mxu0 %v10641_v15  ;;  %9603 = vmatprep.subr.bf16.mxu1 %v10642_v33  ;;  %v10704_v15 = vld [vmem:[%s14910_s9 + $0x4f8] ss:$12 sps:$4 sm:$0xff]   ;;  %v10708_v33 = vld [vmem:[%s14910_s9 + $0x500] ss:$12 sps:$4 sm:$0xff]  }
 0x4d6   : > { %4831 = vmatmul.mubr.bf16.vlgmr.msra.gmra.mrb[36].mxu1 %v13518_v46 }
 0x4d7   : > { %5223 = vmatpush1.bf16.msra.mxu0 %v10639_v36  ;;  %9604 = vmatpush3.bf16.msra.mxu1 %v10643_v12  ;;  %v10711_v36 = vld [vmem:[%s14910_s9 + $0x514] ss:$12 sps:$4 sm:$0xff]   ;;  %v10712_v12 = vld [vmem:[%s14910_s9 + $0x5d8] ss:$12 sps:$4 sm:$0xff]  }
 0x4d8   : > { %5279 = vmatprep.mubr.bf16.mxu1 %v4947_v5  ;;  %5224 = vmatprep.subr.bf16.mxu0 %v10646_v9  ;;  %v10677_v5 = vld [vmem:[%s14910_s9 + $0x470] ss:$12 sps:$4 sm:$0xff]  }
 0x4d9   : > { %9605 = vmatprep.subr.bf16.mxu1 %v10647_v18  ;;  %v10709_v9 = vld [vmem:[%s14910_s9 + $0x510] ss:$12 sps:$4 sm:$0xff]   ;;  %v10713_v18 = vld [vmem:[%s14910_s9 + $0x518] ss:$12 sps:$4 sm:$0xff]  }
 0x4db   : > { %5225 = vmatpush1.bf16.msra.mxu0 %v10644_v42  ;;  %9606 = vmatpush3.bf16.msra.mxu1 %v10648_v51  ;;  %v10716_v42 = vld [vmem:[%s14910_s9 + $0x52c] ss:$12 sps:$4 sm:$0xff]   ;;  %v10717_v51 = vld [vmem:[%s14910_s9 + $0x5f0] ss:$12 sps:$4 sm:$0xff]  }
 0x4dc   : > { %5226 = vmatprep.subr.bf16.mxu0 %v10651_v53  ;;  %9607 = vmatprep.subr.bf16.mxu1 %v10652_v1  ;;  %v10714_v53 = vld [vmem:[%s14910_s9 + $0x528] ss:$12 sps:$4 sm:$0xff]   ;;  %v10718_v1 = vld [vmem:[%s14910_s9 + $0x530] ss:$12 sps:$4 sm:$0xff]  }
 0x4df   : > { %5227 = vmatpush1.bf16.msra.mxu0 %v10649_v20  ;;  %9608 = vmatpush3.bf16.msra.mxu1 %v10653_v59  ;;  %v10721_v20 = vld [vmem:[%s14910_s9 + $0x544] ss:$12 sps:$4 sm:$0xff]  }
 0x4e0   : > { %5228 = vmatprep.subr.bf16.mxu0 %v10656_v14  ;;  %9609 = vmatprep.subr.bf16.mxu1 %v10657_v37  ;;  %v10724_v59 = vld [vmem:[%s14910_s9 + $0x604] ss:$12 sps:$4 sm:$0xff]   ;;  %v10719_v14 = vld [vmem:[%s14910_s9 + $0x540] ss:$12 sps:$4 sm:$0xff]  }
 0x4e1   : > { %v10722_v37 = vld [vmem:[%s14910_s9 + $0x600] ss:$12 sps:$4 sm:$0xff]  }
 0x4e3   : > { %5229 = vmatpush1.bf16.msra.mxu0 %v10654_v57  ;;  %9610 = vmatpush3.bf16.msra.mxu1 %v10658_v8  ;;  %v5355_v57 = vrot.slane %v13536_v4, 1  ;;  %v10727_v8 = vld [vmem:[%s14910_s9 + $0x55c] ss:$12 sps:$4 sm:$0xff]  }
 0x4e4   : > { %5230 = vmatprep.subr.bf16.mxu0 %v10661_v16  ;;  %9611 = vmatprep.subr.bf16.mxu1 %v10662_v61  ;;  %v10730_v16 = vld [vmem:[%s14910_s9 + $0x61c] ss:$12 sps:$4 sm:$0xff]   ;;  %v5765_v61 = vrot.slane %v13522_v24, 2 }
 0x4e7   : > { %5231 = vmatpush1.bf16.msra.mxu0 %v10659_v0  ;;  %9612 = vmatpush3.bf16.msra.mxu1 %v10663_v3  ;;  %v10725_v0 = vld [vmem:[%s14910_s9 + $0x558] ss:$12 sps:$4 sm:$0xff]  }
 0x4e8   : > { %5232 = vmatprep.subr.bf16.mxu0 %v10666_v28  ;;  %9613 = vmatprep.subr.bf16.mxu1 %v10667_v39  ;;  %v10728_v3 = vld [vmem:[%s14910_s9 + $0x618] ss:$12 sps:$4 sm:$0xff]   ;;  %v10733_v28 = vld [vmem:[%s14910_s9 + $0x574] ss:$12 sps:$4 sm:$0xff]  }
 0x4e9   : > { %v10736_v39 = vld [vmem:[%s14910_s9 + $0x634] ss:$12 sps:$4 sm:$0xff]  }
 0x4eb   : > { %5233 = vmatpush1.bf16.msra.mxu0 %v10664_v45  ;;  %9614 = vmatpush3.bf16.msra.mxu1 %v10668_v62  ;;  %v10731_v45 = vld [vmem:[%s14910_s9 + $0x570] ss:$12 sps:$4 sm:$0xff]  }
 0x4ec   : > { %5234 = vmatprep.subr.bf16.mxu0 %v10671_v30  ;;  %9615 = vmatprep.subr.bf16.mxu1 %v10672_v47  ;;  %v10734_v62 = vld [vmem:[%s14910_s9 + $0x630] ss:$12 sps:$4 sm:$0xff]   ;;  %v10739_v30 = vld [vmem:[%s14910_s9 + $0x58c] ss:$12 sps:$4 sm:$0xff]  }
 0x4ed   : > { %v10742_v47 = vld [vmem:[%s14910_s9 + $0x64c] ss:$12 sps:$4 sm:$0xff]  }
 0x4ef   : > { %5235 = vmatpush1.bf16.msra.mxu0 %v10669_v52  ;;  %9616 = vmatpush3.bf16.msra.mxu1 %v10673_v22  ;;  %v10737_v52 = vld [vmem:[%s14910_s9 + $0x588] ss:$12 sps:$4 sm:$0xff]  }
 0x4f0   : > { %5236 = vmatprep.subr.bf16.mxu0 %v10676_v21  ;;  %9617 = vmatprep.subr.bf16.mxu1 %v10677_v5  ;;  %v10740_v22 = vld [vmem:[%s14910_s9 + $0x648] ss:$12 sps:$4 sm:$0xff]   ;;  %v10745_v21 = vld [vmem:[%s14910_s9 + $0x5a4] ss:$12 sps:$4 sm:$0xff]  }
 0x4f1   : > { %v10748_v5 = vld [vmem:[%s14910_s9 + $0x664] ss:$12 sps:$4 sm:$0xff]  }
 0x4f3   : > { %5237 = vmatpush1.bf16.msra.mxu0 %v10674_v32  ;;  %9618 = vmatpush3.bf16.msra.mxu1 %v10678_v63  ;;  %v10743_v32 = vld [vmem:[%s14910_s9 + $0x5a0] ss:$12 sps:$4 sm:$0xff]  }
 0x4f4   : > { %5615 = vmatprep.subr.bf16.mxu1 %v10681_v49  ;;  %9625 = vmatprep.subr.bf16.mxu0 %v10682_v58  ;;  %v10746_v63 = vld [vmem:[%s14910_s9 + $0x660] ss:$12 sps:$4 sm:$0xff]   ;;  %v10751_v49 = vld [vmem:[%s14910_s9 + $0x5bc] ss:$12 sps:$4 sm:$0xff]  }
 0x4f5   : > { %v10754_v58 = vld [vmem:[%s14910_s9 + $0x67c] ss:$12 sps:$4 sm:$0xff]  }
 0x4f6   : > { %5239 = vmatmul.mubr.bf16.vlgmr.msra.gmra.mrb[40].mxu0 %v4946_v11  ;;  %5280 = vmatmul.mubr.bf16.vlgmr.msra.gmra.mrb[40].mxu1 %v4946_v11  ;;  %v10752_v11 = vld [vmem:[%s14910_s9 + $0x678] ss:$12 sps:$4 sm:$0xff]  }
 0x4f7   : > { %5616 = vmatpush1.bf16.msra.mxu1 %v10679_v17  ;;  %5647 = vmatprep.mubr.bf16.mxu1 %v5356_v29  ;;  %v10749_v17 = vld [vmem:[%s14910_s9 + $0x5b8] ss:$12 sps:$4 sm:$0xff]  }
 0x4f8   : > { %9626 = vmatpush3.bf16.msra.mxu0 %v10683_v60  ;;  %5688 = vmatprep.mubr.bf16.mxu0 %v5356_v29  ;;  %v10757_v60 = vld [vmem:[%s14910_s9 + $0x5d4] ss:$12 sps:$4 sm:$0xff]  }
 0x4f9   : > { %5617 = vmatprep.subr.bf16.mxu1 %v10686_v7  ;;  %9627 = vmatprep.subr.bf16.mxu0 %v10687_v34  ;;  %v10760_v29 = vld [vmem:[%s14910_s9 + $0x694] ss:$12 sps:$4 sm:$0xff]   ;;  %v10755_v7 = vld [vmem:[%s14910_s9 + $0x5d0] ss:$12 sps:$4 sm:$0xff]  }
 0x4fa   : > { %v10758_v34 = vld [vmem:[%s14910_s9 + $0x690] ss:$12 sps:$4 sm:$0xff]  }
 0x4fb   : > { %5618 = vmatpush1.bf16.msra.mxu1 %v10684_v13  ;;  %v10763_v13 = vld [vmem:[%s14910_s9 + $0x5ec] ss:$12 sps:$4 sm:$0xff]  }
 0x4fc   : > { %9628 = vmatpush3.bf16.msra.mxu0 %v10688_v31  ;;  %5619 = vmatprep.subr.bf16.mxu1 %v10691_v19  ;;  %v10766_v31 = vld [vmem:[%s14910_s9 + $0x6ac] ss:$12 sps:$4 sm:$0xff]   ;;  %v10761_v19 = vld [vmem:[%s14910_s9 + $0x5e8] ss:$12 sps:$4 sm:$0xff]  }
 0x4fd   : > { %9629 = vmatprep.subr.bf16.mxu0 %v10692_v38  ;;  %v10764_v38 = vld [vmem:[%s14910_s9 + $0x6a8] ss:$12 sps:$4 sm:$0xff]  }
 0x4ff   : > { %5620 = vmatpush1.bf16.msra.mxu1 %v10689_v43  ;;  %v10770_v43 = vld [vmem:[%s14910_s9 + $0x6c8] ss:$12 sps:$4 sm:$0xff]  }
 0x500   : > { %9630 = vmatpush3.bf16.msra.mxu0 %v10693_v41  ;;  %5621 = vmatprep.subr.bf16.mxu1 %v10696_v26  ;;  %v10769_v41 = vld [vmem:[%s14910_s9 + $0x6c4] ss:$12 sps:$4 sm:$0xff]   ;;  %v10771_v26 = vld [vmem:[%s14910_s9 + $0x608] ss:$12 sps:$4 sm:$0xff]  }
 0x501   : > { %9631 = vmatprep.subr.bf16.mxu0 %v10697_v2  ;;  %v10767_v2 = vld [vmem:[%s14910_s9 + $0x6c0] ss:$12 sps:$4 sm:$0xff]  }
 0x503   : > { %5622 = vmatpush1.bf16.msra.mxu1 %v10694_v25  ;;  %v10775_v25 = vld [vmem:[%s14910_s9 + $0x6e0] ss:$12 sps:$4 sm:$0xff]  }
 0x504   : > { %9632 = vmatpush3.bf16.msra.mxu0 %v10698_v10  ;;  %5623 = vmatprep.subr.bf16.mxu1 %v10701_v23  ;;  %v10774_v10 = vld [vmem:[%s14910_s9 + $0x6dc] ss:$12 sps:$4 sm:$0xff]   ;;  %v10776_v23 = vld [vmem:[%s14910_s9 + $0x620] ss:$12 sps:$4 sm:$0xff]  }
 0x505   : > { %9633 = vmatprep.subr.bf16.mxu0 %v10702_v44  ;;  %v10772_v44 = vld [vmem:[%s14910_s9 + $0x6d8] ss:$12 sps:$4 sm:$0xff]  }
 0x507   : > { %5624 = vmatpush1.bf16.msra.mxu1 %v10699_v40  ;;  %v10780_v40 = vld [vmem:[%s14910_s9 + $0x6f8] ss:$12 sps:$4 sm:$0xff]  }
 0x508   : > { %9634 = vmatpush3.bf16.msra.mxu0 %v10703_v35  ;;  %5625 = vmatprep.subr.bf16.mxu1 %v10706_v6  ;;  %v10779_v35 = vld [vmem:[%s14910_s9 + $0x6f4] ss:$12 sps:$4 sm:$0xff]   ;;  %v10781_v6 = vld [vmem:[%s14910_s9 + $0x638] ss:$12 sps:$4 sm:$0xff]  }
 0x509   : > { %9635 = vmatprep.subr.bf16.mxu0 %v10707_v55  ;;  %v10777_v55 = vld [vmem:[%s14910_s9 + $0x6f0] ss:$12 sps:$4 sm:$0xff]  }
 0x50b   : > { %5626 = vmatpush1.bf16.msra.mxu1 %v10704_v15  ;;  %v10785_v15 = vld [vmem:[%s14910_s9 + $0x710] ss:$12 sps:$4 sm:$0xff]  }
 0x50c   : > { %9636 = vmatpush3.bf16.msra.mxu0 %v10708_v33  ;;  %5627 = vmatprep.subr.bf16.mxu1 %v10711_v36  ;;  %v10784_v33 = vld [vmem:[%s14910_s9 + $0x70c] ss:$12 sps:$4 sm:$0xff]   ;;  %v10786_v36 = vld [vmem:[%s14910_s9 + $0x650] ss:$12 sps:$4 sm:$0xff]  }
 0x50d   : > { %9637 = vmatprep.subr.bf16.mxu0 %v10712_v12  ;;  %v10782_v12 = vld [vmem:[%s14910_s9 + $0x708] ss:$12 sps:$4 sm:$0xff]  }
 0x50f   : > { %5628 = vmatpush1.bf16.msra.mxu1 %v10709_v9  ;;  %v10790_v9 = vld [vmem:[%s14910_s9 + $0x728] ss:$12 sps:$4 sm:$0xff]  }
 0x510   : > { %9638 = vmatpush3.bf16.msra.mxu0 %v10713_v18  ;;  %5629 = vmatprep.subr.bf16.mxu1 %v10716_v42  ;;  %v10789_v18 = vld [vmem:[%s14910_s9 + $0x724] ss:$12 sps:$4 sm:$0xff]   ;;  %v10791_v42 = vld [vmem:[%s14910_s9 + $0x668] ss:$12 sps:$4 sm:$0xff]  }
 0x511   : > { %9639 = vmatprep.subr.bf16.mxu0 %v10717_v51  ;;  %v10787_v51 = vld [vmem:[%s14910_s9 + $0x720] ss:$12 sps:$4 sm:$0xff]  }
 0x513   : > { %5630 = vmatpush1.bf16.msra.mxu1 %v10714_v53  ;;  %v10795_v53 = vld [vmem:[%s14910_s9 + $0x740] ss:$12 sps:$4 sm:$0xff]  }
 0x514   : > { %9640 = vmatpush3.bf16.msra.mxu0 %v10718_v1  ;;  %5631 = vmatprep.subr.bf16.mxu1 %v10721_v20  ;;  %v10794_v1 = vld [vmem:[%s14910_s9 + $0x73c] ss:$12 sps:$4 sm:$0xff]   ;;  %v10796_v20 = vld [vmem:[%s14910_s9 + $0x680] ss:$12 sps:$4 sm:$0xff]  }
 0x515   : > { %6024 = vmatprep.subr.bf16.mxu0 %v10724_v59  ;;  %v10792_v59 = vld [vmem:[%s14910_s9 + $0x738] ss:$12 sps:$4 sm:$0xff]  }
 0x517   : > { %5689 = vmatmul.mubr.bf16.vlgmr.msra.gmra.mrb[44].mxu0 %v5355_v57  ;;  %5632 = vmatpush1.bf16.msra.mxu1 %v10719_v14  ;;  %v10800_v14 = vld [vmem:[%s14910_s9 + $0x758] ss:$12 sps:$4 sm:$0xff]  }
 0x518   : > { %6025 = vmatpush1.bf16.msra.mxu0 %v10722_v37  ;;  %6056 = vmatprep.mubr.bf16.mxu0 %v5765_v61  ;;  %v10799_v37 = vld [vmem:[%s14910_s9 + $0x754] ss:$12 sps:$4 sm:$0xff]  }
 0x519   : > { %5633 = vmatprep.subr.bf16.mxu1 %v10727_v8  ;;  %6026 = vmatprep.subr.bf16.mxu0 %v10730_v16  ;;  %v10797_v8 = vld [vmem:[%s14910_s9 + $0x750] ss:$12 sps:$4 sm:$0xff]  }
 0x51a   : > { %v10805_v16 = vld [vmem:[%s14910_s9 + $0x770] ss:$12 sps:$4 sm:$0xff]  }
 0x51b   : > { %5634 = vmatpush1.bf16.msra.mxu1 %v10725_v0  ;;  %v10806_v0 = vld [vmem:[%s14910_s9 + $0x6b0] ss:$12 sps:$4 sm:$0xff]  }
 0x51c   : > { %6027 = vmatpush1.bf16.msra.mxu0 %v10728_v3  ;;  %5635 = vmatprep.subr.bf16.mxu1 %v10733_v28  ;;  %v10802_v3 = vld [vmem:[%s14910_s9 + $0x768] ss:$12 sps:$4 sm:$0xff]   ;;  %v10809_v28 = vld [vmem:[%s14910_s9 + $0x784] ss:$12 sps:$4 sm:$0xff]  }
 0x51d   : > { %6028 = vmatprep.subr.bf16.mxu0 %v10736_v39  ;;  %v10810_v39 = vld [vmem:[%s14910_s9 + $0x848] ss:$12 sps:$4 sm:$0xff]  }
 0x51f   : > { %5636 = vmatpush1.bf16.msra.mxu1 %v10731_v45  ;;  %v10807_v45 = vld [vmem:[%s14910_s9 + $0x780] ss:$12 sps:$4 sm:$0xff]  }
 0x520   : > { %6029 = vmatpush1.bf16.msra.mxu0 %v10734_v62  ;;  %5637 = vmatprep.subr.bf16.mxu1 %v10739_v30  ;;  %v5764_v62 = vrot.slane %v13518_v46, 2  ;;  %v10811_v30 = vld [vmem:[%s14910_s9 + $0x788] ss:$12 sps:$4 sm:$0xff]  }
 0x521   : > { %6030 = vmatprep.subr.bf16.mxu0 %v10742_v47  ;;  %v10814_v47 = vld [vmem:[%s14910_s9 + $0x79c] ss:$12 sps:$4 sm:$0xff]  }
 0x523   : > { %5638 = vmatpush1.bf16.msra.mxu1 %v10737_v52  ;;  %v6174_v52 = vrot.slane %v13527_v54, 2 }
 0x524   : > { %6031 = vmatpush1.bf16.msra.mxu0 %v10740_v22  ;;  %5639 = vmatprep.subr.bf16.mxu1 %v10745_v21  ;;  %v10815_v22 = vld [vmem:[%s14910_s9 + $0x860] ss:$12 sps:$4 sm:$0xff]   ;;  %v10812_v21 = vld [vmem:[%s14910_s9 + $0x798] ss:$12 sps:$4 sm:$0xff]  }
 0x525   : > { %6032 = vmatprep.subr.bf16.mxu0 %v10748_v5  ;;  %v10816_v5 = vld [vmem:[%s14910_s9 + $0x7a0] ss:$12 sps:$4 sm:$0xff]  }
 0x527   : > { %5640 = vmatpush1.bf16.msra.mxu1 %v10743_v32  ;;  %v10819_v32 = vld [vmem:[%s14910_s9 + $0x7b4] ss:$12 sps:$4 sm:$0xff]  }
 0x528   : > { %6033 = vmatpush1.bf16.msra.mxu0 %v10746_v63  ;;  %5641 = vmatprep.subr.bf16.mxu1 %v10751_v49  ;;  %v10820_v63 = vld [vmem:[%s14910_s9 + $0x878] ss:$12 sps:$4 sm:$0xff]   ;;  %v10817_v49 = vld [vmem:[%s14910_s9 + $0x7b0] ss:$12 sps:$4 sm:$0xff]  }
 0x529   : > { %6034 = vmatprep.subr.bf16.mxu0 %v10754_v58  ;;  %v10821_v58 = vld [vmem:[%s14910_s9 + $0x7b8] ss:$12 sps:$4 sm:$0xff]  }
 0x52b   : > { %5642 = vmatpush1.bf16.msra.mxu1 %v10749_v17  ;;  %v10824_v17 = vld [vmem:[%s14910_s9 + $0x7cc] ss:$12 sps:$4 sm:$0xff]  }
 0x52c   : > { %6035 = vmatpush1.bf16.msra.mxu0 %v10752_v11  ;;  %5643 = vmatprep.subr.bf16.mxu1 %v10757_v60  ;;  %v10825_v11 = vld [vmem:[%s14910_s9 + $0x890] ss:$12 sps:$4 sm:$0xff]   ;;  %v10822_v60 = vld [vmem:[%s14910_s9 + $0x7c8] ss:$12 sps:$4 sm:$0xff]  }
 0x52d   : > { %6036 = vmatprep.subr.bf16.mxu0 %v10760_v29  ;;  %v10826_v29 = vld [vmem:[%s14910_s9 + $0x7d0] ss:$12 sps:$4 sm:$0xff]  }
 0x52f   : > { %5644 = vmatpush1.bf16.msra.mxu1 %v10755_v7  ;;  %v10829_v7 = vld [vmem:[%s14910_s9 + $0x7e4] ss:$12 sps:$4 sm:$0xff]  }
 0x530   : > { %6037 = vmatpush1.bf16.msra.mxu0 %v10758_v34  ;;  %5645 = vmatprep.subr.bf16.mxu1 %v10763_v13  ;;  %v10830_v34 = vld [vmem:[%s14910_s9 + $0x8a8] ss:$12 sps:$4 sm:$0xff]   ;;  %v10827_v13 = vld [vmem:[%s14910_s9 + $0x7e0] ss:$12 sps:$4 sm:$0xff]  }
 0x531   : > { %6038 = vmatprep.subr.bf16.mxu0 %v10766_v31  ;;  %v10831_v31 = vld [vmem:[%s14910_s9 + $0x7e8] ss:$12 sps:$4 sm:$0xff]  }
 0x533   : > { %5646 = vmatpush1.bf16.msra.mxu1 %v10761_v19  ;;  %v10834_v19 = vld [vmem:[%s14910_s9 + $0x7fc] ss:$12 sps:$4 sm:$0xff]  }
 0x534   : > { %6039 = vmatpush1.bf16.msra.mxu0 %v10764_v38  ;;  %9647 = vmatprep.subr.bf16.mxu1 %v10770_v43  ;;  %v10835_v38 = vld [vmem:[%s14910_s9 + $0x8c0] ss:$12 sps:$4 sm:$0xff]   ;;  %v10832_v43 = vld [vmem:[%s14910_s9 + $0x7f8] ss:$12 sps:$4 sm:$0xff]  }
 0x535   : > { %6040 = vmatprep.subr.bf16.mxu0 %v10769_v41  ;;  %v10836_v41 = vld [vmem:[%s14910_s9 + $0x800] ss:$12 sps:$4 sm:$0xff]  }
 0x536   : > { %5648 = vmatmul.mubr.bf16.vlgmr.msra.gmra.mrb[44].mxu1 %v5355_v57  ;;  %v10801_v57 = vld [vmem:[%s14910_s9 + $0x698] ss:$12 sps:$4 sm:$0xff]  }
 0x537   : > { %9648 = vmatpush3.bf16.msra.mxu1 %v10771_v26  ;;  %6097 = vmatprep.mubr.bf16.mxu1 %v5765_v61  ;;  %v10804_v61 = vld [vmem:[%s14910_s9 + $0x76c] ss:$12 sps:$4 sm:$0xff]   ;;  %v10839_v26 = vld [vmem:[%s14910_s9 + $0x814] ss:$12 sps:$4 sm:$0xff]  }
 0x538   : > { %6041 = vmatpush1.bf16.msra.mxu0 %v10767_v2  ;;  %9649 = vmatprep.subr.bf16.mxu1 %v10775_v25 }
 0x539   : > { %6042 = vmatprep.subr.bf16.mxu0 %v10774_v10  ;;  %v10840_v10 = vld [vmem:[%s14910_s9 + $0x8d8] ss:$12 sps:$4 sm:$0xff]  }
 0x53b   : > { %9650 = vmatpush3.bf16.msra.mxu1 %v10776_v23 }
 0x53c   : > { %6043 = vmatpush1.bf16.msra.mxu0 %v10772_v44  ;;  %9651 = vmatprep.subr.bf16.mxu1 %v10780_v40 }
 0x53d   : > { %6044 = vmatprep.subr.bf16.mxu0 %v10779_v35 }
 0x53f   : > { %9652 = vmatpush3.bf16.msra.mxu1 %v10781_v6 }
 0x540   : > { %6045 = vmatpush1.bf16.msra.mxu0 %v10777_v55  ;;  %9653 = vmatprep.subr.bf16.mxu1 %v10785_v15  ;;  %v10837_v55 = vld [vmem:[%s14910_s9 + $0x810] ss:$12 sps:$4 sm:$0xff]  }
 0x541   : > { %6046 = vmatprep.subr.bf16.mxu0 %v10784_v33 }
 0x543   : > { %9654 = vmatpush3.bf16.msra.mxu1 %v10786_v36  ;;  %v10841_v36 = vld [vmem:[%s14910_s9 + $0x818] ss:$12 sps:$4 sm:$0xff]  }
 0x544   : > { %6047 = vmatpush1.bf16.msra.mxu0 %v10782_v12  ;;  %9655 = vmatprep.subr.bf16.mxu1 %v10790_v9  ;;  %v10844_v12 = vld [vmem:[%s14910_s9 + $0x82c] ss:$12 sps:$4 sm:$0xff]   ;;  %v10845_v9 = vld [vmem:[%s14910_s9 + $0x8f0] ss:$12 sps:$4 sm:$0xff]  }
 0x545   : > { %6048 = vmatprep.subr.bf16.mxu0 %v10789_v18  ;;  %v10842_v18 = vld [vmem:[%s14910_s9 + $0x828] ss:$12 sps:$4 sm:$0xff]  }
 0x547   : > { %9656 = vmatpush3.bf16.msra.mxu1 %v10791_v42  ;;  %v10846_v42 = vld [vmem:[%s14910_s9 + $0x830] ss:$12 sps:$4 sm:$0xff]  }
 0x548   : > { %6049 = vmatpush1.bf16.msra.mxu0 %v10787_v51  ;;  %9657 = vmatprep.subr.bf16.mxu1 %v10795_v53  ;;  %v10849_v51 = vld [vmem:[%s14910_s9 + $0x844] ss:$12 sps:$4 sm:$0xff]  }
 0x549   : > { %6050 = vmatprep.subr.bf16.mxu0 %v10794_v1  ;;  %v10852_v53 = vld [vmem:[%s14910_s9 + $0x904] ss:$12 sps:$4 sm:$0xff]   ;;  %v10847_v1 = vld [vmem:[%s14910_s9 + $0x840] ss:$12 sps:$4 sm:$0xff]  }
 0x54b   : > { %9658 = vmatpush3.bf16.msra.mxu1 %v10796_v20  ;;  %v10850_v20 = vld [vmem:[%s14910_s9 + $0x900] ss:$12 sps:$4 sm:$0xff]  }
 0x54c   : > { %6051 = vmatpush1.bf16.msra.mxu0 %v10792_v59  ;;  %9659 = vmatprep.subr.bf16.mxu1 %v10800_v14  ;;  %v6173_v59 = vrot.slane %v13536_v4, 2  ;;  %v10855_v14 = vld [vmem:[%s14910_s9 + $0x85c] ss:$12 sps:$4 sm:$0xff]  }
 0x54d   : > { %6052 = vmatprep.subr.bf16.mxu0 %v10799_v37  ;;  %v10858_v37 = vld [vmem:[%s14910_s9 + $0x91c] ss:$12 sps:$4 sm:$0xff]  }
 0x54f   : > { %9660 = vmatpush3.bf16.msra.mxu1 %v10801_v57  ;;  %v6583_v57 = vrot.slane %v13522_v24, 3  ;;  %v10907_v24 = vld [vmem:[%s14910_s9 + $0x9f4] ss:$12 sps:$4 sm:$0xff]  }
 0x550   : > { %6053 = vmatpush1.bf16.msra.mxu0 %v10797_v8  ;;  %9661 = vmatprep.subr.bf16.mxu1 %v10805_v16  ;;  %v10853_v8 = vld [vmem:[%s14910_s9 + $0x858] ss:$12 sps:$4 sm:$0xff]  }
 0x551   : > { %6054 = vmatprep.subr.bf16.mxu0 %v10804_v61  ;;  %v10856_v16 = vld [vmem:[%s14910_s9 + $0x918] ss:$12 sps:$4 sm:$0xff]   ;;  %v10861_v61 = vld [vmem:[%s14910_s9 + $0x874] ss:$12 sps:$4 sm:$0xff]  }
 0x553   : > { %9662 = vmatpush3.bf16.msra.mxu1 %v10806_v0  ;;  %v10864_v0 = vld [vmem:[%s14910_s9 + $0x934] ss:$12 sps:$4 sm:$0xff]  }
 0x554   : > { %6055 = vmatpush1.bf16.msra.mxu0 %v10802_v3  ;;  %6433 = vmatprep.subr.bf16.mxu1 %v10809_v28  ;;  %v10859_v3 = vld [vmem:[%s14910_s9 + $0x870] ss:$12 sps:$4 sm:$0xff]  }
 0x555   : > { %9669 = vmatprep.subr.bf16.mxu0 %v10810_v39  ;;  %v10862_v28 = vld [vmem:[%s14910_s9 + $0x930] ss:$12 sps:$4 sm:$0xff]   ;;  %v10867_v39 = vld [vmem:[%s14910_s9 + $0x88c] ss:$12 sps:$4 sm:$0xff]  }
 0x556   : > { %6098 = vmatmul.mubr.bf16.vlgmr.msra.gmra.mrb[48].mxu1 %v5764_v62 }
 0x557   : > { %6057 = vmatmul.mubr.bf16.vlgmr.msra.gmra.mrb[48].mxu0 %v5764_v62  ;;  %6434 = vmatpush1.bf16.msra.mxu1 %v10807_v45  ;;  %v10870_v45 = vld [vmem:[%s14910_s9 + $0x94c] ss:$12 sps:$4 sm:$0xff]   ;;  %v10865_v62 = vld [vmem:[%s14910_s9 + $0x888] ss:$12 sps:$4 sm:$0xff]  }
 0x558   : > { %6465 = vmatprep.mubr.bf16.mxu1 %v6174_v52  ;;  %9670 = vmatpush3.bf16.msra.mxu0 %v10811_v30  ;;  %v10868_v30 = vld [vmem:[%s14910_s9 + $0x948] ss:$12 sps:$4 sm:$0xff]  }
 0x559   : > { %6506 = vmatprep.mubr.bf16.mxu0 %v6174_v52  ;;  %6435 = vmatprep.subr.bf16.mxu1 %v10814_v47  ;;  %v10873_v47 = vld [vmem:[%s14910_s9 + $0x8a4] ss:$12 sps:$4 sm:$0xff]  }
 0x55a   : > { %9671 = vmatprep.subr.bf16.mxu0 %v10815_v22  ;;  %v10876_v52 = vld [vmem:[%s14910_s9 + $0x964] ss:$12 sps:$4 sm:$0xff]   ;;  %v10871_v22 = vld [vmem:[%s14910_s9 + $0x8a0] ss:$12 sps:$4 sm:$0xff]  }
 0x55b   : > { %6436 = vmatpush1.bf16.msra.mxu1 %v10812_v21  ;;  %v10874_v21 = vld [vmem:[%s14910_s9 + $0x960] ss:$12 sps:$4 sm:$0xff]  }
 0x55c   : > { %9672 = vmatpush3.bf16.msra.mxu0 %v10816_v5  ;;  %6437 = vmatprep.subr.bf16.mxu1 %v10819_v32  ;;  %v10879_v5 = vld [vmem:[%s14910_s9 + $0x8bc] ss:$12 sps:$4 sm:$0xff]  }
 0x55d   : > { %9673 = vmatprep.subr.bf16.mxu0 %v10820_v63  ;;  %v10882_v32 = vld [vmem:[%s14910_s9 + $0x97c] ss:$12 sps:$4 sm:$0xff]   ;;  %v10877_v63 = vld [vmem:[%s14910_s9 + $0x8b8] ss:$12 sps:$4 sm:$0xff]  }
 0x55f   : > { %6438 = vmatpush1.bf16.msra.mxu1 %v10817_v49  ;;  %v10880_v49 = vld [vmem:[%s14910_s9 + $0x978] ss:$12 sps:$4 sm:$0xff]  }
 0x560   : > { %9674 = vmatpush3.bf16.msra.mxu0 %v10821_v58  ;;  %6439 = vmatprep.subr.bf16.mxu1 %v10824_v17  ;;  %v10885_v58 = vld [vmem:[%s14910_s9 + $0x8d4] ss:$12 sps:$4 sm:$0xff]  }
 0x561   : > { %9675 = vmatprep.subr.bf16.mxu0 %v10825_v11  ;;  %v10888_v11 = vld [vmem:[%s14910_s9 + $0x994] ss:$12 sps:$4 sm:$0xff]  }
 0x563   : > { %6440 = vmatpush1.bf16.msra.mxu1 %v10822_v60 }
 0x564   : > { %9676 = vmatpush3.bf16.msra.mxu0 %v10826_v29  ;;  %6441 = vmatprep.subr.bf16.mxu1 %v10829_v7 }
 0x565   : > { %9677 = vmatprep.subr.bf16.mxu0 %v10830_v34  ;;  %v10883_v34 = vld [vmem:[%s14910_s9 + $0x8d0] ss:$12 sps:$4 sm:$0xff]  }
 0x567   : > { %6442 = vmatpush1.bf16.msra.mxu1 %v10827_v13 }
 0x568   : > { %9678 = vmatpush3.bf16.msra.mxu0 %v10831_v31  ;;  %6443 = vmatprep.subr.bf16.mxu1 %v10834_v19  ;;  %v10886_v31 = vld [vmem:[%s14910_s9 + $0x990] ss:$12 sps:$4 sm:$0xff]   ;;  %v10891_v19 = vld [vmem:[%s14910_s9 + $0x8ec] ss:$12 sps:$4 sm:$0xff]  }
 0x569   : > { %v14204_v2 = vpop.f32.mrb[32].mxu0  ;;  %v9575_v25 = vpop.f32.mrb[32].mxu1  ;;  %9679 = vmatprep.subr.bf16.mxu0 %v10835_v38 }
 0x56a   : > { %v14209_v23 = vpop.f32.mrb[33].mxu0  ;;  %v9576_v44 = vpop.f32.mrb[33].mxu1 }
 0x56b   : > { %v14211_v40 = vadd.f32 %v9576_v44, %v9575_v25  ;;  %6444 = vmatpush1.bf16.msra.mxu1 %v10832_v43  ;;  %v4499_v35 = vpop.f32.mrb[34].mxu0  ;;  %v9578_v6 = vpop.f32.mrb[34].mxu1  ;;  %v10894_v43 = vld [vmem:[%s14910_s9 + $0x9ac] ss:$12 sps:$4 sm:$0xff]   ;;  %v10898_v25 = vld [vmem:[%s14910_s9 + $0x9c8] ss:$12 sps:$4 sm:$0xff]  }
 0x56c   : > { %9680 = vmatpush3.bf16.msra.mxu0 %v10836_v41  ;;  %v4500_v15 = vpop.f32.mrb[35].mxu0  ;;  %v9579_v33 = vpop.f32.mrb[35].mxu1  ;;  %6445 = vmatprep.subr.bf16.mxu1 %v10839_v26  ;;  %v10889_v41 = vld [vmem:[%s14910_s9 + $0x8e8] ss:$12 sps:$4 sm:$0xff]   ;;  %v10903_v35 = vld [vmem:[%s14910_s9 + $0x9e0] ss:$12 sps:$4 sm:$0xff]  }
 0x56d   : > { %9681 = vmatprep.subr.bf16.mxu0 %v10840_v10  ;;  %v10892_v26 = vld [vmem:[%s14910_s9 + $0x9a8] ss:$12 sps:$4 sm:$0xff]   ;;  %v10897_v10 = vld [vmem:[%s14910_s9 + $0x9c4] ss:$12 sps:$4 sm:$0xff]  }
 0x56e   : > { %v10899_v44 = vld [vmem:[%s14910_s9 + $0x908] ss:$12 sps:$4 sm:$0xff]   ;;  %v10900_v15 = vld [vmem:[%s14910_s9 + $0x9d8] ss:$12 sps:$4 sm:$0xff]  }
 0x56f   : > { %6446 = vmatpush1.bf16.msra.mxu1 %v10837_v55  ;;  %v10902_v6 = vld [vmem:[%s14910_s9 + $0x9dc] ss:$12 sps:$4 sm:$0xff]   ;;  %v10904_v55 = vld [vmem:[%s14910_s9 + $0x920] ss:$12 sps:$4 sm:$0xff]   ;;  %v10908_v33 = vld [vmem:[%s14910_s9 + $0x9f8] ss:$12 sps:$4 sm:$0xff]  }
 0x570   : > { %9682 = vmatpush3.bf16.msra.mxu0 %v10841_v36  ;;  %6447 = vmatprep.subr.bf16.mxu1 %v10844_v12  ;;  %v10909_v36 = vld [vmem:[%s14910_s9 + $0x938] ss:$12 sps:$4 sm:$0xff]   ;;  %v10905_v12 = vld [vmem:[%s14910_s9 + $0x9f0] ss:$12 sps:$4 sm:$0xff]  }
 0x571   : > { %9683 = vmatprep.subr.bf16.mxu0 %v10845_v9  ;;  %v10913_v9 = vld [vmem:[%s14910_s9 + $0xa10] ss:$12 sps:$4 sm:$0xff]  }
 0x573   : > { %6448 = vmatpush1.bf16.msra.mxu1 %v10842_v18  ;;  %v10912_v18 = vld [vmem:[%s14910_s9 + $0xa0c] ss:$12 sps:$4 sm:$0xff]  }
 0x574   : > { %9684 = vmatpush3.bf16.msra.mxu0 %v10846_v42  ;;  %6449 = vmatprep.subr.bf16.mxu1 %v10849_v51  ;;  %v10914_v42 = vld [vmem:[%s14910_s9 + $0x950] ss:$12 sps:$4 sm:$0xff]   ;;  %v10910_v51 = vld [vmem:[%s14910_s9 + $0xa08] ss:$12 sps:$4 sm:$0xff]  }
 0x575   : > { %6842 = vmatprep.subr.bf16.mxu0 %v10852_v53  ;;  %v10918_v53 = vld [vmem:[%s14910_s9 + $0xa28] ss:$12 sps:$4 sm:$0xff]  }
 0x577   : > { %6507 = vmatmul.mubr.bf16.vlgmr.msra.gmra.mrb[52].mxu0 %v6173_v59  ;;  %6450 = vmatpush1.bf16.msra.mxu1 %v10847_v1  ;;  %v10917_v1 = vld [vmem:[%s14910_s9 + $0xa24] ss:$12 sps:$4 sm:$0xff]  }
 0x578   : > { %6843 = vmatpush1.bf16.msra.mxu0 %v10850_v20  ;;  %6874 = vmatprep.mubr.bf16.mxu0 %v6583_v57  ;;  %v10919_v20 = vld [vmem:[%s14910_s9 + $0x968] ss:$12 sps:$4 sm:$0xff]  }
 0x579   : > { %6451 = vmatprep.subr.bf16.mxu1 %v10855_v14  ;;  %6844 = vmatprep.subr.bf16.mxu0 %v10858_v37  ;;  %v10923_v14 = vld [vmem:[%s14910_s9 + $0xa40] ss:$12 sps:$4 sm:$0xff]   ;;  %v10922_v37 = vld [vmem:[%s14910_s9 + $0xa3c] ss:$12 sps:$4 sm:$0xff]  }
 0x57b   : > { %6452 = vmatpush1.bf16.msra.mxu1 %v10853_v8  ;;  %v10920_v8 = vld [vmem:[%s14910_s9 + $0xa38] ss:$12 sps:$4 sm:$0xff]  }
 0x57c   : > { %6845 = vmatpush1.bf16.msra.mxu0 %v10856_v16  ;;  %6453 = vmatprep.subr.bf16.mxu1 %v10861_v61  ;;  %v10928_v16 = vld [vmem:[%s14910_s9 + $0xa58] ss:$12 sps:$4 sm:$0xff]  }
 0x57d   : > { %6846 = vmatprep.subr.bf16.mxu0 %v10864_v0  ;;  %v10927_v0 = vld [vmem:[%s14910_s9 + $0xa54] ss:$12 sps:$4 sm:$0xff]  }
 0x57f   : > { %6454 = vmatpush1.bf16.msra.mxu1 %v10859_v3 }
 0x580   : > { %6847 = vmatpush1.bf16.msra.mxu0 %v10862_v28  ;;  %6455 = vmatprep.subr.bf16.mxu1 %v10867_v39 }
 0x581   : > { %6848 = vmatprep.subr.bf16.mxu0 %v10870_v45 }
 0x583   : > { %6456 = vmatpush1.bf16.msra.mxu1 %v10865_v62  ;;  %v10929_v62 = vld [vmem:[%s14910_s9 + $0x998] ss:$12 sps:$4 sm:$0xff]  }
 0x584   : > { %6849 = vmatpush1.bf16.msra.mxu0 %v10868_v30  ;;  %6457 = vmatprep.subr.bf16.mxu1 %v10873_v47  ;;  %v10925_v47 = vld [vmem:[%s14910_s9 + $0xa50] ss:$12 sps:$4 sm:$0xff]  }
 0x585   : > { %6850 = vmatprep.subr.bf16.mxu0 %v10876_v52  ;;  %v10934_v52 = vld [vmem:[%s14910_s9 + $0x9b0] ss:$12 sps:$4 sm:$0xff]  }
 0x587   : > { %6458 = vmatpush1.bf16.msra.mxu1 %v10871_v22  ;;  %v10930_v22 = vld [vmem:[%s14910_s9 + $0xa68] ss:$12 sps:$4 sm:$0xff]  }
 0x588   : > { %6851 = vmatpush1.bf16.msra.mxu0 %v10874_v21  ;;  %6459 = vmatprep.subr.bf16.mxu1 %v10879_v5  ;;  %v10937_v21 = vld [vmem:[%s14910_s9 + $0xa84] ss:$12 sps:$4 sm:$0xff]   ;;  %v10938_v5 = vld [vmem:[%s14910_s9 + $0xb48] ss:$12 sps:$4 sm:$0xff]  }
 0x589   : > { %v9597_v17 = vpop.f32.mrb[36].mxu0  ;;  %6852 = vmatprep.subr.bf16.mxu0 %v10882_v32  ;;  %v10935_v32 = vld [vmem:[%s14910_s9 + $0xa80] ss:$12 sps:$4 sm:$0xff]  }
 0x58a   : > { %v9598_v60 = vpop.f32.mrb[37].mxu0 }
 0x58b   : > { %v9599_v29 = vadd.f32 %v9598_v60, %v9597_v17  ;;  %v9600_v7 = vpop.f32.mrb[38].mxu0  ;;  %6460 = vmatpush1.bf16.msra.mxu1 %v10877_v63  ;;  %v6582_v63 = vrot.slane %v13518_v46, 3  ;;  %v6992_v17 = vrot.slane %v13527_v54, 3  ;;  %v10940_v46 = vld [vmem:[%s14910_s9 + $0xa98] ss:$12 sps:$4 sm:$0xff]  }
 0x58c   : > { %6853 = vmatpush1.bf16.msra.mxu0 %v10880_v49  ;;  %v9601_v13 = vpop.f32.mrb[39].mxu0  ;;  %6461 = vmatprep.subr.bf16.mxu1 %v10885_v58  ;;  %v10939_v49 = vld [vmem:[%s14910_s9 + $0xa88] ss:$12 sps:$4 sm:$0xff]   ;;  %v10944_v60 = vld [vmem:[%s14910_s9 + $0xaa0] ss:$12 sps:$4 sm:$0xff]  }
 0x58d   : > { %v14325_v38 = vadd.f32 %v9599_v29, %v14211_v40  ;;  %6854 = vmatprep.subr.bf16.mxu0 %v10888_v11  ;;  %v10895_v40 = vld [vmem:[%s14910_s9 + $0x9c0] ss:$12 sps:$4 sm:$0xff]   ;;  %v10942_v58 = vld [vmem:[%s14910_s9 + $0xa9c] ss:$12 sps:$4 sm:$0xff]   ;;  %v10948_v29 = vld [vmem:[%s14910_s9 + $0xb78] ss:$12 sps:$4 sm:$0xff]  }
 0x58e   : > { %v10943_v11 = vld [vmem:[%s14910_s9 + $0xb60] ss:$12 sps:$4 sm:$0xff]   ;;  %v10945_v7 = vld [vmem:[%s14910_s9 + $0xab0] ss:$12 sps:$4 sm:$0xff]  }
 0x58f   : > { %6462 = vmatpush1.bf16.msra.mxu1 %v10883_v34  ;;  %v10947_v54 = vld [vmem:[%s14910_s9 + $0xab4] ss:$12 sps:$4 sm:$0xff]   ;;  %v10949_v34 = vld [vmem:[%s14910_s9 + $0xab8] ss:$12 sps:$4 sm:$0xff]  }
 0x590   : > { %6855 = vmatpush1.bf16.msra.mxu0 %v10886_v31  ;;  %6463 = vmatprep.subr.bf16.mxu1 %v10891_v19  ;;  %v10952_v13 = vld [vmem:[%s14910_s9 + $0xacc] ss:$12 sps:$4 sm:$0xff]   ;;  %v10953_v31 = vld [vmem:[%s14910_s9 + $0xb90] ss:$12 sps:$4 sm:$0xff]   ;;  %v10950_v19 = vld [vmem:[%s14910_s9 + $0xac8] ss:$12 sps:$4 sm:$0xff]  }
 0x591   : > { %6856 = vmatprep.subr.bf16.mxu0 %v10894_v43  ;;  %v10954_v43 = vld [vmem:[%s14910_s9 + $0xad0] ss:$12 sps:$4 sm:$0xff]  }
 0x593   : > { %6464 = vmatpush1.bf16.msra.mxu1 %v10889_v41  ;;  %v10957_v41 = vld [vmem:[%s14910_s9 + $0xae4] ss:$12 sps:$4 sm:$0xff]  }
 0x594   : > { %6857 = vmatpush1.bf16.msra.mxu0 %v10892_v26  ;;  %9691 = vmatprep.subr.bf16.mxu1 %v10898_v25  ;;  %v10958_v26 = vld [vmem:[%s14910_s9 + $0xba8] ss:$12 sps:$4 sm:$0xff]   ;;  %v10955_v25 = vld [vmem:[%s14910_s9 + $0xae0] ss:$12 sps:$4 sm:$0xff]  }
 0x595   : > { %6858 = vmatprep.subr.bf16.mxu0 %v10897_v10  ;;  %v10959_v10 = vld [vmem:[%s14910_s9 + $0xae8] ss:$12 sps:$4 sm:$0xff]  }
 0x596   : > { %6466 = vmatmul.mubr.bf16.vlgmr.msra.gmra.mrb[52].mxu1 %v6173_v59  ;;  %v10915_v59 = vld [vmem:[%s14910_s9 + $0xa20] ss:$12 sps:$4 sm:$0xff]  }
 0x597   : > { %9692 = vmatpush3.bf16.msra.mxu1 %v10899_v44  ;;  %6915 = vmatprep.mubr.bf16.mxu1 %v6583_v57  ;;  %v10924_v57 = vld [vmem:[%s14910_s9 + $0x980] ss:$12 sps:$4 sm:$0xff]   ;;  %v10962_v44 = vld [vmem:[%s14910_s9 + $0xafc] ss:$12 sps:$4 sm:$0xff]  }
 0x598   : > { %6859 = vmatpush1.bf16.msra.mxu0 %v10895_v40  ;;  %9693 = vmatprep.subr.bf16.mxu1 %v10903_v35  ;;  %v10963_v40 = vld [vmem:[%s14910_s9 + $0xbc0] ss:$12 sps:$4 sm:$0xff]   ;;  %v10960_v35 = vld [vmem:[%s14910_s9 + $0xaf8] ss:$12 sps:$4 sm:$0xff]  }
 0x599   : > { %6860 = vmatprep.subr.bf16.mxu0 %v10902_v6  ;;  %v10964_v6 = vld [vmem:[%s14910_s9 + $0xb00] ss:$12 sps:$4 sm:$0xff]  }
 0x59b   : > { %9694 = vmatpush3.bf16.msra.mxu1 %v10904_v55  ;;  %v10967_v55 = vld [vmem:[%s14910_s9 + $0xb14] ss:$12 sps:$4 sm:$0xff]  }
 0x59c   : > { %6861 = vmatpush1.bf16.msra.mxu0 %v10900_v15  ;;  %9695 = vmatprep.subr.bf16.mxu1 %v10908_v33 }
 0x59d   : > { %6862 = vmatprep.subr.bf16.mxu0 %v10907_v24  ;;  %v10968_v24 = vld [vmem:[%s14910_s9 + $0xbd8] ss:$12 sps:$4 sm:$0xff]  }
 0x59f   : > { %9696 = vmatpush3.bf16.msra.mxu1 %v10909_v36 }
 0x5a0   : > { %6863 = vmatpush1.bf16.msra.mxu0 %v10905_v12  ;;  %9697 = vmatprep.subr.bf16.mxu1 %v10913_v9 }
 0x5a1   : > { %6864 = vmatprep.subr.bf16.mxu0 %v10912_v18 }
 0x5a3   : > { %9698 = vmatpush3.bf16.msra.mxu1 %v10914_v42 }
 0x5a4   : > { %6865 = vmatpush1.bf16.msra.mxu0 %v10910_v51  ;;  %9699 = vmatprep.subr.bf16.mxu1 %v10918_v53 }
 0x5a5   : > { %6866 = vmatprep.subr.bf16.mxu0 %v10917_v1  ;;  %v10965_v1 = vld [vmem:[%s14910_s9 + $0xb10] ss:$12 sps:$4 sm:$0xff]  }
 0x5a7   : > { %9700 = vmatpush3.bf16.msra.mxu1 %v10919_v20 }
 0x5a8   : > { %6867 = vmatpush1.bf16.msra.mxu0 %v10915_v59  ;;  %9701 = vmatprep.subr.bf16.mxu1 %v10923_v14  ;;  %v10969_v14 = vld [vmem:[%s14910_s9 + $0xb18] ss:$12 sps:$4 sm:$0xff]  }
 0x5a9   : > { %v4832_v61 = vpop.f32.mrb[36].mxu1  ;;  %6868 = vmatprep.subr.bf16.mxu0 %v10922_v37  ;;  %v10972_v37 = vld [vmem:[%s14910_s9 + $0xb2c] ss:$12 sps:$4 sm:$0xff]  }
 0x5aa   : > { %v14419_v3 = vadd.f32 %v4832_v61, %v14204_v2  ;;  %v4834_v28 = vpop.f32.mrb[37].mxu1  ;;  %v10933_v2 = vld [vmem:[%s14910_s9 + $0xa70] ss:$12 sps:$4 sm:$0xff]  }
 0x5ab   : > { %v14422_v39 = vadd.f32 %v4834_v28, %v14209_v23  ;;  %v4836_v45 = vpop.f32.mrb[38].mxu1  ;;  %9702 = vmatpush3.bf16.msra.mxu1 %v10924_v57  ;;  %v10932_v23 = vld [vmem:[%s14910_s9 + $0xa6c] ss:$12 sps:$4 sm:$0xff]   ;;  %v10974_v61 = vld [vmem:[%s14910_s9 + $0xb30] ss:$12 sps:$4 sm:$0xff]  }
 0x5ac   : > { %6869 = vmatpush1.bf16.msra.mxu0 %v10920_v8  ;;  %v4837_v30 = vpop.f32.mrb[39].mxu1  ;;  %9703 = vmatprep.subr.bf16.mxu1 %v10928_v16  ;;  %v10973_v8 = vld [vmem:[%s14910_s9 + $0xbf0] ss:$12 sps:$4 sm:$0xff]   ;;  %v10970_v16 = vld [vmem:[%s14910_s9 + $0xb28] ss:$12 sps:$4 sm:$0xff]  }
 0x5ad   : > { %6870 = vmatprep.subr.bf16.mxu0 %v10927_v0  ;;  %v10980_v0 = vld [vmem:[%s14910_s9 + $0xc04] ss:$12 sps:$4 sm:$0xff]   ;;  %v10978_v28 = vld [vmem:[%s14910_s9 + $0xc00] ss:$12 sps:$4 sm:$0xff]   ;;  %v10983_v45 = vld [vmem:[%s14910_s9 + $0xb5c] ss:$12 sps:$4 sm:$0xff]   ;;  %v14570_v30 = vpack.c.bf16 %v13524_v27, %v13524_v27 }
 0x5ae   : > { %v10989_v27 = vld [vmem:[%s14910_s9 + $0xb74] ss:$12 sps:$4 sm:$0xff]  }
 0x5af   : > { %9704 = vmatpush3.bf16.msra.mxu1 %v10929_v62  ;;  %v10986_v62 = vld [vmem:[%s14910_s9 + $0xc1c] ss:$12 sps:$4 sm:$0xff]  }
 0x5b0   : > { %6871 = vmatpush1.bf16.msra.mxu0 %v10925_v47  ;;  %9705 = vmatprep.subr.bf16.mxu1 %v10933_v2  ;;  %v10981_v47 = vld [vmem:[%s14910_s9 + $0xb58] ss:$12 sps:$4 sm:$0xff]  }
 0x5b1   : > { %6872 = vmatprep.subr.bf16.mxu0 %v10932_v23  ;;  %v10984_v2 = vld [vmem:[%s14910_s9 + $0xc18] ss:$12 sps:$4 sm:$0xff]   ;;  %v10992_v23 = vld [vmem:[%s14910_s9 + $0xc34] ss:$12 sps:$4 sm:$0xff]  }
 0x5b3   : > { %9706 = vmatpush3.bf16.msra.mxu1 %v10934_v52  ;;  %v10987_v52 = vld [vmem:[%s14910_s9 + $0xb70] ss:$12 sps:$4 sm:$0xff]  }
 0x5b4   : > { %6873 = vmatpush1.bf16.msra.mxu0 %v10930_v22  ;;  %7251 = vmatprep.subr.bf16.mxu1 %v10937_v21  ;;  %v10990_v22 = vld [vmem:[%s14910_s9 + $0xc30] ss:$12 sps:$4 sm:$0xff]   ;;  %v10995_v21 = vld [vmem:[%s14910_s9 + $0xb8c] ss:$12 sps:$4 sm:$0xff]  }
 0x5b5   : > { %9713 = vmatprep.subr.bf16.mxu0 %v10938_v5  ;;  %v10998_v5 = vld [vmem:[%s14910_s9 + $0xc4c] ss:$12 sps:$4 sm:$0xff]  }
 0x5b6   : > { %6916 = vmatmul.mubr.bf16.vlgmr.msra.gmra.mrb[56].mxu1 %v6582_v63 }
 0x5b7   : > { %6875 = vmatmul.mubr.bf16.vlgmr.msra.gmra.mrb[56].mxu0 %v6582_v63  ;;  %7252 = vmatpush1.bf16.msra.mxu1 %v10935_v32  ;;  %v10993_v32 = vld [vmem:[%s14910_s9 + $0xb88] ss:$12 sps:$4 sm:$0xff]  }
 0x5b8   : > { %7283 = vmatprep.mubr.bf16.mxu1 %v6992_v17  ;;  %9714 = vmatpush3.bf16.msra.mxu0 %v10939_v49  ;;  %v10996_v63 = vld [vmem:[%s14910_s9 + $0xc48] ss:$12 sps:$4 sm:$0xff]   ;;  %v11001_v49 = vld [vmem:[%s14910_s9 + $0xba4] ss:$12 sps:$4 sm:$0xff]  }
 0x5b9   : > { %7324 = vmatprep.mubr.bf16.mxu0 %v6992_v17  ;;  %7253 = vmatprep.subr.bf16.mxu1 %v10942_v58  ;;  %v11004_v58 = vld [vmem:[%s14910_s9 + $0xc64] ss:$12 sps:$4 sm:$0xff]   ;;  %v10999_v17 = vld [vmem:[%s14910_s9 + $0xba0] ss:$12 sps:$4 sm:$0xff]  }
 0x5ba   : > { %9715 = vmatprep.subr.bf16.mxu0 %v10943_v11  ;;  %v11002_v11 = vld [vmem:[%s14910_s9 + $0xc60] ss:$12 sps:$4 sm:$0xff]  }
 0x5bb   : > { %7254 = vmatpush1.bf16.msra.mxu1 %v10940_v46  ;;  %v11007_v46 = vld [vmem:[%s14910_s9 + $0xbbc] ss:$12 sps:$4 sm:$0xff]  }
 0x5bc   : > { %9716 = vmatpush3.bf16.msra.mxu0 %v10944_v60  ;;  %7255 = vmatprep.subr.bf16.mxu1 %v10947_v54  ;;  %v11010_v60 = vld [vmem:[%s14910_s9 + $0xc7c] ss:$12 sps:$4 sm:$0xff]   ;;  %v11005_v54 = vld [vmem:[%s14910_s9 + $0xbb8] ss:$12 sps:$4 sm:$0xff]  }
 0x5bd   : > { %9717 = vmatprep.subr.bf16.mxu0 %v10948_v29  ;;  %v11008_v29 = vld [vmem:[%s14910_s9 + $0xc78] ss:$12 sps:$4 sm:$0xff]  }
 0x5bf   : > { %7256 = vmatpush1.bf16.msra.mxu1 %v10945_v7  ;;  %v11013_v7 = vld [vmem:[%s14910_s9 + $0xbd4] ss:$12 sps:$4 sm:$0xff]  }
 0x5c0   : > { %9718 = vmatpush3.bf16.msra.mxu0 %v10949_v34  ;;  %7257 = vmatprep.subr.bf16.mxu1 %v10952_v13  ;;  %v11016_v34 = vld [vmem:[%s14910_s9 + $0xc94] ss:$12 sps:$4 sm:$0xff]  }
 0x5c1   : > { %9719 = vmatprep.subr.bf16.mxu0 %v10953_v31 }
 0x5c3   : > { %7258 = vmatpush1.bf16.msra.mxu1 %v10950_v19  ;;  %v11011_v19 = vld [vmem:[%s14910_s9 + $0xbd0] ss:$12 sps:$4 sm:$0xff]  }
 0x5c4   : > { %9720 = vmatpush3.bf16.msra.mxu0 %v10954_v43  ;;  %7259 = vmatprep.subr.bf16.mxu1 %v10957_v41 }
 0x5c5   : > { %9721 = vmatprep.subr.bf16.mxu0 %v10958_v26  ;;  %v11014_v26 = vld [vmem:[%s14910_s9 + $0xc90] ss:$12 sps:$4 sm:$0xff]  }
 0x5c7   : > { %7260 = vmatpush1.bf16.msra.mxu1 %v10955_v25  ;;  %v11019_v25 = vld [vmem:[%s14910_s9 + $0xbec] ss:$12 sps:$4 sm:$0xff]  }
 0x5c8   : > { %9722 = vmatpush3.bf16.msra.mxu0 %v10959_v10  ;;  %7261 = vmatprep.subr.bf16.mxu1 %v10962_v44  ;;  %v11022_v44 = vld [vmem:[%s14910_s9 + $0xcac] ss:$12 sps:$4 sm:$0xff]  }
 0x5c9   : > { %v5240_v15 = vpop.f32.mrb[40].mxu0  ;;  %v9619_v33 = vpop.f32.mrb[40].mxu1  ;;  %9723 = vmatprep.subr.bf16.mxu0 %v10963_v40 }
 0x5ca   : > { %v14523_v36 = vadd.f32 %v5240_v15, %v14419_v3  ;;  %v5242_v12 = vpop.f32.mrb[41].mxu0  ;;  %v9620_v9 = vpop.f32.mrb[41].mxu1  ;;  %v10975_v3 = vld [vmem:[%s14910_s9 + $0xb40] ss:$12 sps:$4 sm:$0xff]   ;;  %v11025_v15 = vld [vmem:[%s14910_s9 + $0xcc4] ss:$12 sps:$4 sm:$0xff]  }
 0x5cb   : > { %v14526_v18 = vadd.f32 %v5242_v12, %v14422_v39  ;;  %v9621_v42 = vadd.f32 %v9620_v9, %v9619_v33  ;;  %v5244_v51 = vpop.f32.mrb[42].mxu0  ;;  %v9622_v53 = vpop.f32.mrb[42].mxu1  ;;  %7262 = vmatpush1.bf16.msra.mxu1 %v10960_v35  ;;  %v6991_v39 = vrot.slane %v13536_v4, 3  ;;  %v11017_v35 = vld [vmem:[%s14910_s9 + $0xbe8] ss:$12 sps:$4 sm:$0xff]  }
 0x5cc   : > { %9724 = vmatpush3.bf16.msra.mxu0 %v10964_v6  ;;  %v5245_v20 = vpop.f32.mrb[43].mxu0  ;;  %v9623_v59 = vpop.f32.mrb[43].mxu1  ;;  %7263 = vmatprep.subr.bf16.mxu1 %v10967_v55  ;;  %v11020_v6 = vld [vmem:[%s14910_s9 + $0xca8] ss:$12 sps:$4 sm:$0xff]   ;;  %v11031_v12 = vld [vmem:[%s14910_s9 + $0xce0] ss:$12 sps:$4 sm:$0xff]  }
 0x5cd   : > { %v14538_v57 = vadd.f32 %v9621_v42, %v14325_v38  ;;  %9725 = vmatprep.subr.bf16.mxu0 %v10968_v24  ;;  %v10977_v38 = vld [vmem:[%s14910_s9 + $0xb44] ss:$12 sps:$4 sm:$0xff]   ;;  %v11026_v55 = vld [vmem:[%s14910_s9 + $0xcc8] ss:$12 sps:$4 sm:$0xff]   ;;  %v11023_v24 = vld [vmem:[%s14910_s9 + $0xcc0] ss:$12 sps:$4 sm:$0xff]  }
 0x5ce   : > { %v11027_v33 = vld [vmem:[%s14910_s9 + $0xc08] ss:$12 sps:$4 sm:$0xff]   ;;  %v11032_v42 = vld [vmem:[%s14910_s9 + $0xc20] ss:$12 sps:$4 sm:$0xff]   ;;  %v11028_v51 = vld [vmem:[%s14910_s9 + $0xcd8] ss:$12 sps:$4 sm:$0xff]  }
 0x5cf   : > { %7264 = vmatpush1.bf16.msra.mxu1 %v10965_v1  ;;  %v11030_v9 = vld [vmem:[%s14910_s9 + $0xcdc] ss:$12 sps:$4 sm:$0xff]   ;;  %v11036_v53 = vld [vmem:[%s14910_s9 + $0xcf8] ss:$12 sps:$4 sm:$0xff]   ;;  %v11035_v4 = vld [vmem:[%s14910_s9 + $0xcf4] ss:$12 sps:$4 sm:$0xff]  }
 0x5d0   : > { %9726 = vmatpush3.bf16.msra.mxu0 %v10969_v14  ;;  %7265 = vmatprep.subr.bf16.mxu1 %v10972_v37  ;;  %v11037_v1 = vld [vmem:[%s14910_s9 + $0xc38] ss:$12 sps:$4 sm:$0xff]   ;;  %v11033_v20 = vld [vmem:[%s14910_s9 + $0xcf0] ss:$12 sps:$4 sm:$0xff]  }
 0x5d1   : > { %9727 = vmatprep.subr.bf16.mxu0 %v10973_v8  ;;  %v11041_v59 = vld [vmem:[%s14910_s9 + $0xd10] ss:$12 sps:$4 sm:$0xff]   ;;  %v11040_v14 = vld [vmem:[%s14910_s9 + $0xd0c] ss:$12 sps:$4 sm:$0xff]   ;;  %v11046_v8 = vld [vmem:[%s14910_s9 + $0xd28] ss:$12 sps:$4 sm:$0xff]  }
 0x5d2   : > { %v11042_v37 = vld [vmem:[%s14910_s9 + $0xc50] ss:$12 sps:$4 sm:$0xff]  }
 0x5d3   : > { %7266 = vmatpush1.bf16.msra.mxu1 %v10970_v16  ;;  %v11045_v16 = vld [vmem:[%s14910_s9 + $0xd24] ss:$12 sps:$4 sm:$0xff]  }
 0x5d4   : > { %9728 = vmatpush3.bf16.msra.mxu0 %v10974_v61  ;;  %7267 = vmatprep.subr.bf16.mxu1 %v10977_v38  ;;  %v11047_v61 = vld [vmem:[%s14910_s9 + $0xc68] ss:$12 sps:$4 sm:$0xff]   ;;  %v11043_v38 = vld [vmem:[%s14910_s9 + $0xd20] ss:$12 sps:$4 sm:$0xff]  }
 0x5d5   : > { %7658 = vmatprep.subr.bf16.mxu0 %v10980_v0  ;;  %v11051_v0 = vld [vmem:[%s14910_s9 + $0xd40] ss:$12 sps:$4 sm:$0xff]  }
 0x5d7   : > { %7325 = vmatmul.mubr.bf16.vlgmr.msra.gmra.mrb[60].mxu0 %v6991_v39  ;;  %7268 = vmatpush1.bf16.msra.mxu1 %v10975_v3  ;;  %v11050_v3 = vld [vmem:[%s14910_s9 + $0xd3c] ss:$12 sps:$4 sm:$0xff]  }
 0x5d8   : > { %7659 = vmatpush1.bf16.msra.mxu0 %v10978_v28  ;;  %7690 = vmatprep.mubr.bf16.mxu0 %v14570_v30  ;;  %v11052_v28 = vld [vmem:[%s14910_s9 + $0xc80] ss:$12 sps:$4 sm:$0xff]  }
 0x5d9   : > { %7269 = vmatprep.subr.bf16.mxu1 %v10983_v45  ;;  %7660 = vmatprep.subr.bf16.mxu0 %v10986_v62  ;;  %v11056_v45 = vld [vmem:[%s14910_s9 + $0xd58] ss:$12 sps:$4 sm:$0xff]  }
 0x5db   : > { %7270 = vmatpush1.bf16.msra.mxu1 %v10981_v47 }
 0x5dc   : > { %7661 = vmatpush1.bf16.msra.mxu0 %v10984_v2  ;;  %7271 = vmatprep.subr.bf16.mxu1 %v10989_v27 }
 0x5dd   : > { %7662 = vmatprep.subr.bf16.mxu0 %v10992_v23 }
 0x5df   : > { %7272 = vmatpush1.bf16.msra.mxu1 %v10987_v52  ;;  %v11057_v52 = vld [vmem:[%s14910_s9 + $0xc98] ss:$12 sps:$4 sm:$0xff]  }
 0x5e0   : > { %7663 = vmatpush1.bf16.msra.mxu0 %v10990_v22  ;;  %7273 = vmatprep.subr.bf16.mxu1 %v10995_v21  ;;  %v11053_v21 = vld [vmem:[%s14910_s9 + $0xd50] ss:$12 sps:$4 sm:$0xff]  }
 0x5e1   : > { %7664 = vmatprep.subr.bf16.mxu0 %v10998_v5  ;;  %v11062_v5 = vld [vmem:[%s14910_s9 + $0xcb0] ss:$12 sps:$4 sm:$0xff]  }
 0x5e3   : > { %7274 = vmatpush1.bf16.msra.mxu1 %v10993_v32  ;;  %v11058_v32 = vld [vmem:[%s14910_s9 + $0xd68] ss:$12 sps:$4 sm:$0xff]  }
 0x5e4   : > { %7665 = vmatpush1.bf16.msra.mxu0 %v10996_v63  ;;  %7275 = vmatprep.subr.bf16.mxu1 %v11001_v49  ;;  %v7335_v63 = vpack.c.bf16 %v13520_v48, %v13520_v48  ;;  %v11063_v48 = vld [vmem:[%s14914_s13 + $0x40] sm:$0xff]  }
 0x5e5   : > { %7666 = vmatprep.subr.bf16.mxu0 %v11004_v58 }
 0x5e7   : > { %7276 = vmatpush1.bf16.msra.mxu1 %v10999_v17 }
 0x5e8   : > { %7667 = vmatpush1.bf16.msra.mxu0 %v11002_v11  ;;  %7277 = vmatprep.subr.bf16.mxu1 %v11007_v46 }
 0x5e9   : > { %7668 = vmatprep.subr.bf16.mxu0 %v11010_v60 }
 0x5ea   : > { %v9641_v13 = vpop.f32.mrb[44].mxu0 }
 0x5eb   : > { %v9642_v31 = vpop.f32.mrb[45].mxu0  ;;  %7278 = vmatpush1.bf16.msra.mxu1 %v11005_v54 }
 0x5ec   : > { %v9643_v43 = vadd.f32 %v9642_v31, %v9641_v13  ;;  %v9644_v41 = vpop.f32.mrb[46].mxu0  ;;  %7669 = vmatpush1.bf16.msra.mxu0 %v11008_v29  ;;  %7279 = vmatprep.subr.bf16.mxu1 %v11013_v7 }
 0x5ed   : > { %v9645_v10 = vpop.f32.mrb[47].mxu0  ;;  %7670 = vmatprep.subr.bf16.mxu0 %v11016_v34 }
 0x5ee   : > { %v14648_v40 = vadd.f32 %v9643_v43, %v14538_v57  ;;  %v11038_v57 = vld [vmem:[%s14910_s9 + $0xd08] ss:$12 sps:$4 sm:$0xff]  }
 0x5ef   : > { %7280 = vmatpush1.bf16.msra.mxu1 %v11011_v19 }
 0x5f0   : > { %7671 = vmatpush1.bf16.msra.mxu0 %v11014_v26  ;;  %7281 = vmatprep.subr.bf16.mxu1 %v11019_v25 }
 0x5f1   : > { %7672 = vmatprep.subr.bf16.mxu0 %v11022_v44 }
 0x5f3   : > { %7282 = vmatpush1.bf16.msra.mxu1 %v11017_v35 }
 0x5f4   : > { %7673 = vmatpush1.bf16.msra.mxu0 %v11020_v6  ;;  %9735 = vmatprep.subr.bf16.mxu1 %v11026_v55 }
 0x5f5   : > { %7674 = vmatprep.subr.bf16.mxu0 %v11025_v15 }
 0x5f6   : > { %7284 = vmatmul.mubr.bf16.vlgmr.msra.gmra.mrb[60].mxu1 %v6991_v39  ;;  %v11048_v39 = vld [vmem:[%s14910_s9 + $0xd38] ss:$12 sps:$4 sm:$0xff]  }
 0x5f7   : > { %9736 = vmatpush3.bf16.msra.mxu1 %v11027_v33  ;;  %7731 = vmatprep.mubr.bf16.mxu1 %v14570_v30  ;;  %v11055_v30 = vld [vmem:[%s14910_s9 + $0xd54] ss:$12 sps:$4 sm:$0xff]  }
 0x5f8   : > { %7675 = vmatpush1.bf16.msra.mxu0 %v11023_v24  ;;  %9737 = vmatprep.subr.bf16.mxu1 %v11031_v12  ;;  %v11065_v24 = vld [vmem:[%s14914_s13 + $0x80] sm:$0xff]   ;;  %v11414_v12 = vmov 0.0  }
 0x5f9   : > { %7676 = vmatprep.subr.bf16.mxu0 %v11030_v9  ;;  %v11066_v9 = vld [vmem:[%s14914_s13 + $0x48] sm:$0xff]  }
 0x5fb   : > { %9738 = vmatpush3.bf16.msra.mxu1 %v11032_v42  ;;  %v11067_v42 = vld [vmem:[%s14914_s13 + $0x8] sm:$0xff]  }
 0x5fc   : > { %7677 = vmatpush1.bf16.msra.mxu0 %v11028_v51  ;;  %9739 = vmatprep.subr.bf16.mxu1 %v11036_v53  ;;  %v11068_v51 = vld [vmem:[%s14914_s13 + $0x88] sm:$0xff]   ;;  %v11069_v53 = vld [vmem:[%s14914_s13 + $0x50] sm:$0xff]  }
 0x5fd   : > { %7678 = vmatprep.subr.bf16.mxu0 %v11035_v4  ;;  %v11070_v4 = vld [vmem:[%s14914_s13 + $0x10] sm:$0xff]  }
 0x5ff   : > { %9740 = vmatpush3.bf16.msra.mxu1 %v11037_v1  ;;  %v11071_v1 = vld [vmem:[%s14914_s13 + $0x90] sm:$0xff]  }
 0x600   : > { %7679 = vmatpush1.bf16.msra.mxu0 %v11033_v20  ;;  %9741 = vmatprep.subr.bf16.mxu1 %v11041_v59  ;;  %v11072_v20 = vld [vmem:[%s14914_s13 + $0x58] sm:$0xff]  }
 0x601   : > { %7680 = vmatprep.subr.bf16.mxu0 %v11040_v14  ;;  %v11073_v59 = vld [vmem:[%s14914_s13 + $0x18] sm:$0xff]  }
 0x602   : > { %v11074_v14 = vld [vmem:[%s14914_s13 + $0x98] sm:$0xff]  }
 0x603   : > { %9742 = vmatpush3.bf16.msra.mxu1 %v11042_v37  ;;  %v11075_v37 = vld [vmem:[%s14914_s13 + $0x60] sm:$0xff]  }
 0x604   : > { %7681 = vmatpush1.bf16.msra.mxu0 %v11038_v57  ;;  %9743 = vmatprep.subr.bf16.mxu1 %v11046_v8  ;;  %v11076_v57 = vld [vmem:[%s14914_s13 + $0x20] sm:$0xff]  }
 0x605   : > { %7682 = vmatprep.subr.bf16.mxu0 %v11045_v16  ;;  %v11077_v8 = vld [vmem:[%s14914_s13 + $0xa0] sm:$0xff]   ;;  %v11078_v16 = vld [vmem:[%s14914_s13 + $0x68] sm:$0xff]  }
 0x607   : > { %9744 = vmatpush3.bf16.msra.mxu1 %v11047_v61  ;;  %v11079_v61 = vld [vmem:[%s14914_s13 + $0x28] sm:$0xff]  }
 0x608   : > { %7683 = vmatpush1.bf16.msra.mxu0 %v11043_v38  ;;  %9745 = vmatprep.subr.bf16.mxu1 %v11051_v0  ;;  %v11080_v38 = vld [vmem:[%s14914_s13 + $0xa8] sm:$0xff]   ;;  %v11081_v0 = vld [vmem:[%s14914_s13 + $0x70] sm:$0xff]  }
 0x609   : > { %v5649_v62 = vpop.f32.mrb[44].mxu1  ;;  %7684 = vmatprep.subr.bf16.mxu0 %v11050_v3  ;;  %v11082_v3 = vld [vmem:[%s14914_s13 + $0x30] sm:$0xff]  }
 0x60a   : > { %v5696_v47 = vadd.f32 %v5649_v62, %v14523_v36  ;;  %v5651_v2 = vpop.f32.mrb[45].mxu1  ;;  %v11061_v36 = vld [vmem:[%s14910_s9 + $0xd70] ss:$12 sps:$4 sm:$0xff]  }
 0x60b   : > { %v5697_v27 = vadd.f32 %v5651_v2, %v14526_v18  ;;  %v5653_v23 = vpop.f32.mrb[46].mxu1  ;;  %9746 = vmatpush3.bf16.msra.mxu1 %v11052_v28  ;;  %v11060_v18 = vld [vmem:[%s14910_s9 + $0xd6c] ss:$12 sps:$4 sm:$0xff]  }
 0x60c   : > { %7685 = vmatpush1.bf16.msra.mxu0 %v11048_v39  ;;  %v5654_v22 = vpop.f32.mrb[47].mxu1  ;;  %9747 = vmatprep.subr.bf16.mxu1 %v11056_v45  ;;  %v11083_v39 = vld [vmem:[%s14914_s13 + $0xb0] sm:$0xff]   ;;  %v11084_v45 = vld [vmem:[%s14914_s13 + $0x78] sm:$0xff]  }
 0x60d   : > { %7686 = vmatprep.subr.bf16.mxu0 %v11055_v30 }
 0x60f   : > { %9748 = vmatpush3.bf16.msra.mxu1 %v11057_v52 }
 0x610   : > { %7687 = vmatpush1.bf16.msra.mxu0 %v11053_v21  ;;  %9749 = vmatprep.subr.bf16.mxu1 %v11061_v36  ;;  %v11085_v36 = vld [vmem:[%s14914_s13 + $0x38] sm:$0xff]  }
 0x611   : > { %7688 = vmatprep.subr.bf16.mxu0 %v11060_v18 }
 0x613   : > { %9750 = vmatpush3.bf16.msra.mxu1 %v11062_v5 }
 0x614   : > { %7689 = vmatpush1.bf16.msra.mxu0 %v11058_v32  ;;  %9757 = vmatprep.subr.bf16.mxu1 %v11063_v48  ;;  %v11086_v32 = vld [vmem:[%s14914_s13 + $0xb8] sm:$0xff]  }
 0x615   : > { %9788 = vmatprep.subr.bf16.mxu0 %v11414_v12 }
 0x616   : > { %7732 = vmatmul.mubr.bf16.vlgmr.msra.gmra.mrb[64].mxu1 %v7335_v63 }
 0x617   : > { %7691 = vmatmul.mubr.bf16.vlgmr.msra.gmra.mrb[64].mxu0 %v7335_v63 }
 0x618   : > { %9789 = vmatpush3.bf16.msra.mxu0 %v11065_v24  ;;  %9804 = vmatprep.mubr.msk.bf16.mxu0 %vm11415_vm8, %v11414_v12 }
 0x619   : > { %9790 = vmatprep.subr.bf16.mxu0 %v11414_v12 }
 0x61c   : > { %9791 = vmatpush3.bf16.msra.mxu0 %v11068_v51 }
 0x61d   : > { %9792 = vmatprep.subr.bf16.mxu0 %v11414_v12 }
 0x620   : > { %9793 = vmatpush3.bf16.msra.mxu0 %v11071_v1 }
 0x621   : > { %9794 = vmatprep.subr.bf16.mxu0 %v11414_v12 }
 0x624   : > { %9795 = vmatpush3.bf16.msra.mxu0 %v11074_v14 }
 0x625   : > { %9796 = vmatprep.subr.bf16.mxu0 %v11414_v12 }
 0x628   : > { %9797 = vmatpush3.bf16.msra.mxu0 %v11077_v8  ;;  %v7800_v8 = vld [vmem:[%s14913_s12] sm:$0x7] }
 0x629   : > { %v9663_v49 = vpop.f32.mrb[48].mxu1  ;;  %9798 = vmatprep.subr.bf16.mxu0 %v11414_v12 }
 0x62a   : > { %v6058_v58 = vpop.f32.mrb[48].mxu0  ;;  %v9664_v17 = vpop.f32.mrb[49].mxu1 }
 0x62b   : > { %v6105_v11 = vadd.f32 %v6058_v58, %v5696_v47  ;;  %v6060_v46 = vpop.f32.mrb[49].mxu0  ;;  %v9665_v60 = vadd.f32 %v9664_v17, %v9663_v49  ;;  %v9666_v54 = vpop.f32.mrb[50].mxu1 }
 0x62c   : > { %v6106_v29 = vadd.f32 %v6060_v46, %v5697_v27  ;;  %v6062_v7 = vpop.f32.mrb[50].mxu0  ;;  %v9667_v34 = vpop.f32.mrb[51].mxu1  ;;  %9799 = vmatpush3.bf16.msra.mxu0 %v11080_v38 }
 0x62d   : > { %v6107_v13 = vadd.f32 %v9665_v60, %v14648_v40  ;;  %v6063_v31 = vpop.f32.mrb[51].mxu0  ;;  %v11064_v40 = vld [vmem:[%s14914_s13] sm:$0xff]   ;;  %9800 = vmatprep.subr.bf16.mxu0 %v11414_v12 }
 0x62e   : > { %9758 = vmatpush3.bf16.msra.mxu1 %v11064_v40  ;;  %v7742_v31 = vld [vmem:[%s14911_s10] sm:$0x7] }
 0x62f   : > { %9759 = vmatprep.subr.bf16.mxu1 %v11066_v9 }
 0x630   : > { %9801 = vmatpush3.bf16.msra.mxu0 %v11083_v39 }
 0x631   : > { %9802 = vmatprep.subr.bf16.mxu0 %v11414_v12 }
 0x632   : > { %9760 = vmatpush3.bf16.msra.mxu1 %v11067_v42 }
 0x633   : > { %9761 = vmatprep.subr.bf16.mxu1 %v11069_v53 }
 0x634   : > { %9803 = vmatpush3.bf16.msra.mxu0 %v11086_v32 }
 0x636   : > { %9762 = vmatpush3.bf16.msra.mxu1 %v11070_v4 }
 0x637   : > { %9763 = vmatprep.subr.bf16.mxu1 %v11072_v20 }
 0x63a   : > { %9764 = vmatpush3.bf16.msra.mxu1 %v11073_v59 }
 0x63b   : > { %9765 = vmatprep.subr.bf16.mxu1 %v11075_v37 }
 0x63e   : > { %9766 = vmatpush3.bf16.msra.mxu1 %v11076_v57  ;;  %v7780_v57 = vld [vmem:[%s14912_s11] sm:$0x7] }
 0x63f   : > { %9767 = vmatprep.subr.bf16.mxu1 %v11078_v16 }
 0x642   : > { %9768 = vmatpush3.bf16.msra.mxu1 %v11079_v61  ;;  %v7785_v61 = vrot.slane %v7780_v57, %v15065_v50 }
 0x643   : > { %9769 = vmatprep.subr.bf16.mxu1 %v11081_v0 }
 0x646   : > { %9770 = vmatpush3.bf16.msra.mxu1 %v11082_v3  ;;  %v7789_v3 = vrot.slane %v7780_v57, %v15066_v56 }
 0x647   : > { %9771 = vmatprep.subr.bf16.mxu1 %v11084_v45  ;;  %v7805_v45 = vrot.slane %v7800_v8, %v15065_v50 }
 0x64a   : > { %v9685_v19 = vpop.f32.mrb[52].mxu0  ;;  %9772 = vmatpush3.bf16.msra.mxu1 %v11085_v36 }
 0x64b   : > { %v9686_v43 = vpop.f32.mrb[53].mxu0 }
 0x64c   : > { %v9687_v41 = vadd.f32 %v9686_v43, %v9685_v19  ;;  %v9688_v26 = vpop.f32.mrb[54].mxu0  ;;  %v15067_v19 = vld [vmem:[#allocation10_spill] sm:$0xff] }
 0x64d   : > { %v9689_v25 = vpop.f32.mrb[55].mxu0  ;;  %v7754_v43 = vsub.s32 2, %v15067_v19 }
 0x64e   : > { %v14763_v10 = vadd.f32 %v9687_v41, %v6107_v13  ;;  %v7747_v41 = vrot.slane %v7742_v31, %v15065_v50  ;;  %v7751_v25 = vrot.slane %v7742_v31, %v15066_v56 }
 0x669   : > { %v6467_v44 = vpop.f32.mrb[52].mxu1 }
 0x66a   : > { %v6514_v35 = vadd.f32 %v6467_v44, %v6105_v11  ;;  %v6469_v6 = vpop.f32.mrb[53].mxu1 }
 0x66b   : > { %v6515_v55 = vadd.f32 %v6469_v6, %v6106_v29  ;;  %v6471_v15 = vpop.f32.mrb[54].mxu1 }
 0x66c   : > { %v6472_v33 = vpop.f32.mrb[55].mxu1 }
 0x689   : > { %v9707_v28 = vpop.f32.mrb[56].mxu1 }
 0x68a   : > { %v6876_v62 = vpop.f32.mrb[56].mxu0  ;;  %v9708_v30 = vpop.f32.mrb[57].mxu1 }
 0x68b   : > { %v6923_v47 = vadd.f32 %v6876_v62, %v6514_v35  ;;  %v6878_v2 = vpop.f32.mrb[57].mxu0  ;;  %v9709_v27 = vadd.f32 %v9708_v30, %v9707_v28  ;;  %v9710_v23 = vpop.f32.mrb[58].mxu1  ;;  %v7793_v62 = vrot.slane %v7780_v57, %v7754_v43 }
 0x68c   : > { %v6924_v52 = vadd.f32 %v6878_v2, %v6515_v55  ;;  %v6880_v22 = vpop.f32.mrb[58].mxu0  ;;  %v9711_v21 = vpop.f32.mrb[59].mxu1  ;;  %v7755_v55 = vrot.slane %v7742_v31, %v7754_v43  ;;  %v7809_v2 = vrot.slane %v7800_v8, %v15066_v56 }
 0x68d   : > { %v6925_v18 = vadd.f32 %v9709_v27, %v14763_v10  ;;  %v6881_v5 = vpop.f32.mrb[59].mxu0 }
 0x6aa   : > { %v9729_v63 = vpop.f32.mrb[60].mxu0 }
 0x6ab   : > { %v9730_v49 = vpop.f32.mrb[61].mxu0 }
 0x6ac   : > { %v9731_v58 = vadd.f32 %v9730_v49, %v9729_v63  ;;  %v9732_v17 = vpop.f32.mrb[62].mxu0 }
 0x6ad   : > { %v9733_v11 = vpop.f32.mrb[63].mxu0 }
 0x6ae   : > { %v7334_v46 = vadd.f32 %v9731_v58, %v6925_v18  ;;  %v7871_v11 = vld [vmem:[%s14915_s14] sm:$0x1] }
 0x6c9   : > { %v7285_v60 = vpop.f32.mrb[60].mxu1 }
 0x6ca   : > { %v7332_v54 = vadd.f32 %v7285_v60, %v6923_v47  ;;  %v7287_v29 = vpop.f32.mrb[61].mxu1 }
 0x6cb   : > { %v7333_v7 = vadd.f32 %v7287_v29, %v6924_v52  ;;  %v7289_v34 = vpop.f32.mrb[62].mxu1  ;;  %v7813_v52 = vrot.slane %v7800_v8, %v7754_v43 }
 0x6cc   : > { %v7290_v13 = vpop.f32.mrb[63].mxu1 }
 0x6e9   : > { %v9751_v26 = vpop.f32.mrb[64].mxu1 }
 0x6ea   : > { %v7692_v48 = vpop.f32.mrb[64].mxu0  ;;  %v9752_v10 = vpop.f32.mrb[65].mxu1 }
 0x6eb   : > { %v7739_v44 = vadd.f32 %v7692_v48, %v7332_v54  ;;  %v7694_v35 = vpop.f32.mrb[65].mxu0  ;;  %v9753_v6 = vadd.f32 %v9752_v10, %v9751_v26  ;;  %v9754_v15 = vpop.f32.mrb[66].mxu1 }
 0x6ec   : > { %v7740_v33 = vadd.f32 %v7694_v35, %v7333_v7  ;;  %v7696_v40 = vpop.f32.mrb[66].mxu0  ;;  %v9755_v24 = vpop.f32.mrb[67].mxu1 }
 0x6ed   : > { %v7759_v12 = vadd.f32 %v7747_v41, %v7739_v44  ;;  %v7741_v9 = vadd.f32 %v9753_v6, %v7334_v46  ;;  %v7697_v42 = vpop.f32.mrb[67].mxu0 }
 0x6ee   : > { %v7760_v51 = vadd.f32 %v7751_v25, %v7740_v33 }
 0x6ef   : > { %v7765_v53 = vmin.f32 %v7759_v12, 0.0  ;;  %v7761_v4 = vadd.f32 %v7755_v55, %v7741_v9  ;;  %vm7762_vm9 = vcmp.gt.f32.partialorder %v7759_v12, 0.0 }
 0x6f0   : > { %v7766_v1 = vmin.f32 %v7760_v51, 0.0  ;;  %vm7763_vm10 = vcmp.gt.f32.partialorder %v7760_v51, 0.0 }
 0x6f1   : > { %v7768_v20 = vmul.f32 1.442695, %v7765_v53  ;;  %v7767_v59 = vmin.f32 %v7761_v4, 0.0  ;;  %vm7764_vm11 = vcmp.gt.f32.partialorder %v7761_v4, 0.0 }
 0x6f2   : > { %v7770_v14 = vmul.f32 1.442695, %v7766_v1 }
 0x6f3   : > { %11199 = vpow2.f32 %v7768_v20  ;;  %v7772_v37 = vmul.f32 1.442695, %v7767_v59 }
 0x6f4   : > { %11201 = vpow2.f32 %v7770_v14 }
 0x6f5   : > { %11203 = vpow2.f32 %v7772_v37 }
 0x6fd   : > { %v11200_v16 = vpop.eup %11199 }
 0x6fe   : > { %v11202_v38 = vpop.eup %11201  ;;  %v9529_v0 = vadd.f32 -1.0, %v11200_v16 }
 0x6ff   : > { %v11204_v28 = vpop.eup %11203  ;;  %v9530_v39 = vadd.f32 -1.0, %v11202_v38 }
 0x700   : > { %v7777_v30 = vsel %vm7762_vm9, %v7759_v12, %v9529_v0  ;;  %v9531_v47 = vadd.f32 -1.0, %v11204_v28 }
 0x701   : > { %v7797_v27 = vmul.f32 %v7785_v61, %v7777_v30  ;;  %v7778_v23 = vsel %vm7763_vm10, %v7760_v51, %v9530_v39 }
 0x702   : > { %v7779_v22 = vsel %vm7764_vm11, %v7761_v4, %v9531_v47  ;;  %v7798_v21 = vmul.f32 %v7789_v3, %v7778_v23 }
 0x703   : > { %v7817_v36 = vadd.f32 %v7805_v45, %v7797_v27  ;;  %v7799_v18 = vmul.f32 %v7793_v62, %v7779_v22 }
 0x704   : > { %v7818_v5 = vadd.f32 %v7809_v2, %v7798_v21 }
 0x705   : > { %v7819_v32 = vadd.f32 %v7813_v52, %v7799_v18  ;;  %v7820_v49 = vpack.c.bf16 %v7817_v36, %v7817_v36 }
 0x706   : > { %v7821_v63 = vpack.c.bf16 %v7818_v5, %v7818_v5 }
 0x707   : > { %v7822_v50 = vpack.c.bf16 %v7819_v32, %v7819_v32 }
 0x708   : > { %8048 = vmatprep.mubr.bf16.mxu1 %v7821_v63 }
 0x709   : > { %8049 = vmatmul.mubr.bf16.vlgmr.msra.gmra.mrb[68].mxu1 %v7820_v49  ;;  %9805 = vmatmul.mubr.bf16.vlgmr.msra.gmra.mrb[68].mxu0 %v7822_v50 }
 0x7dc   : > { %v9773_v56 = vpop.f32.mrb[68].mxu1  ;;  %v8090_v58 = vpop.f32.mrb[68].mxu0 }
 0x7dd   : > { %v9774_v17 = vpop.f32.mrb[69].mxu1  ;;  %v9806_v46 = vpop.f32.mrb[69].mxu0 }
 0x7de   : > { %v9775_v60 = vadd.f32 %v9774_v17, %v9773_v56  ;;  %v9776_v54 = vpop.f32.mrb[70].mxu1  ;;  %v8093_v29 = vpop.f32.mrb[70].mxu0 }
 0x7df   : > { %v9777_v7 = vpop.f32.mrb[71].mxu1  ;;  %v9807_v34 = vpop.f32.mrb[71].mxu0 }
 0x7e0   : > { %v8051_v13 = vadd.f32 %v9775_v60, %v7871_v11 }
 0x7e2   : > { %v8091_v31 = vadd.f32 %v8090_v58, %v8051_v13 }
 0x7e4   : > { %8096 = vst [vmem:[%s486_s17] sm:$0x1] %v8091_v31 }
 0x7e5   : > { %11362 = shalt.err (!%p11359_p3)
}
 0x7e6   : > { %s11363_s27 = scalar_lea.hbm %s14859_s25, 16  ;;  %s11367_s23 = scalar_lea.hbm %s14916_s15, 32 }
 0x7e7   : > { %p11364_p4 = scmp.ne.s32.totalorder %s14859_s25, %s11363_s27  ;;  %p11368_p9 = scmp.lt.u32.totalorder %s14859_s25, %s14916_s15 }
 0x7e8   : > { %p11369_p10 = scmp.lt.u32.totalorder %s11367_s23, %s11363_s27  ;;  %p11371_p12 = scmp.lt.u32.totalorder %s11363_s27, %s14859_s25 }
 0x7e9   : > { %p11365_p7 = pnand %p11364_p4, %p11535_p5 }
 0x7ea   : > { %p11370_p11 = por %p11369_p10, %p11368_p9 }
 0x7eb   : > { %p11366_p8 = pneg %p11365_p7 }
 0x7ec   : > { %p11372_p13 = por %p11371_p12, %p11370_p11 }
 0x7ee   : > { %p11373_p0 = pnand %p11372_p13, %p11366_p8 }
 0x7f0   : > { %11376 = shalt.err (!%p11373_p0)
}
 0x7f1   : > { %10041 = dma.vmem_to_hbm [thread:$0]  (%p11535_p5), %s14861_s29, 16, %s14859_s25, %s8098_s18  }
 0x7f2 PF: > { %s15068_s20 = sld [smem:[#allocation5_spill]]  ;;  %p10047_p1 = scmp.ge.s32.totalorder %s11411_s21, 2 }
 0x7f4   : > { %p10044_p2 = pnand %p10047_p1, %p11539_p6 }
 0x7f8   : > { %s8122_s16 = sand.u32 1, %s15068_s20  }
 0x7f9   : > { %s8123_s30 = scalar_lea.sflag [#allocation3], %s8122_s16 }
 0x7fa   : > { %11394 = dma.done.wait (!%p10044_p2), %s8123_s30, 16  }
 0x7fb   : > { %11396 = vsyncadd (!%p10044_p2), %s8123_s30, 4294967280  ;;  %s15070_s21 = sld [smem:[#allocation7_spill]]  ;;  %s15071_s27 = sld [smem:[#allocation6_spill]] }
 0x7fc   : > { %s15072_s20 = sld [smem:[#allocation8_spill]]  ;;  %s15073_s18 = smov %s11403_s19 }
 0x801   : > { %p25_p3 = scmp.ge.s32.totalorder %s15070_s21, 4   ;;  %s15074_s19 = smov %s15071_s27 }
 0x803   :  { %27 = sbr.rel (!%p25_p3) target bundleno = 3 (0x3), region = 126 }
 0x80a   :  { %8127 = vsyncpa [#allocation3], 1 }
 0x80b   :  { %8129 = vsyncpa [#allocation3 + $0x1], 1 }

</bundles_post_ra>
